<compile_context>
chip_gen: v5e
topology: v5e:2x2
jax: 0.10.0
libtpu: 0.0.40
codegen_flags: <defaults>
</compile_context>

<pallas_src>
import numpy as np
import jax
import jax.numpy as jnp
from jax import lax
from jax.experimental import pallas as pl
from jax.experimental.pallas import tpu as pltpu


# --------------------------------------------------------------------------- blur operators

def _gaussian_1d_np(k: int = 5, sigma: float = 1.0) -> np.ndarray:
    # 1D factor of the separable kernel built by gaussian_kernel() in the PyTorch source.
    ax = np.arange(-k // 2 + 1.0, k // 2 + 1.0, dtype=np.float64)
    e = np.exp(-(ax ** 2) / (2.0 * sigma ** 2))
    return e / np.sum(e)


def _gaussian_kernel_np(k: int = 5, sigma: float = 1.0) -> np.ndarray:
    # 2D kernel exactly as in the PyTorch source (used only by the pure-JAX reference).
    ax = np.arange(-k // 2 + 1.0, k // 2 + 1.0, dtype=np.float32)
    xx, yy = np.meshgrid(ax, ax, indexing="ij")
    kern = np.exp(-(xx ** 2 + yy ** 2) / (2.0 * sigma ** 2)).astype(np.float32)
    return kern / np.sum(kern)


def _banded_blur_matrix(n: int, g1: np.ndarray) -> np.ndarray:
    # M[a, b] = g1[a - b + P] for |a - b| <= P else 0.  x -> x @ M is the 1D "same" blur
    # (zero padding) along that axis; M is symmetric.
    p = g1.shape[0] // 2
    m = np.zeros((n, n), dtype=np.float64)
    for a in range(g1.shape[0]):
        m += g1[a] * np.eye(n, k=-(a - p), dtype=np.float64)
    return m


def _dense_blur_operator_np(h: int, w: int, k: int = 5, sigma: float = 1.0) -> np.ndarray:
    # Flat index p = i*W + j  ==>  one 2D "same" blur is  x_flat @ kron(Gv, Gh).
    g1 = _gaussian_1d_np(k, sigma)
    return np.kron(_banded_blur_matrix(h, g1),
                   _banded_blur_matrix(w, g1)).astype(np.float32)


# ------------------------------------------------------------------- VMEM / tiling decisions

def _vmem_limit_bytes() -> int:
    cap = 64 << 20  # conservative default: v7x per-TensorCore VMEM
    try:
        info = pltpu.get_tpu_info()
        cap = int(getattr(info, "vmem_capacity_bytes", cap)) or cap
    except Exception:
        pass
    # ~48 MiB of 64 MiB (v7x), ~102 MiB of 128 MiB (v5e/v6e): leave compiler-scratch headroom.
    return max(32 << 20, min(cap - (16 << 20), int(cap * 0.80)))


def _choose_tile_n(b: int, n: int, img_bytes: int, dim_out: int,
                   op_bytes: int, vmem_limit: int):
    # Per image resident per grid step: double-buffered input + double-buffered lf/hf
    # (dim_out levels each) + a few images of live temporaries / scratch.
    per_img = (2 + 4 * dim_out + 4) * img_bytes
    budget = max(8 * per_img, vmem_limit - 2 * op_bytes - (6 << 20))
    target = int(min(max(budget // per_img, 8), 1024))
    if n <= target:
        tb_n, n_pad = n, n
        # v7x megacore: keep >= 2 grid steps when b == 1 so both TensorCores get work
        # (neutral on single-core v5e/v6e).  Only split when the halves stay 8-aligned.
        if b == 1 and n >= 16 and n % 16 == 0:
            tb_n = n // 2
    else:
        tb_n = max(8, (target // 8) * 8)
        n_pad = ((n + tb_n - 1) // tb_n) * tb_n
    return tb_n, n_pad


def _constant_op_spec(shape, single_buffer):
    idx = lambda bi, ni: (0,) * len(shape)
    if single_buffer:
        # Fetched once (constant index_map): a single VMEM buffer is enough.
        return pl.BlockSpec(shape, idx, pipeline_mode=pl.Buffered(1))
    return pl.BlockSpec(shape, idx)


# ------------------------------------------------------------------------------ kernels

def _make_dense_call(*, b, n_pad, tb_n, hw, dim_out, precision, vmem_limit, single_buffer_op):
    def kernel(g2_ref, x_ref, lf_ref, hf_ref):
        x = x_ref[0]                 # (tb_n, hw) lane-dense tile of flattened images
        g2 = g2_ref[...]             # (hw, hw) blur operator, resident across grid steps
        buf = x
        for i in range(dim_out):
            buf = jnp.dot(buf, g2, precision=precision,
                          preferred_element_type=jnp.float32)
            lf_ref[0, i] = buf
            hf_ref[0, i] = x - buf   # short_cut (C == 1) minus low_freq[i]

    out_sds = jax.ShapeDtypeStruct((b, dim_out, n_pad, hw), jnp.float32)
    return pl.pallas_call(
        kernel,
        out_shape=(out_sds, out_sds),
        grid_spec=pltpu.PrefetchScalarGridSpec(
            num_scalar_prefetch=0,
            grid=(b, n_pad // tb_n),
            in_specs=[
                _constant_op_spec((hw, hw), single_buffer_op),
                pl.BlockSpec((1, tb_n, hw), lambda bi, ni: (bi, ni, 0)),
            ],
            out_specs=(
                pl.BlockSpec((1, dim_out, tb_n, hw), lambda bi, ni: (bi, 0, ni, 0)),
                pl.BlockSpec((1, dim_out, tb_n, hw), lambda bi, ni: (bi, 0, ni, 0)),
            ),
        ),
        compiler_params=pltpu.CompilerParams(
            dimension_semantics=("parallel", "parallel"),
            vmem_limit_bytes=vmem_limit,
        ),
    )


def _make_separable_call(*, b, n_pad, tb_n, h, w, dim_out, precision, vmem_limit,
                         single_buffer_op):
    def kernel(gh_ref, gv_ref, x_ref, lf_ref, hf_ref, buf_ref):
        x = x_ref[0]                 # (tb_n, h, w)
        gh = gh_ref[...]             # (w, w) horizontal blur operator
        gv = gv_ref[...]             # (h, h) vertical blur operator
        buf_ref[...] = x
        for i in range(dim_out):
            def blur_one(t, carry):
                img = buf_ref[t]     # (h, w): dynamic first-axis index into VMEM scratch
                # Horizontal "same" blur on the MXU, then vertical via a 2D transpose.
                yh = jnp.dot(img, gh, precision=precision,
                             preferred_element_type=jnp.float32)
                yv = jnp.dot(yh.T, gv, precision=precision,
                             preferred_element_type=jnp.float32).T
                buf_ref[t] = yv
                return carry
            lax.fori_loop(0, tb_n, blur_one, 0)
            lf_ref[0, i] = buf_ref[...]
            hf_ref[0, i] = x - buf_ref[...]

    out_sds = jax.ShapeDtypeStruct((b, dim_out, n_pad, h, w), jnp.float32)
    return pl.pallas_call(
        kernel,
        out_shape=(out_sds, out_sds),
        grid_spec=pltpu.PrefetchScalarGridSpec(
            num_scalar_prefetch=0,
            grid=(b, n_pad // tb_n),
            in_specs=[
                _constant_op_spec((w, w), single_buffer_op),
                _constant_op_spec((h, h), single_buffer_op),
                pl.BlockSpec((1, tb_n, h, w), lambda bi, ni: (bi, ni, 0, 0)),
            ],
            out_specs=(
                pl.BlockSpec((1, dim_out, tb_n, h, w), lambda bi, ni: (bi, 0, ni, 0, 0)),
                pl.BlockSpec((1, dim_out, tb_n, h, w), lambda bi, ni: (bi, 0, ni, 0, 0)),
            ),
            scratch_shapes=[pltpu.VMEM((tb_n, h, w), jnp.float32)],
        ),
        compiler_params=pltpu.CompilerParams(
            dimension_semantics=("parallel", "parallel"),
            vmem_limit_bytes=vmem_limit,
        ),
    )


# ------------------------------------------------------------------------------ wrapper

def gaussian_decompose_block(x, dim_out: int, precision=jax.lax.Precision.HIGHEST):
    """Forward of GaussionDecomposeBlock.
    x: (B, C=1, N, H, W) -> (x_lf, x_hf), each (B, dim_out, N, H, W) float32."""
    b, c, n, h, w = x.shape
    assert c == 1, "F.conv2d with a (1, 1, 5, 5) weight requires single-channel input"
    assert dim_out >= 1
    hw = h * w
    vmem_limit = _vmem_limit_bytes()
    g1 = _gaussian_1d_np(5, 1.0)

    # Dense kron operator only for tiny frames; separable two-matmul path otherwise.
    use_separable = hw > 1024 and h % 8 == 0 and w % 8 == 0
    if use_separable:
        op_bytes = (h * h + w * w) * 4
    else:
        assert hw * hw * 4 <= (16 << 20), "frame too large for the dense kron blur operator"
        op_bytes = hw * hw * 4

    tb_n, n_pad = _choose_tile_n(b, n, hw * 4, dim_out, op_bytes, vmem_limit)

    if use_separable:
        x_in = x.reshape(b, n, h, w).astype(jnp.float32)        # C == 1: free reshape
        if n_pad != n:
            x_in = jnp.pad(x_in, ((0, 0), (0, n_pad - n), (0, 0), (0, 0)))
        ops = (jnp.asarray(_banded_blur_matrix(w, g1), dtype=jnp.float32),
               jnp.asarray(_banded_blur_matrix(h, g1), dtype=jnp.float32))
        make = lambda single: _make_separable_call(
            b=b, n_pad=n_pad, tb_n=tb_n, h=h, w=w, dim_out=dim_out,
            precision=precision, vmem_limit=vmem_limit, single_buffer_op=single)
    else:
        x_in = x.reshape(b, n, hw).astype(jnp.float32)          # C == 1: free reshape
        if n_pad != n:
            x_in = jnp.pad(x_in, ((0, 0), (0, n_pad - n), (0, 0)))
        ops = (jnp.asarray(_dense_blur_operator_np(h, w)),)
        make = lambda single: _make_dense_call(
            b=b, n_pad=n_pad, tb_n=tb_n, hw=hw, dim_out=dim_out,
            precision=precision, vmem_limit=vmem_limit, single_buffer_op=single)

    try:
        lf, hf = make(True)(*ops, x_in)
    except Exception:
        # pipeline_mode=pl.Buffered(1) hint not available on this JAX build -> default
        # double-buffered specs for the (small) resident blur operators.
        lf, hf = make(False)(*ops, x_in)

    if n_pad != n:
        lf, hf = lf[:, :, :n], hf[:, :, :n]
    # Kernel already emitted the final (b, dim_out, n, ...) layout; reshapes below are free.
    return lf.reshape(b, dim_out, n, h, w), hf.reshape(b, dim_out, n, h, w)


# ------------------------------------------------------------------------------ reference

def _reference(x, dim_out: int):
    """Pure-JAX (plain XLA) shifted-add reference for validation."""
    b, c, n, h, w = x.shape
    g = jnp.asarray(_gaussian_kernel_np(5, 1.0))
    xb = x.astype(jnp.float32).reshape(b * n, h, w)     # C == 1
    buf = xb
    lows = []
    for _ in range(dim_out):
        padded = jnp.pad(buf, ((0, 0), (2, 2), (2, 2)))
        out = jnp.zeros_like(buf)
        for di in range(5):
            for dj in range(5):
                out = out + g[di, dj] * padded[:, di:di + h, dj:dj + w]
        buf = out
        lows.append(buf)
    lf = jnp.stack(lows, axis=1)                        # (b*n, dim_out, h, w)
    hf = xb[:, None] - lf
    lf = lf.reshape(b, n, dim_out, h, w).transpose(0, 2, 1, 3, 4)
    hf = hf.reshape(b, n, dim_out, h, w).transpose(0, 2, 1, 3, 4)
    return lf, hf


if __name__ == "__main__":
    # Small-frame test (dense kron path) at the module's natural small shapes.
    b, c, n, h, w = 2, 1, 4, 16, 16
    dim_out = 3
    x = jax.random.normal(jax.random.PRNGKey(0), (b, c, n, h, w), dtype=jnp.float32)

    lf, hf = gaussian_decompose_block(x, dim_out)
    jax.block_until_ready((lf, hf))

    lf_ref, hf_ref = _reference(x, dim_out)
    assert lf.shape == (b, dim_out, n, h, w) and hf.shape == (b, dim_out, n, h, w)
    assert jnp.allclose(lf, lf_ref, atol=1e-5, rtol=1e-5)
    assert jnp.allclose(hf, hf_ref, atol=1e-5, rtol=1e-5)

    # Larger-frame test exercising the separable (two 1D matmuls per level) path.
    b2, n2, h2, w2, dim_out2 = 1, 16, 64, 64, 2
    x2 = jax.random.normal(jax.random.PRNGKey(1), (b2, 1, n2, h2, w2), dtype=jnp.float32)
    lf2, hf2 = gaussian_decompose_block(x2, dim_out2)
    jax.block_until_ready((lf2, hf2))
    lf2_ref, hf2_ref = _reference(x2, dim_out2)
    assert lf2.shape == (b2, dim_out2, n2, h2, w2)
    assert jnp.allclose(lf2, lf2_ref, atol=1e-5, rtol=1e-5)
    assert jnp.allclose(hf2, hf2_ref, atol=1e-5, rtol=1e-5)

    print("KERNEL_OK")
</pallas_src>

<mosaic_0001>
module attributes {stable_mosaic.version = 11 : i64} {
  func.func @kernel(%arg0: i32, %arg1: i32, %arg2: memref<256x256xf32, #tpu.memory_space<vmem>>, %arg3: memref<1x4x256xf32, #tpu.memory_space<vmem>>, %arg4: memref<1x3x4x256xf32, #tpu.memory_space<vmem>>, %arg5: memref<1x3x4x256xf32, #tpu.memory_space<vmem>>) attributes {dimension_semantics = [#tpu.dimension_semantics<parallel>, #tpu.dimension_semantics<parallel>], iteration_bounds = array<i64: 2, 1>, scalar_prefetch = 0 : i64, scratch_operands = 0 : i64, tpu.core_type = #tpu.core_type<tc>, window_params = [{pipeline_mode = #tpu.pipeline_mode<synchronous>, transform_indices = @transform_0, window_bounds = array<i64: 256, 256>}, {transform_indices = @transform_1, window_bounds = array<i64: 1, 4, 256>}, {transform_indices = @transform_2, window_bounds = array<i64: 1, 3, 4, 256>}, {transform_indices = @transform_3, window_bounds = array<i64: 1, 3, 4, 256>}]} {
    %c0 = arith.constant 0 : index
    %c0_0 = arith.constant 0 : index
    %c0_1 = arith.constant 0 : index
    %0 = vector.load %arg3[%c0, %c0_0, %c0_1] : memref<1x4x256xf32, #tpu.memory_space<vmem>>, vector<1x4x256xf32>
    %1 = vector.shape_cast %0 : vector<1x4x256xf32> to vector<4x256xf32>
    %c0_2 = arith.constant 0 : index
    %c0_3 = arith.constant 0 : index
    %2 = vector.load %arg2[%c0_2, %c0_3] : memref<256x256xf32, #tpu.memory_space<vmem>>, vector<256x256xf32>
    %cst = arith.constant dense<0.000000e+00> : vector<4x256xf32>
    %3 = tpu.matmul %1, %2, %cst {dimension_numbers = #tpu.dot_dimension_numbers<[1], [0], [0], [1], [0, 0, 1, 1], [], []>, precision = #tpu.contract_precision<fp32>} : vector<4x256xf32>, vector<256x256xf32>, vector<4x256xf32> -> vector<4x256xf32>
    %c0_4 = arith.constant 0 : index
    %c0_5 = arith.constant 0 : index
    %c0_6 = arith.constant 0 : index
    %c0_7 = arith.constant 0 : index
    %4 = vector.load %arg4[%c0_4, %c0_5, %c0_6, %c0_7] : memref<1x3x4x256xf32, #tpu.memory_space<vmem>>, vector<1x1x4x256xf32>
    %5 = vector.shape_cast %4 : vector<1x1x4x256xf32> to vector<4x256xf32>
    %6 = vector.shape_cast %3 : vector<4x256xf32> to vector<1x1x4x256xf32>
    tpu.vector_store %arg4[%c0_4, %c0_5, %c0_6, %c0_7], %6 {strides = array<i32>} : memref<1x3x4x256xf32, #tpu.memory_space<vmem>>, vector<1x1x4x256xf32>,
    %7 = arith.subf %1, %3 : vector<4x256xf32>
    %c0_8 = arith.constant 0 : index
    %c0_9 = arith.constant 0 : index
    %c0_10 = arith.constant 0 : index
    %c0_11 = arith.constant 0 : index
    %8 = vector.load %arg5[%c0_8, %c0_9, %c0_10, %c0_11] : memref<1x3x4x256xf32, #tpu.memory_space<vmem>>, vector<1x1x4x256xf32>
    %9 = vector.shape_cast %8 : vector<1x1x4x256xf32> to vector<4x256xf32>
    %10 = vector.shape_cast %7 : vector<4x256xf32> to vector<1x1x4x256xf32>
    tpu.vector_store %arg5[%c0_8, %c0_9, %c0_10, %c0_11], %10 {strides = array<i32>} : memref<1x3x4x256xf32, #tpu.memory_space<vmem>>, vector<1x1x4x256xf32>,
    %cst_12 = arith.constant dense<0.000000e+00> : vector<4x256xf32>
    %11 = tpu.matmul %3, %2, %cst_12 {dimension_numbers = #tpu.dot_dimension_numbers<[1], [0], [0], [1], [0, 0, 1, 1], [], []>, precision = #tpu.contract_precision<fp32>} : vector<4x256xf32>, vector<256x256xf32>, vector<4x256xf32> -> vector<4x256xf32>
    %c0_13 = arith.constant 0 : index
    %c1 = arith.constant 1 : index
    %c0_14 = arith.constant 0 : index
    %c0_15 = arith.constant 0 : index
    %12 = vector.load %arg4[%c0_13, %c1, %c0_14, %c0_15] : memref<1x3x4x256xf32, #tpu.memory_space<vmem>>, vector<1x1x4x256xf32>
    %13 = vector.shape_cast %12 : vector<1x1x4x256xf32> to vector<4x256xf32>
    %14 = vector.shape_cast %11 : vector<4x256xf32> to vector<1x1x4x256xf32>
    tpu.vector_store %arg4[%c0_13, %c1, %c0_14, %c0_15], %14 {strides = array<i32>} : memref<1x3x4x256xf32, #tpu.memory_space<vmem>>, vector<1x1x4x256xf32>,
    %15 = arith.subf %1, %11 : vector<4x256xf32>
    %c0_16 = arith.constant 0 : index
    %c1_17 = arith.constant 1 : index
    %c0_18 = arith.constant 0 : index
    %c0_19 = arith.constant 0 : index
    %16 = vector.load %arg5[%c0_16, %c1_17, %c0_18, %c0_19] : memref<1x3x4x256xf32, #tpu.memory_space<vmem>>, vector<1x1x4x256xf32>
    %17 = vector.shape_cast %16 : vector<1x1x4x256xf32> to vector<4x256xf32>
    %18 = vector.shape_cast %15 : vector<4x256xf32> to vector<1x1x4x256xf32>
    tpu.vector_store %arg5[%c0_16, %c1_17, %c0_18, %c0_19], %18 {strides = array<i32>} : memref<1x3x4x256xf32, #tpu.memory_space<vmem>>, vector<1x1x4x256xf32>,
    %cst_20 = arith.constant dense<0.000000e+00> : vector<4x256xf32>
    %19 = tpu.matmul %11, %2, %cst_20 {dimension_numbers = #tpu.dot_dimension_numbers<[1], [0], [0], [1], [0, 0, 1, 1], [], []>, precision = #tpu.contract_precision<fp32>} : vector<4x256xf32>, vector<256x256xf32>, vector<4x256xf32> -> vector<4x256xf32>
    %c0_21 = arith.constant 0 : index
    %c2 = arith.constant 2 : index
    %c0_22 = arith.constant 0 : index
    %c0_23 = arith.constant 0 : index
    %20 = vector.load %arg4[%c0_21, %c2, %c0_22, %c0_23] : memref<1x3x4x256xf32, #tpu.memory_space<vmem>>, vector<1x1x4x256xf32>
    %21 = vector.shape_cast %20 : vector<1x1x4x256xf32> to vector<4x256xf32>
    %22 = vector.shape_cast %19 : vector<4x256xf32> to vector<1x1x4x256xf32>
    tpu.vector_store %arg4[%c0_21, %c2, %c0_22, %c0_23], %22 {strides = array<i32>} : memref<1x3x4x256xf32, #tpu.memory_space<vmem>>, vector<1x1x4x256xf32>,
    %23 = arith.subf %1, %19 : vector<4x256xf32>
    %c0_24 = arith.constant 0 : index
    %c2_25 = arith.constant 2 : index
    %c0_26 = arith.constant 0 : index
    %c0_27 = arith.constant 0 : index
    %24 = vector.load %arg5[%c0_24, %c2_25, %c0_26, %c0_27] : memref<1x3x4x256xf32, #tpu.memory_space<vmem>>, vector<1x1x4x256xf32>
    %25 = vector.shape_cast %24 : vector<1x1x4x256xf32> to vector<4x256xf32>
    %26 = vector.shape_cast %23 : vector<4x256xf32> to vector<1x1x4x256xf32>
    tpu.vector_store %arg5[%c0_24, %c2_25, %c0_26, %c0_27], %26 {strides = array<i32>} : memref<1x3x4x256xf32, #tpu.memory_space<vmem>>, vector<1x1x4x256xf32>,
    return
  }
  func.func @transform_0(%arg0: i32, %arg1: i32) -> (i32, i32) {
    %c0_i32 = arith.constant 0 : i32
    %c0_i32_0 = arith.constant 0 : i32
    %c0_i32_1 = arith.constant 0 : i32
    return %c0_i32, %c0_i32_0 : i32, i32
  }
  func.func @transform_1(%arg0: i32, %arg1: i32) -> (i32, i32, i32) {
    %c0_i32 = arith.constant 0 : i32
    %c0_i32_0 = arith.constant 0 : i32
    return %arg0, %arg1, %c0_i32 : i32, i32, i32
  }
  func.func @transform_2(%arg0: i32, %arg1: i32) -> (i32, i32, i32, i32) {
    %c0_i32 = arith.constant 0 : i32
    %c0_i32_0 = arith.constant 0 : i32
    %c0_i32_1 = arith.constant 0 : i32
    return %arg0, %c0_i32, %arg1, %c0_i32_0 : i32, i32, i32, i32
  }
  func.func @transform_3(%arg0: i32, %arg1: i32) -> (i32, i32, i32, i32) {
    %c0_i32 = arith.constant 0 : i32
    %c0_i32_0 = arith.constant 0 : i32
    %c0_i32_1 = arith.constant 0 : i32
    return %arg0, %c0_i32, %arg1, %c0_i32_0 : i32, i32, i32, i32
  }
}

module attributes {stable_mosaic.version = 11 : i64} {
  func.func @kernel(%arg0: i32, %arg1: i32, %arg2: memref<256x256xf32, #tpu.memory_space<vmem>>, %arg3: memref<1x4x256xf32, #tpu.memory_space<vmem>>, %arg4: memref<1x3x4x256xf32, #tpu.memory_space<vmem>>, %arg5: memref<1x3x4x256xf32, #tpu.memory_space<vmem>>) attributes {dimension_semantics = [#tpu.dimension_semantics<parallel>, #tpu.dimension_semantics<parallel>], iteration_bounds = array<i64: 2, 1>, scalar_prefetch = 0 : i64, scratch_operands = 0 : i64, tpu.core_type = #tpu.core_type<tc>, window_params = [{pipeline_mode = #tpu.pipeline_mode<synchronous>, transform_indices = @transform_0, window_bounds = array<i64: 256, 256>}, {transform_indices = @transform_1, window_bounds = array<i64: 1, 4, 256>}, {transform_indices = @transform_2, window_bounds = array<i64: 1, 3, 4, 256>}, {transform_indices = @transform_3, window_bounds = array<i64: 1, 3, 4, 256>}]} {
    %c0 = arith.constant 0 : index
    %c0_0 = arith.constant 0 : index
    %c0_1 = arith.constant 0 : index
    %0 = vector.load %arg3[%c0, %c0_0, %c0_1] : memref<1x4x256xf32, #tpu.memory_space<vmem>>, vector<1x4x256xf32>
    %1 = vector.shape_cast %0 : vector<1x4x256xf32> to vector<4x256xf32>
    %c0_2 = arith.constant 0 : index
    %c0_3 = arith.constant 0 : index
    %2 = vector.load %arg2[%c0_2, %c0_3] : memref<256x256xf32, #tpu.memory_space<vmem>>, vector<256x256xf32>
    %cst = arith.constant dense<0.000000e+00> : vector<4x256xf32>
    %3 = tpu.matmul %1, %2, %cst {dimension_numbers = #tpu.dot_dimension_numbers<[1], [0], [0], [1], [0, 0, 1, 1], [], []>, precision = #tpu.contract_precision<fp32>} : vector<4x256xf32>, vector<256x256xf32>, vector<4x256xf32> -> vector<4x256xf32>
    %c0_4 = arith.constant 0 : index
    %c0_5 = arith.constant 0 : index
    %c0_6 = arith.constant 0 : index
    %c0_7 = arith.constant 0 : index
    %4 = vector.load %arg4[%c0_4, %c0_5, %c0_6, %c0_7] : memref<1x3x4x256xf32, #tpu.memory_space<vmem>>, vector<1x1x4x256xf32>
    %5 = vector.shape_cast %4 : vector<1x1x4x256xf32> to vector<4x256xf32>
    %6 = vector.shape_cast %3 : vector<4x256xf32> to vector<1x1x4x256xf32>
    tpu.vector_store %arg4[%c0_4, %c0_5, %c0_6, %c0_7], %6 {strides = array<i32>} : memref<1x3x4x256xf32, #tpu.memory_space<vmem>>, vector<1x1x4x256xf32>,
    %7 = arith.subf %1, %3 : vector<4x256xf32>
    %c0_8 = arith.constant 0 : index
    %c0_9 = arith.constant 0 : index
    %c0_10 = arith.constant 0 : index
    %c0_11 = arith.constant 0 : index
    %8 = vector.load %arg5[%c0_8, %c0_9, %c0_10, %c0_11] : memref<1x3x4x256xf32, #tpu.memory_space<vmem>>, vector<1x1x4x256xf32>
    %9 = vector.shape_cast %8 : vector<1x1x4x256xf32> to vector<4x256xf32>
    %10 = vector.shape_cast %7 : vector<4x256xf32> to vector<1x1x4x256xf32>
    tpu.vector_store %arg5[%c0_8, %c0_9, %c0_10, %c0_11], %10 {strides = array<i32>} : memref<1x3x4x256xf32, #tpu.memory_space<vmem>>, vector<1x1x4x256xf32>,
    %cst_12 = arith.constant dense<0.000000e+00> : vector<4x256xf32>
    %11 = tpu.matmul %3, %2, %cst_12 {dimension_numbers = #tpu.dot_dimension_numbers<[1], [0], [0], [1], [0, 0, 1, 1], [], []>, precision = #tpu.contract_precision<fp32>} : vector<4x256xf32>, vector<256x256xf32>, vector<4x256xf32> -> vector<4x256xf32>
    %c0_13 = arith.constant 0 : index
    %c1 = arith.constant 1 : index
    %c0_14 = arith.constant 0 : index
    %c0_15 = arith.constant 0 : index
    %12 = vector.load %arg4[%c0_13, %c1, %c0_14, %c0_15] : memref<1x3x4x256xf32, #tpu.memory_space<vmem>>, vector<1x1x4x256xf32>
    %13 = vector.shape_cast %12 : vector<1x1x4x256xf32> to vector<4x256xf32>
    %14 = vector.shape_cast %11 : vector<4x256xf32> to vector<1x1x4x256xf32>
    tpu.vector_store %arg4[%c0_13, %c1, %c0_14, %c0_15], %14 {strides = array<i32>} : memref<1x3x4x256xf32, #tpu.memory_space<vmem>>, vector<1x1x4x256xf32>,
    %15 = arith.subf %1, %11 : vector<4x256xf32>
    %c0_16 = arith.constant 0 : index
    %c1_17 = arith.constant 1 : index
    %c0_18 = arith.constant 0 : index
    %c0_19 = arith.constant 0 : index
    %16 = vector.load %arg5[%c0_16, %c1_17, %c0_18, %c0_19] : memref<1x3x4x256xf32, #tpu.memory_space<vmem>>, vector<1x1x4x256xf32>
    %17 = vector.shape_cast %16 : vector<1x1x4x256xf32> to vector<4x256xf32>
    %18 = vector.shape_cast %15 : vector<4x256xf32> to vector<1x1x4x256xf32>
    tpu.vector_store %arg5[%c0_16, %c1_17, %c0_18, %c0_19], %18 {strides = array<i32>} : memref<1x3x4x256xf32, #tpu.memory_space<vmem>>, vector<1x1x4x256xf32>,
    %cst_20 = arith.constant dense<0.000000e+00> : vector<4x256xf32>
    %19 = tpu.matmul %11, %2, %cst_20 {dimension_numbers = #tpu.dot_dimension_numbers<[1], [0], [0], [1], [0, 0, 1, 1], [], []>, precision = #tpu.contract_precision<fp32>} : vector<4x256xf32>, vector<256x256xf32>, vector<4x256xf32> -> vector<4x256xf32>
    %c0_21 = arith.constant 0 : index
    %c2 = arith.constant 2 : index
    %c0_22 = arith.constant 0 : index
    %c0_23 = arith.constant 0 : index
    %20 = vector.load %arg4[%c0_21, %c2, %c0_22, %c0_23] : memref<1x3x4x256xf32, #tpu.memory_space<vmem>>, vector<1x1x4x256xf32>
    %21 = vector.shape_cast %20 : vector<1x1x4x256xf32> to vector<4x256xf32>
    %22 = vector.shape_cast %19 : vector<4x256xf32> to vector<1x1x4x256xf32>
    tpu.vector_store %arg4[%c0_21, %c2, %c0_22, %c0_23], %22 {strides = array<i32>} : memref<1x3x4x256xf32, #tpu.memory_space<vmem>>, vector<1x1x4x256xf32>,
    %23 = arith.subf %1, %19 : vector<4x256xf32>
    %c0_24 = arith.constant 0 : index
    %c2_25 = arith.constant 2 : index
    %c0_26 = arith.constant 0 : index
    %c0_27 = arith.constant 0 : index
    %24 = vector.load %arg5[%c0_24, %c2_25, %c0_26, %c0_27] : memref<1x3x4x256xf32, #tpu.memory_space<vmem>>, vector<1x1x4x256xf32>
    %25 = vector.shape_cast %24 : vector<1x1x4x256xf32> to vector<4x256xf32>
    %26 = vector.shape_cast %23 : vector<4x256xf32> to vector<1x1x4x256xf32>
    tpu.vector_store %arg5[%c0_24, %c2_25, %c0_26, %c0_27], %26 {strides = array<i32>} : memref<1x3x4x256xf32, #tpu.memory_space<vmem>>, vector<1x1x4x256xf32>,
    return
  }
  func.func @transform_0(%arg0: i32, %arg1: i32) -> (i32, i32) {
    %c0_i32 = arith.constant 0 : i32
    %c0_i32_0 = arith.constant 0 : i32
    %c0_i32_1 = arith.constant 0 : i32
    return %c0_i32, %c0_i32_0 : i32, i32
  }
  func.func @transform_1(%arg0: i32, %arg1: i32) -> (i32, i32, i32) {
    %c0_i32 = arith.constant 0 : i32
    %c0_i32_0 = arith.constant 0 : i32
    return %arg0, %arg1, %c0_i32 : i32, i32, i32
  }
  func.func @transform_2(%arg0: i32, %arg1: i32) -> (i32, i32, i32, i32) {
    %c0_i32 = arith.constant 0 : i32
    %c0_i32_0 = arith.constant 0 : i32
    %c0_i32_1 = arith.constant 0 : i32
    return %arg0, %c0_i32, %arg1, %c0_i32_0 : i32, i32, i32, i32
  }
  func.func @transform_3(%arg0: i32, %arg1: i32) -> (i32, i32, i32, i32) {
    %c0_i32 = arith.constant 0 : i32
    %c0_i32_0 = arith.constant 0 : i32
    %c0_i32_1 = arith.constant 0 : i32
    return %arg0, %c0_i32, %arg1, %c0_i32_0 : i32, i32, i32, i32
  }
}

</mosaic_0001>

<bundles_post_ra>
// kernel: tpu_custom_call.1
= control target key start
LH: loop header
LB: loop body
LE: loop exit
PB: predicated region body
PF: predicated region fallthrough
CT: control target
= control target key end

     0   :  { %9 = vsyncpa [#allocation3], 0  ;;  %s7182_s0 = inlined_call_operand.hbm [shape: f32[256,256], index: 0, kind: input, shape index: {}]   ;;  %s7183_s1 = inlined_call_operand.hbm [shape: f32[2,4,256], index: 1, kind: input, shape index: {}]   ;;  %s7184_s2 = inlined_call_operand.hbm [shape: f32[2,3,4,256], index: 2, kind: output, shape index: {0}]   ;;  %s7185_s3 = inlined_call_operand.hbm [shape: f32[2,3,4,256], index: 3, kind: output, shape index: {1}]  }
   0x1   :  { %10 = vsyncpa [#allocation6], 0 }
   0x2   :  { %12 = vsyncpa [#allocation6 + $0x1], 0 }
   0x3   :  { %13 = vsyncpa [#allocation4], 0 }
   0x4   :  { %15 = vsyncpa [#allocation4 + $0x1], 0 }
   0x5   :  { %16 = vsyncpa [#allocation9], 0 }
   0x6   :  { %18 = vsyncpa [#allocation9 + $0x1], 0  ;;  %s4916_s12 = smov 0   ;;  %s4918_s13 = smov 0  }
   0x7   :  { %s4920_s14 = smov 0   ;;  %s4922_s15 = smov 0  }
   0x8   :  { %s4924_s16 = smov 0   ;;  %s4926_s17 = smov 0  }
   0x9 LB: > { %s4606_s18 = sadd.s32 4294967295, %s4889_s17   ;;  %p4608_p0 = scmp.ge.s32.totalorder %s4889_s17, 1  ;;  %s4889_s17 = sphi %s4926_s17, %s24_s17   ;;  %s4885_s16 = sphi %s4924_s16, %s8415_s16   ;;  %s4881_s15 = sphi %s4922_s15, %s8414_s15   ;;  %s4877_s14 = sphi %s4920_s14, %s8413_s14   ;;  %s4873_s13 = sphi %s4918_s13, %s8412_s13   ;;  %s4869_s12 = sphi %s4916_s12, %s8411_s12  }
   0xa   : > { %p4948_p1 = scmp.eq.s32.totalorder %s4606_s18, 0  ;;  %p146_p2 = scmp.lt.s32.totalorder %s4889_s17, 3 }
   0xb   : > { %s157_s22 = sshll.u32 %s7182_s0, 4  ;;  %s4891_s24 = smov [#allocation2]   ;;  %s158_s22 = int_to_ptr.hbm [resolvable:$true] %s157_s22 }
   0xc   : > { %p4956_p3 = pnand %p4608_p0, %p146_p2  ;;  %s159_s25 = sshll.u32 %s4891_s24, 4  ;;  %s160_s25 = int_to_ptr.vmem [resolvable:$true] %s159_s25 }
   0xd   : > { %p4610_p6 = scmp.ge.s32.totalorder %s4889_s17, 2  ;;  %s4892_s26 = smov 256  }
   0xe   : > { %p4639_p4 = pneg %p4956_p3  ;;  %s4893_s27 = smov 16  }
   0xf   : > { %s4607_s28 = sadd.s32 4294967294, %s4889_s17   ;;  %s36_s29 = sadd.s32 1, %s4885_s16 }
  0x10   : > { %p4640_p5 = pnand %p4639_p4, %p4948_p1  ;;  %s66_s30 = sadd.s32 1, %s4877_s14 }
  0x11   : > { %p38_p7 = scmp.ge.s32.totalorder %s36_s29, 2  ;;  %p73_p8 = scmp.ne.s32.totalorder %s4877_s14, %s4873_s13 }
  0x12   : > { %4642 = dma.hbm_to_vmem [thread:$0]  (!%p4640_p5), %s158_s22, 8192, %s160_s25, [#allocation3], %s4892_s26, %s4892_s26, %s4893_s27  }
  0x13   : > { %p74_p9 = scmp.eq.s32.totalorder %s4889_s17, 0  ;;  %p79_p10 = scmp.ne.s32.totalorder %s4873_s13, %s4869_s12 }
  0x14   : > { %s8417_s29 = smov (%p38_p7, %s36_s29), 0  ;;  %p105_p13 = scmp.eq.s32.totalorder %s4606_s18, 1 }
  0x15   : > { %p4975_p11 = por %p74_p9, %p73_p8  ;;  %p4981_p12 = por %p4948_p1, %p79_p10 }
  0x16   : > { %s61_s6 = ssub.s32 %s4885_s16, %s8417_s29  ;;  %p111_p2 = scmp.eq.s32.totalorder %s4607_s28, 1 }
  0x17   : > { %p64_p0 = scmp.eq.s32.totalorder %s61_s6, 0  ;;  %p4987_p4 = por %p105_p13, %p73_p8 }
  0x18   : > { %p4655_p5 = scmp.lt.s32.totalorder %s4889_s17, 2  ;;  %p4995_p7 = por %p111_p2, %p79_p10 }
  0x19   : > { %s4993_s8 = scalar_select %p64_p0, %s4877_s14, %s66_s30  }
  0x1a   : > { %s173_s10 = sand.u32 1, %s4877_s14   ;;  %s4625_s20 = sshll.u32 %s4885_s16, 3 }
  0x1b   : > { %s4611_s11 = sshll.u32 %s173_s10, 3  ;;  %s184_s18 = scalar_lea.hbm %s7183_s1, %s4625_s20 }
  0x1c   : > { %s177_s24 = scalar_lea.vmem [#allocation5], %s4611_s11  ;;  %s186_s26 = sshll.u32 %s184_s18, 4  ;;  %s187_s26 = int_to_ptr.hbm [resolvable:$true] %s186_s26 }
  0x1d   : > { %s188_s25 = sshll.u32 %s177_s24, 4  ;;  %p4644_p8 = pnand %p4655_p5, %p4975_p11  ;;  %s189_s25 = int_to_ptr.vmem [resolvable:$true] %s188_s25 }
  0x1e   : > { %s174_s27 = scalar_lea.sflag [#allocation6], %s173_s10  ;;  %197 = sbr.rel (%p4956_p3) target bundleno = 981 (0x3d5), region = 28 }
  0x1f   : > { %4646 = dma.hbm_to_vmem [thread:$0]  (!%p4644_p8), %s187_s26, 128, %s189_s25, %s174_s27  }
  0x23   : > { %4852 = dma.done.wait (%p4948_p1), [#allocation3], 8192  }
  0x24   : > { %4854 = vsyncadd (%p4948_p1), [#allocation3], 4294959104  ;;  %s5013_s28 = sand.u32 1, %s4873_s13  }
  0x25   : > { %s4616_s30 = sshll.u32 %s5013_s28, 3  ;;  %s205_s4 = scalar_lea.sflag [#allocation6], %s5013_s28 }
  0x26   : > { %s5017_s6 = scalar_lea.vmem [#allocation5], %s4616_s30 }
  0x27   : > { %4856 = dma.done.wait (%p4981_p12), %s205_s4, 128  }
  0x28   : > { %4858 = vsyncadd (%p4981_p12), %s205_s4, 4294967168  ;;  %v268_v0 = vld [vmem:[#allocation2 + $0xf0] sm:$0xff]  ;;  %v266_v1 = vld [vmem:[#allocation2 + $0xe0] sm:$0xff]  ;;  %s4626_s19 = smul.u32 24, %s5013_s28  ;;  %vm1675_vm0 = vcmask 1043456   ;;  %s4430_s30 = scalar_lea.sflag [#allocation4], %s5013_s28 }
  0x29   : > { %v264_v2 = vld [vmem:[#allocation2 + $0xd0] sm:$0xff]  ;;  %v5023_v3 = vand.u32 4294901760, %v268_v0  ;;  %v5025_v4 = vand.u32 4294901760, %v266_v1  ;;  %v262_v6 = vld [vmem:[#allocation2 + $0xc0] sm:$0xff]  ;;  %s4627_s10 = smul.u32 24, %s4881_s15  ;;  %s4791_s11 = scalar_lea.hbm %s7184_s2, 48 }
  0x2a   : > { %v5027_v5 = vand.u32 4294901760, %v264_v2  ;;  %v260_v7 = vld [vmem:[#allocation2 + $0xb0] sm:$0xff]  ;;  %v258_v8 = vld [vmem:[#allocation2 + $0xa0] sm:$0xff]  ;;  %v5029_v9 = vand.u32 4294901760, %v262_v6  ;;  %s6482_s23 = scalar_lea.vmem [#allocation7], %s4626_s19  ;;  %s6491_s5 = scalar_lea.vmem [#allocation8], %s4626_s19 }
  0x2b   : > { %7706 = vst [vmem:[#allocation14_spill] sm:$0xff] %v5023_v3  ;;  %v5031_v10 = vand.u32 4294901760, %v260_v7  ;;  %v5033_v11 = vand.u32 4294901760, %v258_v8  ;;  %v256_v12 = vld [vmem:[#allocation2 + $0x90] sm:$0xff]  ;;  %v254_v13 = vld [vmem:[#allocation2 + $0x80] sm:$0xff]  ;;  %309 = vmatpush.msra.mxu0 %v5023_v3  ;;  %v5037_v14 = vsub.f32 %v268_v0, %v5023_v3  ;;  %v5040_v15 = vsub.f32 %v266_v1, %v5025_v4  ;;  %505 = vmatpush.msra.mxu3 %v5023_v3  ;;  %s4448_s21 = scalar_lea.hbm %s7184_s2, %s4627_s10  ;;  %s4449_s22 = sshll.u32 %s6482_s23, 4  ;;  %s7123_s22 = int_to_ptr.vmem [resolvable:$true] %s4449_s22 }
  0x2c   : > { %7707 = vst [vmem:[#allocation15_spill] sm:$0xff] %v5025_v4  ;;  %v5044_v16 = vsub.f32 %v264_v2, %v5027_v5  ;;  %v5046_v17 = vand.u32 4294901760, %v256_v12  ;;  %v252_v18 = vld [vmem:[#allocation2 + $0x70] sm:$0xff]  ;;  %v5049_v19 = vsub.f32 %v262_v6, %v5029_v9  ;;  %v5068_v25 = vand.u32 4294901760, %v254_v13  ;;  %v250_v26 = vld [vmem:[#allocation2 + $0x60] sm:$0xff]  ;;  %s4451_s18 = sshll.u32 %s4448_s21, 4  ;;  %s4467_s26 = scalar_lea.hbm %s7185_s3, %s4627_s10  ;;  %s4452_s18 = int_to_ptr.hbm [resolvable:$true] %s4451_s18 }
  0x2d   : > { %7708 = vst [vmem:[#allocation16_spill] sm:$0xff] %v5027_v5  ;;  %v5052_v20 = vsub.f32 %v260_v7, %v5031_v10  ;;  %v5055_v21 = vsub.f32 %v258_v8, %v5033_v11  ;;  %311 = vmatpush.msra.mxu0 %v5025_v4  ;;  %452 = vmatpush.msra.mxu2 %v5037_v14  ;;  %v5060_v22 = vand.u32 4294901760, %v5037_v14  ;;  %v5063_v23 = vand.u32 4294901760, %v5040_v15  ;;  %v248_v34 = vld [vmem:[#allocation2 + $0x50] sm:$0xff]  ;;  %v246_v42 = vld [vmem:[#allocation2 + $0x40] sm:$0xff]  ;;  %s4468_s15 = sshll.u32 %s6491_s5, 4  ;;  %s7128_s15 = int_to_ptr.vmem [resolvable:$true] %s4468_s15 }
  0x2e   : > { %7709 = vst [vmem:[#allocation17_spill] sm:$0xff] %v5029_v9  ;;  %v5066_v24 = vand.u32 4294901760, %v5044_v16  ;;  %507 = vmatpush.msra.mxu3 %v5025_v4  ;;  %v5072_v27 = vand.u32 4294901760, %v5049_v19  ;;  %v5074_v28 = vand.u32 4294901760, %v252_v18  ;;  %v5077_v29 = vsub.f32 %v256_v12, %v5046_v17  ;;  %v244_v48 = vld [vmem:[#allocation2 + $0x30] sm:$0xff]  ;;  %v242_v54 = vld [vmem:[#allocation2 + $0x20] sm:$0xff] }
  0x2f   : > { %7710 = vst [vmem:[#allocation18_spill] sm:$0xff] %v5031_v10  ;;  %313 = vmatpush.msra.mxu0 %v5027_v5  ;;  %455 = vmatpush.msra.mxu2 %v5040_v15  ;;  %v352_v30 = vsub.f32 %v5037_v14, %v5060_v22  ;;  %v358_v31 = vsub.f32 %v5040_v15, %v5063_v23  ;;  %v5088_v33 = vand.u32 4294901760, %v5052_v20  ;;  %v5091_v35 = vand.u32 4294901760, %v250_v26  ;;  %v5144_v55 = vld [vmem:[%s5017_s6] sm:$0xff]  ;;  %v300_v60 = vld [vmem:[#allocation2 + $0x1f0] sm:$0xff]  ;;  %s4470_s27 = sshll.u32 %s4467_s26, 4  ;;  %s7130_s27 = int_to_ptr.hbm [resolvable:$true] %s4470_s27 }
  0x30   : > { %7711 = vst [vmem:[#allocation19_spill] sm:$0xff] %v5033_v11  ;;  %v364_v32 = vsub.f32 %v5044_v16, %v5066_v24  ;;  %509 = vmatpush.msra.mxu3 %v5027_v5  ;;  %v5094_v36 = vand.u32 4294901760, %v5055_v21  ;;  %v370_v39 = vsub.f32 %v5049_v19, %v5072_v27  ;;  %v5105_v40 = vsub.f32 %v254_v13, %v5068_v25  ;;  %v240_v62 = vld [vmem:[#allocation2 + $0x10] sm:$0xff]  ;;  %v238_v6 = vld [vmem:[#allocation2] sm:$0xff]  ;;  %s4785_s4 = sshra.s32 %s4452_s18, 4  ;;  %s4786_s4 = int_to_ptr.hbm [resolvable:$true] %s4785_s4 }
  0x31   : > { %7712 = vst [vmem:[#allocation20_spill] sm:$0xff] %v5037_v14  ;;  %315 = vmatpush.msra.mxu0 %v5029_v9  ;;  %v5097_v37 = vand.u32 4294901760, %v352_v30  ;;  %458 = vmatpush.msra.mxu2 %v5044_v16  ;;  %v5100_v38 = vand.u32 4294901760, %v358_v31  ;;  %v5108_v41 = vand.u32 4294901760, %v248_v34  ;;  %v376_v44 = vsub.f32 %v5052_v20, %v5088_v33  ;;  %v298_v7 = vld [vmem:[#allocation2 + $0x1e0] sm:$0xff]  ;;  %s4787_s6 = scalar_lea.hbm %s4786_s4, 24  ;;  %p4792_p10 = scmp.lt.s32.totalorder %s4786_s4, %s7184_s2 }
  0x32   : > { %7713 = vst [vmem:[#allocation21_spill] sm:$0xff] %v5040_v15  ;;  %511 = vmatpush.msra.mxu3 %v5029_v9  ;;  %v5112_v43 = vand.u32 4294901760, %v364_v32  ;;  %v5117_v45 = vand.u32 4294901760, %v5077_v29  ;;  %v5120_v46 = vsub.f32 %v252_v18, %v5074_v28  ;;  %v382_v47 = vsub.f32 %v5055_v21, %v5094_v36  ;;  %p4788_p1 = scmp.ne.s32.totalorder %s4786_s4, %s4787_s6  ;;  %p4793_p11 = scmp.lt.s32.totalorder %s4791_s11, %s4787_s6 }
  0x33   : > { %7714 = vst [vmem:[#allocation22_spill] sm:$0xff] %v5044_v16  ;;  %317 = vmatpush.msra.mxu0 %v5031_v10  ;;  %354 = vmatpush.msra.mxu1 %v5097_v37  ;;  %v5128_v49 = vand.u32 4294901760, %v370_v39  ;;  %v5130_v50 = vand.u32 4294901760, %v246_v42  ;;  %v5133_v51 = vand.u32 4294901760, %v5105_v40  ;;  %v5136_v52 = vsub.f32 %v250_v26, %v5091_v35  ;;  %v286_v16 = vld [vmem:[#allocation2 + $0x180] sm:$0xff] }
  0x34   : > { %7715 = vst [vmem:[#allocation23_spill] sm:$0xff] %v5046_v17  ;;  %461 = vmatpush.msra.mxu2 %v5049_v19  ;;  %513 = vmatpush.msra.mxu3 %v5031_v10  ;;  %v5141_v53 = vsub.f32 %v248_v34, %v5108_v41  ;;  %v5148_v56 = vand.u32 4294901760, %v376_v44  ;;  %v388_v57 = vsub.f32 %v5077_v29, %v5117_v45  ;;  %v5152_v58 = vand.u32 4294901760, %v244_v48  ;;  %v296_v34 = vld [vmem:[#allocation2 + $0x1d0] sm:$0xff]  ;;  %p4789_p3 = pnand %p4788_p1, %p4987_p4  ;;  %p4794_p12 = por %p4793_p11, %p4792_p10 }
  0x35   : > { %7716 = vst [vmem:[#allocation24_spill] sm:$0xff] %v5049_v19  ;;  %319 = vmatpush.msra.mxu0 %v5033_v11  ;;  %360 = vmatpush.msra.mxu1 %v5100_v38  ;;  %v5155_v59 = vand.u32 4294901760, %v5120_v46  ;;  %v5159_v61 = vand.u32 4294901760, %v382_v47  ;;  %v394_v63 = vsub.f32 %v5105_v40, %v5133_v51  ;;  %v5166_v0 = vand.u32 4294901760, %v242_v54 }
  0x36   : > { %7717 = vst [vmem:[#allocation25_spill] sm:$0xff] %v5052_v20  ;;  %464 = vmatpush.msra.mxu2 %v5052_v20  ;;  %515 = vmatpush.msra.mxu3 %v5033_v11  ;;  %v5169_v1 = vand.u32 4294901760, %v5136_v52  ;;  %v5172_v2 = vsub.f32 %v246_v42, %v5130_v50  ;;  %v5177_v8 = vand.u32 4294901760, %v5141_v53  ;;  %v5179_v12 = vand.u32 4294901760, %v300_v60  ;;  %v288_v20 = vld [vmem:[#allocation2 + $0x190] sm:$0xff]  ;;  %p4790_p9 = pneg %p4789_p3 }
  0x37   : > { %7718 = vst [vmem:[#allocation26_spill] sm:$0xff] %v5055_v21  ;;  %321 = vmatpush.msra.mxu0 %v5046_v17  ;;  %366 = vmatpush.msra.mxu1 %v5112_v43  ;;  %v5183_v13 = vand.u32 4294901760, %v388_v57  ;;  %v400_v18 = vsub.f32 %v5120_v46, %v5155_v59  ;;  %v5187_v26 = vand.u32 4294901760, %v240_v62  ;;  %v5190_v30 = vsub.f32 %v244_v48, %v5152_v58 }
  0x38   : > { %7719 = vst [vmem:[#allocation27_spill] sm:$0xff] %v5060_v22  ;;  %467 = vmatpush.msra.mxu2 %v5055_v21  ;;  %517 = vmatpush.msra.mxu3 %v5046_v17  ;;  %v5194_v31 = vand.u32 4294901760, %v238_v6  ;;  %v5196_v32 = vand.u32 4294901760, %v298_v7  ;;  %v5200_v39 = vand.u32 4294901760, %v394_v63  ;;  %v406_v42 = vsub.f32 %v5136_v52, %v5169_v1  ;;  %v294_v63 = vld [vmem:[#allocation2 + $0x1c0] sm:$0xff]  ;;  %p4795_p13 = pnand %p4794_p12, %p4790_p9 }
  0x39   : > { %7720 = vst [vmem:[#allocation28_spill] sm:$0xff] %v5063_v23  ;;  %323 = vmatpush.msra.mxu0 %v5068_v25  ;;  %372 = vmatpush.msra.mxu1 %v5128_v49  ;;  %v5205_v44 = vand.u32 4294901760, %v5172_v2  ;;  %v5208_v47 = vsub.f32 %v242_v54, %v5166_v0  ;;  %v412_v48 = vsub.f32 %v5141_v53, %v5177_v8  ;;  %v5222_v54 = vand.u32 4294901760, %v5190_v30 }
  0x3a   : > { %7721 = vst [vmem:[#allocation29_spill] sm:$0xff] %v5066_v24  ;;  %470 = vmatpush.msra.mxu2 %v5077_v29  ;;  %519 = vmatpush.msra.mxu3 %v5068_v25  ;;  %v5215_v57 = vsub.f32 %v300_v60, %v5179_v12  ;;  %v5232_v60 = vsub.f32 %v238_v6, %v5194_v31  ;;  %v5246_v21 = vand.u32 4294901760, %v294_v63  ;;  %v5290_v15 = vand.u32 4294901760, %v288_v20 }
  0x3b   : > { %7722 = vst [vmem:[#allocation30_spill] sm:$0xff] %v5068_v25  ;;  %325 = vmatpush.msra.mxu0 %v5074_v28  ;;  %378 = vmatpush.msra.mxu1 %v5148_v56  ;;  %v5249_v6 = vand.u32 4294901760, %v412_v48  ;;  %v5308_v14 = vand.u32 4294901760, %v286_v16 }
  0x3c   : > { %7723 = vst [vmem:[#allocation31_spill] sm:$0xff] %v5072_v27  ;;  %473 = vmatpush.msra.mxu2 %v5105_v40  ;;  %521 = vmatpush.msra.mxu3 %v5074_v28 }
  0x3d   : > { %7724 = vst [vmem:[#allocation32_spill] sm:$0xff] %v5074_v28  ;;  %327 = vmatpush.msra.mxu0 %v5091_v35  ;;  %384 = vmatpush.msra.mxu1 %v5159_v61 }
  0x3e   : > { %7725 = vst [vmem:[#allocation33_spill] sm:$0xff] %v5077_v29  ;;  %476 = vmatpush.msra.mxu2 %v5120_v46  ;;  %523 = vmatpush.msra.mxu3 %v5091_v35  ;;  %v5235_v29 = vsub.f32 %v298_v7, %v5196_v32  ;;  %v5253_v7 = vand.u32 4294901760, %v5215_v57 }
  0x3f   : > { %7726 = vst [vmem:[#allocation34_spill] sm:$0xff] %v5088_v33  ;;  %329 = vmatpush.msra.mxu0 %v5108_v41  ;;  %390 = vmatpush.msra.mxu1 %v5183_v13 }
  0x40   : > { %7727 = vst [vmem:[#allocation35_spill] sm:$0xff] %v5091_v35  ;;  %479 = vmatpush.msra.mxu2 %v5136_v52  ;;  %525 = vmatpush.msra.mxu3 %v5108_v41 }
  0x41   : > { %7728 = vst [vmem:[#allocation36_spill] sm:$0xff] %v5094_v36  ;;  %331 = vmatpush.msra.mxu0 %v5130_v50  ;;  %396 = vmatpush.msra.mxu1 %v5200_v39 }
  0x42   : > { %7729 = vst [vmem:[#allocation37_spill] sm:$0xff] %v5097_v37  ;;  %482 = vmatpush.msra.mxu2 %v5141_v53  ;;  %527 = vmatpush.msra.mxu3 %v5130_v50 }
  0x43   : > { %7730 = vst [vmem:[#allocation38_spill] sm:$0xff] %v5100_v38  ;;  %333 = vmatpush.msra.mxu0 %v5152_v58 }
  0x44   : > { %7731 = vst [vmem:[#allocation39_spill] sm:$0xff] %v5105_v40  ;;  %v5227_v40 = vand.u32 4294901760, %v296_v34  ;;  %485 = vmatpush.msra.mxu2 %v5172_v2  ;;  %529 = vmatpush.msra.mxu3 %v5152_v58 }
  0x45   : > { %7732 = vst [vmem:[#allocation40_spill] sm:$0xff] %v5108_v41  ;;  %335 = vmatpush.msra.mxu0 %v5166_v0 }
  0x46   : > { %7733 = vst [vmem:[#allocation41_spill] sm:$0xff] %v5112_v43  ;;  %488 = vmatpush.msra.mxu2 %v5190_v30  ;;  %531 = vmatpush.msra.mxu3 %v5166_v0  ;;  %v693_v43 = vsub.f32 %v5215_v57, %v5253_v7 }
  0x47   : > { %7734 = vst [vmem:[#allocation42_spill] sm:$0xff] %v5117_v45  ;;  %337 = vmatpush.msra.mxu0 %v5187_v26 }
  0x48   : > { %7735 = vst [vmem:[#allocation43_spill] sm:$0xff] %v5120_v46  ;;  %v5225_v46 = vsub.f32 %v240_v62, %v5187_v26  ;;  %v418_v62 = vsub.f32 %v5172_v2, %v5205_v44  ;;  %491 = vmatpush.msra.mxu2 %v5208_v47  ;;  %533 = vmatpush.msra.mxu3 %v5187_v26 }
  0x49   : > { %7736 = vst [vmem:[#allocation44_spill] sm:$0xff] %v5128_v49  ;;  %v5282_v49 = vsub.f32 %v294_v63, %v5246_v21  ;;  %339 = vmatpush.msra.mxu0 %v5194_v31 }
  0x4a   : > { %7737 = vst [vmem:[#allocation45_spill] sm:$0xff] %v5130_v50  ;;  %v5277_v19 = vand.u32 4294901760, %v418_v62  ;;  %494 = vmatpush.msra.mxu2 %v5225_v46  ;;  %535 = vmatpush.msra.mxu3 %v5194_v31 }
  0x4b   : > { %7738 = vst [vmem:[#allocation46_spill] sm:$0xff] %v5133_v51  ;;  %v5317_v37 = vand.u32 4294901760, %v5282_v49  ;;  %546 = vmatpush.msrb.mxu0 %v5060_v22 }
  0x4c   : > { %7739 = vst [vmem:[#allocation47_spill] sm:$0xff] %v5136_v52  ;;  %v5244_v52 = vand.u32 4294901760, %v5208_v47  ;;  %497 = vmatpush.msra.mxu2 %v5232_v60 }
  0x4d   : > { %7740 = vst [vmem:[#allocation48_spill] sm:$0xff] %v5141_v53  ;;  %v5263_v53 = vsub.f32 %v296_v34, %v5227_v40  ;;  %550 = vmatpush.msrb.mxu0 %v5063_v23 }
  0x4e   : > { %7741 = vst [vmem:[#allocation49_spill] sm:$0xff] %v5144_v55  ;;  %v430_v34 = vsub.f32 %v5208_v47, %v5244_v52  ;;  %650 = vmatpush.msrb.mxu2 %v5179_v12 }
  0x4f   : > { %7742 = vst [vmem:[#allocation50_spill] sm:$0xff] %v5148_v56  ;;  %v5270_v56 = vand.u32 4294901760, %v5232_v60  ;;  %554 = vmatpush.msrb.mxu0 %v5066_v24  ;;  %v276_v24 = vld [vmem:[#allocation2 + $0x130] sm:$0xff] }
  0x50   : > { %7743 = vst [vmem:[#allocation51_spill] sm:$0xff] %v5152_v58  ;;  %652 = vmatpush.msrb.mxu2 %v5196_v32 }
  0x51   : > { %7744 = vst [vmem:[#allocation52_spill] sm:$0xff] %v5155_v59  ;;  %558 = vmatpush.msrb.mxu0 %v5072_v27 }
  0x52   : > { %303 = vst [vmem:[#allocation1] ss:$2 sm:$0xff] %v5144_v55  ;;  %v5219_v55 = vand.u32 4294901760, %v400_v18  ;;  %v292_v18 = vld [vmem:[#allocation2 + $0x1b0] sm:$0xff]  ;;  %654 = vmatpush.msrb.mxu2 %v5227_v40 }
  0x53   : > { %7745 = vst [vmem:[#allocation53_spill] sm:$0xff] %v5159_v61  ;;  %v5260_v61 = vand.u32 4294901760, %v5225_v46  ;;  %v5265_v48 = vand.u32 4294901760, %v292_v18  ;;  %562 = vmatpush.msrb.mxu0 %v5088_v33 }
  0x54   : > { %7746 = vst [vmem:[#allocation54_spill] sm:$0xff] %v5166_v0  ;;  %402 = vmatpush.msra.mxu1 %v5219_v55  ;;  %656 = vmatpush.msrb.mxu2 %v5246_v21 }
  0x55   : > { %7747 = vst [vmem:[#allocation55_spill] sm:$0xff] %v5169_v1  ;;  %v436_v63 = vsub.f32 %v5225_v46, %v5260_v61  ;;  %566 = vmatpush.msrb.mxu0 %v5094_v36 }
  0x56   : > { %7748 = vst [vmem:[#allocation56_spill] sm:$0xff] %v5172_v2  ;;  %658 = vmatpush.msrb.mxu2 %v5265_v48 }
  0x57   : > { %7749 = vst [vmem:[#allocation57_spill] sm:$0xff] %v5177_v8  ;;  %570 = vmatpush.msrb.mxu0 %v5117_v45 }
  0x58   : > { %7750 = vst [vmem:[#allocation58_spill] sm:$0xff] %v5179_v12 }
  0x59   : > { %7751 = vst [vmem:[#allocation59_spill] sm:$0xff] %v5183_v13  ;;  %v5239_v13 = vand.u32 4294901760, %v406_v42  ;;  %v424_v42 = vsub.f32 %v5190_v30, %v5222_v54  ;;  %v304_v27 = vld.sshfl [vmem:[#allocation1] sm:$0xff pattern:$0x75316420]  ;;  %574 = vmatpush.msrb.mxu0 %v5133_v51  ;;  %v270_v51 = vld [vmem:[#allocation2 + $0x100] sm:$0xff] }
  0x5a   : > { %7752 = vst [vmem:[#allocation60_spill] sm:$0xff] %v5187_v26  ;;  %v5327_v26 = vsub.f32 %v288_v20, %v5290_v15 }
  0x5b   : > { %7753 = vst [vmem:[#allocation61_spill] sm:$0xff] %v5190_v30  ;;  %408 = vmatpush.msra.mxu1 %v5239_v13  ;;  %v5294_v62 = vand.u32 4294901760, %v424_v42  ;;  %v5302_v30 = vsub.f32 %v292_v18, %v5265_v48  ;;  %v284_v42 = vld [vmem:[#allocation2 + $0x170] sm:$0xff]  ;;  %v442_v18 = vsub.f32 %v5232_v60, %v5270_v56  ;;  %578 = vmatpush.msrb.mxu0 %v5155_v59  ;;  %v5470_v59 = vand.u32 4294901760, %v270_v51 }
  0x5c   : > { %7754 = vst [vmem:[#allocation62_spill] sm:$0xff] %v5194_v31  ;;  %v5338_v22 = vand.u32 4294901760, %v284_v42 }
  0x5d   : > { %7755 = vst [vmem:[#allocation63_spill] sm:$0xff] %v5196_v32  ;;  %414 = vmatpush.msra.mxu1 %v5249_v6  ;;  %582 = vmatpush.msrb.mxu0 %v5169_v1  ;;  %v305_v1 = vld.sshfl [vmem:[#allocation1 + $0x8] sm:$0xff pattern:$0x75316420] }
  0x5e   : > { %7756 = vst [vmem:[#allocation64_spill] sm:$0xff] %v5200_v39  ;;  %v290_v39 = vld [vmem:[#allocation2 + $0x1a0] sm:$0xff] }
  0x5f   : > { %7757 = vst [vmem:[#allocation65_spill] sm:$0xff] %v5205_v44  ;;  %v5284_v2 = vand.u32 4294901760, %v290_v39  ;;  %420 = vmatpush.msra.mxu1 %v5277_v19  ;;  %586 = vmatpush.msrb.mxu0 %v5177_v8 }
  0x60   : > { %7758 = vst [vmem:[#allocation66_spill] sm:$0xff] %v5208_v47 }
  0x61   : > { %7759 = vst [vmem:[#allocation67_spill] sm:$0xff] %v5215_v57  ;;  %v5320_v47 = vsub.f32 %v290_v39, %v5284_v2  ;;  %426 = vmatpush.msra.mxu1 %v5294_v62  ;;  %660 = vmatpush.msrb.mxu2 %v5284_v2 }
  0x62   : > { %7760 = vst [vmem:[#allocation68_spill] sm:$0xff] %v5219_v55  ;;  %v5273_v55 = vand.u32 4294901760, %v5235_v29  ;;  %590 = vmatpush.msrb.mxu0 %v5205_v44 }
  0x63   : > { %7761 = vst [vmem:[#allocation69_spill] sm:$0xff] %v5222_v54  ;;  %662 = vmatpush.msrb.mxu2 %v5290_v15 }
  0x64   : > { %7762 = vst [vmem:[#allocation70_spill] sm:$0xff] %v5225_v46  ;;  %v699_v38 = vsub.f32 %v5235_v29, %v5273_v55  ;;  %v5349_v46 = vand.u32 4294901760, %v442_v18  ;;  %594 = vmatpush.msrb.mxu0 %v5222_v54 }
  0x65   : > { %7763 = vst [vmem:[#allocation71_spill] sm:$0xff] %v5227_v40  ;;  %664 = vmatpush.msrb.mxu2 %v5308_v14 }
  0x66   : > { %7764 = vst [vmem:[#allocation72_spill] sm:$0xff] %v5232_v60  ;;  %v5342_v20 = vand.u32 4294901760, %v699_v38  ;;  %v278_v38 = vld [vmem:[#allocation2 + $0x140] sm:$0xff]  ;;  %598 = vmatpush.msrb.mxu0 %v5244_v52 }
  0x67   : > { %7765 = vst [vmem:[#allocation73_spill] sm:$0xff] %v5235_v29  ;;  %666 = vmatpush.msrb.mxu2 %v5338_v22 }
  0x68   : > { %7766 = vst [vmem:[#allocation74_spill] sm:$0xff] %v5239_v13  ;;  %v5299_v13 = vand.u32 4294901760, %v5263_v53  ;;  %602 = vmatpush.msrb.mxu0 %v5260_v61 }
  0x69   : > { %7767 = vst [vmem:[#allocation75_spill] sm:$0xff] %v5244_v52 }
  0x6a   : > { %7768 = vst [vmem:[#allocation76_spill] sm:$0xff] %v5246_v21  ;;  %v705_v39 = vsub.f32 %v5263_v53, %v5299_v13  ;;  %606 = vmatpush.msrb.mxu0 %v5270_v56 }
  0x6b   : > { %7769 = vst [vmem:[#allocation77_spill] sm:$0xff] %v5249_v6  ;;  %v5312_v6 = vand.u32 4294901760, %v430_v34  ;;  %v282_v34 = vld [vmem:[#allocation2 + $0x160] sm:$0xff] }
  0x6c   : > { %7770 = vst [vmem:[#allocation78_spill] sm:$0xff] %v5253_v7  ;;  %v5336_v7 = vand.u32 4294901760, %v5302_v30  ;;  %v5356_v23 = vand.u32 4294901760, %v282_v34  ;;  %v5365_v18 = vand.u32 4294901760, %v705_v39 }
  0x6d   : > { %7771 = vst [vmem:[#allocation79_spill] sm:$0xff] %v5260_v61  ;;  %432 = vmatpush.msra.mxu1 %v5312_v6 }
  0x6e   : > { %7772 = vst [vmem:[#allocation80_spill] sm:$0xff] %v5263_v53  ;;  %v717_v60 = vsub.f32 %v5302_v30, %v5336_v7  ;;  %668 = vmatpush.msrb.mxu2 %v5356_v23 }
  0x6f   : > { %7773 = vst [vmem:[#allocation81_spill] sm:$0xff] %v5265_v48 }
  0x70   : > { %7774 = vst [vmem:[#allocation82_spill] sm:$0xff] %v5270_v56 }
  0x71   : > { %7775 = vst [vmem:[#allocation83_spill] sm:$0xff] %v5273_v55  ;;  %v5324_v55 = vand.u32 4294901760, %v693_v43  ;;  %v5345_v43 = vsub.f32 %v286_v16, %v5308_v14  ;;  %v5361_v16 = vand.u32 4294901760, %v5327_v26 }
  0x72   : > { %7776 = vst [vmem:[#allocation84_spill] sm:$0xff] %v5277_v19  ;;  %v5330_v19 = vand.u32 4294901760, %v436_v63  ;;  %v280_v63 = vld [vmem:[#allocation2 + $0x150] sm:$0xff] }
  0x73   : > { %7777 = vst [vmem:[#allocation85_spill] sm:$0xff] %v5282_v49  ;;  %695 = vmatpush.msrb.mxu3 %v5324_v55 }
  0x74   : > { %7778 = vst [vmem:[#allocation86_spill] sm:$0xff] %v5284_v2  ;;  %438 = vmatpush.msra.mxu1 %v5330_v19 }
  0x75   : > { %7779 = vst [vmem:[#allocation87_spill] sm:$0xff] %v5290_v15  ;;  %701 = vmatpush.msrb.mxu3 %v5342_v20 }
  0x76   : > { %7780 = vst [vmem:[#allocation88_spill] sm:$0xff] %v5294_v62  ;;  %v711_v62 = vsub.f32 %v5282_v49, %v5317_v37  ;;  %444 = vmatpush.msra.mxu1 %v5349_v46 }
  0x77   : > { %7781 = vst [vmem:[#allocation89_spill] sm:$0xff] %v5299_v13  ;;  %v5354_v13 = vand.u32 4294901760, %v5320_v47  ;;  %707 = vmatpush.msrb.mxu3 %v5365_v18 }
  0x78   : > { %7782 = vst [vmem:[#allocation90_spill] sm:$0xff] %v5302_v30  ;;  %v5381_v39 = vand.u32 4294901760, %v711_v62  ;;  %613 = vmatpush.msrb.mxu1 %v5023_v3  ;;  %v5396_v62 = vand.u32 4294901760, %v717_v60  ;;  %v274_v3 = vld [vmem:[#allocation2 + $0x120] sm:$0xff] }
  0x79   : > { %7783 = vst [vmem:[#allocation91_spill] sm:$0xff] %v5308_v14 }
  0x7a   : > { %7784 = vst [vmem:[#allocation92_spill] sm:$0xff] %v5312_v6  ;;  %v5370_v6 = vsub.f32 %v284_v42, %v5338_v22  ;;  %v723_v42 = vsub.f32 %v5320_v47, %v5354_v13  ;;  %615 = vmatpush.msrb.mxu1 %v5025_v4  ;;  %713 = vmatpush.msrb.mxu3 %v5381_v39  ;;  %v272_v4 = vld [vmem:[#allocation2 + $0x110] sm:$0xff] }
  0x7b   : > { %7785 = vst [vmem:[#allocation93_spill] sm:$0xff] %v5317_v37  ;;  %v5372_v37 = vand.u32 4294901760, %v280_v63 }
  0x7c   : > { %7786 = vst [vmem:[#allocation94_spill] sm:$0xff] %v5320_v47  ;;  %v5412_v60 = vand.u32 4294901760, %v723_v42  ;;  %617 = vmatpush.msrb.mxu1 %v5027_v5  ;;  %719 = vmatpush.msrb.mxu3 %v5396_v62 }
  0x7d   : > { %7787 = vst [vmem:[#allocation95_spill] sm:$0xff] %v5324_v55  ;;  %v5377_v55 = vand.u32 4294901760, %v5345_v43  ;;  %670 = vmatpush.msrb.mxu2 %v5372_v37 }
  0x7e   : > { %7788 = vst [vmem:[#allocation96_spill] sm:$0xff] %v5327_v26  ;;  %619 = vmatpush.msrb.mxu1 %v5029_v9  ;;  %725 = vmatpush.msrb.mxu3 %v5412_v60 }
  0x7f   : > { %7789 = vst [vmem:[#allocation97_spill] sm:$0xff] %v5330_v19  ;;  %v5386_v19 = vsub.f32 %v282_v34, %v5356_v23  ;;  %v5402_v34 = vsub.f32 %v280_v63, %v5372_v37  ;;  %v735_v33 = vsub.f32 %v5345_v43, %v5377_v55 }
  0x80   : > { %7790 = vst [vmem:[#allocation98_spill] sm:$0xff] %v5336_v7  ;;  %v5388_v7 = vand.u32 4294901760, %v278_v38  ;;  %621 = vmatpush.msrb.mxu1 %v5031_v10 }
  0x81   : > { %7791 = vst [vmem:[#allocation99_spill] sm:$0xff] %v5338_v22 }
  0x82   : > { %7792 = vst [vmem:[#allocation100_spill] sm:$0xff] %v5342_v20  ;;  %v729_v20 = vsub.f32 %v5327_v26, %v5361_v16  ;;  %v5418_v63 = vsub.f32 %v278_v38, %v5388_v7  ;;  %v5433_v38 = vand.u32 4294901760, %v274_v3  ;;  %623 = vmatpush.msrb.mxu1 %v5033_v11  ;;  %672 = vmatpush.msrb.mxu2 %v5388_v7 }
  0x83   : > { %7793 = vst [vmem:[#allocation101_spill] sm:$0xff] %v5345_v43 }
  0x84   : > { %7794 = vst [vmem:[#allocation102_spill] sm:$0xff] %v5349_v46  ;;  %v5399_v46 = vand.u32 4294901760, %v5370_v6  ;;  %v5424_v36 = vand.u32 4294901760, %v729_v20  ;;  %v5440_v20 = vand.u32 4294901760, %v735_v33  ;;  %v5447_v45 = vand.u32 4294901760, %v5418_v63  ;;  %625 = vmatpush.msrb.mxu1 %v5046_v17 }
  0x85   : > { %7795 = vst [vmem:[#allocation103_spill] sm:$0xff] %v5354_v13  ;;  %v5404_v13 = vand.u32 4294901760, %v276_v24  ;;  %v5509_v17 = vand.u32 4294901760, %v305_v1 }
  0x86   : > { %7796 = vst [vmem:[#allocation104_spill] sm:$0xff] %v5356_v23  ;;  %v741_v42 = vsub.f32 %v5370_v6, %v5399_v46  ;;  %731 = vmatpush.msrb.mxu3 %v5424_v36  ;;  %627 = vmatpush.msrb.mxu1 %v5068_v25 }
  0x87   : > { %7797 = vst [vmem:[#allocation105_spill] sm:$0xff] %v5361_v16  ;;  %v5420_v16 = vand.u32 4294901760, %v304_v27  ;;  %674 = vmatpush.msrb.mxu2 %v5404_v13 }
  0x88   : > { %7798 = vst [vmem:[#allocation106_spill] sm:$0xff] %v5365_v18  ;;  %v5415_v18 = vand.u32 4294901760, %v5386_v19  ;;  %v5458_v33 = vand.u32 4294901760, %v741_v42  ;;  %737 = vmatpush.msrb.mxu3 %v5440_v20  ;;  %629 = vmatpush.msrb.mxu1 %v5074_v28 }
  0x89   : > { %7799 = vst [vmem:[#allocation107_spill] sm:$0xff] %v5370_v6  ;;  %v5450_v5 = vsub.f32 %v304_v27, %v5420_v16  ;;  %v5466_v27 = vsub.f32 %v274_v3, %v5433_v38  ;;  %676 = vmatpush.msrb.mxu2 %v5433_v38  ;;  %446 = vmatmul.f32.vlgmr.msra.gmra.mxu1 %v5420_v16 }
  0x8a   : > { %7800 = vst [vmem:[#allocation108_spill] sm:$0xff] %v5372_v37  ;;  %743 = vmatpush.msrb.mxu3 %v5458_v33  ;;  %631 = vmatpush.msrb.mxu1 %v5091_v35 }
  0x8b   : > { %7801 = vst [vmem:[#allocation109_spill] sm:$0xff] %v5377_v55  ;;  %v5436_v55 = vsub.f32 %v276_v24, %v5404_v13  ;;  %v5452_v24 = vand.u32 4294901760, %v272_v4  ;;  %v5479_v10 = vand.u32 4294901760, %v5450_v5  ;;  %v5493_v11 = vand.u32 4294901760, %v5466_v27  ;;  %500 = vmatmul.f32.vlgmr.msra.gmra.mxu2 %v5450_v5 }
  0x8c   : > { %7802 = vst [vmem:[#allocation110_spill] sm:$0xff] %v5381_v39  ;;  %v5431_v39 = vand.u32 4294901760, %v5402_v34  ;;  %633 = vmatpush.msrb.mxu1 %v5108_v41 }
  0x8d   : > { %7803 = vst [vmem:[#allocation111_spill] sm:$0xff] %v5386_v19  ;;  %v5463_v9 = vand.u32 4294901760, %v5436_v55  ;;  %v5482_v3 = vsub.f32 %v272_v4, %v5452_v24  ;;  %v5498_v4 = vsub.f32 %v270_v51, %v5470_v59  ;;  %678 = vmatpush.msrb.mxu2 %v5452_v24  ;;  %539 = vmatmul.f32.vlgmr.msra.gmra.mxu3 %v5479_v10 }
  0x8e   : > { %7804 = vst [vmem:[#allocation112_spill] sm:$0xff] %v5388_v7  ;;  %635 = vmatpush.msrb.mxu1 %v5130_v50 }
  0x8f   : > { %7805 = vst [vmem:[#allocation113_spill] sm:$0xff] %v5396_v62  ;;  %v747_v62 = vsub.f32 %v5386_v19, %v5415_v18  ;;  %v5507_v8 = vand.u32 4294901760, %v5482_v3  ;;  %680 = vmatpush.msrb.mxu2 %v5470_v59 }
  0x90   : > { %7806 = vst [vmem:[#allocation114_spill] sm:$0xff] %v5399_v46  ;;  %637 = vmatpush.msrb.mxu1 %v5152_v58 }
  0x91   : > { %7807 = vst [vmem:[#allocation115_spill] sm:$0xff] %v5402_v34  ;;  %v5474_v42 = vand.u32 4294901760, %v747_v62 }
  0x92   : > { %7808 = vst [vmem:[#allocation116_spill] sm:$0xff] %v5404_v13  ;;  %639 = vmatpush.msrb.mxu1 %v5166_v0  ;;  %v295_v0 = vld [vmem:[#allocation2 + $0x1c8] sm:$0xff] }
  0x93   : > { %7809 = vst [vmem:[#allocation117_spill] sm:$0xff] %v5412_v60  ;;  %v753_v60 = vsub.f32 %v5402_v34, %v5431_v39  ;;  %749 = vmatpush.msrb.mxu3 %v5474_v42 }
  0x94   : > { %7810 = vst [vmem:[#allocation118_spill] sm:$0xff] %v5415_v18 }
  0x95   : > { %7811 = vst [vmem:[#allocation119_spill] sm:$0xff] %v5418_v63  ;;  %v5488_v62 = vand.u32 4294901760, %v753_v60  ;;  %v343_v60 = vsub.f32 %v5450_v5, %v5479_v10 }
  0x96   : > { %7812 = vst [vmem:[#allocation120_spill] sm:$0xff] %v5420_v16 }
  0x97   : > { %7813 = vst [vmem:[#allocation121_spill] sm:$0xff] %v5424_v36  ;;  %v759_v36 = vsub.f32 %v5418_v63, %v5447_v45  ;;  %755 = vmatpush.msrb.mxu3 %v5488_v62  ;;  %v5526_v54 = vand.u32 4294901760, %v343_v60 }
  0x98   : > { %7814 = vst [vmem:[#allocation122_spill] sm:$0xff] %v5431_v39 }
  0x99   : > { %7815 = vst [vmem:[#allocation123_spill] sm:$0xff] %v5433_v38  ;;  %345 = vmatmul.f32.vlgmr.msra.gmra.mxu0 %v5526_v54 }
  0x9a   : > { %7816 = vst [vmem:[#allocation124_spill] sm:$0xff] %v5436_v55  ;;  %793 = vmatpush.msra.mxu0 %v5215_v57 }
  0x9b   : > { %7817 = vst [vmem:[#allocation125_spill] sm:$0xff] %v5440_v20  ;;  %v765_v20 = vsub.f32 %v5436_v55, %v5463_v9 }
  0x9c   : > { %7818 = vst [vmem:[#allocation126_spill] sm:$0xff] %v5447_v45  ;;  %796 = vmatpush.msra.mxu0 %v5235_v29 }
  0x9d   : > { %7819 = vst [vmem:[#allocation127_spill] sm:$0xff] %v5452_v24  ;;  %v5515_v51 = vand.u32 4294901760, %v765_v20  ;;  %v777_v20 = vsub.f32 %v5482_v3, %v5507_v8 }
  0x9e   : > { %7820 = vst [vmem:[#allocation128_spill] sm:$0xff] %v5458_v33  ;;  %v5502_v33 = vand.u32 4294901760, %v759_v36  ;;  %v771_v36 = vsub.f32 %v5466_v27, %v5493_v11  ;;  %799 = vmatpush.msra.mxu0 %v5263_v53 }
  0x9f   : > { %7821 = vst [vmem:[#allocation129_spill] sm:$0xff] %v5463_v9 }
  0xa0   : > { %7822 = vst [vmem:[#allocation130_spill] sm:$0xff] %v5466_v27  ;;  %761 = vmatpush.msrb.mxu3 %v5502_v33  ;;  %v5537_v52 = vand.u32 4294901760, %v771_v36  ;;  %802 = vmatpush.msra.mxu0 %v5282_v49 }
  0xa1   : > { %7823 = vst [vmem:[#allocation131_spill] sm:$0xff] %v5470_v59  ;;  %608 = vmatmul.f32.vlgmr.msrb.gmra.mxu0 %v5420_v16 }
  0xa2   : > { %7824 = vst [vmem:[#allocation132_spill] sm:$0xff] %v5474_v42  ;;  %v5522_v42 = vand.u32 4294901760, %v5498_v4  ;;  %767 = vmatpush.msrb.mxu3 %v5515_v51  ;;  %805 = vmatpush.msra.mxu0 %v5302_v30 }
  0xa3   : > { %7825 = vst [vmem:[#allocation133_spill] sm:$0xff] %v5479_v10 }
  0xa4   : > { %7826 = vst [vmem:[#allocation134_spill] sm:$0xff] %v5482_v3  ;;  %v783_v60 = vsub.f32 %v5498_v4, %v5522_v42  ;;  %773 = vmatpush.msrb.mxu3 %v5537_v52  ;;  %808 = vmatpush.msra.mxu0 %v5320_v47 }
  0xa5   : > { %7827 = vst [vmem:[#allocation135_spill] sm:$0xff] %v5488_v62  ;;  %v5531_v62 = vsub.f32 %v305_v1, %v5509_v17  ;;  %v5545_v1 = vand.u32 4294901760, %v777_v20 }
  0xa6   : > { %7828 = vst [vmem:[#allocation136_spill] sm:$0xff] %v5493_v11  ;;  %v5556_v36 = vand.u32 4294901760, %v783_v60  ;;  %v7842_v60 = vld [vmem:[#allocation83_spill] sm:$0xff]  ;;  %811 = vmatpush.msra.mxu0 %v5327_v26 }
  0xa7   : > { %7829 = vst [vmem:[#allocation137_spill] sm:$0xff] %v5498_v4  ;;  %779 = vmatpush.msrb.mxu3 %v5545_v1 }
  0xa8   : > { %7830 = vst [vmem:[#allocation138_spill] sm:$0xff] %v5502_v33  ;;  %v5548_v33 = vand.u32 4294901760, %v5531_v62  ;;  %814 = vmatpush.msra.mxu0 %v5345_v43 }
  0xa9   : > { %7831 = vst [vmem:[#allocation139_spill] sm:$0xff] %v5507_v8  ;;  %785 = vmatpush.msrb.mxu3 %v5556_v36 }
  0xaa   : > { %7832 = vst [vmem:[#allocation140_spill] sm:$0xff] %v5509_v17  ;;  %v684_v20 = vsub.f32 %v5531_v62, %v5548_v33  ;;  %787 = vmatmul.f32.vlgmr.msrb.gmra.mxu3 %v5509_v17  ;;  %817 = vmatpush.msra.mxu0 %v5370_v6 }
  0xab   : > { %7833 = vst [vmem:[#allocation141_spill] sm:$0xff] %v5515_v51  ;;  %v7841_v51 = vld [vmem:[#allocation60_spill] sm:$0xff]  ;;  %954 = vmatpush.msra.mxu3 %v5179_v12 }
  0xac   : > { %7834 = vst [vmem:[#allocation142_spill] sm:$0xff] %v5522_v42  ;;  %641 = vmatpush.msrb.mxu1 %v7841_v51  ;;  %820 = vmatpush.msra.mxu0 %v5386_v19 }
  0xad   : > { %7835 = vst [vmem:[#allocation143_spill] sm:$0xff] %v5531_v62  ;;  %956 = vmatpush.msra.mxu3 %v5196_v32 }
  0xae   : > { %7836 = vst [vmem:[#allocation144_spill] sm:$0xff] %v5537_v52  ;;  %v7840_v52 = vld [vmem:[#allocation78_spill] sm:$0xff]  ;;  %643 = vmatpush.msrb.mxu1 %v5194_v31  ;;  %823 = vmatpush.msra.mxu0 %v5402_v34  ;;  %v265_v34 = vld [vmem:[#allocation2 + $0xd8] sm:$0xff] }
  0xaf   : > { %7837 = vst [vmem:[#allocation145_spill] sm:$0xff] %v5545_v1  ;;  %887 = vmatpush.msra.mxu2 %v7840_v52  ;;  %v5570_v1 = vand.u32 4294901760, %v684_v20  ;;  %v7844_v52 = vld [vmem:[#allocation89_spill] sm:$0xff]  ;;  %958 = vmatpush.msra.mxu3 %v5227_v40  ;;  %v297_v31 = vld [vmem:[#allocation2 + $0x1d8] sm:$0xff] }
  0xb0   : > { %7838 = vst [vmem:[#allocation146_spill] sm:$0xff] %v5548_v33  ;;  %846 = vmatpush.msra.mxu1 %v5179_v12  ;;  %v7845_v20 = vld [vmem:[#allocation93_spill] sm:$0xff]  ;;  %826 = vmatpush.msra.mxu0 %v5418_v63  ;;  %v5622_v63 = vand.u32 4294901760, %v265_v34  ;;  %v5851_v50 = vand.u32 4294901760, %v297_v31 }
  0xb1   : > { %7839 = vst [vmem:[#allocation147_spill] sm:$0xff] %v5556_v36  ;;  %891 = vmatpush.msra.mxu2 %v7842_v60  ;;  %960 = vmatpush.msra.mxu3 %v5246_v21  ;;  %v7848_v60 = vld [vmem:[#allocation105_spill] sm:$0xff] }
  0xb2   : > { %7843 = vst [vmem:[#allocation148_spill] sm:$0xff] %v5570_v1  ;;  %686 = vmatmul.f32.vlgmr.msrb.gmra.mxu2 %v5570_v1  ;;  %848 = vmatpush.msra.mxu1 %v5196_v32  ;;  %v5646_v19 = vsub.f32 %v265_v34, %v5622_v63  ;;  %v255_v34 = vld [vmem:[#allocation2 + $0x88] sm:$0xff] }
  0xb3   : > { %895 = vmatpush.msra.mxu2 %v7844_v52  ;;  %v7846_v52 = vld [vmem:[#allocation98_spill] sm:$0xff]  ;;  %645 = vmatmul.f32.vlgmr.msrb.gmra.mxu1 %v5420_v16  ;;  %7852 = vst [vmem:[#allocation151_spill] sm:$0xff] %v5622_v63  ;;  %v251_v36 = vld [vmem:[#allocation2 + $0x68] sm:$0xff] }
  0xb4   : > { %850 = vmatpush.msra.mxu1 %v5227_v40  ;;  %962 = vmatpush.msra.mxu3 %v5265_v48  ;;  %7858 = vst [vmem:[#allocation157_spill] sm:$0xff] %v5646_v19  ;;  %v5669_v26 = vand.u32 4294901760, %v5646_v19  ;;  %v299_v40 = vld [vmem:[#allocation2 + $0x1e8] sm:$0xff] }
  0xb5   : > { %899 = vmatpush.msra.mxu2 %v7845_v20  ;;  %v7847_v20 = vld [vmem:[#allocation103_spill] sm:$0xff]  ;;  %829 = vmatpush.msra.mxu0 %v5436_v55  ;;  %v5832_v51 = vand.u32 4294901760, %v299_v40 }
  0xb6   : > { %852 = vmatpush.msra.mxu1 %v5246_v21  ;;  %964 = vmatpush.msra.mxu3 %v5284_v2  ;;  %7861 = vst [vmem:[#allocation160_spill] sm:$0xff] %v5669_v26 }
  0xb7   : > { %903 = vmatpush.msra.mxu2 %v7846_v52  ;;  %v7849_v52 = vld [vmem:[#allocation109_spill] sm:$0xff]  ;;  %832 = vmatpush.msra.mxu0 %v5466_v27  ;;  %v5867_v41 = vsub.f32 %v299_v40, %v5832_v51 }
  0xb8   : > { %854 = vmatpush.msra.mxu1 %v5265_v48  ;;  %966 = vmatpush.msra.mxu3 %v5290_v15  ;;  %v301_v48 = vld [vmem:[#allocation2 + $0x1f8] sm:$0xff] }
  0xb9   : > { %907 = vmatpush.msra.mxu2 %v7847_v20  ;;  %v269_v20 = vld [vmem:[#allocation2 + $0xf8] sm:$0xff]  ;;  %835 = vmatpush.msra.mxu0 %v5482_v3 }
  0xba   : > { %856 = vmatpush.msra.mxu1 %v5284_v2  ;;  %968 = vmatpush.msra.mxu3 %v5308_v14 }
  0xbb   : > { %911 = vmatpush.msra.mxu2 %v7848_v60  ;;  %v267_v60 = vld [vmem:[#allocation2 + $0xe8] sm:$0xff]  ;;  %838 = vmatpush.msra.mxu0 %v5498_v4 }
  0xbc   : > { %858 = vmatpush.msra.mxu1 %v5290_v15  ;;  %970 = vmatpush.msra.mxu3 %v5338_v22 }
  0xbd   : > { %915 = vmatpush.msra.mxu2 %v7849_v52  ;;  %v5610_v52 = vand.u32 4294901760, %v269_v20  ;;  %841 = vmatmul.f32.vlgmr.msra.gmra.mxu0 %v5531_v62 }
  0xbe   : > { %860 = vmatpush.msra.mxu1 %v5308_v14  ;;  %972 = vmatpush.msra.mxu3 %v5356_v23 }
  0xbf   : > { %919 = vmatpush.msra.mxu2 %v5399_v46  ;;  %7850 = vst [vmem:[#allocation149_spill] sm:$0xff] %v5610_v52  ;;  %v5616_v46 = vand.u32 4294901760, %v267_v60  ;;  %v5625_v55 = vsub.f32 %v269_v20, %v5610_v52  ;;  %v259_v20 = vld [vmem:[#allocation2 + $0xa8] sm:$0xff]  ;;  %991 = vmatpush.msrb.mxu0 %v5610_v52 }
  0xc0   : > { %862 = vmatpush.msra.mxu1 %v5338_v22  ;;  %974 = vmatpush.msra.mxu3 %v5372_v37 }
  0xc1   : > { %923 = vmatpush.msra.mxu2 %v5415_v18  ;;  %7851 = vst [vmem:[#allocation150_spill] sm:$0xff] %v5616_v46  ;;  %v263_v18 = vld [vmem:[#allocation2 + $0xc8] sm:$0xff]  ;;  %993 = vmatpush.msrb.mxu0 %v5616_v46 }
  0xc2   : > { %864 = vmatpush.msra.mxu1 %v5356_v23  ;;  %7853 = vst [vmem:[#allocation152_spill] sm:$0xff] %v5625_v55  ;;  %976 = vmatpush.msra.mxu3 %v5388_v7  ;;  %v5631_v27 = vand.u32 4294901760, %v263_v18 }
  0xc3   : > { %927 = vmatpush.msra.mxu2 %v5431_v39  ;;  %v261_v39 = vld [vmem:[#allocation2 + $0xb8] sm:$0xff]  ;;  %995 = vmatpush.msrb.mxu0 %v5622_v63 }
  0xc4   : > { %866 = vmatpush.msra.mxu1 %v5372_v37  ;;  %7854 = vst [vmem:[#allocation153_spill] sm:$0xff] %v5631_v27  ;;  %978 = vmatpush.msra.mxu3 %v5404_v13  ;;  %v5640_v3 = vand.u32 4294901760, %v261_v39  ;;  %v5658_v6 = vsub.f32 %v263_v18, %v5631_v27  ;;  %v249_v37 = vld [vmem:[#allocation2 + $0x58] sm:$0xff] }
  0xc5   : > { %931 = vmatpush.msra.mxu2 %v5447_v45  ;;  %v5634_v45 = vsub.f32 %v267_v60, %v5616_v46  ;;  %v257_v60 = vld [vmem:[#allocation2 + $0x98] sm:$0xff]  ;;  %997 = vmatpush.msrb.mxu0 %v5631_v27  ;;  %v5731_v22 = vand.u32 4294901760, %v249_v37 }
  0xc6   : > { %868 = vmatpush.msra.mxu1 %v5388_v7  ;;  %7856 = vst [vmem:[#allocation155_spill] sm:$0xff] %v5640_v3  ;;  %980 = vmatpush.msra.mxu3 %v5433_v38  ;;  %v5666_v43 = vand.u32 4294901760, %v257_v60  ;;  %v5672_v18 = vsub.f32 %v261_v39, %v5640_v3  ;;  %v5683_v47 = vand.u32 4294901760, %v5658_v6  ;;  %v1046_v7 = vsub.f32 %v5646_v19, %v5669_v26 }
  0xc7   : > { %935 = vmatpush.msra.mxu2 %v5463_v9  ;;  %7855 = vst [vmem:[#allocation154_spill] sm:$0xff] %v5634_v45  ;;  %v5643_v9 = vand.u32 4294901760, %v5625_v55  ;;  %v5655_v4 = vand.u32 4294901760, %v5634_v45  ;;  %999 = vmatpush.msrb.mxu0 %v5640_v3  ;;  %v5766_v61 = vsub.f32 %v249_v37, %v5731_v22 }
  0xc8   : > { %870 = vmatpush.msra.mxu1 %v5404_v13  ;;  %7860 = vst [vmem:[#allocation159_spill] sm:$0xff] %v5658_v6  ;;  %v253_v13 = vld [vmem:[#allocation2 + $0x78] sm:$0xff]  ;;  %982 = vmatpush.msra.mxu3 %v5452_v24  ;;  %v5699_v49 = vand.u32 4294901760, %v5672_v18  ;;  %v1052_v53 = vsub.f32 %v5658_v6, %v5683_v47 }
  0xc9   : > { %939 = vmatpush.msra.mxu2 %v5493_v11  ;;  %7857 = vst [vmem:[#allocation156_spill] sm:$0xff] %v5643_v9  ;;  %v5652_v11 = vand.u32 4294901760, %v259_v20  ;;  %v5690_v30 = vand.u32 4294901760, %v253_v13 }
  0xca   : > { %7859 = vst [vmem:[#allocation158_spill] sm:$0xff] %v5655_v4  ;;  %872 = vmatpush.msra.mxu1 %v5433_v38  ;;  %v5680_v38 = vand.u32 4294901760, %v255_v34  ;;  %984 = vmatpush.msra.mxu3 %v5470_v59  ;;  %v1058_v29 = vsub.f32 %v5672_v18, %v5699_v49 }
  0xcb   : > { %943 = vmatpush.msra.mxu2 %v5507_v8  ;;  %v1034_v8 = vsub.f32 %v5625_v55, %v5643_v9  ;;  %7862 = vst [vmem:[#allocation161_spill] sm:$0xff] %v5672_v18  ;;  %v5686_v39 = vsub.f32 %v259_v20, %v5652_v11  ;;  %986 = vmatmul.f32.vlgmr.msra.gmra.mxu3 %v5509_v17 }
  0xcc   : > { %7863 = vst [vmem:[#allocation162_spill] sm:$0xff] %v5683_v47  ;;  %874 = vmatpush.msra.mxu1 %v5452_v24  ;;  %v5702_v20 = vsub.f32 %v257_v60, %v5666_v43  ;;  %1187 = vmatpush.msrb.mxu3 %v5610_v52  ;;  %v5706_v24 = vand.u32 4294901760, %v251_v36  ;;  %v5718_v60 = vsub.f32 %v255_v34, %v5680_v38 }
  0xcd   : > { %947 = vmatpush.msra.mxu2 %v5522_v42  ;;  %v1040_v42 = vsub.f32 %v5634_v45, %v5655_v4  ;;  %7864 = vst [vmem:[#allocation163_spill] sm:$0xff] %v5686_v39  ;;  %v5715_v23 = vand.u32 4294901760, %v5686_v39  ;;  %1001 = vmatpush.msrb.mxu0 %v5652_v11 }
  0xce   : > { %949 = vmatmul.f32.vlgmr.msra.gmra.mxu2 %v5509_v17  ;;  %7866 = vst [vmem:[#allocation165_spill] sm:$0xff] %v5699_v49  ;;  %876 = vmatpush.msra.mxu1 %v5470_v59  ;;  %v247_v59 = vld [vmem:[#allocation2 + $0x48] sm:$0xff]  ;;  %v5734_v34 = vand.u32 4294901760, %v5702_v20  ;;  %v5750_v56 = vand.u32 4294901760, %v5718_v60 }
  0xcf   : > { %1134 = vmatpush.msrb.mxu2 %v5625_v55  ;;  %v5694_v55 = vand.u32 4294901760, %v1034_v8  ;;  %7867 = vst [vmem:[#allocation166_spill] sm:$0xff] %v5702_v20  ;;  %v5710_v8 = vand.u32 4294901760, %v1040_v42  ;;  %880 = vmatmul.f32.vlgmr.msra.gmra.mxu1 %v5548_v33  ;;  %v5727_v42 = vand.u32 4294901760, %v1046_v7  ;;  %v5743_v7 = vand.u32 4294901760, %v1052_v53 }
  0xd0   : > { %7869 = vst [vmem:[#allocation168_spill] sm:$0xff] %v5715_v23  ;;  %1189 = vmatpush.msrb.mxu3 %v5616_v46  ;;  %v5747_v57 = vand.u32 4294901760, %v247_v59  ;;  %1003 = vmatpush.msrb.mxu0 %v5666_v43  ;;  %v5759_v53 = vand.u32 4294901760, %v1058_v29  ;;  %v1076_v15 = vsub.f32 %v5718_v60, %v5750_v56 }
  0xd1   : > { %7865 = vst [vmem:[#allocation164_spill] sm:$0xff] %v5694_v55  ;;  %1137 = vmatpush.msrb.mxu2 %v5634_v45  ;;  %v5723_v45 = vsub.f32 %v253_v13, %v5690_v30  ;;  %1036 = vmatpush.msrb.mxu1 %v5694_v55  ;;  %v5739_v13 = vsub.f32 %v251_v36, %v5706_v24 }
  0xd2   : > { %7868 = vst [vmem:[#allocation167_spill] sm:$0xff] %v5710_v8  ;;  %1191 = vmatpush.msrb.mxu3 %v5622_v63  ;;  %v1064_v55 = vsub.f32 %v5686_v39, %v5715_v23  ;;  %1005 = vmatpush.msrb.mxu0 %v5680_v38  ;;  %v5782_v37 = vsub.f32 %v247_v59, %v5747_v57  ;;  %v5795_v59 = vand.u32 4294901760, %v5766_v61 }
  0xd3   : > { %7870 = vst [vmem:[#allocation169_spill] sm:$0xff] %v5718_v60  ;;  %1140 = vmatpush.msrb.mxu2 %v5646_v19  ;;  %v245_v19 = vld [vmem:[#allocation2 + $0x38] sm:$0xff]  ;;  %1042 = vmatpush.msrb.mxu1 %v5710_v8  ;;  %v5755_v36 = vand.u32 4294901760, %v5723_v45  ;;  %v1070_v8 = vsub.f32 %v5702_v20, %v5734_v34 }
  0xd4   : > { %7871 = vst [vmem:[#allocation170_spill] sm:$0xff] %v5723_v45  ;;  %1193 = vmatpush.msrb.mxu3 %v5631_v27  ;;  %v5763_v14 = vand.u32 4294901760, %v245_v19  ;;  %v5775_v29 = vand.u32 4294901760, %v1064_v55  ;;  %1007 = vmatpush.msrb.mxu0 %v5690_v30 }
  0xd5   : > { %7872 = vst [vmem:[#allocation171_spill] sm:$0xff] %v5727_v42  ;;  %1143 = vmatpush.msrb.mxu2 %v5658_v6  ;;  %v243_v6 = vld [vmem:[#allocation2 + $0x28] sm:$0xff]  ;;  %1048 = vmatpush.msrb.mxu1 %v5727_v42  ;;  %v241_v42 = vld [vmem:[#allocation2 + $0x18] sm:$0xff]  ;;  %v5790_v55 = vand.u32 4294901760, %v1070_v8  ;;  %v5808_v8 = vand.u32 4294901760, %v1076_v15  ;;  %v1094_v15 = vsub.f32 %v5766_v61, %v5795_v59 }
  0xd6   : > { %7873 = vst [vmem:[#allocation172_spill] sm:$0xff] %v5734_v34  ;;  %1195 = vmatpush.msrb.mxu3 %v5640_v3  ;;  %v5779_v2 = vand.u32 4294901760, %v243_v6  ;;  %v5792_v44 = vand.u32 4294901760, %v241_v42  ;;  %v5798_v21 = vsub.f32 %v245_v19, %v5763_v14  ;;  %1009 = vmatpush.msrb.mxu0 %v5706_v24  ;;  %v5813_v19 = vand.u32 4294901760, %v5782_v37 }
  0xd7   : > { %7874 = vst [vmem:[#allocation173_spill] sm:$0xff] %v5739_v13  ;;  %1146 = vmatpush.msrb.mxu2 %v5672_v18  ;;  %v5771_v18 = vand.u32 4294901760, %v5739_v13  ;;  %1054 = vmatpush.msrb.mxu1 %v5743_v7 }
  0xd8   : > { %7875 = vst [vmem:[#allocation174_spill] sm:$0xff] %v5743_v7  ;;  %v239_v7 = vld [vmem:[#allocation2 + $0x8] sm:$0xff]  ;;  %1197 = vmatpush.msrb.mxu3 %v5652_v11  ;;  %v5816_v12 = vsub.f32 %v243_v6, %v5779_v2  ;;  %1011 = vmatpush.msrb.mxu0 %v5731_v22  ;;  %v5830_v6 = vsub.f32 %v241_v42, %v5792_v44 }
  0xd9   : > { %7876 = vst [vmem:[#allocation175_spill] sm:$0xff] %v5750_v56  ;;  %1149 = vmatpush.msrb.mxu2 %v5686_v39  ;;  %v1082_v39 = vsub.f32 %v5723_v45, %v5755_v36  ;;  %1060 = vmatpush.msrb.mxu1 %v5759_v53  ;;  %v5810_v32 = vand.u32 4294901760, %v239_v7  ;;  %v1100_v42 = vsub.f32 %v5782_v37, %v5813_v19 }
  0xda   : > { %7877 = vst [vmem:[#allocation176_spill] sm:$0xff] %v5755_v36  ;;  %1199 = vmatpush.msrb.mxu3 %v5666_v43  ;;  %1013 = vmatpush.msrb.mxu0 %v5747_v57 }
  0xdb   : > { %7878 = vst [vmem:[#allocation177_spill] sm:$0xff] %v5759_v53  ;;  %1152 = vmatpush.msrb.mxu2 %v5702_v20  ;;  %v1088_v20 = vsub.f32 %v5739_v13, %v5771_v18  ;;  %v5804_v53 = vand.u32 4294901760, %v301_v48  ;;  %1066 = vmatpush.msrb.mxu1 %v5775_v29  ;;  %v5849_v58 = vsub.f32 %v239_v7, %v5810_v32  ;;  %v5864_v7 = vand.u32 4294901760, %v5830_v6 }
  0xdc   : > { %7879 = vst [vmem:[#allocation178_spill] sm:$0xff] %v5766_v61  ;;  %1201 = vmatpush.msrb.mxu3 %v5680_v38  ;;  %1015 = vmatpush.msrb.mxu0 %v5763_v14  ;;  %v5878_v35 = vand.u32 4294901760, %v1100_v42 }
  0xdd   : > { %7880 = vst [vmem:[#allocation179_spill] sm:$0xff] %v5771_v18  ;;  %1155 = vmatpush.msrb.mxu2 %v5718_v60  ;;  %v5820_v60 = vand.u32 4294901760, %v1082_v39  ;;  %1072 = vmatpush.msrb.mxu1 %v5790_v55  ;;  %v5836_v39 = vand.u32 4294901760, %v1088_v20  ;;  %v293_v20 = vld [vmem:[#allocation2 + $0x1b8] sm:$0xff]  ;;  %v5883_v28 = vand.u32 4294901760, %v5849_v58  ;;  %v1118_v33 = vsub.f32 %v5830_v6, %v5864_v7 }
  0xde   : > { %7881 = vst [vmem:[#allocation180_spill] sm:$0xff] %v5775_v29  ;;  %v5827_v29 = vand.u32 4294901760, %v5798_v21  ;;  %1203 = vmatpush.msrb.mxu3 %v5690_v30  ;;  %1017 = vmatpush.msrb.mxu0 %v5779_v2 }
  0xdf   : > { %7882 = vst [vmem:[#allocation181_spill] sm:$0xff] %v5782_v37  ;;  %1158 = vmatpush.msrb.mxu2 %v5723_v45  ;;  %v5839_v45 = vsub.f32 %v301_v48, %v5804_v53  ;;  %1078 = vmatpush.msrb.mxu1 %v5808_v8  ;;  %v5855_v48 = vand.u32 4294901760, %v295_v0  ;;  %v1124_v17 = vsub.f32 %v5849_v58, %v5883_v28 }
  0xe0   : > { %7883 = vst [vmem:[#allocation182_spill] sm:$0xff] %v5790_v55  ;;  %v5846_v55 = vand.u32 4294901760, %v5816_v12  ;;  %1205 = vmatpush.msrb.mxu3 %v5706_v24  ;;  %1019 = vmatpush.msrb.mxu0 %v5792_v44 }
  0xe1   : > { %7884 = vst [vmem:[#allocation183_spill] sm:$0xff] %v5795_v59  ;;  %1161 = vmatpush.msrb.mxu2 %v5739_v13  ;;  %1084 = vmatpush.msrb.mxu1 %v5820_v60  ;;  %v5859_v13 = vand.u32 4294901760, %v1094_v15  ;;  %v291_v15 = vld [vmem:[#allocation2 + $0x1a8] sm:$0xff]  ;;  %v5891_v25 = vsub.f32 %v295_v0, %v5855_v48 }
  0xe2   : > { %7885 = vst [vmem:[#allocation184_spill] sm:$0xff] %v5798_v21  ;;  %1207 = vmatpush.msrb.mxu3 %v5731_v22  ;;  %v1112_v40 = vsub.f32 %v5816_v12, %v5846_v55  ;;  %v5902_v62 = vand.u32 4294901760, %v291_v15  ;;  %1021 = vmatpush.msrb.mxu0 %v5810_v32 }
  0xe3   : > { %7886 = vst [vmem:[#allocation185_spill] sm:$0xff] %v5808_v8  ;;  %1164 = vmatpush.msrb.mxu2 %v5766_v61  ;;  %v1106_v8 = vsub.f32 %v5798_v21, %v5827_v29  ;;  %v5872_v61 = vand.u32 4294901760, %v5839_v45  ;;  %1090 = vmatpush.msrb.mxu1 %v5836_v39 }
  0xe4   : > { %7887 = vst [vmem:[#allocation186_spill] sm:$0xff] %v5810_v32  ;;  %1209 = vmatpush.msrb.mxu3 %v5747_v57  ;;  %1228 = vmatpush.msra.mxu0 %v5643_v9 }
  0xe5   : > { %7888 = vst [vmem:[#allocation187_spill] sm:$0xff] %v5813_v19  ;;  %1167 = vmatpush.msrb.mxu2 %v5782_v37  ;;  %v5886_v37 = vsub.f32 %v297_v31, %v5851_v50  ;;  %1096 = vmatpush.msrb.mxu1 %v5859_v13  ;;  %v5895_v42 = vand.u32 4294901760, %v1106_v8  ;;  %v5900_v31 = vand.u32 4294901760, %v5867_v41  ;;  %v1375_v0 = vsub.f32 %v5839_v45, %v5872_v61  ;;  %v287_v8 = vld [vmem:[#allocation2 + $0x188] sm:$0xff] }
  0xe6   : > { %7889 = vst [vmem:[#allocation188_spill] sm:$0xff] %v5816_v12  ;;  %1211 = vmatpush.msrb.mxu3 %v5763_v14  ;;  %v5936_v10 = vand.u32 4294901760, %v287_v8  ;;  %1232 = vmatpush.msra.mxu0 %v5655_v4 }
  0xe7   : > { %7890 = vst [vmem:[#allocation189_spill] sm:$0xff] %v5820_v60  ;;  %v5874_v60 = vand.u32 4294901760, %v293_v20  ;;  %1170 = vmatpush.msrb.mxu2 %v5798_v21  ;;  %1102 = vmatpush.msrb.mxu1 %v5878_v35  ;;  %v5918_v1 = vand.u32 4294901760, %v5886_v37  ;;  %v1381_v16 = vsub.f32 %v5867_v41, %v5900_v31 }
  0xe8   : > { %7891 = vst [vmem:[#allocation190_spill] sm:$0xff] %v5827_v29  ;;  %1213 = vmatpush.msrb.mxu3 %v5779_v2  ;;  %1236 = vmatpush.msra.mxu0 %v5669_v26 }
  0xe9   : > { %7892 = vst [vmem:[#allocation191_spill] sm:$0xff] %v5830_v6  ;;  %1173 = vmatpush.msrb.mxu2 %v5816_v12  ;;  %v5909_v21 = vsub.f32 %v293_v20, %v5874_v60  ;;  %v5925_v20 = vand.u32 4294901760, %v5891_v25  ;;  %1108 = vmatpush.msrb.mxu1 %v5895_v42 }
  0xea   : > { %7893 = vst [vmem:[#allocation192_spill] sm:$0xff] %v5836_v39  ;;  %v289_v39 = vld [vmem:[#allocation2 + $0x198] sm:$0xff]  ;;  %1215 = vmatpush.msrb.mxu3 %v5792_v44  ;;  %1240 = vmatpush.msra.mxu0 %v5683_v47 }
  0xeb   : > { %7894 = vst [vmem:[#allocation193_spill] sm:$0xff] %v5839_v45  ;;  %v5920_v12 = vand.u32 4294901760, %v289_v39  ;;  %1176 = vmatpush.msrb.mxu2 %v5830_v6  ;;  %v5940_v6 = vand.u32 4294901760, %v1375_v0  ;;  %v5943_v9 = vand.u32 4294901760, %v5909_v21  ;;  %v1393_v0 = vsub.f32 %v5891_v25, %v5925_v20  ;;  %1027 = vmatmul.f32.vlgmr.msrb.gmra.mxu0 %v5526_v54  ;;  %v7962_v54 = vld [vmem:[#allocation133_spill] sm:$0xff] }
  0xec   : > { %7895 = vst [vmem:[#allocation194_spill] sm:$0xff] %v5846_v55  ;;  %1217 = vmatpush.msrb.mxu3 %v5810_v32  ;;  %1244 = vmatpush.msra.mxu0 %v5699_v49 }
  0xed   : > { %7896 = vst [vmem:[#allocation195_spill] sm:$0xff] %v5849_v58  ;;  %1179 = vmatpush.msrb.mxu2 %v5849_v58  ;;  %v281_v58 = vld [vmem:[#allocation2 + $0x158] sm:$0xff]  ;;  %v1399_v26 = vsub.f32 %v5909_v21, %v5943_v9  ;;  %v5990_v47 = vand.u32 4294901760, %v1393_v0  ;;  %1221 = vmatmul.f32.vlgmr.msrb.gmra.mxu3 %v7962_v54 }
  0xee   : > { %7897 = vst [vmem:[#allocation196_spill] sm:$0xff] %v5855_v48  ;;  %1377 = vmatpush.msra.mxu3 %v5940_v6  ;;  %v5986_v32 = vand.u32 4294901760, %v281_v58  ;;  %1248 = vmatpush.msra.mxu0 %v5715_v23  ;;  %v275_v23 = vld [vmem:[#allocation2 + $0x128] sm:$0xff] }
  0xef   : > { %7898 = vst [vmem:[#allocation197_spill] sm:$0xff] %v5859_v13  ;;  %v5913_v13 = vand.u32 4294901760, %v1112_v40  ;;  %v5929_v40 = vand.u32 4294901760, %v1118_v33  ;;  %v5947_v33 = vand.u32 4294901760, %v1124_v17  ;;  %1332 = vmatpush.msra.mxu2 %v5804_v53  ;;  %v5962_v17 = vand.u32 4294901760, %v1381_v16 }
  0xf0   : > { %7899 = vst [vmem:[#allocation198_spill] sm:$0xff] %v5872_v61  ;;  %v5934_v61 = vsub.f32 %v291_v15, %v5902_v62  ;;  %v1387_v15 = vsub.f32 %v5886_v37, %v5918_v1  ;;  %v6006_v0 = vand.u32 4294901760, %v1399_v26  ;;  %1252 = vmatpush.msra.mxu0 %v5734_v34  ;;  %v6036_v34 = vand.u32 4294901760, %v275_v23  ;;  %1182 = vmatmul.f32.vlgmr.msrb.gmra.mxu2 %v5450_v5  ;;  %v7964_v5 = vld [vmem:[#allocation120_spill] sm:$0xff] }
  0xf1   : > { %7900 = vst [vmem:[#allocation199_spill] sm:$0xff] %v5874_v60  ;;  %1114 = vmatpush.msrb.mxu1 %v5913_v13  ;;  %1334 = vmatpush.msra.mxu2 %v5832_v51 }
  0xf2   : > { %7901 = vst [vmem:[#allocation200_spill] sm:$0xff] %v5878_v35  ;;  %v285_v35 = vld [vmem:[#allocation2 + $0x178] sm:$0xff]  ;;  %v5978_v16 = vand.u32 4294901760, %v1387_v15  ;;  %1383 = vmatpush.msra.mxu3 %v5962_v17  ;;  %1256 = vmatpush.msra.mxu0 %v5750_v56 }
  0xf3   : > { %7902 = vst [vmem:[#allocation201_spill] sm:$0xff] %v5883_v28  ;;  %v5954_v4 = vand.u32 4294901760, %v285_v35  ;;  %1120 = vmatpush.msrb.mxu1 %v5929_v40  ;;  %1336 = vmatpush.msra.mxu2 %v5851_v50 }
  0xf4   : > { %7903 = vst [vmem:[#allocation202_spill] sm:$0xff] %v5886_v37  ;;  %1389 = vmatpush.msra.mxu3 %v5978_v16  ;;  %1260 = vmatpush.msra.mxu0 %v5755_v36 }
  0xf5   : > { %7904 = vst [vmem:[#allocation203_spill] sm:$0xff] %v5895_v42  ;;  %v283_v42 = vld [vmem:[#allocation2 + $0x168] sm:$0xff]  ;;  %1126 = vmatpush.msrb.mxu1 %v5947_v33  ;;  %1338 = vmatpush.msra.mxu2 %v5855_v48 }
  0xf6   : > { %7905 = vst [vmem:[#allocation204_spill] sm:$0xff] %v5900_v31  ;;  %v5952_v31 = vsub.f32 %v289_v39, %v5920_v12  ;;  %v5968_v39 = vsub.f32 %v287_v8, %v5936_v10  ;;  %v5984_v8 = vsub.f32 %v285_v35, %v5954_v4  ;;  %1395 = vmatpush.msra.mxu3 %v5990_v47 }
  0xf7   : > { %7906 = vst [vmem:[#allocation205_spill] sm:$0xff] %v5902_v62  ;;  %1295 = vmatpush.msra.mxu1 %v5610_v52  ;;  %1340 = vmatpush.msra.mxu2 %v5874_v60 }
  0xf8   : > { %7907 = vst [vmem:[#allocation206_spill] sm:$0xff] %v5909_v21  ;;  %v6013_v49 = vand.u32 4294901760, %v5984_v8  ;;  %1401 = vmatpush.msra.mxu3 %v6006_v0  ;;  %1264 = vmatpush.msra.mxu0 %v5771_v18 }
  0xf9   : > { %7908 = vst [vmem:[#allocation207_spill] sm:$0xff] %v5913_v13  ;;  %v5965_v13 = vand.u32 4294901760, %v5934_v61  ;;  %1297 = vmatpush.msra.mxu1 %v5616_v46  ;;  %1342 = vmatpush.msra.mxu2 %v5902_v62 }
  0xfa   : > { %7909 = vst [vmem:[#allocation208_spill] sm:$0xff] %v5918_v1  ;;  %v5970_v1 = vand.u32 4294901760, %v283_v42  ;;  %1268 = vmatpush.msra.mxu0 %v5795_v59  ;;  %1128 = vmatmul.f32.vlgmr.msrb.gmra.mxu1 %v7964_v5 }
  0xfb   : > { %7910 = vst [vmem:[#allocation209_spill] sm:$0xff] %v5920_v12  ;;  %v1405_v15 = vsub.f32 %v5934_v61, %v5965_v13  ;;  %1299 = vmatpush.msra.mxu1 %v5622_v63  ;;  %1344 = vmatpush.msra.mxu2 %v5920_v12 }
  0xfc   : > { %7911 = vst [vmem:[#allocation210_spill] sm:$0xff] %v5925_v20  ;;  %v5981_v20 = vand.u32 4294901760, %v5952_v31  ;;  %v6000_v35 = vsub.f32 %v283_v42, %v5970_v1  ;;  %v6016_v42 = vsub.f32 %v281_v58, %v5986_v32  ;;  %1272 = vmatpush.msra.mxu0 %v5813_v19 }
  0xfd   : > { %7912 = vst [vmem:[#allocation211_spill] sm:$0xff] %v5929_v40  ;;  %v279_v40 = vld [vmem:[#allocation2 + $0x148] sm:$0xff]  ;;  %v6024_v26 = vand.u32 4294901760, %v1405_v15  ;;  %1301 = vmatpush.msra.mxu1 %v5631_v27  ;;  %1346 = vmatpush.msra.mxu2 %v5936_v10 }
  0xfe   : > { %7913 = vst [vmem:[#allocation212_spill] sm:$0xff] %v5934_v61  ;;  %v6029_v46 = vand.u32 4294901760, %v6000_v35  ;;  %v6045_v63 = vand.u32 4294901760, %v6016_v42  ;;  %v271_v27 = vld [vmem:[#allocation2 + $0x108] sm:$0xff]  ;;  %1276 = vmatpush.msra.mxu0 %v5827_v29 }
  0xff   : > { %7914 = vst [vmem:[#allocation213_spill] sm:$0xff] %v5936_v10  ;;  %1303 = vmatpush.msra.mxu1 %v5640_v3  ;;  %1407 = vmatpush.msra.mxu3 %v6024_v26  ;;  %v6077_v3 = vand.u32 4294901760, %v271_v27 }
 0x100   : > { %7915 = vst [vmem:[#allocation214_spill] sm:$0xff] %v5940_v6  ;;  %v5997_v6 = vand.u32 4294901760, %v5968_v39  ;;  %1348 = vmatpush.msra.mxu2 %v5954_v4  ;;  %1280 = vmatpush.msra.mxu0 %v5846_v55 }
 0x101   : > { %7916 = vst [vmem:[#allocation215_spill] sm:$0xff] %v5943_v9  ;;  %v277_v9 = vld [vmem:[#allocation2 + $0x138] sm:$0xff]  ;;  %1305 = vmatpush.msra.mxu1 %v5652_v11  ;;  %v7967_v54 = vld [vmem:[#allocation208_spill] sm:$0xff] }
 0x102   : > { %7917 = vst [vmem:[#allocation216_spill] sm:$0xff] %v5947_v33  ;;  %v6002_v33 = vand.u32 4294901760, %v279_v40  ;;  %v6018_v52 = vand.u32 4294901760, %v277_v9  ;;  %1350 = vmatpush.msra.mxu2 %v5970_v1  ;;  %1284 = vmatpush.msra.mxu0 %v5864_v7 }
 0x103   : > { %7918 = vst [vmem:[#allocation217_spill] sm:$0xff] %v5952_v31  ;;  %1307 = vmatpush.msra.mxu1 %v5666_v43 }
 0x104   : > { %7919 = vst [vmem:[#allocation218_spill] sm:$0xff] %v5954_v4  ;;  %v6032_v58 = vsub.f32 %v279_v40, %v6002_v33  ;;  %v6048_v40 = vsub.f32 %v277_v9, %v6018_v52  ;;  %v6066_v9 = vsub.f32 %v275_v23, %v6036_v34  ;;  %1352 = vmatpush.msra.mxu2 %v5986_v32 }
 0x105   : > { %7920 = vst [vmem:[#allocation219_spill] sm:$0xff] %v5962_v17  ;;  %v1411_v17 = vsub.f32 %v5952_v31, %v5981_v20  ;;  %1309 = vmatpush.msra.mxu1 %v5680_v38  ;;  %1288 = vmatpush.msra.mxu0 %v5883_v28 }
 0x106   : > { %7921 = vst [vmem:[#allocation220_spill] sm:$0xff] %v5965_v13  ;;  %v6075_v36 = vand.u32 4294901760, %v6048_v40  ;;  %v6093_v59 = vand.u32 4294901760, %v6066_v9  ;;  %1354 = vmatpush.msra.mxu2 %v6002_v33  ;;  %1290 = vmatmul.f32.vlgmr.msra.gmra.mxu0 %v7964_v5 }
 0x107   : > { %7922 = vst [vmem:[#allocation221_spill] sm:$0xff] %v5968_v39  ;;  %v6040_v15 = vand.u32 4294901760, %v1411_v17  ;;  %1311 = vmatpush.msra.mxu1 %v5690_v30  ;;  %1475 = vmatpush.msrb.mxu0 %v5839_v45 }
 0x108   : > { %7923 = vst [vmem:[#allocation222_spill] sm:$0xff] %v5970_v1  ;;  %1356 = vmatpush.msra.mxu2 %v6018_v52 }
 0x109   : > { %7924 = vst [vmem:[#allocation223_spill] sm:$0xff] %v5978_v16  ;;  %v1417_v16 = vsub.f32 %v5968_v39, %v5997_v6  ;;  %1413 = vmatpush.msra.mxu3 %v6040_v15  ;;  %1313 = vmatpush.msra.mxu1 %v5706_v24 }
 0x10a   : > { %7925 = vst [vmem:[#allocation224_spill] sm:$0xff] %v5981_v20  ;;  %v273_v20 = vld [vmem:[#allocation2 + $0x118] sm:$0xff]  ;;  %1358 = vmatpush.msra.mxu2 %v6036_v34  ;;  %1478 = vmatpush.msrb.mxu0 %v5867_v41 }
 0x10b   : > { %7926 = vst [vmem:[#allocation225_spill] sm:$0xff] %v5984_v8  ;;  %v6052_v56 = vand.u32 4294901760, %v273_v20  ;;  %v6056_v17 = vand.u32 4294901760, %v1417_v16  ;;  %v1435_v16 = vsub.f32 %v6016_v42, %v6045_v63  ;;  %1315 = vmatpush.msra.mxu1 %v5731_v22 }
 0x10c   : > { %7927 = vst [vmem:[#allocation226_spill] sm:$0xff] %v5986_v32  ;;  %1481 = vmatpush.msrb.mxu0 %v5886_v37 }
 0x10d   : > { %7928 = vst [vmem:[#allocation227_spill] sm:$0xff] %v5990_v47  ;;  %v1423_v47 = vsub.f32 %v5984_v8, %v6013_v49  ;;  %v6082_v23 = vsub.f32 %v273_v20, %v6052_v56  ;;  %1419 = vmatpush.msra.mxu3 %v6056_v17  ;;  %v6097_v20 = vand.u32 4294901760, %v1435_v16  ;;  %1317 = vmatpush.msra.mxu1 %v5747_v57 }
 0x10e   : > { %7929 = vst [vmem:[#allocation228_spill] sm:$0xff] %v5997_v6  ;;  %1360 = vmatpush.msra.mxu2 %v6052_v56  ;;  %1484 = vmatpush.msrb.mxu0 %v5891_v25 }
 0x10f   : > { %7930 = vst [vmem:[#allocation229_spill] sm:$0xff] %v6000_v35  ;;  %v6107_v19 = vand.u32 4294901760, %v6082_v23  ;;  %1319 = vmatpush.msra.mxu1 %v5763_v14 }
 0x110   : > { %7931 = vst [vmem:[#allocation230_spill] sm:$0xff] %v6002_v33  ;;  %1362 = vmatpush.msra.mxu2 %v6077_v3  ;;  %1487 = vmatpush.msrb.mxu0 %v5909_v21 }
 0x111   : > { %7932 = vst [vmem:[#allocation231_spill] sm:$0xff] %v6006_v0  ;;  %v1429_v0 = vsub.f32 %v6000_v35, %v6029_v46  ;;  %1321 = vmatpush.msra.mxu1 %v5779_v2 }
 0x112   : > { %7933 = vst [vmem:[#allocation232_spill] sm:$0xff] %v6013_v49  ;;  %v6061_v49 = vand.u32 4294901760, %v6032_v58  ;;  %1490 = vmatpush.msrb.mxu0 %v5934_v61 }
 0x113   : > { %7934 = vst [vmem:[#allocation233_spill] sm:$0xff] %v6016_v42  ;;  %1323 = vmatpush.msra.mxu1 %v5792_v44 }
 0x114   : > { %7935 = vst [vmem:[#allocation234_spill] sm:$0xff] %v6018_v52  ;;  %1493 = vmatpush.msrb.mxu0 %v5952_v31 }
 0x115   : > { %7936 = vst [vmem:[#allocation235_spill] sm:$0xff] %v6024_v26  ;;  %v6070_v26 = vand.u32 4294901760, %v1423_v47  ;;  %v6086_v47 = vand.u32 4294901760, %v1429_v0  ;;  %v1447_v0 = vsub.f32 %v6048_v40, %v6075_v36 }
 0x116   : > { %7937 = vst [vmem:[#allocation236_spill] sm:$0xff] %v6029_v46  ;;  %1496 = vmatpush.msrb.mxu0 %v5968_v39 }
 0x117   : > { %7938 = vst [vmem:[#allocation237_spill] sm:$0xff] %v6032_v58  ;;  %1425 = vmatpush.msra.mxu3 %v6070_v26  ;;  %v6119_v16 = vand.u32 4294901760, %v1447_v0 }
 0x118   : > { %7939 = vst [vmem:[#allocation238_spill] sm:$0xff] %v6036_v34  ;;  %1499 = vmatpush.msrb.mxu0 %v5984_v8 }
 0x119   : > { %7940 = vst [vmem:[#allocation239_spill] sm:$0xff] %v6040_v15  ;;  %v1441_v15 = vsub.f32 %v6032_v58, %v6061_v49  ;;  %1431 = vmatpush.msra.mxu3 %v6086_v47 }
 0x11a   : > { %7941 = vst [vmem:[#allocation240_spill] sm:$0xff] %v6045_v63  ;;  %1502 = vmatpush.msrb.mxu0 %v6000_v35 }
 0x11b   : > { %7942 = vst [vmem:[#allocation241_spill] sm:$0xff] %v6048_v40  ;;  %1437 = vmatpush.msra.mxu3 %v6097_v20 }
 0x11c   : > { %7943 = vst [vmem:[#allocation242_spill] sm:$0xff] %v6052_v56  ;;  %1505 = vmatpush.msrb.mxu0 %v6016_v42  ;;  %v8024_v42 = vld [vmem:[#allocation102_spill] sm:$0xff] }
 0x11d   : > { %7944 = vst [vmem:[#allocation243_spill] sm:$0xff] %v6056_v17  ;;  %v6102_v17 = vsub.f32 %v271_v27, %v6077_v3  ;;  %v1453_v27 = vsub.f32 %v6066_v9, %v6093_v59 }
 0x11e   : > { %7945 = vst [vmem:[#allocation244_spill] sm:$0xff] %v6061_v49  ;;  %1508 = vmatpush.msrb.mxu0 %v6032_v58 }
 0x11f   : > { %7946 = vst [vmem:[#allocation245_spill] sm:$0xff] %v6066_v9  ;;  %v6122_v29 = vand.u32 4294901760, %v6102_v17  ;;  %v6132_v0 = vand.u32 4294901760, %v1453_v27 }
 0x120   : > { %7947 = vst [vmem:[#allocation246_spill] sm:$0xff] %v6070_v26  ;;  %v6111_v26 = vand.u32 4294901760, %v1441_v15  ;;  %v1459_v15 = vsub.f32 %v6082_v23, %v6107_v19  ;;  %1511 = vmatpush.msrb.mxu0 %v6048_v40 }
 0x121   : > { %7948 = vst [vmem:[#allocation247_spill] sm:$0xff] %v6075_v36 }
 0x122   : > { %7949 = vst [vmem:[#allocation248_spill] sm:$0xff] %v6077_v3  ;;  %1443 = vmatpush.msra.mxu3 %v6111_v26  ;;  %1514 = vmatpush.msrb.mxu0 %v6066_v9  ;;  %v8004_v9 = vld [vmem:[#allocation43_spill] sm:$0xff] }
 0x123   : > { %7950 = vst [vmem:[#allocation249_spill] sm:$0xff] %v6082_v23 }
 0x124   : > { %7951 = vst [vmem:[#allocation250_spill] sm:$0xff] %v6086_v47  ;;  %1449 = vmatpush.msra.mxu3 %v6119_v16  ;;  %v6140_v47 = vand.u32 4294901760, %v1459_v15  ;;  %v7963_v15 = vld [vmem:[#allocation198_spill] sm:$0xff]  ;;  %1517 = vmatpush.msrb.mxu0 %v6082_v23  ;;  %v7998_v23 = vld [vmem:[#allocation33_spill] sm:$0xff] }
 0x125   : > { %7952 = vst [vmem:[#allocation251_spill] sm:$0xff] %v6093_v59  ;;  %1569 = vmatpush.msrb.mxu2 %v7963_v15  ;;  %v7968_v15 = vld [vmem:[#allocation148_spill] sm:$0xff] }
 0x126   : > { %7953 = vst [vmem:[#allocation252_spill] sm:$0xff] %v6097_v20  ;;  %v1465_v20 = vsub.f32 %v6102_v17, %v6122_v29  ;;  %1455 = vmatpush.msra.mxu3 %v6132_v0  ;;  %1368 = vmatmul.f32.vlgmr.msra.gmra.mxu2 %v7968_v15  ;;  %v7972_v15 = vld [vmem:[#allocation224_spill] sm:$0xff] }
 0x127   : > { %7954 = vst [vmem:[#allocation253_spill] sm:$0xff] %v6102_v17  ;;  %1520 = vmatpush.msrb.mxu0 %v6102_v17  ;;  %v7992_v17 = vld [vmem:[#allocation25_spill] sm:$0xff] }
 0x128   : > { %7955 = vst [vmem:[#allocation254_spill] sm:$0xff] %v6107_v19  ;;  %v6148_v27 = vand.u32 4294901760, %v1465_v20  ;;  %1461 = vmatpush.msra.mxu3 %v6140_v47  ;;  %v7965_v20 = vld [vmem:[#allocation204_spill] sm:$0xff] }
 0x129   : > { %7956 = vst [vmem:[#allocation255_spill] sm:$0xff] %v6111_v26  ;;  %1573 = vmatpush.msrb.mxu2 %v7965_v20  ;;  %v7970_v20 = vld [vmem:[#allocation140_spill] sm:$0xff] }
 0x12a   : > { %7957 = vst [vmem:[#allocation256_spill] sm:$0xff] %v6119_v16  ;;  %1467 = vmatpush.msra.mxu3 %v6148_v27 }
 0x12b   : > { %7958 = vst [vmem:[#allocation257_spill] sm:$0xff] %v6122_v29  ;;  %1577 = vmatpush.msrb.mxu2 %v7967_v54  ;;  %1469 = vmatmul.f32.vlgmr.msra.gmra.mxu3 %v7970_v20  ;;  %v7971_v54 = vld [vmem:[#allocation215_spill] sm:$0xff] }
 0x12c   : > { %7959 = vst [vmem:[#allocation258_spill] sm:$0xff] %v6132_v0  ;;  %1636 = vmatpush.msrb.mxu3 %v5804_v53  ;;  %v7966_v0 = vld [vmem:[#allocation186_spill] sm:$0xff] }
 0x12d   : > { %7960 = vst [vmem:[#allocation259_spill] sm:$0xff] %v6140_v47  ;;  %1325 = vmatpush.msra.mxu1 %v7966_v0  ;;  %v8006_v47 = vld [vmem:[#allocation74_spill] sm:$0xff] }
 0x12e   : > { %7961 = vst [vmem:[#allocation260_spill] sm:$0xff] %v6148_v27  ;;  %1638 = vmatpush.msrb.mxu3 %v5832_v51  ;;  %v7969_v27 = vld [vmem:[#allocation210_spill] sm:$0xff]  ;;  %1327 = vmatmul.f32.vlgmr.msra.gmra.mxu1 %v7964_v5  ;;  %v7973_v5 = vld [vmem:[#allocation232_spill] sm:$0xff] }
 0x12f   : > { %1528 = vmatpush.msrb.mxu1 %v5804_v53  ;;  %1581 = vmatpush.msrb.mxu2 %v7969_v27  ;;  %v7982_v27 = vld [vmem:[#allocation38_spill] sm:$0xff] }
 0x130   : > { %1640 = vmatpush.msrb.mxu3 %v5851_v50 }
 0x131   : > { %1530 = vmatpush.msrb.mxu1 %v5832_v51  ;;  %1585 = vmatpush.msrb.mxu2 %v7971_v54 }
 0x132   : > { %1642 = vmatpush.msrb.mxu3 %v5855_v48 }
 0x133   : > { %1532 = vmatpush.msrb.mxu1 %v5851_v50  ;;  %1589 = vmatpush.msrb.mxu2 %v5965_v13  ;;  %v7981_v13 = vld [vmem:[#allocation17_spill] sm:$0xff] }
 0x134   : > { %1644 = vmatpush.msrb.mxu3 %v5874_v60 }
 0x135   : > { %1534 = vmatpush.msrb.mxu1 %v5855_v48  ;;  %1593 = vmatpush.msrb.mxu2 %v7972_v15  ;;  %v7980_v15 = vld [vmem:[#allocation20_spill] sm:$0xff] }
 0x136   : > { %1646 = vmatpush.msrb.mxu3 %v5902_v62 }
 0x137   : > { %1536 = vmatpush.msrb.mxu1 %v5874_v60  ;;  %1597 = vmatpush.msrb.mxu2 %v5997_v6  ;;  %v7979_v6 = vld [vmem:[#allocation37_spill] sm:$0xff] }
 0x138   : > { %1648 = vmatpush.msrb.mxu3 %v5920_v12 }
 0x139   : > { %1538 = vmatpush.msrb.mxu1 %v5902_v62  ;;  %1601 = vmatpush.msrb.mxu2 %v7973_v5  ;;  %v501_v5 = vpop.f32.mrf.mxu2 }
 0x13a   : > { %1650 = vmatpush.msrb.mxu3 %v5936_v10 }
 0x13b   : > { %1540 = vmatpush.msrb.mxu1 %v5920_v12  ;;  %1605 = vmatpush.msrb.mxu2 %v6029_v46  ;;  %v7977_v46 = vld [vmem:[#allocation16_spill] sm:$0xff] }
 0x13c   : > { %1652 = vmatpush.msrb.mxu3 %v5954_v4 }
 0x13d   : > { %1542 = vmatpush.msrb.mxu1 %v5936_v10  ;;  %1609 = vmatpush.msrb.mxu2 %v6045_v63  ;;  %v7974_v63 = vld [vmem:[#allocation143_spill] sm:$0xff] }
 0x13e   : > { %1654 = vmatpush.msrb.mxu3 %v5970_v1  ;;  %1523 = vmatmul.f32.vlgmr.msrb.gmra.mxu0 %v7974_v63  ;;  %v346_v63 = vpop.f32.mrf.mxu0 }
 0x13f   : > { %1544 = vmatpush.msrb.mxu1 %v5954_v4  ;;  %1613 = vmatpush.msrb.mxu2 %v6061_v49  ;;  %v447_v49 = vpop.f32.mrf.mxu1 }
 0x140   : > { %1656 = vmatpush.msrb.mxu3 %v5986_v32 }
 0x141   : > { %1546 = vmatpush.msrb.mxu1 %v5970_v1  ;;  %1617 = vmatpush.msrb.mxu2 %v6075_v36  ;;  %v7975_v36 = vld [vmem:[#allocation14_spill] sm:$0xff] }
 0x142   : > { %1658 = vmatpush.msrb.mxu3 %v6002_v33  ;;  %1682 = vmatpush.msra.mxu0 %v7975_v36  ;;  %v8023_v1 = vld [vmem:[#allocation70_spill] sm:$0xff] }
 0x143   : > { %1548 = vmatpush.msrb.mxu1 %v5986_v32  ;;  %1621 = vmatpush.msrb.mxu2 %v6093_v59  ;;  %v7976_v59 = vld [vmem:[#allocation15_spill] sm:$0xff]  ;;  %v8015_v32 = vld [vmem:[#allocation88_spill] sm:$0xff] }
 0x144   : > { %1660 = vmatpush.msrb.mxu3 %v6018_v52  ;;  %1684 = vmatpush.msra.mxu0 %v7976_v59 }
 0x145   : > { %1550 = vmatpush.msrb.mxu1 %v6002_v33  ;;  %1625 = vmatpush.msrb.mxu2 %v6107_v19  ;;  %v448_v19 = vadd.f32 %v447_v49, %v346_v63  ;;  %v540_v49 = vpop.f32.mrf.mxu3  ;;  %v7984_v63 = vld [vmem:[#allocation18_spill] sm:$0xff]  ;;  %v8010_v33 = vld [vmem:[#allocation48_spill] sm:$0xff] }
 0x146   : > { %1662 = vmatpush.msrb.mxu3 %v6036_v34  ;;  %1686 = vmatpush.msra.mxu0 %v7977_v46 }
 0x147   : > { %1552 = vmatpush.msrb.mxu1 %v6018_v52  ;;  %1629 = vmatpush.msrb.mxu2 %v6122_v29  ;;  %v7978_v29 = vld [vmem:[#allocation146_spill] sm:$0xff]  ;;  %v502_v54 = vadd.f32 %v501_v5, %v448_v19  ;;  %v7989_v19 = vld [vmem:[#allocation24_spill] sm:$0xff]  ;;  %v609_v5 = vpop.f32.mrf.mxu0 }
 0x148   : > { %1664 = vmatpush.msrb.mxu3 %v6052_v56  ;;  %1631 = vmatmul.f32.vlgmr.msrb.gmra.mxu2 %v7970_v20  ;;  %v8000_v52 = vld [vmem:[#allocation64_spill] sm:$0xff] }
 0x149   : > { %1554 = vmatpush.msrb.mxu1 %v6036_v34  ;;  %1825 = vmatpush.msra.mxu2 %v7980_v15  ;;  %v541_v15 = vadd.f32 %v540_v49, %v502_v54  ;;  %v7994_v34 = vld [vmem:[#allocation53_spill] sm:$0xff]  ;;  %v7995_v54 = vld [vmem:[#allocation26_spill] sm:$0xff]  ;;  %v646_v49 = vpop.f32.mrf.mxu1 }
 0x14a   : > { %1666 = vmatpush.msrb.mxu3 %v6077_v3  ;;  %1688 = vmatpush.msra.mxu0 %v7981_v13 }
 0x14b   : > { %1556 = vmatpush.msrb.mxu1 %v6052_v56  ;;  %1668 = vmatmul.f32.vlgmr.msrb.gmra.mxu3 %v7970_v20  ;;  %v7983_v20 = vld [vmem:[#allocation21_spill] sm:$0xff]  ;;  %v7988_v56 = vld [vmem:[#allocation44_spill] sm:$0xff] }
 0x14c   : > { %1878 = vmatpush.msra.mxu3 %v7975_v36  ;;  %1828 = vmatpush.msra.mxu2 %v7983_v20  ;;  %v7990_v20 = vld [vmem:[#allocation23_spill] sm:$0xff] }
 0x14d   : > { %1558 = vmatpush.msrb.mxu1 %v6077_v3  ;;  %1690 = vmatpush.msra.mxu0 %v7984_v63  ;;  %v7986_v3 = vld [vmem:[#allocation22_spill] sm:$0xff] }
 0x14e   : > { %1562 = vmatmul.f32.vlgmr.msrb.gmra.mxu1 %v7978_v29  ;;  %1880 = vmatpush.msra.mxu3 %v7976_v59  ;;  %v7985_v29 = vld [vmem:[#allocation41_spill] sm:$0xff] }
 0x14f   : > { %1727 = vmatpush.msra.mxu1 %v7979_v6  ;;  %1831 = vmatpush.msra.mxu2 %v7986_v3  ;;  %v7987_v6 = vld [vmem:[#allocation19_spill] sm:$0xff]  ;;  %v610_v3 = vadd.f32 %v609_v5, %v541_v15  ;;  %v687_v5 = vpop.f32.mrf.mxu2 }
 0x150   : > { %1692 = vmatpush.msra.mxu0 %v7987_v6  ;;  %1882 = vmatpush.msra.mxu3 %v7977_v46  ;;  %v8001_v15 = vld [vmem:[#allocation39_spill] sm:$0xff] }
 0x151   : > { %1733 = vmatpush.msra.mxu1 %v7982_v27  ;;  %1834 = vmatpush.msra.mxu2 %v7989_v19  ;;  %v7991_v27 = vld [vmem:[#allocation50_spill] sm:$0xff]  ;;  %v7996_v19 = vld [vmem:[#allocation32_spill] sm:$0xff]  ;;  %v881_v58 = vpop.f32.mrf.mxu1 }
 0x152   : > { %1694 = vmatpush.msra.mxu0 %v7990_v20  ;;  %1884 = vmatpush.msra.mxu3 %v7981_v13 }
 0x153   : > { %1739 = vmatpush.msra.mxu1 %v7985_v29  ;;  %1837 = vmatpush.msra.mxu2 %v7992_v17  ;;  %v7993_v29 = vld [vmem:[#allocation30_spill] sm:$0xff]  ;;  %v647_v17 = vadd.f32 %v646_v49, %v610_v3  ;;  %v8007_v3 = vld [vmem:[#allocation47_spill] sm:$0xff]  ;;  %v788_v49 = vpop.f32.mrf.mxu3 }
 0x154   : > { %1696 = vmatpush.msra.mxu0 %v7993_v29  ;;  %1886 = vmatpush.msra.mxu3 %v7984_v63 }
 0x155   : > { %1745 = vmatpush.msra.mxu1 %v7988_v56  ;;  %1840 = vmatpush.msra.mxu2 %v7995_v54  ;;  %v7997_v56 = vld [vmem:[#allocation59_spill] sm:$0xff]  ;;  %v8002_v54 = vld [vmem:[#allocation40_spill] sm:$0xff] }
 0x156   : > { %1698 = vmatpush.msra.mxu0 %v7996_v19  ;;  %1888 = vmatpush.msra.mxu3 %v7987_v6 }
 0x157   : > { %1751 = vmatpush.msra.mxu1 %v7991_v27  ;;  %1843 = vmatpush.msra.mxu2 %v7998_v23  ;;  %v7999_v27 = vld [vmem:[#allocation35_spill] sm:$0xff]  ;;  %v688_v23 = vadd.f32 %v687_v5, %v647_v17  ;;  %v8012_v17 = vld [vmem:[#allocation84_spill] sm:$0xff]  ;;  %v950_v16 = vpop.f32.mrf.mxu2 }
 0x158   : > { %1700 = vmatpush.msra.mxu0 %v7999_v27  ;;  %1890 = vmatpush.msra.mxu3 %v7990_v20  ;;  %v8013_v5 = vld [vmem:[#allocation56_spill] sm:$0xff] }
 0x159   : > { %1757 = vmatpush.msra.mxu1 %v7994_v34  ;;  %1846 = vmatpush.msra.mxu2 %v8001_v15  ;;  %v8003_v34 = vld [vmem:[#allocation68_spill] sm:$0xff]  ;;  %v8008_v15 = vld [vmem:[#allocation51_spill] sm:$0xff]  ;;  %v789_v40 = vadd.f32 %v788_v49, %v688_v23 }
 0x15a   : > { %1702 = vmatpush.msra.mxu0 %v8002_v54  ;;  %1892 = vmatpush.msra.mxu3 %v7993_v29  ;;  %v8018_v23 = vld [vmem:[#allocation92_spill] sm:$0xff]  ;;  %v8019_v49 = vld [vmem:[#allocation27_spill] sm:$0xff] }
 0x15b   : > { %1763 = vmatpush.msra.mxu1 %v7997_v56  ;;  %1849 = vmatpush.msra.mxu2 %v8004_v9  ;;  %v8005_v56 = vld [vmem:[#allocation45_spill] sm:$0xff]  ;;  %v842_v9 = vpop.f32.mrf.mxu0 }
 0x15c   : > { %1704 = vmatpush.msra.mxu0 %v8005_v56  ;;  %1894 = vmatpush.msra.mxu3 %v7996_v19 }
 0x15d   : > { %1769 = vmatpush.msra.mxu1 %v8000_v52  ;;  %1852 = vmatpush.msra.mxu2 %v8007_v3  ;;  %v8009_v52 = vld [vmem:[#allocation77_spill] sm:$0xff]  ;;  %v8014_v3 = vld [vmem:[#allocation60_spill] sm:$0xff] }
 0x15e   : > { %1706 = vmatpush.msra.mxu0 %v8008_v15  ;;  %1896 = vmatpush.msra.mxu3 %v7999_v27 }
 0x15f   : > { %1775 = vmatpush.msra.mxu1 %v8003_v34  ;;  %1855 = vmatpush.msra.mxu2 %v8010_v33  ;;  %v8011_v34 = vld [vmem:[#allocation54_spill] sm:$0xff] }
 0x160   : > { %1708 = vmatpush.msra.mxu0 %v8011_v34  ;;  %1898 = vmatpush.msra.mxu3 %v8002_v54  ;;  %v8017_v33 = vld [vmem:[#allocation62_spill] sm:$0xff] }
 0x161   : > { %1781 = vmatpush.msra.mxu1 %v8006_v47  ;;  %1858 = vmatpush.msra.mxu2 %v8013_v5  ;;  %v843_v47 = vadd.f32 %v842_v9, %v789_v40  ;;  %v8021_v40 = vld [vmem:[#allocation97_spill] sm:$0xff]  ;;  %v8022_v9 = vld [vmem:[#allocation28_spill] sm:$0xff] }
 0x162   : > { %1710 = vmatpush.msra.mxu0 %v8014_v3  ;;  %1900 = vmatpush.msra.mxu3 %v8005_v56 }
 0x163   : > { %1787 = vmatpush.msra.mxu1 %v8009_v52  ;;  %v8016_v52 = vld [vmem:[#allocation61_spill] sm:$0xff]  ;;  %v882_v5 = vadd.f32 %v881_v58, %v843_v47  ;;  %v8026_v58 = vld [vmem:[#allocation72_spill] sm:$0xff]  ;;  %v8027_v47 = vld [vmem:[#allocation31_spill] sm:$0xff] }
 0x164   : > { %1861 = vmatpush.msra.mxu2 %v8016_v52  ;;  %1712 = vmatpush.msra.mxu0 %v8017_v33 }
 0x165   : > { %1793 = vmatpush.msra.mxu1 %v8012_v17  ;;  %1902 = vmatpush.msra.mxu3 %v8008_v15  ;;  %v8020_v17 = vld [vmem:[#allocation66_spill] sm:$0xff]  ;;  %v951_v52 = vadd.f32 %v950_v16, %v882_v5  ;;  %v8028_v16 = vld [vmem:[#allocation95_spill] sm:$0xff] }
 0x166   : > { %1919 = vmatpush.msrb.mxu0 %v8019_v49  ;;  %1864 = vmatpush.msra.mxu2 %v8020_v17  ;;  %v8029_v5 = vld [vmem:[#allocation34_spill] sm:$0xff] }
 0x167   : > { %1799 = vmatpush.msra.mxu1 %v8015_v32  ;;  %1904 = vmatpush.msra.mxu3 %v8011_v34  ;;  %v987_v32 = vpop.f32.mrf.mxu3 }
 0x168   : > { %1923 = vmatpush.msrb.mxu0 %v8022_v9  ;;  %1867 = vmatpush.msra.mxu2 %v8023_v1  ;;  %v6292_v49 = vadd.f32 %v987_v32, %v951_v52  ;;  %v8030_v32 = vld [vmem:[#allocation100_spill] sm:$0xff]  ;;  %v8036_v9 = vld [vmem:[#allocation58_spill] sm:$0xff] }
 0x169   : > { %1805 = vmatpush.msra.mxu1 %v8018_v23  ;;  %1906 = vmatpush.msra.mxu3 %v8014_v3  ;;  %v8025_v23 = vld [vmem:[#allocation29_spill] sm:$0xff] }
 0x16a   : > { %1927 = vmatpush.msrb.mxu0 %v8025_v23  ;;  %1870 = vmatpush.msra.mxu2 %v8026_v58  ;;  %v6298_v17 = vand.u32 4294901760, %v6292_v49  ;;  %v8031_v58 = vld [vmem:[#allocation36_spill] sm:$0xff] }
 0x16b   : > { %1811 = vmatpush.msra.mxu1 %v8021_v40  ;;  %1908 = vmatpush.msra.mxu3 %v8017_v33  ;;  %v8040_v40 = vld [vmem:[#allocation55_spill] sm:$0xff] }
 0x16c   : > { %1931 = vmatpush.msrb.mxu0 %v8027_v47  ;;  %v6306_v52 = vsub.f32 %v6292_v49, %v6298_v17  ;;  %2023 = vmatpush.msrb.mxu2 %v8036_v9 }
 0x16d   : > { %1817 = vmatpush.msra.mxu1 %v8024_v42  ;;  %2068 = vmatpush.msrb.mxu3 %v8028_v16  ;;  %v8032_v16 = vld [vmem:[#allocation106_spill] sm:$0xff]  ;;  %v8039_v42 = vld [vmem:[#allocation63_spill] sm:$0xff] }
 0x16e   : > { %1935 = vmatpush.msrb.mxu0 %v8029_v5  ;;  %1819 = vmatmul.f32.vlgmr.msra.gmra.mxu1 %v6298_v17  ;;  %v6314_v1 = vand.u32 4294901760, %v6306_v52  ;;  %v8033_v5 = vld [vmem:[#allocation42_spill] sm:$0xff] }
 0x16f   : > { %1986 = vmatpush.msrb.mxu1 %v7975_v36  ;;  %2074 = vmatpush.msrb.mxu3 %v8030_v32  ;;  %v8034_v32 = vld [vmem:[#allocation110_spill] sm:$0xff] }
 0x170   : > { %1939 = vmatpush.msrb.mxu0 %v8031_v58  ;;  %1873 = vmatmul.f32.vlgmr.msra.gmra.mxu2 %v6306_v52  ;;  %v1716_v47 = vsub.f32 %v6306_v52, %v6314_v1  ;;  %v8035_v58 = vld [vmem:[#allocation46_spill] sm:$0xff] }
 0x171   : > { %1988 = vmatpush.msrb.mxu1 %v7976_v59  ;;  %2080 = vmatpush.msrb.mxu3 %v8032_v16  ;;  %v8037_v16 = vld [vmem:[#allocation113_spill] sm:$0xff] }
 0x172   : > { %1943 = vmatpush.msrb.mxu0 %v8033_v5  ;;  %1912 = vmatmul.f32.vlgmr.msra.gmra.mxu3 %v6314_v1  ;;  %v6325_v23 = vand.u32 4294901760, %v1716_v47  ;;  %v8038_v5 = vld [vmem:[#allocation52_spill] sm:$0xff]  ;;  %v8042_v47 = vld [vmem:[#allocation71_spill] sm:$0xff] }
 0x173   : > { %1990 = vmatpush.msrb.mxu1 %v7977_v46  ;;  %2086 = vmatpush.msrb.mxu3 %v8034_v32  ;;  %v8041_v32 = vld [vmem:[#allocation117_spill] sm:$0xff] }
 0x174   : > { %1947 = vmatpush.msrb.mxu0 %v8035_v58  ;;  %2025 = vmatpush.msrb.mxu2 %v8039_v42  ;;  %v8043_v58 = vld [vmem:[#allocation57_spill] sm:$0xff] }
 0x175   : > { %1992 = vmatpush.msrb.mxu1 %v7981_v13  ;;  %2092 = vmatpush.msrb.mxu3 %v8037_v16  ;;  %v8045_v16 = vld [vmem:[#allocation76_spill] sm:$0xff] }
 0x176   : > { %1951 = vmatpush.msrb.mxu0 %v8038_v5  ;;  %2027 = vmatpush.msrb.mxu2 %v8042_v47  ;;  %v8046_v5 = vld [vmem:[#allocation65_spill] sm:$0xff] }
 0x177   : > { %1994 = vmatpush.msrb.mxu1 %v7984_v63  ;;  %1718 = vmatmul.f32.vlgmr.msra.gmra.mxu0 %v6325_v23 }
 0x178   : > { %1955 = vmatpush.msrb.mxu0 %v8040_v40  ;;  %2098 = vmatpush.msrb.mxu3 %v8041_v32  ;;  %v8048_v40 = vld [vmem:[#allocation81_spill] sm:$0xff] }
 0x179   : > { %1996 = vmatpush.msrb.mxu1 %v7987_v6  ;;  %v8044_v6 = vld [vmem:[#allocation121_spill] sm:$0xff]  ;;  %2029 = vmatpush.msrb.mxu2 %v8045_v16 }
 0x17a   : > { %1959 = vmatpush.msrb.mxu0 %v8043_v58  ;;  %2104 = vmatpush.msrb.mxu3 %v8044_v6  ;;  %v8049_v32 = vld [vmem:[#allocation69_spill] sm:$0xff]  ;;  %v8051_v58 = vld [vmem:[#allocation86_spill] sm:$0xff]  ;;  %v8052_v6 = vld [vmem:[#allocation75_spill] sm:$0xff] }
 0x17b   : > { %1998 = vmatpush.msrb.mxu1 %v7990_v20  ;;  %v8047_v20 = vld [vmem:[#allocation125_spill] sm:$0xff]  ;;  %2031 = vmatpush.msrb.mxu2 %v8048_v40 }
 0x17c   : > { %1963 = vmatpush.msrb.mxu0 %v8046_v5  ;;  %2110 = vmatpush.msrb.mxu3 %v8047_v20  ;;  %v8054_v5 = vld [vmem:[#allocation87_spill] sm:$0xff] }
 0x17d   : > { %2000 = vmatpush.msrb.mxu1 %v7993_v29  ;;  %v8050_v29 = vld [vmem:[#allocation128_spill] sm:$0xff]  ;;  %2033 = vmatpush.msrb.mxu2 %v8051_v58  ;;  %v8055_v20 = vld [vmem:[#allocation79_spill] sm:$0xff] }
 0x17e   : > { %1967 = vmatpush.msrb.mxu0 %v8049_v32  ;;  %2116 = vmatpush.msrb.mxu3 %v8050_v29  ;;  %v8057_v32 = vld [vmem:[#allocation91_spill] sm:$0xff]  ;;  %v8058_v29 = vld [vmem:[#allocation82_spill] sm:$0xff] }
 0x17f   : > { %2002 = vmatpush.msrb.mxu1 %v7996_v19  ;;  %v8053_v19 = vld [vmem:[#allocation132_spill] sm:$0xff]  ;;  %2035 = vmatpush.msrb.mxu2 %v8054_v5 }
 0x180   : > { %1971 = vmatpush.msrb.mxu0 %v8052_v6  ;;  %2122 = vmatpush.msrb.mxu3 %v8053_v19  ;;  %v8060_v19 = vld [vmem:[#allocation67_spill] sm:$0xff] }
 0x181   : > { %2004 = vmatpush.msrb.mxu1 %v7999_v27  ;;  %v8056_v27 = vld [vmem:[#allocation135_spill] sm:$0xff]  ;;  %2037 = vmatpush.msrb.mxu2 %v8057_v32 }
 0x182   : > { %1975 = vmatpush.msrb.mxu0 %v8055_v20  ;;  %2128 = vmatpush.msrb.mxu3 %v8056_v27  ;;  %v8061_v6 = vld [vmem:[#allocation99_spill] sm:$0xff]  ;;  %v8062_v20 = vld [vmem:[#allocation141_spill] sm:$0xff] }
 0x183   : > { %2006 = vmatpush.msrb.mxu1 %v8002_v54  ;;  %v8059_v54 = vld [vmem:[#allocation138_spill] sm:$0xff]  ;;  %2039 = vmatpush.msrb.mxu2 %v8061_v6  ;;  %v8063_v27 = vld [vmem:[#allocation73_spill] sm:$0xff] }
 0x184   : > { %1979 = vmatpush.msrb.mxu0 %v8058_v29  ;;  %2134 = vmatpush.msrb.mxu3 %v8059_v54  ;;  %v8065_v29 = vld [vmem:[#allocation144_spill] sm:$0xff] }
 0x185   : > { %2008 = vmatpush.msrb.mxu1 %v8005_v56  ;;  %1981 = vmatmul.f32.vlgmr.msrb.gmra.mxu0 %v6298_v17  ;;  %v8066_v54 = vld [vmem:[#allocation80_spill] sm:$0xff] }
 0x186   : > { %2166 = vmatpush.msra.mxu0 %v8060_v19  ;;  %2140 = vmatpush.msrb.mxu3 %v8062_v20  ;;  %v8067_v19 = vld [vmem:[#allocation108_spill] sm:$0xff]  ;;  %v8071_v20 = vld [vmem:[#allocation90_spill] sm:$0xff] }
 0x187   : > { %2010 = vmatpush.msrb.mxu1 %v8008_v15  ;;  %v8064_v15 = vld [vmem:[#allocation104_spill] sm:$0xff] }
 0x188   : > { %2169 = vmatpush.msra.mxu0 %v8063_v27  ;;  %2041 = vmatpush.msrb.mxu2 %v8064_v15  ;;  %v8070_v27 = vld [vmem:[#allocation112_spill] sm:$0xff] }
 0x189   : > { %2012 = vmatpush.msrb.mxu1 %v8011_v34  ;;  %2146 = vmatpush.msrb.mxu3 %v8065_v29  ;;  %v8068_v34 = vld [vmem:[#allocation85_spill] sm:$0xff]  ;;  %v8074_v29 = vld [vmem:[#allocation116_spill] sm:$0xff] }
 0x18a   : > { %2172 = vmatpush.msra.mxu0 %v8066_v54  ;;  %2043 = vmatpush.msrb.mxu2 %v8067_v19  ;;  %v8073_v54 = vld [vmem:[#allocation94_spill] sm:$0xff] }
 0x18b   : > { %2014 = vmatpush.msrb.mxu1 %v8014_v3  ;;  %v8069_v3 = vld [vmem:[#allocation145_spill] sm:$0xff] }
 0x18c   : > { %2175 = vmatpush.msra.mxu0 %v8068_v34  ;;  %2152 = vmatpush.msrb.mxu3 %v8069_v3  ;;  %v8075_v34 = vld [vmem:[#allocation96_spill] sm:$0xff]  ;;  %v8076_v3 = vld [vmem:[#allocation123_spill] sm:$0xff] }
 0x18d   : > { %2016 = vmatpush.msrb.mxu1 %v8017_v33  ;;  %2045 = vmatpush.msrb.mxu2 %v8070_v27  ;;  %v8072_v33 = vld [vmem:[#allocation147_spill] sm:$0xff] }
 0x18e   : > { %2018 = vmatmul.f32.vlgmr.msrb.gmra.mxu1 %v6298_v17  ;;  %2178 = vmatpush.msra.mxu0 %v8071_v20  ;;  %v8077_v20 = vld [vmem:[#allocation101_spill] sm:$0xff] }
 0x18f   : > { %2219 = vmatpush.msra.mxu1 %v8036_v9  ;;  %2158 = vmatpush.msrb.mxu3 %v8072_v33  ;;  %v8078_v33 = vld [vmem:[#allocation127_spill] sm:$0xff] }
 0x190   : > { %2181 = vmatpush.msra.mxu0 %v8073_v54  ;;  %2047 = vmatpush.msrb.mxu2 %v8074_v29  ;;  %v8079_v54 = vld [vmem:[#allocation107_spill] sm:$0xff] }
 0x191   : > { %2221 = vmatpush.msra.mxu1 %v8039_v42  ;;  %2327 = vmatpush.msra.mxu3 %v8036_v9  ;;  %v8080_v9 = vld [vmem:[#allocation131_spill] sm:$0xff] }
 0x192   : > { %2184 = vmatpush.msra.mxu0 %v8075_v34  ;;  %2049 = vmatpush.msrb.mxu2 %v8076_v3  ;;  %v8081_v34 = vld [vmem:[#allocation78_spill] sm:$0xff] }
 0x193   : > { %2223 = vmatpush.msra.mxu1 %v8042_v47  ;;  %2329 = vmatpush.msra.mxu3 %v8039_v42  ;;  %v8082_v42 = vld [vmem:[#allocation111_spill] sm:$0xff] }
 0x194   : > { %2187 = vmatpush.msra.mxu0 %v8077_v20  ;;  %2051 = vmatpush.msrb.mxu2 %v8078_v33  ;;  %v8083_v20 = vld [vmem:[#allocation83_spill] sm:$0xff] }
 0x195   : > { %2225 = vmatpush.msra.mxu1 %v8045_v16  ;;  %2331 = vmatpush.msra.mxu3 %v8042_v47  ;;  %v8084_v47 = vld [vmem:[#allocation115_spill] sm:$0xff] }
 0x196   : > { %2190 = vmatpush.msra.mxu0 %v8079_v54  ;;  %2053 = vmatpush.msrb.mxu2 %v8080_v9  ;;  %v8085_v54 = vld [vmem:[#allocation89_spill] sm:$0xff] }
 0x197   : > { %2227 = vmatpush.msra.mxu1 %v8048_v40  ;;  %2333 = vmatpush.msra.mxu3 %v8045_v16  ;;  %v8086_v16 = vld [vmem:[#allocation119_spill] sm:$0xff] }
 0x198   : > { %2260 = vmatpush.msra.mxu2 %v8081_v34  ;;  %2193 = vmatpush.msra.mxu0 %v8082_v42  ;;  %v8087_v42 = vld [vmem:[#allocation93_spill] sm:$0xff]  ;;  %v8088_v34 = vld [vmem:[#allocation124_spill] sm:$0xff] }
 0x199   : > { %2229 = vmatpush.msra.mxu1 %v8051_v58  ;;  %2335 = vmatpush.msra.mxu3 %v8048_v40  ;;  %v8124_v40 = vld [vmem:[#allocation216_spill] sm:$0xff] }
 0x19a   : > { %2264 = vmatpush.msra.mxu2 %v8083_v20  ;;  %2196 = vmatpush.msra.mxu0 %v8084_v47  ;;  %v8089_v47 = vld [vmem:[#allocation98_spill] sm:$0xff] }
 0x19b   : > { %2231 = vmatpush.msra.mxu1 %v8054_v5  ;;  %2337 = vmatpush.msra.mxu3 %v8051_v58  ;;  %v8090_v20 = vld [vmem:[#allocation130_spill] sm:$0xff]  ;;  %v8106_v58 = vld [vmem:[#allocation171_spill] sm:$0xff] }
 0x19c   : > { %2268 = vmatpush.msra.mxu2 %v8085_v54  ;;  %2199 = vmatpush.msra.mxu0 %v8086_v16  ;;  %v8091_v16 = vld [vmem:[#allocation103_spill] sm:$0xff]  ;;  %v8092_v54 = vld [vmem:[#allocation134_spill] sm:$0xff] }
 0x19d   : > { %2233 = vmatpush.msra.mxu1 %v8057_v32  ;;  %2339 = vmatpush.msra.mxu3 %v8054_v5  ;;  %v1183_v5 = vpop.f32.mrf.mxu2 }
 0x19e   : > { %2272 = vmatpush.msra.mxu2 %v8087_v42  ;;  %2202 = vmatpush.msra.mxu0 %v8088_v34  ;;  %v8093_v34 = vld [vmem:[#allocation105_spill] sm:$0xff] }
 0x19f   : > { %2235 = vmatpush.msra.mxu1 %v8061_v6  ;;  %2341 = vmatpush.msra.mxu3 %v8057_v32  ;;  %v8094_v42 = vld [vmem:[#allocation137_spill] sm:$0xff]  ;;  %v8104_v32 = vld [vmem:[#allocation122_spill] sm:$0xff] }
 0x1a0   : > { %2276 = vmatpush.msra.mxu2 %v8089_v47  ;;  %2205 = vmatpush.msra.mxu0 %v8090_v20  ;;  %v8095_v20 = vld [vmem:[#allocation149_spill] sm:$0xff] }
 0x1a1   : > { %2237 = vmatpush.msra.mxu1 %v8064_v15  ;;  %2343 = vmatpush.msra.mxu3 %v8061_v6  ;;  %v8096_v47 = vld [vmem:[#allocation109_spill] sm:$0xff]  ;;  %v8103_v6 = vld [vmem:[#allocation167_spill] sm:$0xff] }
 0x1a2   : > { %2280 = vmatpush.msra.mxu2 %v8091_v16  ;;  %2208 = vmatpush.msra.mxu0 %v8092_v54  ;;  %v8097_v54 = vld [vmem:[#allocation150_spill] sm:$0xff] }
 0x1a3   : > { %2239 = vmatpush.msra.mxu1 %v8067_v19  ;;  %2345 = vmatpush.msra.mxu3 %v8064_v15  ;;  %v8098_v16 = vld [vmem:[#allocation114_spill] sm:$0xff] }
 0x1a4   : > { %2284 = vmatpush.msra.mxu2 %v8093_v34  ;;  %2211 = vmatpush.msra.mxu0 %v8094_v42  ;;  %v8099_v42 = vld [vmem:[#allocation151_spill] sm:$0xff]  ;;  %v1129_v34 = vpop.f32.mrf.mxu1  ;;  %v8101_v15 = vld [vmem:[#allocation118_spill] sm:$0xff] }
 0x1a5   : > { %2241 = vmatpush.msra.mxu1 %v8070_v27  ;;  %2347 = vmatpush.msra.mxu3 %v8067_v19  ;;  %v8100_v19 = vld [vmem:[#allocation164_spill] sm:$0xff] }
 0x1a6   : > { %2364 = vmatpush.msrb.mxu0 %v8095_v20  ;;  %2288 = vmatpush.msra.mxu2 %v8096_v47  ;;  %v8102_v47 = vld [vmem:[#allocation153_spill] sm:$0xff] }
 0x1a7   : > { %2243 = vmatpush.msra.mxu1 %v8074_v29  ;;  %2349 = vmatpush.msra.mxu3 %v8070_v27  ;;  %v1028_v27 = vpop.f32.mrf.mxu0 }
 0x1a8   : > { %2366 = vmatpush.msrb.mxu0 %v8097_v54  ;;  %2292 = vmatpush.msra.mxu2 %v8098_v16  ;;  %v1130_v16 = vadd.f32 %v1129_v34, %v1028_v27  ;;  %v1222_v34 = vpop.f32.mrf.mxu3  ;;  %v8110_v27 = vld [vmem:[#allocation177_spill] sm:$0xff] }
 0x1a9   : > { %2245 = vmatpush.msra.mxu1 %v8076_v3  ;;  %2351 = vmatpush.msra.mxu3 %v8074_v29  ;;  %v8105_v29 = vld [vmem:[#allocation155_spill] sm:$0xff] }
 0x1aa   : > { %2368 = vmatpush.msrb.mxu0 %v8099_v42  ;;  %2296 = vmatpush.msra.mxu2 %v8101_v15  ;;  %v8108_v15 = vld [vmem:[#allocation174_spill] sm:$0xff] }
 0x1ab   : > { %2247 = vmatpush.msra.mxu1 %v8078_v33  ;;  %2353 = vmatpush.msra.mxu3 %v8076_v3  ;;  %v8109_v3 = vld [vmem:[#allocation129_spill] sm:$0xff] }
 0x1ac   : > { %2370 = vmatpush.msrb.mxu0 %v8102_v47  ;;  %2300 = vmatpush.msra.mxu2 %v8104_v32  ;;  %v8111_v32 = vld [vmem:[#allocation136_spill] sm:$0xff] }
 0x1ad   : > { %2249 = vmatpush.msra.mxu1 %v8080_v9  ;;  %2355 = vmatpush.msra.mxu3 %v8078_v33 }
 0x1ae   : > { %2372 = vmatpush.msrb.mxu0 %v8105_v29 }
 0x1af   : > { %2409 = vmatpush.msrb.mxu1 %v8100_v19  ;;  %v8107_v19 = vld [vmem:[#allocation126_spill] sm:$0xff]  ;;  %2357 = vmatpush.msra.mxu3 %v8080_v9 }
 0x1b0   : > { %2304 = vmatpush.msra.mxu2 %v8107_v19  ;;  %2374 = vmatpush.msrb.mxu0 %v5652_v11  ;;  %v8113_v19 = vld [vmem:[#allocation139_spill] sm:$0xff]  ;;  %v8114_v9 = vld [vmem:[#allocation182_spill] sm:$0xff] }
 0x1b1   : > { %2415 = vmatpush.msrb.mxu1 %v8103_v6  ;;  %v1184_v6 = vadd.f32 %v1183_v5, %v1130_v16  ;;  %v8115_v16 = vld [vmem:[#allocation142_spill] sm:$0xff]  ;;  %v8116_v5 = vld [vmem:[#allocation185_spill] sm:$0xff] }
 0x1b2   : > { %2308 = vmatpush.msra.mxu2 %v8109_v3  ;;  %2376 = vmatpush.msrb.mxu0 %v5666_v43 }
 0x1b3   : > { %2421 = vmatpush.msrb.mxu1 %v8106_v58  ;;  %v8112_v58 = vld [vmem:[#allocation180_spill] sm:$0xff]  ;;  %v1223_v33 = vadd.f32 %v1222_v34, %v1184_v6 }
 0x1b4   : > { %2312 = vmatpush.msra.mxu2 %v8111_v32  ;;  %2378 = vmatpush.msrb.mxu0 %v5680_v38  ;;  %v1328_v32 = vpop.f32.mrf.mxu1  ;;  %v8118_v6 = vld [vmem:[#allocation192_spill] sm:$0xff] }
 0x1b5   : > { %2427 = vmatpush.msrb.mxu1 %v8108_v15  ;;  %v1291_v15 = vpop.f32.mrf.mxu0 }
 0x1b6   : > { %2316 = vmatpush.msra.mxu2 %v8113_v19  ;;  %2380 = vmatpush.msrb.mxu0 %v5690_v30  ;;  %v1292_v3 = vadd.f32 %v1291_v15, %v1223_v33  ;;  %v1369_v19 = vpop.f32.mrf.mxu2  ;;  %v1470_v15 = vpop.f32.mrf.mxu3 }
 0x1b7   : > { %2433 = vmatpush.msrb.mxu1 %v8110_v27  ;;  %v8117_v27 = vld [vmem:[#allocation189_spill] sm:$0xff] }
 0x1b8   : > { %2320 = vmatpush.msra.mxu2 %v8115_v16  ;;  %2382 = vmatpush.msrb.mxu0 %v5706_v24  ;;  %v1329_v34 = vadd.f32 %v1328_v32, %v1292_v3  ;;  %v8120_v16 = vld [vmem:[#allocation200_spill] sm:$0xff]  ;;  %v8122_v3 = vld [vmem:[#allocation207_spill] sm:$0xff] }
 0x1b9   : > { %2439 = vmatpush.msrb.mxu1 %v8112_v58 }
 0x1ba   : > { %2384 = vmatpush.msrb.mxu0 %v5731_v22  ;;  %v1370_v33 = vadd.f32 %v1369_v19, %v1329_v34 }
 0x1bb   : > { %2445 = vmatpush.msrb.mxu1 %v8114_v9  ;;  %v8119_v9 = vld [vmem:[#allocation197_spill] sm:$0xff] }
 0x1bc   : > { %2386 = vmatpush.msrb.mxu0 %v5747_v57  ;;  %v1471_v32 = vadd.f32 %v1470_v15, %v1370_v33  ;;  %v8129_v15 = vld [vmem:[#allocation152_spill] sm:$0xff] }
 0x1bd   : > { %2451 = vmatpush.msrb.mxu1 %v8116_v5  ;;  %v8123_v5 = vld [vmem:[#allocation211_spill] sm:$0xff] }
 0x1be   : > { %2388 = vmatpush.msrb.mxu0 %v5763_v14 }
 0x1bf   : > { %2457 = vmatpush.msrb.mxu1 %v8117_v27  ;;  %v8121_v27 = vld [vmem:[#allocation203_spill] sm:$0xff] }
 0x1c0   : > { %2390 = vmatpush.msrb.mxu0 %v5779_v2 }
 0x1c1   : > { %2463 = vmatpush.msrb.mxu1 %v8118_v6  ;;  %v1524_v6 = vpop.f32.mrf.mxu0 }
 0x1c2   : > { %2392 = vmatpush.msrb.mxu0 %v5792_v44 }
 0x1c3   : > { %2469 = vmatpush.msrb.mxu1 %v8119_v9  ;;  %v1525_v9 = vadd.f32 %v1524_v6, %v1471_v32  ;;  %v8128_v6 = vld [vmem:[#allocation160_spill] sm:$0xff]  ;;  %v8131_v32 = vld [vmem:[#allocation154_spill] sm:$0xff] }
 0x1c4   : > { %2394 = vmatpush.msrb.mxu0 %v7966_v0 }
 0x1c5   : > { %2475 = vmatpush.msrb.mxu1 %v8120_v16 }
 0x1c7   : > { %2481 = vmatpush.msrb.mxu1 %v8121_v27 }
 0x1c9   : > { %2487 = vmatpush.msrb.mxu1 %v8122_v3 }
 0x1cb   : > { %2493 = vmatpush.msrb.mxu1 %v8123_v5  ;;  %v1563_v58 = vpop.f32.mrf.mxu1  ;;  %v1632_v56 = vpop.f32.mrf.mxu2 }
 0x1cc   : > { %v1564_v16 = vadd.f32 %v1563_v58, %v1525_v9 }
 0x1cd   : > { %2499 = vmatpush.msrb.mxu1 %v8124_v40 }
 0x1ce   : > { %v1633_v19 = vadd.f32 %v1632_v56, %v1564_v16  ;;  %v1669_v34 = vpop.f32.mrf.mxu3  ;;  %v8125_v56 = vld [vmem:[#allocation49_spill] sm:$0xff] }
 0x1d0   : > { %v1670_v63 = vadd.f32 %v1669_v34, %v1633_v19  ;;  %v8132_v19 = vld [vmem:[#allocation165_spill] sm:$0xff] }
 0x1d1   : > { %v8133_v34 = vld [vmem:[#allocation157_spill] sm:$0xff] }
 0x1d2   : > { %v1674_v27 = vrot.slane %v1670_v63, 4  ;;  %v6474_v13 = vand.u32 4294901760, %v1670_v63 }
 0x1d4   : > { %v1676_v3 = vsel %vm1675_vm0, %v6292_v49, %v1674_v27  ;;  %v6479_v33 = vsub.f32 %v1670_v63, %v6474_v13  ;;  %2160 = vmatmul.f32.vlgmr.msrb.gmra.mxu3 %v6474_v13  ;;  %v8126_v63 = vld [vmem:[#allocation156_spill] sm:$0xff]  ;;  %v8127_v27 = vld [vmem:[#allocation158_spill] sm:$0xff] }
 0x1d5   : > { %1678 = vst [vmem:[%s6482_s23] sm:$0xff] %v1676_v3  ;;  %v1679_v9 = vsub.f32 %v8125_v56, %v1676_v3  ;;  %2560 = vmatpush.msrb.mxu3 %v8095_v20  ;;  %v8130_v3 = vld [vmem:[#allocation162_spill] sm:$0xff] }
 0x1d6   : > { %2214 = vmatmul.f32.vlgmr.msra.gmra.mxu0 %v6479_v33  ;;  %v6489_v58 = vand.u32 4294901760, %v6479_v33 }
 0x1d7   : > { %1680 = vst [vmem:[%s6491_s5] sm:$0xff] %v1679_v9  ;;  %2562 = vmatpush.msrb.mxu3 %v8097_v54  ;;  %2601 = vmatpush.msra.mxu0 %v8126_v63  ;;  %v8134_v9 = vld [vmem:[#allocation168_spill] sm:$0xff] }
 0x1d8   : > { %2253 = vmatmul.f32.vlgmr.msra.gmra.mxu1 %v6489_v58  ;;  %v2057_v49 = vsub.f32 %v6479_v33, %v6489_v58 }
 0x1d9   : > { %2564 = vmatpush.msrb.mxu3 %v8099_v42  ;;  %2605 = vmatpush.msra.mxu0 %v8127_v27 }
 0x1da   : > { %2668 = vmatpush.msra.mxu1 %v8095_v20  ;;  %v6502_v16 = vand.u32 4294901760, %v2057_v49  ;;  %v8135_v49 = vld [vmem:[#allocation159_spill] sm:$0xff] }
 0x1db   : > { %2566 = vmatpush.msrb.mxu3 %v8102_v47  ;;  %2609 = vmatpush.msra.mxu0 %v8128_v6 }
 0x1dc   : > { %2670 = vmatpush.msra.mxu1 %v8097_v54  ;;  %2059 = vmatmul.f32.vlgmr.msrb.gmra.mxu2 %v6502_v16 }
 0x1dd   : > { %2359 = vmatmul.f32.vlgmr.msra.gmra.mxu3 %v6474_v13  ;;  %2507 = vmatpush.msrb.mxu2 %v8129_v15 }
 0x1de   : > { %2568 = vmatpush.msrb.mxu3 %v8105_v29  ;;  %2613 = vmatpush.msra.mxu0 %v8130_v3 }
 0x1df   : > { %2672 = vmatpush.msra.mxu1 %v8099_v42  ;;  %2400 = vmatmul.f32.vlgmr.msrb.gmra.mxu0 %v6325_v23  ;;  %v8136_v23 = vld [vmem:[#allocation172_spill] sm:$0xff] }
 0x1e0   : > { %2510 = vmatpush.msrb.mxu2 %v8131_v32  ;;  %2570 = vmatpush.msrb.mxu3 %v5652_v11 }
 0x1e1   : > { %2617 = vmatpush.msra.mxu0 %v8132_v19  ;;  %2674 = vmatpush.msra.mxu1 %v8102_v47  ;;  %v8137_v19 = vld [vmem:[#allocation161_spill] sm:$0xff] }
 0x1e2   : > { %2501 = vmatmul.f32.vlgmr.msrb.gmra.mxu1 %v6298_v17  ;;  %2513 = vmatpush.msrb.mxu2 %v8133_v34  ;;  %v8138_v34 = vld [vmem:[#allocation175_spill] sm:$0xff] }
 0x1e3   : > { %2572 = vmatpush.msrb.mxu3 %v5666_v43  ;;  %2621 = vmatpush.msra.mxu0 %v8134_v9  ;;  %v8139_v9 = vld [vmem:[#allocation163_spill] sm:$0xff] }
 0x1e4   : > { %2676 = vmatpush.msra.mxu1 %v8105_v29  ;;  %2516 = vmatpush.msrb.mxu2 %v8135_v49  ;;  %v8140_v49 = vld [vmem:[#allocation176_spill] sm:$0xff] }
 0x1e5   : > { %2574 = vmatpush.msrb.mxu3 %v5680_v38  ;;  %2625 = vmatpush.msra.mxu0 %v8136_v23  ;;  %v8141_v23 = vld [vmem:[#allocation166_spill] sm:$0xff] }
 0x1e6   : > { %2678 = vmatpush.msra.mxu1 %v5652_v11  ;;  %2322 = vmatmul.f32.vlgmr.msra.gmra.mxu2 %v6474_v13 }
 0x1e7   : > { %2519 = vmatpush.msrb.mxu2 %v8137_v19  ;;  %2576 = vmatpush.msrb.mxu3 %v5690_v30  ;;  %v8142_v19 = vld [vmem:[#allocation169_spill] sm:$0xff] }
 0x1e8   : > { %2629 = vmatpush.msra.mxu0 %v8138_v34  ;;  %2680 = vmatpush.msra.mxu1 %v5666_v43  ;;  %v8143_v34 = vld [vmem:[#allocation183_spill] sm:$0xff] }
 0x1e9   : > { %2522 = vmatpush.msrb.mxu2 %v8139_v9  ;;  %2578 = vmatpush.msrb.mxu3 %v5706_v24  ;;  %v8144_v9 = vld [vmem:[#allocation170_spill] sm:$0xff] }
 0x1ea   : > { %2633 = vmatpush.msra.mxu0 %v8140_v49  ;;  %2682 = vmatpush.msra.mxu1 %v5680_v38  ;;  %v8145_v49 = vld [vmem:[#allocation187_spill] sm:$0xff] }
 0x1eb   : > { %2525 = vmatpush.msrb.mxu2 %v8141_v23  ;;  %2580 = vmatpush.msrb.mxu3 %v5731_v22  ;;  %v8146_v23 = vld [vmem:[#allocation173_spill] sm:$0xff] }
 0x1ec   : > { %2637 = vmatpush.msra.mxu0 %v5771_v18  ;;  %2684 = vmatpush.msra.mxu1 %v5690_v30  ;;  %v8147_v18 = vld [vmem:[#allocation190_spill] sm:$0xff] }
 0x1ed   : > { %2528 = vmatpush.msrb.mxu2 %v8142_v19  ;;  %2582 = vmatpush.msrb.mxu3 %v5747_v57  ;;  %v8148_v19 = vld [vmem:[#allocation178_spill] sm:$0xff] }
 0x1ee   : > { %2641 = vmatpush.msra.mxu0 %v8143_v34  ;;  %2686 = vmatpush.msra.mxu1 %v5706_v24 }
 0x1ef   : > { %2531 = vmatpush.msrb.mxu2 %v8144_v9  ;;  %2584 = vmatpush.msrb.mxu3 %v5763_v14  ;;  %v8149_v9 = vld [vmem:[#allocation181_spill] sm:$0xff] }
 0x1f0   : > { %2645 = vmatpush.msra.mxu0 %v8145_v49  ;;  %2688 = vmatpush.msra.mxu1 %v5731_v22 }
 0x1f1   : > { %2534 = vmatpush.msrb.mxu2 %v8146_v23  ;;  %2586 = vmatpush.msrb.mxu3 %v5779_v2  ;;  %v8151_v23 = vld [vmem:[#allocation214_spill] sm:$0xff] }
 0x1f2   : > { %2649 = vmatpush.msra.mxu0 %v8147_v18  ;;  %2690 = vmatpush.msra.mxu1 %v5747_v57  ;;  %v8150_v18 = vld [vmem:[#allocation184_spill] sm:$0xff] }
 0x1f3   : > { %2537 = vmatpush.msrb.mxu2 %v8148_v19  ;;  %2588 = vmatpush.msrb.mxu3 %v5792_v44 }
 0x1f4   : > { %2653 = vmatpush.msra.mxu0 %v5846_v55  ;;  %2692 = vmatpush.msra.mxu1 %v5763_v14  ;;  %v8152_v55 = vld [vmem:[#allocation219_spill] sm:$0xff] }
 0x1f5   : > { %2540 = vmatpush.msrb.mxu2 %v8149_v9  ;;  %2590 = vmatpush.msrb.mxu3 %v7966_v0  ;;  %v8153_v9 = vld [vmem:[#allocation188_spill] sm:$0xff] }
 0x1f6   : > { %2657 = vmatpush.msra.mxu0 %v5864_v7  ;;  %2694 = vmatpush.msra.mxu1 %v5779_v2 }
 0x1f7   : > { %2594 = vmatmul.f32.vlgmr.msrb.gmra.mxu3 %v6314_v1  ;;  %2543 = vmatpush.msrb.mxu2 %v8150_v18  ;;  %v8154_v1 = vld [vmem:[#allocation223_spill] sm:$0xff] }
 0x1f8   : > { %2750 = vmatpush.msra.mxu3 %v8151_v23  ;;  %2661 = vmatpush.msra.mxu0 %v5883_v28  ;;  %v8155_v28 = vld [vmem:[#allocation191_spill] sm:$0xff] }
 0x1f9   : > { %2696 = vmatpush.msra.mxu1 %v5792_v44  ;;  %2663 = vmatmul.f32.vlgmr.msra.gmra.mxu0 %v6298_v17  ;;  %v8156_v23 = vld [vmem:[#allocation227_spill] sm:$0xff] }
 0x1fa   : > { %2756 = vmatpush.msra.mxu3 %v8152_v55  ;;  %2848 = vmatpush.msrb.mxu0 %v5839_v45  ;;  %v8157_v45 = vld [vmem:[#allocation195_spill] sm:$0xff] }
 0x1fb   : > { %2546 = vmatpush.msrb.mxu2 %v8153_v9  ;;  %2698 = vmatpush.msra.mxu1 %v7966_v0  ;;  %v8158_v9 = vld [vmem:[#allocation231_spill] sm:$0xff] }
 0x1fc   : > { %2700 = vmatmul.f32.vlgmr.msra.gmra.mxu1 %v6298_v17  ;;  %2762 = vmatpush.msra.mxu3 %v8154_v1  ;;  %v8159_v17 = vld [vmem:[#allocation235_spill] sm:$0xff] }
 0x1fd   : > { %2851 = vmatpush.msrb.mxu0 %v5867_v41  ;;  %2901 = vmatpush.msrb.mxu1 %v5804_v53 }
 0x1fe   : > { %2549 = vmatpush.msrb.mxu2 %v8155_v28  ;;  %2768 = vmatpush.msra.mxu3 %v8156_v23 }
 0x1ff   : > { %2854 = vmatpush.msrb.mxu0 %v5886_v37  ;;  %2903 = vmatpush.msrb.mxu1 %v5832_v51  ;;  %v8160_v37 = vld [vmem:[#allocation239_spill] sm:$0xff] }
 0x200   : > { %2552 = vmatpush.msrb.mxu2 %v8157_v45  ;;  %2774 = vmatpush.msra.mxu3 %v8158_v9 }
 0x201   : > { %2555 = vmatmul.f32.vlgmr.msrb.gmra.mxu2 %v6306_v52  ;;  %2857 = vmatpush.msrb.mxu0 %v5891_v25  ;;  %v8161_v52 = vld [vmem:[#allocation243_spill] sm:$0xff] }
 0x202   : > { %2705 = vmatpush.msra.mxu2 %v5804_v53  ;;  %2905 = vmatpush.msrb.mxu1 %v5851_v50 }
 0x203   : > { %2780 = vmatpush.msra.mxu3 %v8159_v17  ;;  %2860 = vmatpush.msrb.mxu0 %v5909_v21  ;;  %v8162_v21 = vld [vmem:[#allocation246_spill] sm:$0xff]  ;;  %v8177_v17 = vld [vmem:[#allocation249_spill] sm:$0xff] }
 0x204   : > { %2707 = vmatpush.msra.mxu2 %v5832_v51  ;;  %2907 = vmatpush.msrb.mxu1 %v5855_v48 }
 0x205   : > { %2786 = vmatpush.msra.mxu3 %v8160_v37  ;;  %2863 = vmatpush.msrb.mxu0 %v5934_v61  ;;  %v8163_v61 = vld [vmem:[#allocation250_spill] sm:$0xff]  ;;  %v8174_v37 = vld [vmem:[#allocation245_spill] sm:$0xff] }
 0x206   : > { %2709 = vmatpush.msra.mxu2 %v5851_v50  ;;  %2909 = vmatpush.msrb.mxu1 %v5874_v60 }
 0x207   : > { %2792 = vmatpush.msra.mxu3 %v8161_v52  ;;  %2866 = vmatpush.msrb.mxu0 %v5952_v31  ;;  %v8164_v31 = vld [vmem:[#allocation252_spill] sm:$0xff]  ;;  %v8171_v52 = vld [vmem:[#allocation241_spill] sm:$0xff] }
 0x208   : > { %2711 = vmatpush.msra.mxu2 %v5855_v48  ;;  %2911 = vmatpush.msrb.mxu1 %v5902_v62 }
 0x209   : > { %2798 = vmatpush.msra.mxu3 %v8162_v21  ;;  %2869 = vmatpush.msrb.mxu0 %v5968_v39  ;;  %v8165_v39 = vld [vmem:[#allocation233_spill] sm:$0xff] }
 0x20a   : > { %2713 = vmatpush.msra.mxu2 %v5874_v60  ;;  %2913 = vmatpush.msrb.mxu1 %v5920_v12  ;;  %v8168_v21 = vld [vmem:[#allocation237_spill] sm:$0xff] }
 0x20b   : > { %2804 = vmatpush.msra.mxu3 %v8163_v61  ;;  %2872 = vmatpush.msrb.mxu0 %v5984_v8  ;;  %v8166_v61 = vld [vmem:[#allocation222_spill] sm:$0xff]  ;;  %v8167_v8 = vld [vmem:[#allocation256_spill] sm:$0xff] }
 0x20c   : > { %2715 = vmatpush.msra.mxu2 %v5902_v62  ;;  %2915 = vmatpush.msrb.mxu1 %v5936_v10 }
 0x20d   : > { %2810 = vmatpush.msra.mxu3 %v8164_v31  ;;  %2875 = vmatpush.msrb.mxu0 %v6000_v35  ;;  %v8169_v31 = vld [vmem:[#allocation226_spill] sm:$0xff] }
 0x20e   : > { %2717 = vmatpush.msra.mxu2 %v5920_v12  ;;  %2917 = vmatpush.msrb.mxu1 %v5954_v4  ;;  %v8170_v35 = vld [vmem:[#allocation258_spill] sm:$0xff] }
 0x20f   : > { %2816 = vmatpush.msra.mxu3 %v6111_v26  ;;  %2878 = vmatpush.msrb.mxu0 %v8165_v39  ;;  %v8172_v26 = vld [vmem:[#allocation230_spill] sm:$0xff]  ;;  %v8173_v39 = vld [vmem:[#allocation259_spill] sm:$0xff] }
 0x210   : > { %2719 = vmatpush.msra.mxu2 %v5936_v10  ;;  %2919 = vmatpush.msrb.mxu1 %v8166_v61 }
 0x211   : > { %2822 = vmatpush.msra.mxu3 %v8167_v8  ;;  %2881 = vmatpush.msrb.mxu0 %v8168_v21  ;;  %v8175_v8 = vld [vmem:[#allocation234_spill] sm:$0xff]  ;;  %v8176_v21 = vld [vmem:[#allocation260_spill] sm:$0xff] }
 0x212   : > { %2721 = vmatpush.msra.mxu2 %v5954_v4  ;;  %2921 = vmatpush.msrb.mxu1 %v8169_v31 }
 0x213   : > { %2828 = vmatpush.msra.mxu3 %v8170_v35  ;;  %2884 = vmatpush.msrb.mxu0 %v8171_v52  ;;  %v8178_v35 = vld [vmem:[#allocation238_spill] sm:$0xff]  ;;  %v8179_v52 = vld [vmem:[#allocation253_spill] sm:$0xff] }
 0x214   : > { %2723 = vmatpush.msra.mxu2 %v8166_v61  ;;  %2923 = vmatpush.msrb.mxu1 %v8172_v26 }
 0x215   : > { %2834 = vmatpush.msra.mxu3 %v8173_v39  ;;  %2887 = vmatpush.msrb.mxu0 %v8174_v37  ;;  %v8180_v37 = vld [vmem:[#allocation242_spill] sm:$0xff]  ;;  %v8187_v39 = vld [vmem:[#allocation44_spill] sm:$0xff] }
 0x216   : > { %2725 = vmatpush.msra.mxu2 %v8169_v31  ;;  %2925 = vmatpush.msrb.mxu1 %v8175_v8 }
 0x217   : > { %2840 = vmatpush.msra.mxu3 %v8176_v21  ;;  %2890 = vmatpush.msrb.mxu0 %v8177_v17  ;;  %v8181_v17 = vld [vmem:[#allocation248_spill] sm:$0xff]  ;;  %v8184_v21 = vld [vmem:[#allocation198_spill] sm:$0xff] }
 0x218   : > { %2727 = vmatpush.msra.mxu2 %v8172_v26  ;;  %2927 = vmatpush.msrb.mxu1 %v8178_v35 }
 0x219   : > { %2842 = vmatmul.f32.vlgmr.msra.gmra.mxu3 %v6474_v13  ;;  %2893 = vmatpush.msrb.mxu0 %v8179_v52  ;;  %v8182_v52 = vld [vmem:[#allocation37_spill] sm:$0xff] }
 0x21a   : > { %3009 = vmatpush.msrb.mxu3 %v5804_v53  ;;  %2729 = vmatpush.msra.mxu2 %v8175_v8 }
 0x21b   : > { %2929 = vmatpush.msrb.mxu1 %v8180_v37  ;;  %2896 = vmatmul.f32.vlgmr.msrb.gmra.mxu0 %v6479_v33  ;;  %v8183_v33 = vld [vmem:[#allocation38_spill] sm:$0xff] }
 0x21c   : > { %3011 = vmatpush.msrb.mxu3 %v5832_v51  ;;  %2731 = vmatpush.msra.mxu2 %v8178_v35 }
 0x21d   : > { %2931 = vmatpush.msrb.mxu1 %v8181_v17  ;;  %3056 = vmatpush.msra.mxu0 %v7975_v36 }
 0x21e   : > { %2935 = vmatmul.f32.vlgmr.msrb.gmra.mxu1 %v6489_v58  ;;  %3013 = vmatpush.msrb.mxu3 %v5851_v50  ;;  %v8185_v58 = vld [vmem:[#allocation41_spill] sm:$0xff] }
 0x21f   : > { %2733 = vmatpush.msra.mxu2 %v8180_v37  ;;  %3101 = vmatpush.msra.mxu1 %v8182_v52  ;;  %v8186_v52 = vld [vmem:[#allocation204_spill] sm:$0xff] }
 0x220   : > { %3015 = vmatpush.msrb.mxu3 %v5855_v48  ;;  %3058 = vmatpush.msra.mxu0 %v7976_v59  ;;  %v8188_v48 = vld [vmem:[#allocation17_spill] sm:$0xff] }
 0x221   : > { %2735 = vmatpush.msra.mxu2 %v8181_v17  ;;  %3107 = vmatpush.msra.mxu1 %v8183_v33  ;;  %v8189_v33 = vld [vmem:[#allocation208_spill] sm:$0xff] }
 0x222   : > { %2741 = vmatmul.f32.vlgmr.msra.gmra.mxu2 %v6502_v16  ;;  %3017 = vmatpush.msrb.mxu3 %v5874_v60  ;;  %v8190_v16 = vld [vmem:[#allocation50_spill] sm:$0xff]  ;;  %v8291_v60 = vld [vmem:[#allocation85_spill] sm:$0xff] }
 0x223   : > { %2942 = vmatpush.msrb.mxu2 %v8184_v21  ;;  %3113 = vmatpush.msra.mxu1 %v8185_v58  ;;  %v8191_v21 = vld [vmem:[#allocation18_spill] sm:$0xff] }
 0x224   : > { %3019 = vmatpush.msrb.mxu3 %v5902_v62  ;;  %3060 = vmatpush.msra.mxu0 %v7977_v46  ;;  %v8192_v58 = vld [vmem:[#allocation210_spill] sm:$0xff]  ;;  %v8193_v62 = vld [vmem:[#allocation53_spill] sm:$0xff] }
 0x225   : > { %2946 = vmatpush.msrb.mxu2 %v8186_v52  ;;  %3119 = vmatpush.msra.mxu1 %v8187_v39  ;;  %v8194_v52 = vld [vmem:[#allocation19_spill] sm:$0xff] }
 0x226   : > { %3021 = vmatpush.msrb.mxu3 %v5920_v12  ;;  %3062 = vmatpush.msra.mxu0 %v8188_v48  ;;  %v8195_v39 = vld [vmem:[#allocation215_spill] sm:$0xff] }
 0x227   : > { %2950 = vmatpush.msrb.mxu2 %v8189_v33  ;;  %3125 = vmatpush.msra.mxu1 %v8190_v16  ;;  %v8196_v12 = vld [vmem:[#allocation59_spill] sm:$0xff]  ;;  %v8198_v16 = vld [vmem:[#allocation220_spill] sm:$0xff] }
 0x228   : > { %3023 = vmatpush.msrb.mxu3 %v5936_v10  ;;  %3064 = vmatpush.msra.mxu0 %v8191_v21  ;;  %v8197_v33 = vld [vmem:[#allocation23_spill] sm:$0xff]  ;;  %v8199_v10 = vld [vmem:[#allocation64_spill] sm:$0xff] }
 0x229   : > { %2954 = vmatpush.msrb.mxu2 %v8192_v58  ;;  %3131 = vmatpush.msra.mxu1 %v8193_v62  ;;  %v8200_v58 = vld [vmem:[#allocation30_spill] sm:$0xff]  ;;  %v8201_v62 = vld [vmem:[#allocation224_spill] sm:$0xff] }
 0x22a   : > { %3025 = vmatpush.msrb.mxu3 %v5954_v4  ;;  %3066 = vmatpush.msra.mxu0 %v8194_v52  ;;  %v8202_v4 = vld [vmem:[#allocation68_spill] sm:$0xff] }
 0x22b   : > { %2958 = vmatpush.msrb.mxu2 %v8195_v39  ;;  %3137 = vmatpush.msra.mxu1 %v8196_v12  ;;  %v8203_v39 = vld [vmem:[#allocation32_spill] sm:$0xff] }
 0x22c   : > { %3027 = vmatpush.msrb.mxu3 %v8166_v61  ;;  %3068 = vmatpush.msra.mxu0 %v8197_v33  ;;  %v8204_v12 = vld [vmem:[#allocation228_spill] sm:$0xff]  ;;  %v8205_v61 = vld [vmem:[#allocation74_spill] sm:$0xff] }
 0x22d   : > { %2962 = vmatpush.msrb.mxu2 %v8198_v16  ;;  %3143 = vmatpush.msra.mxu1 %v8199_v10  ;;  %v8206_v16 = vld [vmem:[#allocation35_spill] sm:$0xff]  ;;  %v8207_v10 = vld [vmem:[#allocation232_spill] sm:$0xff] }
 0x22e   : > { %3029 = vmatpush.msrb.mxu3 %v8169_v31  ;;  %3070 = vmatpush.msra.mxu0 %v8200_v58  ;;  %v8208_v31 = vld [vmem:[#allocation77_spill] sm:$0xff] }
 0x22f   : > { %2966 = vmatpush.msrb.mxu2 %v8201_v62  ;;  %3149 = vmatpush.msra.mxu1 %v8202_v4  ;;  %v8209_v62 = vld [vmem:[#allocation40_spill] sm:$0xff] }
 0x230   : > { %3031 = vmatpush.msrb.mxu3 %v8172_v26  ;;  %3072 = vmatpush.msra.mxu0 %v8203_v39  ;;  %v8210_v4 = vld [vmem:[#allocation236_spill] sm:$0xff] }
 0x231   : > { %2970 = vmatpush.msrb.mxu2 %v8204_v12  ;;  %3155 = vmatpush.msra.mxu1 %v8205_v61  ;;  %v8211_v26 = vld [vmem:[#allocation84_spill] sm:$0xff]  ;;  %v8212_v12 = vld [vmem:[#allocation45_spill] sm:$0xff] }
 0x232   : > { %3033 = vmatpush.msrb.mxu3 %v8175_v8  ;;  %3074 = vmatpush.msra.mxu0 %v8206_v16  ;;  %v8213_v61 = vld [vmem:[#allocation240_spill] sm:$0xff] }
 0x233   : > { %2974 = vmatpush.msrb.mxu2 %v8207_v10  ;;  %3161 = vmatpush.msra.mxu1 %v8208_v31  ;;  %v8214_v8 = vld [vmem:[#allocation88_spill] sm:$0xff]  ;;  %v8215_v10 = vld [vmem:[#allocation51_spill] sm:$0xff] }
 0x234   : > { %3035 = vmatpush.msrb.mxu3 %v8178_v35  ;;  %3076 = vmatpush.msra.mxu0 %v8209_v62  ;;  %v8216_v31 = vld [vmem:[#allocation244_spill] sm:$0xff] }
 0x235   : > { %2978 = vmatpush.msrb.mxu2 %v8210_v4  ;;  %3167 = vmatpush.msra.mxu1 %v8211_v26  ;;  %v8217_v35 = vld [vmem:[#allocation92_spill] sm:$0xff]  ;;  %v8218_v26 = vld [vmem:[#allocation247_spill] sm:$0xff]  ;;  %v8219_v4 = vld [vmem:[#allocation54_spill] sm:$0xff] }
 0x236   : > { %3037 = vmatpush.msrb.mxu3 %v8180_v37  ;;  %3078 = vmatpush.msra.mxu0 %v8212_v12  ;;  %v8220_v37 = vld [vmem:[#allocation97_spill] sm:$0xff] }
 0x237   : > { %2982 = vmatpush.msrb.mxu2 %v8213_v61  ;;  %3173 = vmatpush.msra.mxu1 %v8214_v8  ;;  %v8221_v8 = vld [vmem:[#allocation251_spill] sm:$0xff]  ;;  %v8222_v61 = vld [vmem:[#allocation60_spill] sm:$0xff] }
 0x238   : > { %3039 = vmatpush.msrb.mxu3 %v8181_v17  ;;  %3080 = vmatpush.msra.mxu0 %v8215_v10  ;;  %v8223_v17 = vld [vmem:[#allocation102_spill] sm:$0xff] }
 0x239   : > { %2986 = vmatpush.msrb.mxu2 %v8216_v31  ;;  %3041 = vmatmul.f32.vlgmr.msrb.gmra.mxu3 %v6474_v13  ;;  %v8224_v31 = vld [vmem:[#allocation254_spill] sm:$0xff] }
 0x23a   : > { %3179 = vmatpush.msra.mxu1 %v8217_v35  ;;  %3252 = vmatpush.msra.mxu3 %v7975_v36  ;;  %v8225_v35 = vld [vmem:[#allocation62_spill] sm:$0xff] }
 0x23b   : > { %2990 = vmatpush.msrb.mxu2 %v8218_v26  ;;  %3082 = vmatpush.msra.mxu0 %v8219_v4  ;;  %v8226_v26 = vld [vmem:[#allocation257_spill] sm:$0xff] }
 0x23c   : > { %3185 = vmatpush.msra.mxu1 %v8220_v37  ;;  %3254 = vmatpush.msra.mxu3 %v7976_v59  ;;  %v8227_v37 = vld [vmem:[#allocation20_spill] sm:$0xff] }
 0x23d   : > { %2994 = vmatpush.msrb.mxu2 %v8221_v8  ;;  %3084 = vmatpush.msra.mxu0 %v8222_v61  ;;  %v8288_v8 = vld [vmem:[#allocation147_spill] sm:$0xff] }
 0x23e   : > { %3191 = vmatpush.msra.mxu1 %v8223_v17  ;;  %3256 = vmatpush.msra.mxu3 %v7977_v46  ;;  %v8228_v17 = vld [vmem:[#allocation27_spill] sm:$0xff] }
 0x23f   : > { %2998 = vmatpush.msrb.mxu2 %v8224_v31  ;;  %3086 = vmatpush.msra.mxu0 %v8225_v35  ;;  %v8285_v31 = vld [vmem:[#allocation145_spill] sm:$0xff] }
 0x240   : > { %3360 = vmatpush.msrb.mxu1 %v7975_v36  ;;  %3258 = vmatpush.msra.mxu3 %v8188_v48  ;;  %v8229_v36 = vld [vmem:[#allocation21_spill] sm:$0xff] }
 0x241   : > { %3002 = vmatpush.msrb.mxu2 %v8226_v26  ;;  %3293 = vmatpush.msrb.mxu0 %v8228_v17  ;;  %v8230_v26 = vld [vmem:[#allocation28_spill] sm:$0xff] }
 0x242   : > { %3362 = vmatpush.msrb.mxu1 %v7976_v59  ;;  %3004 = vmatmul.f32.vlgmr.msrb.gmra.mxu2 %v6474_v13  ;;  %v8231_v59 = vld [vmem:[#allocation22_spill] sm:$0xff]  ;;  %v8232_v13 = vld [vmem:[#allocation29_spill] sm:$0xff]  ;;  %v8238_v17 = vld [vmem:[#allocation36_spill] sm:$0xff] }
 0x243   : > { %3260 = vmatpush.msra.mxu3 %v8191_v21  ;;  %3199 = vmatpush.msra.mxu2 %v8227_v37  ;;  %v8234_v37 = vld [vmem:[#allocation31_spill] sm:$0xff] }
 0x244   : > { %3364 = vmatpush.msrb.mxu1 %v7977_v46  ;;  %3297 = vmatpush.msrb.mxu0 %v8230_v26  ;;  %v8233_v46 = vld [vmem:[#allocation24_spill] sm:$0xff]  ;;  %v8236_v26 = vld [vmem:[#allocation34_spill] sm:$0xff] }
 0x245   : > { %3262 = vmatpush.msra.mxu3 %v8194_v52  ;;  %3202 = vmatpush.msra.mxu2 %v8229_v36  ;;  %v8239_v36 = vld [vmem:[#allocation33_spill] sm:$0xff] }
 0x246   : > { %3366 = vmatpush.msrb.mxu1 %v8188_v48  ;;  %3301 = vmatpush.msrb.mxu0 %v8232_v13  ;;  %v8235_v48 = vld [vmem:[#allocation25_spill] sm:$0xff]  ;;  %v8241_v13 = vld [vmem:[#allocation39_spill] sm:$0xff] }
 0x247   : > { %3264 = vmatpush.msra.mxu3 %v8197_v33  ;;  %3205 = vmatpush.msra.mxu2 %v8231_v59  ;;  %v1820_v59 = vpop.f32.mrf.mxu1 }
 0x248   : > { %3368 = vmatpush.msrb.mxu1 %v8191_v21  ;;  %3305 = vmatpush.msrb.mxu0 %v8234_v37  ;;  %v8237_v21 = vld [vmem:[#allocation26_spill] sm:$0xff]  ;;  %v8243_v37 = vld [vmem:[#allocation43_spill] sm:$0xff] }
 0x249   : > { %3266 = vmatpush.msra.mxu3 %v8200_v58  ;;  %3208 = vmatpush.msra.mxu2 %v8233_v46 }
 0x24a   : > { %3370 = vmatpush.msrb.mxu1 %v8194_v52  ;;  %3309 = vmatpush.msrb.mxu0 %v8236_v26  ;;  %v1719_v52 = vpop.f32.mrf.mxu0  ;;  %v8245_v26 = vld [vmem:[#allocation47_spill] sm:$0xff] }
 0x24b   : > { %3268 = vmatpush.msra.mxu3 %v8203_v39  ;;  %3211 = vmatpush.msra.mxu2 %v8235_v48  ;;  %v1821_v46 = vadd.f32 %v1820_v59, %v1719_v52  ;;  %v1874_v48 = vpop.f32.mrf.mxu2  ;;  %v1913_v52 = vpop.f32.mrf.mxu3  ;;  %v8250_v59 = vld [vmem:[#allocation65_spill] sm:$0xff] }
 0x24c   : > { %3372 = vmatpush.msrb.mxu1 %v8197_v33  ;;  %3313 = vmatpush.msrb.mxu0 %v8238_v17  ;;  %v8240_v33 = vld [vmem:[#allocation42_spill] sm:$0xff]  ;;  %v8247_v17 = vld [vmem:[#allocation48_spill] sm:$0xff] }
 0x24d   : > { %3270 = vmatpush.msra.mxu3 %v8206_v16  ;;  %3214 = vmatpush.msra.mxu2 %v8237_v21  ;;  %v1875_v21 = vadd.f32 %v1874_v48, %v1821_v46  ;;  %v8255_v48 = vld [vmem:[#allocation66_spill] sm:$0xff] }
 0x24e   : > { %3374 = vmatpush.msrb.mxu1 %v8200_v58  ;;  %3317 = vmatpush.msrb.mxu0 %v8240_v33  ;;  %v8242_v58 = vld [vmem:[#allocation46_spill] sm:$0xff]  ;;  %v8249_v33 = vld [vmem:[#allocation56_spill] sm:$0xff] }
 0x24f   : > { %3272 = vmatpush.msra.mxu3 %v8209_v62  ;;  %3217 = vmatpush.msra.mxu2 %v8239_v36  ;;  %v2019_v46 = vpop.f32.mrf.mxu1 }
 0x250   : > { %3376 = vmatpush.msrb.mxu1 %v8203_v39  ;;  %3321 = vmatpush.msrb.mxu0 %v8242_v58  ;;  %v8244_v39 = vld [vmem:[#allocation52_spill] sm:$0xff]  ;;  %v8252_v58 = vld [vmem:[#allocation61_spill] sm:$0xff] }
 0x251   : > { %3274 = vmatpush.msra.mxu3 %v8212_v12  ;;  %3220 = vmatpush.msra.mxu2 %v8241_v13  ;;  %v8251_v13 = vld [vmem:[#allocation95_spill] sm:$0xff] }
 0x252   : > { %3378 = vmatpush.msrb.mxu1 %v8206_v16  ;;  %3325 = vmatpush.msrb.mxu0 %v8244_v39  ;;  %v8246_v16 = vld [vmem:[#allocation55_spill] sm:$0xff]  ;;  %v1982_v36 = vpop.f32.mrf.mxu0  ;;  %v8254_v39 = vld [vmem:[#allocation100_spill] sm:$0xff] }
 0x253   : > { %3276 = vmatpush.msra.mxu3 %v8215_v10  ;;  %3223 = vmatpush.msra.mxu2 %v8243_v37  ;;  %v8253_v37 = vld [vmem:[#allocation69_spill] sm:$0xff] }
 0x254   : > { %3380 = vmatpush.msrb.mxu1 %v8209_v62  ;;  %3329 = vmatpush.msrb.mxu0 %v8246_v16  ;;  %v8248_v62 = vld [vmem:[#allocation57_spill] sm:$0xff] }
 0x255   : > { %3278 = vmatpush.msra.mxu3 %v8219_v4  ;;  %3226 = vmatpush.msra.mxu2 %v8245_v26  ;;  %v8256_v26 = vld [vmem:[#allocation75_spill] sm:$0xff] }
 0x256   : > { %3382 = vmatpush.msrb.mxu1 %v8212_v12  ;;  %3333 = vmatpush.msrb.mxu0 %v8248_v62  ;;  %v1914_v12 = vadd.f32 %v1913_v52, %v1875_v21  ;;  %v8257_v21 = vld [vmem:[#allocation106_spill] sm:$0xff]  ;;  %v8259_v52 = vld [vmem:[#allocation79_spill] sm:$0xff] }
 0x257   : > { %3280 = vmatpush.msra.mxu3 %v8222_v61  ;;  %3229 = vmatpush.msra.mxu2 %v8247_v17  ;;  %v8258_v17 = vld [vmem:[#allocation70_spill] sm:$0xff] }
 0x258   : > { %3384 = vmatpush.msrb.mxu1 %v8215_v10  ;;  %3337 = vmatpush.msrb.mxu0 %v8250_v59  ;;  %v1983_v10 = vadd.f32 %v1982_v36, %v1914_v12  ;;  %v2161_v36 = vpop.f32.mrf.mxu3  ;;  %v8262_v59 = vld [vmem:[#allocation82_spill] sm:$0xff] }
 0x259   : > { %3282 = vmatpush.msra.mxu3 %v8225_v35  ;;  %3232 = vmatpush.msra.mxu2 %v8249_v33  ;;  %v8261_v33 = vld [vmem:[#allocation72_spill] sm:$0xff] }
 0x25a   : > { %3386 = vmatpush.msrb.mxu1 %v8219_v4  ;;  %3341 = vmatpush.msrb.mxu0 %v8253_v37  ;;  %v2020_v4 = vadd.f32 %v2019_v46, %v1983_v10  ;;  %v8264_v46 = vld [vmem:[#allocation113_spill] sm:$0xff]  ;;  %v8265_v10 = vld [vmem:[#allocation63_spill] sm:$0xff]  ;;  %v2254_v37 = vpop.f32.mrf.mxu1 }
 0x25b   : > { %3442 = vmatpush.msrb.mxu3 %v8251_v13  ;;  %3235 = vmatpush.msra.mxu2 %v8252_v58  ;;  %v2215_v13 = vpop.f32.mrf.mxu0 }
 0x25c   : > { %3388 = vmatpush.msrb.mxu1 %v8222_v61  ;;  %3345 = vmatpush.msrb.mxu0 %v8256_v26  ;;  %v8260_v61 = vld [vmem:[#allocation110_spill] sm:$0xff]  ;;  %v8268_v26 = vld [vmem:[#allocation121_spill] sm:$0xff] }
 0x25d   : > { %3448 = vmatpush.msrb.mxu3 %v8254_v39  ;;  %3238 = vmatpush.msra.mxu2 %v8255_v48  ;;  %v8266_v39 = vld [vmem:[#allocation117_spill] sm:$0xff] }
 0x25e   : > { %3390 = vmatpush.msrb.mxu1 %v8225_v35  ;;  %3349 = vmatpush.msrb.mxu0 %v8259_v52  ;;  %v8263_v35 = vld [vmem:[#allocation58_spill] sm:$0xff]  ;;  %v8271_v52 = vld [vmem:[#allocation81_spill] sm:$0xff] }
 0x25f   : > { %3454 = vmatpush.msrb.mxu3 %v8257_v21  ;;  %v2060_v16 = vpop.f32.mrf.mxu2  ;;  %3241 = vmatpush.msra.mxu2 %v8258_v17  ;;  %v8269_v21 = vld [vmem:[#allocation76_spill] sm:$0xff]  ;;  %v8270_v17 = vld [vmem:[#allocation125_spill] sm:$0xff] }
 0x260   : > { %v2061_v62 = vadd.f32 %v2060_v16, %v2020_v4  ;;  %3353 = vmatpush.msrb.mxu0 %v8262_v59  ;;  %v8267_v4 = vld [vmem:[#allocation71_spill] sm:$0xff]  ;;  %v8274_v59 = vld [vmem:[#allocation132_spill] sm:$0xff] }
 0x261   : > { %3460 = vmatpush.msrb.mxu3 %v8260_v61  ;;  %3244 = vmatpush.msra.mxu2 %v8261_v33  ;;  %v2360_v61 = vpop.f32.mrf.mxu3 }
 0x262   : > { %v2162_v12 = vadd.f32 %v2161_v36, %v2061_v62  ;;  %v8272_v36 = vld [vmem:[#allocation128_spill] sm:$0xff] }
 0x263   : > { %3397 = vmatpush.msrb.mxu2 %v8263_v35  ;;  %3466 = vmatpush.msrb.mxu3 %v8264_v46  ;;  %v8275_v46 = vld [vmem:[#allocation87_spill] sm:$0xff] }
 0x264   : > { %v2216_v58 = vadd.f32 %v2215_v13, %v2162_v12  ;;  %v8273_v12 = vld [vmem:[#allocation86_spill] sm:$0xff] }
 0x265   : > { %3399 = vmatpush.msrb.mxu2 %v8265_v10  ;;  %3472 = vmatpush.msrb.mxu3 %v8266_v39  ;;  %v8277_v39 = vld [vmem:[#allocation91_spill] sm:$0xff] }
 0x266   : > { %v2255_v48 = vadd.f32 %v2254_v37, %v2216_v58  ;;  %v8276_v58 = vld [vmem:[#allocation135_spill] sm:$0xff] }
 0x267   : > { %3401 = vmatpush.msrb.mxu2 %v8267_v4  ;;  %3478 = vmatpush.msrb.mxu3 %v8268_v26 }
 0x269   : > { %3403 = vmatpush.msrb.mxu2 %v8269_v21  ;;  %v2323_v16 = vpop.f32.mrf.mxu2  ;;  %3484 = vmatpush.msrb.mxu3 %v8270_v17 }
 0x26a   : > { %v2324_v62 = vadd.f32 %v2323_v16, %v2255_v48  ;;  %v8278_v48 = vld [vmem:[#allocation138_spill] sm:$0xff]  ;;  %v8279_v16 = vld [vmem:[#allocation99_spill] sm:$0xff] }
 0x26b   : > { %3405 = vmatpush.msrb.mxu2 %v8271_v52  ;;  %3490 = vmatpush.msrb.mxu3 %v8272_v36  ;;  %v8281_v36 = vld [vmem:[#allocation104_spill] sm:$0xff] }
 0x26c   : > { %v6783_v33 = vadd.f32 %v2360_v61, %v2324_v62  ;;  %v8280_v62 = vld [vmem:[#allocation141_spill] sm:$0xff] }
 0x26d   : > { %3407 = vmatpush.msrb.mxu2 %v8273_v12  ;;  %3496 = vmatpush.msrb.mxu3 %v8274_v59  ;;  %v8282_v59 = vld [vmem:[#allocation144_spill] sm:$0xff] }
 0x26e   : > { %v6788_v13 = vand.u32 4294901760, %v6783_v33 }
 0x26f   : > { %3409 = vmatpush.msrb.mxu2 %v8275_v46  ;;  %3502 = vmatpush.msrb.mxu3 %v8276_v58  ;;  %v8283_v58 = vld [vmem:[#allocation67_spill] sm:$0xff] }
 0x270   : > { %v6794_v37 = vsub.f32 %v6783_v33, %v6788_v13  ;;  %3193 = vmatmul.f32.vlgmr.msra.gmra.mxu1 %v6788_v13 }
 0x271   : > { %3411 = vmatpush.msrb.mxu2 %v8277_v39  ;;  %3593 = vmatpush.msra.mxu1 %v8263_v35 }
 0x272   : > { %3508 = vmatpush.msrb.mxu3 %v8278_v48  ;;  %3247 = vmatmul.f32.vlgmr.msra.gmra.mxu2 %v6794_v37  ;;  %v6802_v26 = vand.u32 4294901760, %v6794_v37  ;;  %v8284_v48 = vld [vmem:[#allocation108_spill] sm:$0xff] }
 0x273   : > { %3595 = vmatpush.msra.mxu1 %v8265_v10  ;;  %3413 = vmatpush.msrb.mxu2 %v8279_v16 }
 0x274   : > { %3286 = vmatmul.f32.vlgmr.msra.gmra.mxu3 %v6802_v26  ;;  %v3090_v17 = vsub.f32 %v6794_v37, %v6802_v26 }
 0x275   : > { %3597 = vmatpush.msra.mxu1 %v8267_v4  ;;  %3514 = vmatpush.msrb.mxu3 %v8280_v62  ;;  %v8287_v62 = vld [vmem:[#allocation112_spill] sm:$0xff] }
 0x276   : > { %v6811_v61 = vand.u32 4294901760, %v3090_v17  ;;  %3415 = vmatpush.msrb.mxu2 %v8281_v36  ;;  %v8286_v17 = vld [vmem:[#allocation73_spill] sm:$0xff] }
 0x277   : > { %3599 = vmatpush.msra.mxu1 %v8269_v21  ;;  %3520 = vmatpush.msrb.mxu3 %v8282_v59  ;;  %v8289_v59 = vld [vmem:[#allocation80_spill] sm:$0xff] }
 0x278   : > { %3092 = vmatmul.f32.vlgmr.msra.gmra.mxu0 %v6811_v61  ;;  %3392 = vmatmul.f32.vlgmr.msrb.gmra.mxu1 %v6788_v13 }
 0x279   : > { %3540 = vmatpush.msra.mxu0 %v8283_v58  ;;  %3601 = vmatpush.msra.mxu1 %v8271_v52  ;;  %v8290_v58 = vld [vmem:[#allocation116_spill] sm:$0xff] }
 0x27a   : > { %3417 = vmatpush.msrb.mxu2 %v8284_v48  ;;  %3526 = vmatpush.msrb.mxu3 %v8285_v31  ;;  %v8292_v31 = vld [vmem:[#allocation90_spill] sm:$0xff] }
 0x27b   : > { %3543 = vmatpush.msra.mxu0 %v8286_v17  ;;  %3603 = vmatpush.msra.mxu1 %v8273_v12  ;;  %v8294_v17 = vld [vmem:[#allocation94_spill] sm:$0xff] }
 0x27c   : > { %3419 = vmatpush.msrb.mxu2 %v8287_v62  ;;  %3532 = vmatpush.msrb.mxu3 %v8288_v8  ;;  %v8293_v8 = vld [vmem:[#allocation123_spill] sm:$0xff] }
 0x27d   : > { %3546 = vmatpush.msra.mxu0 %v8289_v59  ;;  %3605 = vmatpush.msra.mxu1 %v8275_v46  ;;  %v8298_v59 = vld [vmem:[#allocation101_spill] sm:$0xff] }
 0x27e   : > { %3701 = vmatpush.msra.mxu3 %v8263_v35  ;;  %3421 = vmatpush.msrb.mxu2 %v8290_v58  ;;  %v8295_v35 = vld [vmem:[#allocation127_spill] sm:$0xff] }
 0x27f   : > { %3549 = vmatpush.msra.mxu0 %v8291_v60  ;;  %3607 = vmatpush.msra.mxu1 %v8277_v39  ;;  %v8296_v60 = vld [vmem:[#allocation96_spill] sm:$0xff] }
 0x280   : > { %3355 = vmatmul.f32.vlgmr.msrb.gmra.mxu0 %v6788_v13  ;;  %3703 = vmatpush.msra.mxu3 %v8265_v10  ;;  %v8297_v10 = vld [vmem:[#allocation131_spill] sm:$0xff] }
 0x281   : > { %3552 = vmatpush.msra.mxu0 %v8292_v31  ;;  %3609 = vmatpush.msra.mxu1 %v8279_v16  ;;  %v8300_v31 = vld [vmem:[#allocation107_spill] sm:$0xff] }
 0x282   : > { %3423 = vmatpush.msrb.mxu2 %v8293_v8  ;;  %3705 = vmatpush.msra.mxu3 %v8267_v4  ;;  %v8299_v4 = vld [vmem:[#allocation78_spill] sm:$0xff] }
 0x283   : > { %3555 = vmatpush.msra.mxu0 %v8294_v17  ;;  %3611 = vmatpush.msra.mxu1 %v8281_v36  ;;  %v8302_v17 = vld [vmem:[#allocation111_spill] sm:$0xff] }
 0x284   : > { %3425 = vmatpush.msrb.mxu2 %v8295_v35  ;;  %3707 = vmatpush.msra.mxu3 %v8269_v21  ;;  %v8301_v21 = vld [vmem:[#allocation83_spill] sm:$0xff] }
 0x285   : > { %3558 = vmatpush.msra.mxu0 %v8296_v60  ;;  %3613 = vmatpush.msra.mxu1 %v8284_v48  ;;  %v8304_v60 = vld [vmem:[#allocation115_spill] sm:$0xff] }
 0x286   : > { %3427 = vmatpush.msrb.mxu2 %v8297_v10  ;;  %3709 = vmatpush.msra.mxu3 %v8271_v52  ;;  %v8303_v52 = vld [vmem:[#allocation89_spill] sm:$0xff] }
 0x287   : > { %3561 = vmatpush.msra.mxu0 %v8298_v59  ;;  %3615 = vmatpush.msra.mxu1 %v8287_v62  ;;  %v8306_v59 = vld [vmem:[#allocation119_spill] sm:$0xff] }
 0x288   : > { %3634 = vmatpush.msra.mxu2 %v8299_v4  ;;  %3711 = vmatpush.msra.mxu3 %v8273_v12  ;;  %v8305_v12 = vld [vmem:[#allocation93_spill] sm:$0xff]  ;;  %v8308_v4 = vld [vmem:[#allocation98_spill] sm:$0xff] }
 0x289   : > { %3564 = vmatpush.msra.mxu0 %v8300_v31  ;;  %3617 = vmatpush.msra.mxu1 %v8290_v58  ;;  %v8309_v31 = vld [vmem:[#allocation124_spill] sm:$0xff] }
 0x28a   : > { %3638 = vmatpush.msra.mxu2 %v8301_v21  ;;  %3713 = vmatpush.msra.mxu3 %v8275_v46  ;;  %v8307_v46 = vld [vmem:[#allocation164_spill] sm:$0xff]  ;;  %v8311_v21 = vld [vmem:[#allocation103_spill] sm:$0xff] }
 0x28b   : > { %3567 = vmatpush.msra.mxu0 %v8302_v17  ;;  %3619 = vmatpush.msra.mxu1 %v8293_v8  ;;  %v8312_v17 = vld [vmem:[#allocation130_spill] sm:$0xff] }
 0x28c   : > { %3642 = vmatpush.msra.mxu2 %v8303_v52  ;;  %3715 = vmatpush.msra.mxu3 %v8277_v39  ;;  %v8310_v39 = vld [vmem:[#allocation167_spill] sm:$0xff]  ;;  %v8314_v52 = vld [vmem:[#allocation105_spill] sm:$0xff] }
 0x28d   : > { %3570 = vmatpush.msra.mxu0 %v8304_v60  ;;  %3621 = vmatpush.msra.mxu1 %v8295_v35  ;;  %v8315_v60 = vld [vmem:[#allocation134_spill] sm:$0xff] }
 0x28e   : > { %3646 = vmatpush.msra.mxu2 %v8305_v12  ;;  %3717 = vmatpush.msra.mxu3 %v8279_v16  ;;  %v8313_v16 = vld [vmem:[#allocation171_spill] sm:$0xff]  ;;  %v8316_v12 = vld [vmem:[#allocation174_spill] sm:$0xff] }
 0x28f   : > { %3573 = vmatpush.msra.mxu0 %v8306_v59  ;;  %3623 = vmatpush.msra.mxu1 %v8297_v10  ;;  %v8317_v59 = vld [vmem:[#allocation109_spill] sm:$0xff] }
 0x290   : > { %3650 = vmatpush.msra.mxu2 %v8308_v4  ;;  %3719 = vmatpush.msra.mxu3 %v8281_v36  ;;  %v8318_v36 = vld [vmem:[#allocation137_spill] sm:$0xff]  ;;  %v8321_v4 = vld [vmem:[#allocation180_spill] sm:$0xff] }
 0x291   : > { %3783 = vmatpush.msrb.mxu1 %v8307_v46  ;;  %3576 = vmatpush.msra.mxu0 %v8309_v31  ;;  %v8319_v46 = vld [vmem:[#allocation177_spill] sm:$0xff]  ;;  %v8323_v31 = vld [vmem:[#allocation182_spill] sm:$0xff] }
 0x292   : > { %3654 = vmatpush.msra.mxu2 %v8311_v21  ;;  %3721 = vmatpush.msra.mxu3 %v8284_v48  ;;  %v8320_v48 = vld [vmem:[#allocation114_spill] sm:$0xff]  ;;  %v8327_v21 = vld [vmem:[#allocation189_spill] sm:$0xff] }
 0x293   : > { %3789 = vmatpush.msrb.mxu1 %v8310_v39  ;;  %3579 = vmatpush.msra.mxu0 %v8312_v17  ;;  %v8325_v39 = vld [vmem:[#allocation185_spill] sm:$0xff] }
 0x294   : > { %3658 = vmatpush.msra.mxu2 %v8314_v52  ;;  %3723 = vmatpush.msra.mxu3 %v8287_v62  ;;  %v8322_v62 = vld [vmem:[#allocation118_spill] sm:$0xff]  ;;  %v8328_v17 = vld [vmem:[#allocation129_spill] sm:$0xff]  ;;  %v2502_v52 = vpop.f32.mrf.mxu1 }
 0x295   : > { %3795 = vmatpush.msrb.mxu1 %v8313_v16  ;;  %3582 = vmatpush.msra.mxu0 %v8315_v60  ;;  %v8330_v16 = vld [vmem:[#allocation136_spill] sm:$0xff]  ;;  %v8332_v60 = vld [vmem:[#allocation139_spill] sm:$0xff] }
 0x296   : > { %3662 = vmatpush.msra.mxu2 %v8317_v59  ;;  %3725 = vmatpush.msra.mxu3 %v8290_v58  ;;  %v8324_v58 = vld [vmem:[#allocation122_spill] sm:$0xff]  ;;  %v2401_v59 = vpop.f32.mrf.mxu0 }
 0x297   : > { %3801 = vmatpush.msrb.mxu1 %v8316_v12  ;;  %3585 = vmatpush.msra.mxu0 %v8318_v36  ;;  %v8333_v12 = vld [vmem:[#allocation200_spill] sm:$0xff]  ;;  %v2556_v36 = vpop.f32.mrf.mxu2 }
 0x298   : > { %3666 = vmatpush.msra.mxu2 %v8320_v48  ;;  %3727 = vmatpush.msra.mxu3 %v8293_v8  ;;  %v8326_v8 = vld [vmem:[#allocation126_spill] sm:$0xff]  ;;  %v2503_v48 = vadd.f32 %v2502_v52, %v2401_v59 }
 0x299   : > { %3738 = vmatpush.msrb.mxu0 %v8095_v20  ;;  %3807 = vmatpush.msrb.mxu1 %v8319_v46  ;;  %v8334_v46 = vld [vmem:[#allocation142_spill] sm:$0xff] }
 0x29a   : > { %3670 = vmatpush.msra.mxu2 %v8322_v62  ;;  %3729 = vmatpush.msra.mxu3 %v8295_v35  ;;  %v8329_v35 = vld [vmem:[#allocation192_spill] sm:$0xff]  ;;  %v2557_v62 = vadd.f32 %v2556_v36, %v2503_v48 }
 0x29b   : > { %3740 = vmatpush.msrb.mxu0 %v8097_v54  ;;  %3813 = vmatpush.msrb.mxu1 %v8321_v4  ;;  %v8335_v4 = vld [vmem:[#allocation203_spill] sm:$0xff] }
 0x29c   : > { %3674 = vmatpush.msra.mxu2 %v8324_v58  ;;  %3731 = vmatpush.msra.mxu3 %v8297_v10  ;;  %v8331_v10 = vld [vmem:[#allocation197_spill] sm:$0xff]  ;;  %v2595_v58 = vpop.f32.mrf.mxu3 }
 0x29d   : > { %3742 = vmatpush.msrb.mxu0 %v8099_v42  ;;  %3819 = vmatpush.msrb.mxu1 %v8323_v31  ;;  %v8336_v31 = vld [vmem:[#allocation207_spill] sm:$0xff] }
 0x29e   : > { %3678 = vmatpush.msra.mxu2 %v8326_v8  ;;  %v2664_v8 = vpop.f32.mrf.mxu0 }
 0x29f   : > { %3744 = vmatpush.msrb.mxu0 %v8102_v47  ;;  %3825 = vmatpush.msrb.mxu1 %v8325_v39  ;;  %v2596_v39 = vadd.f32 %v2595_v58, %v2557_v62 }
 0x2a0   : > { %3682 = vmatpush.msra.mxu2 %v8328_v17  ;;  %v2701_v17 = vpop.f32.mrf.mxu1 }
 0x2a1   : > { %3746 = vmatpush.msrb.mxu0 %v8105_v29  ;;  %3831 = vmatpush.msrb.mxu1 %v8327_v21  ;;  %v2665_v21 = vadd.f32 %v2664_v8, %v2596_v39 }
 0x2a2   : > { %3686 = vmatpush.msra.mxu2 %v8330_v16 }
 0x2a3   : > { %3748 = vmatpush.msrb.mxu0 %v5652_v11  ;;  %3837 = vmatpush.msrb.mxu1 %v8329_v35  ;;  %v2702_v16 = vadd.f32 %v2701_v17, %v2665_v21 }
 0x2a4   : > { %3690 = vmatpush.msra.mxu2 %v8332_v60 }
 0x2a5   : > { %3750 = vmatpush.msrb.mxu0 %v5666_v43  ;;  %3843 = vmatpush.msrb.mxu1 %v8331_v10  ;;  %v2742_v35 = vpop.f32.mrf.mxu2  ;;  %v2843_v10 = vpop.f32.mrf.mxu3 }
 0x2a6   : > { %3694 = vmatpush.msra.mxu2 %v8334_v46  ;;  %v2897_v60 = vpop.f32.mrf.mxu0 }
 0x2a7   : > { %3752 = vmatpush.msrb.mxu0 %v5680_v38  ;;  %3849 = vmatpush.msrb.mxu1 %v8333_v12 }
 0x2a9   : > { %3754 = vmatpush.msrb.mxu0 %v5690_v30  ;;  %3855 = vmatpush.msrb.mxu1 %v8335_v4 }
 0x2ab   : > { %3756 = vmatpush.msrb.mxu0 %v5706_v24  ;;  %3861 = vmatpush.msrb.mxu1 %v8336_v31 }
 0x2ad   : > { %3758 = vmatpush.msrb.mxu0 %v5731_v22  ;;  %3867 = vmatpush.msrb.mxu1 %v8123_v5  ;;  %v2743_v5 = vadd.f32 %v2742_v35, %v2702_v16  ;;  %v8376_v35 = vld [vmem:[#allocation218_spill] sm:$0xff]  ;;  %v8377_v16 = vld [vmem:[#allocation255_spill] sm:$0xff] }
 0x2af   : > { %3760 = vmatpush.msrb.mxu0 %v5747_v57  ;;  %3873 = vmatpush.msrb.mxu1 %v8124_v40  ;;  %v2844_v52 = vadd.f32 %v2843_v10, %v2743_v5  ;;  %v2936_v40 = vpop.f32.mrf.mxu1  ;;  %v8378_v5 = vld [vmem:[#allocation233_spill] sm:$0xff]  ;;  %v8379_v10 = vld [vmem:[#allocation222_spill] sm:$0xff] }
 0x2b1   : > { %3762 = vmatpush.msrb.mxu0 %v5763_v14  ;;  %v2898_v12 = vadd.f32 %v2897_v60, %v2844_v52  ;;  %v8380_v52 = vld [vmem:[#allocation256_spill] sm:$0xff]  ;;  %v8381_v60 = vld [vmem:[#allocation237_spill] sm:$0xff] }
 0x2b3   : > { %3764 = vmatpush.msrb.mxu0 %v5779_v2  ;;  %v2937_v59 = vadd.f32 %v2936_v40, %v2898_v12  ;;  %v8382_v12 = vld [vmem:[#allocation226_spill] sm:$0xff] }
 0x2b4   : > { %v8383_v40 = vld [vmem:[#allocation258_spill] sm:$0xff] }
 0x2b5   : > { %3766 = vmatpush.msrb.mxu0 %v5792_v44 }
 0x2b7   : > { %3768 = vmatpush.msrb.mxu0 %v7966_v0 }
 0x2bc   : > { %v3042_v48 = vpop.f32.mrf.mxu3 }
 0x2c5   : > { %v3005_v36 = vpop.f32.mrf.mxu2 }
 0x2c6   : > { %v3006_v46 = vadd.f32 %v3005_v36, %v2937_v59  ;;  %v8384_v59 = vld [vmem:[#allocation241_spill] sm:$0xff]  ;;  %v8385_v36 = vld [vmem:[#allocation230_spill] sm:$0xff] }
 0x2c8   : > { %v3043_v4 = vadd.f32 %v3042_v48, %v3006_v46  ;;  %v8386_v46 = vld [vmem:[#allocation259_spill] sm:$0xff]  ;;  %v8387_v48 = vld [vmem:[#allocation245_spill] sm:$0xff] }
 0x2ca   : > { %v3047_v62 = vrot.slane %v3043_v4, 4  ;;  %v6919_v31 = vand.u32 4294901760, %v3043_v4 }
 0x2cc   : > { %v3048_v58 = vsel %vm1675_vm0, %v6783_v33, %v3047_v62  ;;  %v6924_v39 = vsub.f32 %v3043_v4, %v6919_v31  ;;  %3534 = vmatmul.f32.vlgmr.msrb.gmra.mxu3 %v6919_v31  ;;  %v8388_v4 = vld [vmem:[#allocation234_spill] sm:$0xff]  ;;  %v8389_v62 = vld [vmem:[#allocation260_spill] sm:$0xff] }
 0x2cd   : > { %4617 = vst [vmem:[%s6482_s23 + $0x8] sm:$0xff] %v3048_v58  ;;  %v3052_v8 = vsub.f32 %v8125_v56, %v3048_v58  ;;  %3934 = vmatpush.msrb.mxu3 %v8095_v20  ;;  %v8390_v58 = vld [vmem:[#allocation249_spill] sm:$0xff] }
 0x2ce   : > { %3588 = vmatmul.f32.vlgmr.msra.gmra.mxu0 %v6924_v39  ;;  %v6932_v21 = vand.u32 4294901760, %v6924_v39 }
 0x2cf   : > { %4618 = vst [vmem:[%s6491_s5 + $0x8] sm:$0xff] %v3052_v8  ;;  %3936 = vmatpush.msrb.mxu3 %v8097_v54  ;;  %3975 = vmatpush.msra.mxu0 %v8126_v63  ;;  %v8339_v63 = vld [vmem:[#allocation168_spill] sm:$0xff]  ;;  %v8391_v8 = vld [vmem:[#allocation238_spill] sm:$0xff] }
 0x2d0   : > { %3627 = vmatmul.f32.vlgmr.msra.gmra.mxu1 %v6932_v21  ;;  %v3431_v33 = vsub.f32 %v6924_v39, %v6932_v21 }
 0x2d1   : > { %3938 = vmatpush.msrb.mxu3 %v8099_v42  ;;  %3979 = vmatpush.msra.mxu0 %v8127_v27  ;;  %v8341_v27 = vld [vmem:[#allocation172_spill] sm:$0xff] }
 0x2d2   : > { %4042 = vmatpush.msra.mxu1 %v8095_v20  ;;  %v6943_v17 = vand.u32 4294901760, %v3431_v33  ;;  %v8337_v20 = vld [vmem:[#allocation165_spill] sm:$0xff] }
 0x2d3   : > { %3940 = vmatpush.msrb.mxu3 %v8102_v47  ;;  %3983 = vmatpush.msra.mxu0 %v8128_v6  ;;  %v8343_v6 = vld [vmem:[#allocation175_spill] sm:$0xff]  ;;  %v8392_v33 = vld [vmem:[#allocation253_spill] sm:$0xff] }
 0x2d4   : > { %4044 = vmatpush.msra.mxu1 %v8097_v54  ;;  %3433 = vmatmul.f32.vlgmr.msrb.gmra.mxu2 %v6943_v17  ;;  %v8338_v54 = vld [vmem:[#allocation157_spill] sm:$0xff] }
 0x2d5   : > { %3733 = vmatmul.f32.vlgmr.msra.gmra.mxu3 %v6919_v31  ;;  %3881 = vmatpush.msrb.mxu2 %v8129_v15  ;;  %v8344_v15 = vld [vmem:[#allocation163_spill] sm:$0xff] }
 0x2d6   : > { %3942 = vmatpush.msrb.mxu3 %v8105_v29  ;;  %3987 = vmatpush.msra.mxu0 %v8130_v3  ;;  %v8346_v3 = vld [vmem:[#allocation166_spill] sm:$0xff] }
 0x2d7   : > { %4046 = vmatpush.msra.mxu1 %v8099_v42  ;;  %3774 = vmatmul.f32.vlgmr.msrb.gmra.mxu0 %v6811_v61  ;;  %v8340_v42 = vld [vmem:[#allocation159_spill] sm:$0xff]  ;;  %v8375_v61 = vld [vmem:[#allocation229_spill] sm:$0xff] }
 0x2d8   : > { %3884 = vmatpush.msrb.mxu2 %v8131_v32  ;;  %3944 = vmatpush.msrb.mxu3 %v5652_v11  ;;  %v8348_v32 = vld [vmem:[#allocation169_spill] sm:$0xff] }
 0x2d9   : > { %3991 = vmatpush.msra.mxu0 %v8337_v20  ;;  %4048 = vmatpush.msra.mxu1 %v8102_v47  ;;  %v8342_v47 = vld [vmem:[#allocation161_spill] sm:$0xff]  ;;  %v8393_v20 = vld [vmem:[#allocation242_spill] sm:$0xff] }
 0x2da   : > { %3875 = vmatmul.f32.vlgmr.msrb.gmra.mxu1 %v6788_v13  ;;  %3887 = vmatpush.msrb.mxu2 %v8338_v54  ;;  %v8394_v54 = vld [vmem:[#allocation248_spill] sm:$0xff] }
 0x2db   : > { %3946 = vmatpush.msrb.mxu3 %v5666_v43  ;;  %3995 = vmatpush.msra.mxu0 %v8339_v63  ;;  %v8401_v63 = vld [vmem:[#allocation224_spill] sm:$0xff] }
 0x2dc   : > { %4050 = vmatpush.msra.mxu1 %v8105_v29  ;;  %3890 = vmatpush.msrb.mxu2 %v8340_v42  ;;  %v8345_v29 = vld [vmem:[#allocation176_spill] sm:$0xff] }
 0x2dd   : > { %3948 = vmatpush.msrb.mxu3 %v5680_v38  ;;  %3999 = vmatpush.msra.mxu0 %v8341_v27  ;;  %v8402_v42 = vld [vmem:[#allocation228_spill] sm:$0xff] }
 0x2de   : > { %4052 = vmatpush.msra.mxu1 %v5652_v11  ;;  %3696 = vmatmul.f32.vlgmr.msra.gmra.mxu2 %v6919_v31  ;;  %v8347_v11 = vld [vmem:[#allocation179_spill] sm:$0xff]  ;;  %v8403_v27 = vld [vmem:[#allocation232_spill] sm:$0xff] }
 0x2df   : > { %3893 = vmatpush.msrb.mxu2 %v8342_v47  ;;  %3950 = vmatpush.msrb.mxu3 %v5690_v30  ;;  %v8404_v47 = vld [vmem:[#allocation236_spill] sm:$0xff] }
 0x2e0   : > { %4003 = vmatpush.msra.mxu0 %v8343_v6  ;;  %4054 = vmatpush.msra.mxu1 %v5666_v43  ;;  %v8349_v43 = vld [vmem:[#allocation170_spill] sm:$0xff]  ;;  %v8405_v6 = vld [vmem:[#allocation240_spill] sm:$0xff] }
 0x2e1   : > { %3896 = vmatpush.msrb.mxu2 %v8344_v15  ;;  %3952 = vmatpush.msrb.mxu3 %v5706_v24  ;;  %v8406_v15 = vld [vmem:[#allocation244_spill] sm:$0xff] }
 0x2e2   : > { %4007 = vmatpush.msra.mxu0 %v8345_v29  ;;  %4056 = vmatpush.msra.mxu1 %v5680_v38  ;;  %v8350_v38 = vld [vmem:[#allocation173_spill] sm:$0xff]  ;;  %v8407_v29 = vld [vmem:[#allocation247_spill] sm:$0xff] }
 0x2e3   : > { %3899 = vmatpush.msrb.mxu2 %v8346_v3  ;;  %3954 = vmatpush.msrb.mxu3 %v5731_v22  ;;  %v8408_v3 = vld [vmem:[#allocation251_spill] sm:$0xff] }
 0x2e4   : > { %4011 = vmatpush.msra.mxu0 %v8347_v11  ;;  %4058 = vmatpush.msra.mxu1 %v5690_v30  ;;  %v8351_v30 = vld [vmem:[#allocation190_spill] sm:$0xff] }
 0x2e5   : > { %3902 = vmatpush.msrb.mxu2 %v8348_v32  ;;  %3956 = vmatpush.msrb.mxu3 %v5747_v57  ;;  %v8409_v11 = vld [vmem:[#allocation254_spill] sm:$0xff]  ;;  %v8410_v32 = vld [vmem:[#allocation257_spill] sm:$0xff] }
 0x2e6   : > { %4015 = vmatpush.msra.mxu0 %v8143_v34  ;;  %4060 = vmatpush.msra.mxu1 %v5706_v24  ;;  %v8352_v24 = vld [vmem:[#allocation194_spill] sm:$0xff]  ;;  %v8353_v34 = vld [vmem:[#allocation181_spill] sm:$0xff] }
 0x2e7   : > { %3905 = vmatpush.msrb.mxu2 %v8349_v43  ;;  %3958 = vmatpush.msrb.mxu3 %v5763_v14 }
 0x2e8   : > { %4019 = vmatpush.msra.mxu0 %v8145_v49  ;;  %4062 = vmatpush.msra.mxu1 %v5731_v22  ;;  %v8354_v22 = vld [vmem:[#allocation214_spill] sm:$0xff]  ;;  %v8369_v49 = vld [vmem:[#allocation221_spill] sm:$0xff] }
 0x2e9   : > { %3908 = vmatpush.msrb.mxu2 %v8350_v38  ;;  %3960 = vmatpush.msrb.mxu3 %v5779_v2 }
 0x2ea   : > { %4023 = vmatpush.msra.mxu0 %v8351_v30  ;;  %4064 = vmatpush.msra.mxu1 %v5747_v57  ;;  %v8355_v57 = vld [vmem:[#allocation201_spill] sm:$0xff] }
 0x2eb   : > { %3911 = vmatpush.msrb.mxu2 %v8148_v19  ;;  %3962 = vmatpush.msrb.mxu3 %v5792_v44  ;;  %v8357_v19 = vld [vmem:[#allocation188_spill] sm:$0xff] }
 0x2ec   : > { %4027 = vmatpush.msra.mxu0 %v8352_v24  ;;  %4066 = vmatpush.msra.mxu1 %v5763_v14  ;;  %v8356_v14 = vld [vmem:[#allocation193_spill] sm:$0xff] }
 0x2ed   : > { %3914 = vmatpush.msrb.mxu2 %v8353_v34  ;;  %3964 = vmatpush.msrb.mxu3 %v7966_v0  ;;  %v3194_v43 = vpop.f32.mrf.mxu1 }
 0x2ee   : > { %4031 = vmatpush.msra.mxu0 %v5864_v7  ;;  %4068 = vmatpush.msra.mxu1 %v5779_v2  ;;  %v8358_v2 = vld [vmem:[#allocation202_spill] sm:$0xff]  ;;  %v8366_v7 = vld [vmem:[#allocation217_spill] sm:$0xff] }
 0x2ef   : > { %3968 = vmatmul.f32.vlgmr.msrb.gmra.mxu3 %v6802_v26  ;;  %3917 = vmatpush.msrb.mxu2 %v8150_v18  ;;  %v8362_v18 = vld [vmem:[#allocation239_spill] sm:$0xff]  ;;  %v8374_v26 = vld [vmem:[#allocation252_spill] sm:$0xff] }
 0x2f0   : > { %4124 = vmatpush.msra.mxu3 %v8354_v22  ;;  %4035 = vmatpush.msra.mxu0 %v8355_v57 }
 0x2f1   : > { %4070 = vmatpush.msra.mxu1 %v5792_v44  ;;  %4037 = vmatmul.f32.vlgmr.msra.gmra.mxu0 %v6788_v13  ;;  %v8361_v44 = vld [vmem:[#allocation196_spill] sm:$0xff] }
 0x2f2   : > { %4130 = vmatpush.msra.mxu3 %v8152_v55  ;;  %4222 = vmatpush.msrb.mxu0 %v8356_v14  ;;  %v8364_v55 = vld [vmem:[#allocation199_spill] sm:$0xff] }
 0x2f3   : > { %3920 = vmatpush.msrb.mxu2 %v8357_v19  ;;  %4072 = vmatpush.msra.mxu1 %v7966_v0  ;;  %v8367_v0 = vld [vmem:[#allocation205_spill] sm:$0xff] }
 0x2f4   : > { %4074 = vmatmul.f32.vlgmr.msra.gmra.mxu1 %v6788_v13  ;;  %4136 = vmatpush.msra.mxu3 %v8154_v1  ;;  %v8371_v1 = vld [vmem:[#allocation250_spill] sm:$0xff]  ;;  %v8372_v13 = vld [vmem:[#allocation225_spill] sm:$0xff] }
 0x2f5   : > { %4225 = vmatpush.msrb.mxu0 %v5867_v41  ;;  %4275 = vmatpush.msrb.mxu1 %v5804_v53  ;;  %v8359_v41 = vld [vmem:[#allocation235_spill] sm:$0xff]  ;;  %v3093_v38 = vpop.f32.mrf.mxu0  ;;  %v3248_v30 = vpop.f32.mrf.mxu2 }
 0x2f6   : > { %3923 = vmatpush.msrb.mxu2 %v8155_v28  ;;  %4142 = vmatpush.msra.mxu3 %v8156_v23  ;;  %v8360_v28 = vld [vmem:[#allocation206_spill] sm:$0xff]  ;;  %v8370_v23 = vld [vmem:[#allocation209_spill] sm:$0xff]  ;;  %v3393_v24 = vpop.f32.mrf.mxu1 }
 0x2f7   : > { %4228 = vmatpush.msrb.mxu0 %v8358_v2  ;;  %4277 = vmatpush.msrb.mxu1 %v5832_v51  ;;  %v3287_v34 = vpop.f32.mrf.mxu3 }
 0x2f8   : > { %3926 = vmatpush.msrb.mxu2 %v8157_v45  ;;  %4148 = vmatpush.msra.mxu3 %v8158_v9  ;;  %v8363_v45 = vld [vmem:[#allocation212_spill] sm:$0xff]  ;;  %v8368_v9 = vld [vmem:[#allocation246_spill] sm:$0xff] }
 0x2f9   : > { %3929 = vmatmul.f32.vlgmr.msrb.gmra.mxu2 %v6794_v37  ;;  %4231 = vmatpush.msrb.mxu0 %v5891_v25  ;;  %v8365_v25 = vld [vmem:[#allocation243_spill] sm:$0xff]  ;;  %v8373_v37 = vld [vmem:[#allocation213_spill] sm:$0xff] }
 0x2fa   : > { %4079 = vmatpush.msra.mxu2 %v5804_v53  ;;  %4279 = vmatpush.msrb.mxu1 %v5851_v50 }
 0x2fb   : > { %4154 = vmatpush.msra.mxu3 %v8359_v41  ;;  %4234 = vmatpush.msrb.mxu0 %v8360_v28 }
 0x2fc   : > { %4081 = vmatpush.msra.mxu2 %v5832_v51  ;;  %4281 = vmatpush.msrb.mxu1 %v8361_v44 }
 0x2fd   : > { %4160 = vmatpush.msra.mxu3 %v8362_v18  ;;  %4237 = vmatpush.msrb.mxu0 %v8363_v45  ;;  %v3356_v22 = vpop.f32.mrf.mxu0  ;;  %v3195_v18 = vadd.f32 %v3194_v43, %v3093_v38 }
 0x2fe   : > { %4083 = vmatpush.msra.mxu2 %v5851_v50  ;;  %4283 = vmatpush.msrb.mxu1 %v8364_v55 }
 0x2ff   : > { %4166 = vmatpush.msra.mxu3 %v8365_v25  ;;  %4240 = vmatpush.msrb.mxu0 %v8366_v7  ;;  %v3249_v7 = vadd.f32 %v3248_v30, %v3195_v18 }
 0x300   : > { %4085 = vmatpush.msra.mxu2 %v8361_v44  ;;  %4285 = vmatpush.msrb.mxu1 %v8367_v0 }
 0x301   : > { %4172 = vmatpush.msra.mxu3 %v8368_v9  ;;  %4243 = vmatpush.msrb.mxu0 %v8369_v49  ;;  %v3288_v9 = vadd.f32 %v3287_v34, %v3249_v7 }
 0x302   : > { %4087 = vmatpush.msra.mxu2 %v8364_v55  ;;  %4287 = vmatpush.msrb.mxu1 %v8370_v23 }
 0x303   : > { %4178 = vmatpush.msra.mxu3 %v8371_v1  ;;  %4246 = vmatpush.msrb.mxu0 %v8372_v13 }
 0x304   : > { %4089 = vmatpush.msra.mxu2 %v8367_v0  ;;  %4289 = vmatpush.msrb.mxu1 %v8373_v37 }
 0x305   : > { %4184 = vmatpush.msra.mxu3 %v8374_v26  ;;  %4249 = vmatpush.msrb.mxu0 %v8375_v61 }
 0x306   : > { %4091 = vmatpush.msra.mxu2 %v8370_v23  ;;  %4291 = vmatpush.msrb.mxu1 %v8376_v35 }
 0x307   : > { %4190 = vmatpush.msra.mxu3 %v8377_v16  ;;  %4252 = vmatpush.msrb.mxu0 %v8378_v5 }
 0x308   : > { %4093 = vmatpush.msra.mxu2 %v8373_v37  ;;  %4293 = vmatpush.msrb.mxu1 %v8379_v10 }
 0x309   : > { %4196 = vmatpush.msra.mxu3 %v8380_v52  ;;  %4255 = vmatpush.msrb.mxu0 %v8381_v60 }
 0x30a   : > { %4095 = vmatpush.msra.mxu2 %v8376_v35  ;;  %4295 = vmatpush.msrb.mxu1 %v8382_v12 }
 0x30b   : > { %4202 = vmatpush.msra.mxu3 %v8383_v40  ;;  %4258 = vmatpush.msrb.mxu0 %v8384_v59 }
 0x30c   : > { %4097 = vmatpush.msra.mxu2 %v8379_v10  ;;  %4297 = vmatpush.msrb.mxu1 %v8385_v36 }
 0x30d   : > { %4208 = vmatpush.msra.mxu3 %v8386_v46  ;;  %4261 = vmatpush.msrb.mxu0 %v8387_v48 }
 0x30e   : > { %4099 = vmatpush.msra.mxu2 %v8382_v12  ;;  %4299 = vmatpush.msrb.mxu1 %v8388_v4 }
 0x30f   : > { %4214 = vmatpush.msra.mxu3 %v8389_v62  ;;  %4264 = vmatpush.msrb.mxu0 %v8390_v58 }
 0x310   : > { %4101 = vmatpush.msra.mxu2 %v8385_v36  ;;  %4301 = vmatpush.msrb.mxu1 %v8391_v8 }
 0x311   : > { %4216 = vmatmul.f32.vlgmr.msra.gmra.mxu3 %v6919_v31  ;;  %4267 = vmatpush.msrb.mxu0 %v8392_v33 }
 0x312   : > { %4383 = vmatpush.msrb.mxu3 %v5804_v53  ;;  %4103 = vmatpush.msra.mxu2 %v8388_v4  ;;  %v8395_v53 = vld [vmem:[#allocation198_spill] sm:$0xff] }
 0x313   : > { %4303 = vmatpush.msrb.mxu1 %v8393_v20  ;;  %4270 = vmatmul.f32.vlgmr.msrb.gmra.mxu0 %v6924_v39  ;;  %v8397_v39 = vld [vmem:[#allocation208_spill] sm:$0xff] }
 0x314   : > { %4385 = vmatpush.msrb.mxu3 %v5832_v51  ;;  %4105 = vmatpush.msra.mxu2 %v8391_v8  ;;  %v8396_v51 = vld [vmem:[#allocation204_spill] sm:$0xff] }
 0x315   : > { %4305 = vmatpush.msrb.mxu1 %v8394_v54 }
 0x316   : > { %4309 = vmatmul.f32.vlgmr.msrb.gmra.mxu1 %v6932_v21  ;;  %4387 = vmatpush.msrb.mxu3 %v5851_v50  ;;  %v8398_v50 = vld [vmem:[#allocation210_spill] sm:$0xff]  ;;  %v8399_v21 = vld [vmem:[#allocation215_spill] sm:$0xff] }
 0x317   : > { %4107 = vmatpush.msra.mxu2 %v8393_v20 }
 0x318   : > { %4389 = vmatpush.msrb.mxu3 %v8361_v44 }
 0x319   : > { %4109 = vmatpush.msra.mxu2 %v8394_v54 }
 0x31a   : > { %4115 = vmatmul.f32.vlgmr.msra.gmra.mxu2 %v6943_v17  ;;  %4391 = vmatpush.msrb.mxu3 %v8364_v55  ;;  %v8400_v17 = vld [vmem:[#allocation220_spill] sm:$0xff] }
 0x31b   : > { %4316 = vmatpush.msrb.mxu2 %v8395_v53 }
 0x31c   : > { %4393 = vmatpush.msrb.mxu3 %v8367_v0 }
 0x31d   : > { %4320 = vmatpush.msrb.mxu2 %v8396_v51 }
 0x31e   : > { %4395 = vmatpush.msrb.mxu3 %v8370_v23  ;;  %v3357_v23 = vadd.f32 %v3356_v22, %v3288_v9 }
 0x31f   : > { %4324 = vmatpush.msrb.mxu2 %v8397_v39 }
 0x320   : > { %4397 = vmatpush.msrb.mxu3 %v8373_v37  ;;  %v3394_v37 = vadd.f32 %v3393_v24, %v3357_v23 }
 0x321   : > { %4328 = vmatpush.msrb.mxu2 %v8398_v50 }
 0x322   : > { %4399 = vmatpush.msrb.mxu3 %v8376_v35 }
 0x323   : > { %4332 = vmatpush.msrb.mxu2 %v8399_v21 }
 0x324   : > { %4401 = vmatpush.msrb.mxu3 %v8379_v10 }
 0x325   : > { %4336 = vmatpush.msrb.mxu2 %v8400_v17 }
 0x326   : > { %4403 = vmatpush.msrb.mxu3 %v8382_v12 }
 0x327   : > { %4340 = vmatpush.msrb.mxu2 %v8401_v63 }
 0x328   : > { %4405 = vmatpush.msrb.mxu3 %v8385_v36 }
 0x329   : > { %4344 = vmatpush.msrb.mxu2 %v8402_v42 }
 0x32a   : > { %4407 = vmatpush.msrb.mxu3 %v8388_v4 }
 0x32b   : > { %4348 = vmatpush.msrb.mxu2 %v8403_v27 }
 0x32c   : > { %4409 = vmatpush.msrb.mxu3 %v8391_v8 }
 0x32d   : > { %4352 = vmatpush.msrb.mxu2 %v8404_v47 }
 0x32e   : > { %4411 = vmatpush.msrb.mxu3 %v8393_v20 }
 0x32f   : > { %4356 = vmatpush.msrb.mxu2 %v8405_v6 }
 0x330   : > { %4413 = vmatpush.msrb.mxu3 %v8394_v54 }
 0x331   : > { %4360 = vmatpush.msrb.mxu2 %v8406_v15  ;;  %4415 = vmatmul.f32.vlgmr.msrb.gmra.mxu3 %v6919_v31 }
 0x333   : > { %4364 = vmatpush.msrb.mxu2 %v8407_v29 }
 0x335   : > { %4368 = vmatpush.msrb.mxu2 %v8408_v3 }
 0x337   : > { %4372 = vmatpush.msrb.mxu2 %v8409_v11 }
 0x339   : > { %4376 = vmatpush.msrb.mxu2 %v8410_v32 }
 0x33a   : > { %4378 = vmatmul.f32.vlgmr.msrb.gmra.mxu2 %v6919_v31 }
 0x34b   : > { %v3589_v2 = vpop.f32.mrf.mxu0 }
 0x34d   : > { %v3628_v14 = vpop.f32.mrf.mxu1 }
 0x34f   : > { %v3535_v19 = vpop.f32.mrf.mxu3 }
 0x354   : > { %v3775_v45 = vpop.f32.mrf.mxu0 }
 0x357   : > { %v3434_v57 = vpop.f32.mrf.mxu2  ;;  %v3876_v28 = vpop.f32.mrf.mxu1 }
 0x358   : > { %v3734_v44 = vpop.f32.mrf.mxu3  ;;  %v3877_v25 = vadd.f32 %v3876_v28, %v3775_v45  ;;  %v3435_v35 = vadd.f32 %v3434_v57, %v3394_v37 }
 0x35a   : > { %v3536_v10 = vadd.f32 %v3535_v19, %v3435_v35 }
 0x35c   : > { %v3590_v12 = vadd.f32 %v3589_v2, %v3536_v10 }
 0x35e   : > { %v3629_v36 = vadd.f32 %v3628_v14, %v3590_v12 }
 0x361   : > { %v3697_v41 = vpop.f32.mrf.mxu2 }
 0x362   : > { %v3698_v62 = vadd.f32 %v3697_v41, %v3629_v36 }
 0x364   : > { %v3735_v20 = vadd.f32 %v3734_v44, %v3698_v62 }
 0x36e   : > { %v4038_v1 = vpop.f32.mrf.mxu0 }
 0x371   : > { %v4075_v26 = vpop.f32.mrf.mxu1 }
 0x372   : > { %v3969_v31 = vpop.f32.mrf.mxu3 }
 0x37c   : > { %v3930_v55 = vpop.f32.mrf.mxu2 }
 0x37d   : > { %v3931_v0 = vadd.f32 %v3930_v55, %v3877_v25 }
 0x37f   : > { %v3970_v49 = vadd.f32 %v3969_v31, %v3931_v0 }
 0x381   : > { %v4039_v13 = vadd.f32 %v4038_v1, %v3970_v49 }
 0x383   : > { %v4076_v16 = vadd.f32 %v4075_v26, %v4039_v13 }
 0x390   : > { %v4271_v40 = vpop.f32.mrf.mxu0 }
 0x393   : > { %v4310_v46 = vpop.f32.mrf.mxu1 }
 0x394   : > { %v4217_v52 = vpop.f32.mrf.mxu3 }
 0x39d   : > { %v4116_v61 = vpop.f32.mrf.mxu2 }
 0x39e   : > { %v4117_v5 = vadd.f32 %v4116_v61, %v4076_v16 }
 0x3a0   : > { %v4218_v60 = vadd.f32 %v4217_v52, %v4117_v5 }
 0x3a2   : > { %v4272_v59 = vadd.f32 %v4271_v40, %v4218_v60 }
 0x3a4   : > { %v4311_v48 = vadd.f32 %v4310_v46, %v4272_v59 }
 0x3b4   : > { %v4416_v8 = vpop.f32.mrf.mxu3 }
 0x3bd   : > { %v4379_v4 = vpop.f32.mrf.mxu2 }
 0x3be   : > { %v4380_v58 = vadd.f32 %v4379_v4, %v4311_v48 }
 0x3c0   : > { %v4417_v33 = vadd.f32 %v4416_v8, %v4380_v58 }
 0x3c2   : > { %v4421_v54 = vrot.slane %v4417_v33, 4 }
 0x3c4   : > { %v4422_v53 = vsel %vm1675_vm0, %v3735_v20, %v4421_v54 }
 0x3c5   : > { %4619 = vst [vmem:[%s6482_s23 + $0x10] sm:$0xff] %v4422_v53  ;;  %v4426_v51 = vsub.f32 %v8125_v56, %v4422_v53 }
 0x3c6   : > { %4798 = shalt.err (!%p4795_p13)
}
 0x3c7   : > { %s4894_s21 = smov 128   ;;  %s4895_s24 = smov 8   ;;  %4620 = vst [vmem:[%s6491_s5 + $0x10] sm:$0xff] %v4426_v51 }
 0x3c8   : > { %4635 = dma.vmem_to_hbm [thread:$0]  (%p4987_p4), %s7123_s22, 384, %s4452_s18, %s4430_s30, %s4894_s21, %s4894_s21, %s4895_s24  }
 0x3c9   : > { %s4435_s25 = scalar_lea.sflag [#allocation9], %s5013_s28  ;;  %s4813_s26 = sshra.s32 %s7130_s27, 4  ;;  %s4814_s26 = int_to_ptr.hbm [resolvable:$true] %s4813_s26 }
 0x3ca   : > { %s4815_s19 = scalar_lea.hbm %s4814_s26, 24  ;;  %s4819_s10 = scalar_lea.hbm %s7185_s3, 48 }
 0x3cb   : > { %p4816_p0 = scmp.ne.s32.totalorder %s4814_s26, %s4815_s19  ;;  %p4820_p8 = scmp.lt.s32.totalorder %s4814_s26, %s7185_s3 }
 0x3cc   : > { %p4821_p1 = scmp.lt.s32.totalorder %s4819_s10, %s4815_s19 }
 0x3cd   : > { %p4817_p2 = pnand %p4816_p0, %p4987_p4 }
 0x3ce   : > { %p4822_p3 = por %p4821_p1, %p4820_p8 }
 0x3cf   : > { %p4818_p5 = pneg %p4817_p2 }
 0x3d1   : > { %p4823_p9 = pnand %p4822_p3, %p4818_p5 }
 0x3d3   : > { %4826 = shalt.err (!%p4823_p9)
}
 0x3d4   : > { %4636 = dma.vmem_to_hbm [thread:$0]  (%p4987_p4), %s7128_s15, 384, %s7130_s27, %s4435_s25, %s4894_s21, %s4894_s21, %s4895_s24  }
 0x3d5 PF: > { %s4485_s28 = sand.u32 1, %s4869_s12   ;;  %p4648_p10 = pnand %p4610_p6, %p4995_p7 }
 0x3d6   : > { %s4486_s5 = scalar_lea.sflag [#allocation4], %s4485_s28 }
 0x3d7   : > { %p4649_p11 = pneg %p4648_p10 }
 0x3d9   : > { %4860 = dma.done.wait (%p4649_p11), %s4486_s5, 384  }
 0x3da   : > { %4862 = vsyncadd (%p4649_p11), %s4486_s5, 4294966912  ;;  %s4496_s22 = scalar_lea.sflag [#allocation9], %s4485_s28 }
 0x3db   : > { %4864 = dma.done.wait (%p4649_p11), %s4496_s22, 384  }
 0x3dc   : > { %4866 = vsyncadd (%p4649_p11), %s4496_s22, 4294966912  ;;  %s24_s17 = sadd.s32 1, %s4889_s17   ;;  %s8411_s12 = smov %s4873_s13 }
 0x3dd   : > { %p21_p12 = scmp.ge.s32.totalorder %s24_s17, 4   ;;  %s8412_s13 = smov %s4877_s14 }
 0x3de   : > { %s8413_s14 = smov %s4993_s8  ;;  %s8414_s15 = smov %s4885_s16 }
 0x3df   : > { %s8415_s16 = smov %s8417_s29  ;;  %23 = sbr.rel (!%p21_p12) target bundleno = 9 (0x9), region = 99 }
 0x3e4   :  { %4502 = vsyncpa [#allocation3], 1 }
 0x3e5   :  { %4504 = vsyncpa [#allocation3 + $0x1], 1 }
 0x3e6   :  { %4505 = vsyncpa [#allocation6], 1 }
 0x3e7   :  { %4507 = vsyncpa [#allocation6 + $0x1], 1 }
 0x3e8   :  { %4508 = vsyncpa [#allocation4], 1 }
 0x3e9   :  { %4510 = vsyncpa [#allocation4 + $0x1], 1 }
 0x3ea   :  { %4511 = vsyncpa [#allocation9], 1 }
 0x3eb   :  { %4513 = vsyncpa [#allocation9 + $0x1], 1 }

// kernel: tpu_custom_call.1
= control target key start
LH: loop header
LB: loop body
LE: loop exit
PB: predicated region body
PF: predicated region fallthrough
CT: control target
= control target key end

     0   :  { %9 = vsyncpa [#allocation3], 0  ;;  %s7182_s0 = inlined_call_operand.hbm [shape: f32[256,256], index: 0, kind: input, shape index: {}]   ;;  %s7183_s1 = inlined_call_operand.hbm [shape: f32[2,4,256], index: 1, kind: input, shape index: {}]   ;;  %s7184_s2 = inlined_call_operand.hbm [shape: f32[2,3,4,256], index: 2, kind: output, shape index: {0}]   ;;  %s7185_s3 = inlined_call_operand.hbm [shape: f32[2,3,4,256], index: 3, kind: output, shape index: {1}]  }
   0x1   :  { %10 = vsyncpa [#allocation6], 0 }
   0x2   :  { %12 = vsyncpa [#allocation6 + $0x1], 0 }
   0x3   :  { %13 = vsyncpa [#allocation4], 0 }
   0x4   :  { %15 = vsyncpa [#allocation4 + $0x1], 0 }
   0x5   :  { %16 = vsyncpa [#allocation9], 0 }
   0x6   :  { %18 = vsyncpa [#allocation9 + $0x1], 0  ;;  %s4916_s12 = smov 0   ;;  %s4918_s13 = smov 0  }
   0x7   :  { %s4920_s14 = smov 0   ;;  %s4922_s15 = smov 0  }
   0x8   :  { %s4924_s16 = smov 0   ;;  %s4926_s17 = smov 0  }
   0x9 LB: > { %s4606_s18 = sadd.s32 4294967295, %s4889_s17   ;;  %p4608_p0 = scmp.ge.s32.totalorder %s4889_s17, 1  ;;  %s4889_s17 = sphi %s4926_s17, %s24_s17   ;;  %s4885_s16 = sphi %s4924_s16, %s8415_s16   ;;  %s4881_s15 = sphi %s4922_s15, %s8414_s15   ;;  %s4877_s14 = sphi %s4920_s14, %s8413_s14   ;;  %s4873_s13 = sphi %s4918_s13, %s8412_s13   ;;  %s4869_s12 = sphi %s4916_s12, %s8411_s12  }
   0xa   : > { %p4948_p1 = scmp.eq.s32.totalorder %s4606_s18, 0  ;;  %p146_p2 = scmp.lt.s32.totalorder %s4889_s17, 3 }
   0xb   : > { %s157_s22 = sshll.u32 %s7182_s0, 4  ;;  %s4891_s24 = smov [#allocation2]   ;;  %s158_s22 = int_to_ptr.hbm [resolvable:$true] %s157_s22 }
   0xc   : > { %p4956_p3 = pnand %p4608_p0, %p146_p2  ;;  %s159_s25 = sshll.u32 %s4891_s24, 4  ;;  %s160_s25 = int_to_ptr.vmem [resolvable:$true] %s159_s25 }
   0xd   : > { %p4610_p6 = scmp.ge.s32.totalorder %s4889_s17, 2  ;;  %s4892_s26 = smov 256  }
   0xe   : > { %p4639_p4 = pneg %p4956_p3  ;;  %s4893_s27 = smov 16  }
   0xf   : > { %s4607_s28 = sadd.s32 4294967294, %s4889_s17   ;;  %s36_s29 = sadd.s32 1, %s4885_s16 }
  0x10   : > { %p4640_p5 = pnand %p4639_p4, %p4948_p1  ;;  %s66_s30 = sadd.s32 1, %s4877_s14 }
  0x11   : > { %p38_p7 = scmp.ge.s32.totalorder %s36_s29, 2  ;;  %p73_p8 = scmp.ne.s32.totalorder %s4877_s14, %s4873_s13 }
  0x12   : > { %4642 = dma.hbm_to_vmem [thread:$0]  (!%p4640_p5), %s158_s22, 8192, %s160_s25, [#allocation3], %s4892_s26, %s4892_s26, %s4893_s27  }
  0x13   : > { %p74_p9 = scmp.eq.s32.totalorder %s4889_s17, 0  ;;  %p79_p10 = scmp.ne.s32.totalorder %s4873_s13, %s4869_s12 }
  0x14   : > { %s8417_s29 = smov (%p38_p7, %s36_s29), 0  ;;  %p105_p13 = scmp.eq.s32.totalorder %s4606_s18, 1 }
  0x15   : > { %p4975_p11 = por %p74_p9, %p73_p8  ;;  %p4981_p12 = por %p4948_p1, %p79_p10 }
  0x16   : > { %s61_s6 = ssub.s32 %s4885_s16, %s8417_s29  ;;  %p111_p2 = scmp.eq.s32.totalorder %s4607_s28, 1 }
  0x17   : > { %p64_p0 = scmp.eq.s32.totalorder %s61_s6, 0  ;;  %p4987_p4 = por %p105_p13, %p73_p8 }
  0x18   : > { %p4655_p5 = scmp.lt.s32.totalorder %s4889_s17, 2  ;;  %p4995_p7 = por %p111_p2, %p79_p10 }
  0x19   : > { %s4993_s8 = scalar_select %p64_p0, %s4877_s14, %s66_s30  }
  0x1a   : > { %s173_s10 = sand.u32 1, %s4877_s14   ;;  %s4625_s20 = sshll.u32 %s4885_s16, 3 }
  0x1b   : > { %s4611_s11 = sshll.u32 %s173_s10, 3  ;;  %s184_s18 = scalar_lea.hbm %s7183_s1, %s4625_s20 }
  0x1c   : > { %s177_s24 = scalar_lea.vmem [#allocation5], %s4611_s11  ;;  %s186_s26 = sshll.u32 %s184_s18, 4  ;;  %s187_s26 = int_to_ptr.hbm [resolvable:$true] %s186_s26 }
  0x1d   : > { %s188_s25 = sshll.u32 %s177_s24, 4  ;;  %p4644_p8 = pnand %p4655_p5, %p4975_p11  ;;  %s189_s25 = int_to_ptr.vmem [resolvable:$true] %s188_s25 }
  0x1e   : > { %s174_s27 = scalar_lea.sflag [#allocation6], %s173_s10  ;;  %197 = sbr.rel (%p4956_p3) target bundleno = 981 (0x3d5), region = 28 }
  0x1f   : > { %4646 = dma.hbm_to_vmem [thread:$0]  (!%p4644_p8), %s187_s26, 128, %s189_s25, %s174_s27  }
  0x23   : > { %4852 = dma.done.wait (%p4948_p1), [#allocation3], 8192  }
  0x24   : > { %4854 = vsyncadd (%p4948_p1), [#allocation3], 4294959104  ;;  %s5013_s28 = sand.u32 1, %s4873_s13  }
  0x25   : > { %s4616_s30 = sshll.u32 %s5013_s28, 3  ;;  %s205_s4 = scalar_lea.sflag [#allocation6], %s5013_s28 }
  0x26   : > { %s5017_s6 = scalar_lea.vmem [#allocation5], %s4616_s30 }
  0x27   : > { %4856 = dma.done.wait (%p4981_p12), %s205_s4, 128  }
  0x28   : > { %4858 = vsyncadd (%p4981_p12), %s205_s4, 4294967168  ;;  %v268_v0 = vld [vmem:[#allocation2 + $0xf0] sm:$0xff]  ;;  %v266_v1 = vld [vmem:[#allocation2 + $0xe0] sm:$0xff]  ;;  %s4626_s19 = smul.u32 24, %s5013_s28  ;;  %vm1675_vm0 = vcmask 1043456   ;;  %s4430_s30 = scalar_lea.sflag [#allocation4], %s5013_s28 }
  0x29   : > { %v264_v2 = vld [vmem:[#allocation2 + $0xd0] sm:$0xff]  ;;  %v5023_v3 = vand.u32 4294901760, %v268_v0  ;;  %v5025_v4 = vand.u32 4294901760, %v266_v1  ;;  %v262_v6 = vld [vmem:[#allocation2 + $0xc0] sm:$0xff]  ;;  %s4627_s10 = smul.u32 24, %s4881_s15  ;;  %s4791_s11 = scalar_lea.hbm %s7184_s2, 48 }
  0x2a   : > { %v5027_v5 = vand.u32 4294901760, %v264_v2  ;;  %v260_v7 = vld [vmem:[#allocation2 + $0xb0] sm:$0xff]  ;;  %v258_v8 = vld [vmem:[#allocation2 + $0xa0] sm:$0xff]  ;;  %v5029_v9 = vand.u32 4294901760, %v262_v6  ;;  %s6482_s23 = scalar_lea.vmem [#allocation7], %s4626_s19  ;;  %s6491_s5 = scalar_lea.vmem [#allocation8], %s4626_s19 }
  0x2b   : > { %7706 = vst [vmem:[#allocation14_spill] sm:$0xff] %v5023_v3  ;;  %v5031_v10 = vand.u32 4294901760, %v260_v7  ;;  %v5033_v11 = vand.u32 4294901760, %v258_v8  ;;  %v256_v12 = vld [vmem:[#allocation2 + $0x90] sm:$0xff]  ;;  %v254_v13 = vld [vmem:[#allocation2 + $0x80] sm:$0xff]  ;;  %309 = vmatpush.msra.mxu0 %v5023_v3  ;;  %v5037_v14 = vsub.f32 %v268_v0, %v5023_v3  ;;  %v5040_v15 = vsub.f32 %v266_v1, %v5025_v4  ;;  %505 = vmatpush.msra.mxu3 %v5023_v3  ;;  %s4448_s21 = scalar_lea.hbm %s7184_s2, %s4627_s10  ;;  %s4449_s22 = sshll.u32 %s6482_s23, 4  ;;  %s7123_s22 = int_to_ptr.vmem [resolvable:$true] %s4449_s22 }
  0x2c   : > { %7707 = vst [vmem:[#allocation15_spill] sm:$0xff] %v5025_v4  ;;  %v5044_v16 = vsub.f32 %v264_v2, %v5027_v5  ;;  %v5046_v17 = vand.u32 4294901760, %v256_v12  ;;  %v252_v18 = vld [vmem:[#allocation2 + $0x70] sm:$0xff]  ;;  %v5049_v19 = vsub.f32 %v262_v6, %v5029_v9  ;;  %v5068_v25 = vand.u32 4294901760, %v254_v13  ;;  %v250_v26 = vld [vmem:[#allocation2 + $0x60] sm:$0xff]  ;;  %s4451_s18 = sshll.u32 %s4448_s21, 4  ;;  %s4467_s26 = scalar_lea.hbm %s7185_s3, %s4627_s10  ;;  %s4452_s18 = int_to_ptr.hbm [resolvable:$true] %s4451_s18 }
  0x2d   : > { %7708 = vst [vmem:[#allocation16_spill] sm:$0xff] %v5027_v5  ;;  %v5052_v20 = vsub.f32 %v260_v7, %v5031_v10  ;;  %v5055_v21 = vsub.f32 %v258_v8, %v5033_v11  ;;  %311 = vmatpush.msra.mxu0 %v5025_v4  ;;  %452 = vmatpush.msra.mxu2 %v5037_v14  ;;  %v5060_v22 = vand.u32 4294901760, %v5037_v14  ;;  %v5063_v23 = vand.u32 4294901760, %v5040_v15  ;;  %v248_v34 = vld [vmem:[#allocation2 + $0x50] sm:$0xff]  ;;  %v246_v42 = vld [vmem:[#allocation2 + $0x40] sm:$0xff]  ;;  %s4468_s15 = sshll.u32 %s6491_s5, 4  ;;  %s7128_s15 = int_to_ptr.vmem [resolvable:$true] %s4468_s15 }
  0x2e   : > { %7709 = vst [vmem:[#allocation17_spill] sm:$0xff] %v5029_v9  ;;  %v5066_v24 = vand.u32 4294901760, %v5044_v16  ;;  %507 = vmatpush.msra.mxu3 %v5025_v4  ;;  %v5072_v27 = vand.u32 4294901760, %v5049_v19  ;;  %v5074_v28 = vand.u32 4294901760, %v252_v18  ;;  %v5077_v29 = vsub.f32 %v256_v12, %v5046_v17  ;;  %v244_v48 = vld [vmem:[#allocation2 + $0x30] sm:$0xff]  ;;  %v242_v54 = vld [vmem:[#allocation2 + $0x20] sm:$0xff] }
  0x2f   : > { %7710 = vst [vmem:[#allocation18_spill] sm:$0xff] %v5031_v10  ;;  %313 = vmatpush.msra.mxu0 %v5027_v5  ;;  %455 = vmatpush.msra.mxu2 %v5040_v15  ;;  %v352_v30 = vsub.f32 %v5037_v14, %v5060_v22  ;;  %v358_v31 = vsub.f32 %v5040_v15, %v5063_v23  ;;  %v5088_v33 = vand.u32 4294901760, %v5052_v20  ;;  %v5091_v35 = vand.u32 4294901760, %v250_v26  ;;  %v5144_v55 = vld [vmem:[%s5017_s6] sm:$0xff]  ;;  %v300_v60 = vld [vmem:[#allocation2 + $0x1f0] sm:$0xff]  ;;  %s4470_s27 = sshll.u32 %s4467_s26, 4  ;;  %s7130_s27 = int_to_ptr.hbm [resolvable:$true] %s4470_s27 }
  0x30   : > { %7711 = vst [vmem:[#allocation19_spill] sm:$0xff] %v5033_v11  ;;  %v364_v32 = vsub.f32 %v5044_v16, %v5066_v24  ;;  %509 = vmatpush.msra.mxu3 %v5027_v5  ;;  %v5094_v36 = vand.u32 4294901760, %v5055_v21  ;;  %v370_v39 = vsub.f32 %v5049_v19, %v5072_v27  ;;  %v5105_v40 = vsub.f32 %v254_v13, %v5068_v25  ;;  %v240_v62 = vld [vmem:[#allocation2 + $0x10] sm:$0xff]  ;;  %v238_v6 = vld [vmem:[#allocation2] sm:$0xff]  ;;  %s4785_s4 = sshra.s32 %s4452_s18, 4  ;;  %s4786_s4 = int_to_ptr.hbm [resolvable:$true] %s4785_s4 }
  0x31   : > { %7712 = vst [vmem:[#allocation20_spill] sm:$0xff] %v5037_v14  ;;  %315 = vmatpush.msra.mxu0 %v5029_v9  ;;  %v5097_v37 = vand.u32 4294901760, %v352_v30  ;;  %458 = vmatpush.msra.mxu2 %v5044_v16  ;;  %v5100_v38 = vand.u32 4294901760, %v358_v31  ;;  %v5108_v41 = vand.u32 4294901760, %v248_v34  ;;  %v376_v44 = vsub.f32 %v5052_v20, %v5088_v33  ;;  %v298_v7 = vld [vmem:[#allocation2 + $0x1e0] sm:$0xff]  ;;  %s4787_s6 = scalar_lea.hbm %s4786_s4, 24  ;;  %p4792_p10 = scmp.lt.s32.totalorder %s4786_s4, %s7184_s2 }
  0x32   : > { %7713 = vst [vmem:[#allocation21_spill] sm:$0xff] %v5040_v15  ;;  %511 = vmatpush.msra.mxu3 %v5029_v9  ;;  %v5112_v43 = vand.u32 4294901760, %v364_v32  ;;  %v5117_v45 = vand.u32 4294901760, %v5077_v29  ;;  %v5120_v46 = vsub.f32 %v252_v18, %v5074_v28  ;;  %v382_v47 = vsub.f32 %v5055_v21, %v5094_v36  ;;  %p4788_p1 = scmp.ne.s32.totalorder %s4786_s4, %s4787_s6  ;;  %p4793_p11 = scmp.lt.s32.totalorder %s4791_s11, %s4787_s6 }
  0x33   : > { %7714 = vst [vmem:[#allocation22_spill] sm:$0xff] %v5044_v16  ;;  %317 = vmatpush.msra.mxu0 %v5031_v10  ;;  %354 = vmatpush.msra.mxu1 %v5097_v37  ;;  %v5128_v49 = vand.u32 4294901760, %v370_v39  ;;  %v5130_v50 = vand.u32 4294901760, %v246_v42  ;;  %v5133_v51 = vand.u32 4294901760, %v5105_v40  ;;  %v5136_v52 = vsub.f32 %v250_v26, %v5091_v35  ;;  %v286_v16 = vld [vmem:[#allocation2 + $0x180] sm:$0xff] }
  0x34   : > { %7715 = vst [vmem:[#allocation23_spill] sm:$0xff] %v5046_v17  ;;  %461 = vmatpush.msra.mxu2 %v5049_v19  ;;  %513 = vmatpush.msra.mxu3 %v5031_v10  ;;  %v5141_v53 = vsub.f32 %v248_v34, %v5108_v41  ;;  %v5148_v56 = vand.u32 4294901760, %v376_v44  ;;  %v388_v57 = vsub.f32 %v5077_v29, %v5117_v45  ;;  %v5152_v58 = vand.u32 4294901760, %v244_v48  ;;  %v296_v34 = vld [vmem:[#allocation2 + $0x1d0] sm:$0xff]  ;;  %p4789_p3 = pnand %p4788_p1, %p4987_p4  ;;  %p4794_p12 = por %p4793_p11, %p4792_p10 }
  0x35   : > { %7716 = vst [vmem:[#allocation24_spill] sm:$0xff] %v5049_v19  ;;  %319 = vmatpush.msra.mxu0 %v5033_v11  ;;  %360 = vmatpush.msra.mxu1 %v5100_v38  ;;  %v5155_v59 = vand.u32 4294901760, %v5120_v46  ;;  %v5159_v61 = vand.u32 4294901760, %v382_v47  ;;  %v394_v63 = vsub.f32 %v5105_v40, %v5133_v51  ;;  %v5166_v0 = vand.u32 4294901760, %v242_v54 }
  0x36   : > { %7717 = vst [vmem:[#allocation25_spill] sm:$0xff] %v5052_v20  ;;  %464 = vmatpush.msra.mxu2 %v5052_v20  ;;  %515 = vmatpush.msra.mxu3 %v5033_v11  ;;  %v5169_v1 = vand.u32 4294901760, %v5136_v52  ;;  %v5172_v2 = vsub.f32 %v246_v42, %v5130_v50  ;;  %v5177_v8 = vand.u32 4294901760, %v5141_v53  ;;  %v5179_v12 = vand.u32 4294901760, %v300_v60  ;;  %v288_v20 = vld [vmem:[#allocation2 + $0x190] sm:$0xff]  ;;  %p4790_p9 = pneg %p4789_p3 }
  0x37   : > { %7718 = vst [vmem:[#allocation26_spill] sm:$0xff] %v5055_v21  ;;  %321 = vmatpush.msra.mxu0 %v5046_v17  ;;  %366 = vmatpush.msra.mxu1 %v5112_v43  ;;  %v5183_v13 = vand.u32 4294901760, %v388_v57  ;;  %v400_v18 = vsub.f32 %v5120_v46, %v5155_v59  ;;  %v5187_v26 = vand.u32 4294901760, %v240_v62  ;;  %v5190_v30 = vsub.f32 %v244_v48, %v5152_v58 }
  0x38   : > { %7719 = vst [vmem:[#allocation27_spill] sm:$0xff] %v5060_v22  ;;  %467 = vmatpush.msra.mxu2 %v5055_v21  ;;  %517 = vmatpush.msra.mxu3 %v5046_v17  ;;  %v5194_v31 = vand.u32 4294901760, %v238_v6  ;;  %v5196_v32 = vand.u32 4294901760, %v298_v7  ;;  %v5200_v39 = vand.u32 4294901760, %v394_v63  ;;  %v406_v42 = vsub.f32 %v5136_v52, %v5169_v1  ;;  %v294_v63 = vld [vmem:[#allocation2 + $0x1c0] sm:$0xff]  ;;  %p4795_p13 = pnand %p4794_p12, %p4790_p9 }
  0x39   : > { %7720 = vst [vmem:[#allocation28_spill] sm:$0xff] %v5063_v23  ;;  %323 = vmatpush.msra.mxu0 %v5068_v25  ;;  %372 = vmatpush.msra.mxu1 %v5128_v49  ;;  %v5205_v44 = vand.u32 4294901760, %v5172_v2  ;;  %v5208_v47 = vsub.f32 %v242_v54, %v5166_v0  ;;  %v412_v48 = vsub.f32 %v5141_v53, %v5177_v8  ;;  %v5222_v54 = vand.u32 4294901760, %v5190_v30 }
  0x3a   : > { %7721 = vst [vmem:[#allocation29_spill] sm:$0xff] %v5066_v24  ;;  %470 = vmatpush.msra.mxu2 %v5077_v29  ;;  %519 = vmatpush.msra.mxu3 %v5068_v25  ;;  %v5215_v57 = vsub.f32 %v300_v60, %v5179_v12  ;;  %v5232_v60 = vsub.f32 %v238_v6, %v5194_v31  ;;  %v5246_v21 = vand.u32 4294901760, %v294_v63  ;;  %v5290_v15 = vand.u32 4294901760, %v288_v20 }
  0x3b   : > { %7722 = vst [vmem:[#allocation30_spill] sm:$0xff] %v5068_v25  ;;  %325 = vmatpush.msra.mxu0 %v5074_v28  ;;  %378 = vmatpush.msra.mxu1 %v5148_v56  ;;  %v5249_v6 = vand.u32 4294901760, %v412_v48  ;;  %v5308_v14 = vand.u32 4294901760, %v286_v16 }
  0x3c   : > { %7723 = vst [vmem:[#allocation31_spill] sm:$0xff] %v5072_v27  ;;  %473 = vmatpush.msra.mxu2 %v5105_v40  ;;  %521 = vmatpush.msra.mxu3 %v5074_v28 }
  0x3d   : > { %7724 = vst [vmem:[#allocation32_spill] sm:$0xff] %v5074_v28  ;;  %327 = vmatpush.msra.mxu0 %v5091_v35  ;;  %384 = vmatpush.msra.mxu1 %v5159_v61 }
  0x3e   : > { %7725 = vst [vmem:[#allocation33_spill] sm:$0xff] %v5077_v29  ;;  %476 = vmatpush.msra.mxu2 %v5120_v46  ;;  %523 = vmatpush.msra.mxu3 %v5091_v35  ;;  %v5235_v29 = vsub.f32 %v298_v7, %v5196_v32  ;;  %v5253_v7 = vand.u32 4294901760, %v5215_v57 }
  0x3f   : > { %7726 = vst [vmem:[#allocation34_spill] sm:$0xff] %v5088_v33  ;;  %329 = vmatpush.msra.mxu0 %v5108_v41  ;;  %390 = vmatpush.msra.mxu1 %v5183_v13 }
  0x40   : > { %7727 = vst [vmem:[#allocation35_spill] sm:$0xff] %v5091_v35  ;;  %479 = vmatpush.msra.mxu2 %v5136_v52  ;;  %525 = vmatpush.msra.mxu3 %v5108_v41 }
  0x41   : > { %7728 = vst [vmem:[#allocation36_spill] sm:$0xff] %v5094_v36  ;;  %331 = vmatpush.msra.mxu0 %v5130_v50  ;;  %396 = vmatpush.msra.mxu1 %v5200_v39 }
  0x42   : > { %7729 = vst [vmem:[#allocation37_spill] sm:$0xff] %v5097_v37  ;;  %482 = vmatpush.msra.mxu2 %v5141_v53  ;;  %527 = vmatpush.msra.mxu3 %v5130_v50 }
  0x43   : > { %7730 = vst [vmem:[#allocation38_spill] sm:$0xff] %v5100_v38  ;;  %333 = vmatpush.msra.mxu0 %v5152_v58 }
  0x44   : > { %7731 = vst [vmem:[#allocation39_spill] sm:$0xff] %v5105_v40  ;;  %v5227_v40 = vand.u32 4294901760, %v296_v34  ;;  %485 = vmatpush.msra.mxu2 %v5172_v2  ;;  %529 = vmatpush.msra.mxu3 %v5152_v58 }
  0x45   : > { %7732 = vst [vmem:[#allocation40_spill] sm:$0xff] %v5108_v41  ;;  %335 = vmatpush.msra.mxu0 %v5166_v0 }
  0x46   : > { %7733 = vst [vmem:[#allocation41_spill] sm:$0xff] %v5112_v43  ;;  %488 = vmatpush.msra.mxu2 %v5190_v30  ;;  %531 = vmatpush.msra.mxu3 %v5166_v0  ;;  %v693_v43 = vsub.f32 %v5215_v57, %v5253_v7 }
  0x47   : > { %7734 = vst [vmem:[#allocation42_spill] sm:$0xff] %v5117_v45  ;;  %337 = vmatpush.msra.mxu0 %v5187_v26 }
  0x48   : > { %7735 = vst [vmem:[#allocation43_spill] sm:$0xff] %v5120_v46  ;;  %v5225_v46 = vsub.f32 %v240_v62, %v5187_v26  ;;  %v418_v62 = vsub.f32 %v5172_v2, %v5205_v44  ;;  %491 = vmatpush.msra.mxu2 %v5208_v47  ;;  %533 = vmatpush.msra.mxu3 %v5187_v26 }
  0x49   : > { %7736 = vst [vmem:[#allocation44_spill] sm:$0xff] %v5128_v49  ;;  %v5282_v49 = vsub.f32 %v294_v63, %v5246_v21  ;;  %339 = vmatpush.msra.mxu0 %v5194_v31 }
  0x4a   : > { %7737 = vst [vmem:[#allocation45_spill] sm:$0xff] %v5130_v50  ;;  %v5277_v19 = vand.u32 4294901760, %v418_v62  ;;  %494 = vmatpush.msra.mxu2 %v5225_v46  ;;  %535 = vmatpush.msra.mxu3 %v5194_v31 }
  0x4b   : > { %7738 = vst [vmem:[#allocation46_spill] sm:$0xff] %v5133_v51  ;;  %v5317_v37 = vand.u32 4294901760, %v5282_v49  ;;  %546 = vmatpush.msrb.mxu0 %v5060_v22 }
  0x4c   : > { %7739 = vst [vmem:[#allocation47_spill] sm:$0xff] %v5136_v52  ;;  %v5244_v52 = vand.u32 4294901760, %v5208_v47  ;;  %497 = vmatpush.msra.mxu2 %v5232_v60 }
  0x4d   : > { %7740 = vst [vmem:[#allocation48_spill] sm:$0xff] %v5141_v53  ;;  %v5263_v53 = vsub.f32 %v296_v34, %v5227_v40  ;;  %550 = vmatpush.msrb.mxu0 %v5063_v23 }
  0x4e   : > { %7741 = vst [vmem:[#allocation49_spill] sm:$0xff] %v5144_v55  ;;  %v430_v34 = vsub.f32 %v5208_v47, %v5244_v52  ;;  %650 = vmatpush.msrb.mxu2 %v5179_v12 }
  0x4f   : > { %7742 = vst [vmem:[#allocation50_spill] sm:$0xff] %v5148_v56  ;;  %v5270_v56 = vand.u32 4294901760, %v5232_v60  ;;  %554 = vmatpush.msrb.mxu0 %v5066_v24  ;;  %v276_v24 = vld [vmem:[#allocation2 + $0x130] sm:$0xff] }
  0x50   : > { %7743 = vst [vmem:[#allocation51_spill] sm:$0xff] %v5152_v58  ;;  %652 = vmatpush.msrb.mxu2 %v5196_v32 }
  0x51   : > { %7744 = vst [vmem:[#allocation52_spill] sm:$0xff] %v5155_v59  ;;  %558 = vmatpush.msrb.mxu0 %v5072_v27 }
  0x52   : > { %303 = vst [vmem:[#allocation1] ss:$2 sm:$0xff] %v5144_v55  ;;  %v5219_v55 = vand.u32 4294901760, %v400_v18  ;;  %v292_v18 = vld [vmem:[#allocation2 + $0x1b0] sm:$0xff]  ;;  %654 = vmatpush.msrb.mxu2 %v5227_v40 }
  0x53   : > { %7745 = vst [vmem:[#allocation53_spill] sm:$0xff] %v5159_v61  ;;  %v5260_v61 = vand.u32 4294901760, %v5225_v46  ;;  %v5265_v48 = vand.u32 4294901760, %v292_v18  ;;  %562 = vmatpush.msrb.mxu0 %v5088_v33 }
  0x54   : > { %7746 = vst [vmem:[#allocation54_spill] sm:$0xff] %v5166_v0  ;;  %402 = vmatpush.msra.mxu1 %v5219_v55  ;;  %656 = vmatpush.msrb.mxu2 %v5246_v21 }
  0x55   : > { %7747 = vst [vmem:[#allocation55_spill] sm:$0xff] %v5169_v1  ;;  %v436_v63 = vsub.f32 %v5225_v46, %v5260_v61  ;;  %566 = vmatpush.msrb.mxu0 %v5094_v36 }
  0x56   : > { %7748 = vst [vmem:[#allocation56_spill] sm:$0xff] %v5172_v2  ;;  %658 = vmatpush.msrb.mxu2 %v5265_v48 }
  0x57   : > { %7749 = vst [vmem:[#allocation57_spill] sm:$0xff] %v5177_v8  ;;  %570 = vmatpush.msrb.mxu0 %v5117_v45 }
  0x58   : > { %7750 = vst [vmem:[#allocation58_spill] sm:$0xff] %v5179_v12 }
  0x59   : > { %7751 = vst [vmem:[#allocation59_spill] sm:$0xff] %v5183_v13  ;;  %v5239_v13 = vand.u32 4294901760, %v406_v42  ;;  %v424_v42 = vsub.f32 %v5190_v30, %v5222_v54  ;;  %v304_v27 = vld.sshfl [vmem:[#allocation1] sm:$0xff pattern:$0x75316420]  ;;  %574 = vmatpush.msrb.mxu0 %v5133_v51  ;;  %v270_v51 = vld [vmem:[#allocation2 + $0x100] sm:$0xff] }
  0x5a   : > { %7752 = vst [vmem:[#allocation60_spill] sm:$0xff] %v5187_v26  ;;  %v5327_v26 = vsub.f32 %v288_v20, %v5290_v15 }
  0x5b   : > { %7753 = vst [vmem:[#allocation61_spill] sm:$0xff] %v5190_v30  ;;  %408 = vmatpush.msra.mxu1 %v5239_v13  ;;  %v5294_v62 = vand.u32 4294901760, %v424_v42  ;;  %v5302_v30 = vsub.f32 %v292_v18, %v5265_v48  ;;  %v284_v42 = vld [vmem:[#allocation2 + $0x170] sm:$0xff]  ;;  %v442_v18 = vsub.f32 %v5232_v60, %v5270_v56  ;;  %578 = vmatpush.msrb.mxu0 %v5155_v59  ;;  %v5470_v59 = vand.u32 4294901760, %v270_v51 }
  0x5c   : > { %7754 = vst [vmem:[#allocation62_spill] sm:$0xff] %v5194_v31  ;;  %v5338_v22 = vand.u32 4294901760, %v284_v42 }
  0x5d   : > { %7755 = vst [vmem:[#allocation63_spill] sm:$0xff] %v5196_v32  ;;  %414 = vmatpush.msra.mxu1 %v5249_v6  ;;  %582 = vmatpush.msrb.mxu0 %v5169_v1  ;;  %v305_v1 = vld.sshfl [vmem:[#allocation1 + $0x8] sm:$0xff pattern:$0x75316420] }
  0x5e   : > { %7756 = vst [vmem:[#allocation64_spill] sm:$0xff] %v5200_v39  ;;  %v290_v39 = vld [vmem:[#allocation2 + $0x1a0] sm:$0xff] }
  0x5f   : > { %7757 = vst [vmem:[#allocation65_spill] sm:$0xff] %v5205_v44  ;;  %v5284_v2 = vand.u32 4294901760, %v290_v39  ;;  %420 = vmatpush.msra.mxu1 %v5277_v19  ;;  %586 = vmatpush.msrb.mxu0 %v5177_v8 }
  0x60   : > { %7758 = vst [vmem:[#allocation66_spill] sm:$0xff] %v5208_v47 }
  0x61   : > { %7759 = vst [vmem:[#allocation67_spill] sm:$0xff] %v5215_v57  ;;  %v5320_v47 = vsub.f32 %v290_v39, %v5284_v2  ;;  %426 = vmatpush.msra.mxu1 %v5294_v62  ;;  %660 = vmatpush.msrb.mxu2 %v5284_v2 }
  0x62   : > { %7760 = vst [vmem:[#allocation68_spill] sm:$0xff] %v5219_v55  ;;  %v5273_v55 = vand.u32 4294901760, %v5235_v29  ;;  %590 = vmatpush.msrb.mxu0 %v5205_v44 }
  0x63   : > { %7761 = vst [vmem:[#allocation69_spill] sm:$0xff] %v5222_v54  ;;  %662 = vmatpush.msrb.mxu2 %v5290_v15 }
  0x64   : > { %7762 = vst [vmem:[#allocation70_spill] sm:$0xff] %v5225_v46  ;;  %v699_v38 = vsub.f32 %v5235_v29, %v5273_v55  ;;  %v5349_v46 = vand.u32 4294901760, %v442_v18  ;;  %594 = vmatpush.msrb.mxu0 %v5222_v54 }
  0x65   : > { %7763 = vst [vmem:[#allocation71_spill] sm:$0xff] %v5227_v40  ;;  %664 = vmatpush.msrb.mxu2 %v5308_v14 }
  0x66   : > { %7764 = vst [vmem:[#allocation72_spill] sm:$0xff] %v5232_v60  ;;  %v5342_v20 = vand.u32 4294901760, %v699_v38  ;;  %v278_v38 = vld [vmem:[#allocation2 + $0x140] sm:$0xff]  ;;  %598 = vmatpush.msrb.mxu0 %v5244_v52 }
  0x67   : > { %7765 = vst [vmem:[#allocation73_spill] sm:$0xff] %v5235_v29  ;;  %666 = vmatpush.msrb.mxu2 %v5338_v22 }
  0x68   : > { %7766 = vst [vmem:[#allocation74_spill] sm:$0xff] %v5239_v13  ;;  %v5299_v13 = vand.u32 4294901760, %v5263_v53  ;;  %602 = vmatpush.msrb.mxu0 %v5260_v61 }
  0x69   : > { %7767 = vst [vmem:[#allocation75_spill] sm:$0xff] %v5244_v52 }
  0x6a   : > { %7768 = vst [vmem:[#allocation76_spill] sm:$0xff] %v5246_v21  ;;  %v705_v39 = vsub.f32 %v5263_v53, %v5299_v13  ;;  %606 = vmatpush.msrb.mxu0 %v5270_v56 }
  0x6b   : > { %7769 = vst [vmem:[#allocation77_spill] sm:$0xff] %v5249_v6  ;;  %v5312_v6 = vand.u32 4294901760, %v430_v34  ;;  %v282_v34 = vld [vmem:[#allocation2 + $0x160] sm:$0xff] }
  0x6c   : > { %7770 = vst [vmem:[#allocation78_spill] sm:$0xff] %v5253_v7  ;;  %v5336_v7 = vand.u32 4294901760, %v5302_v30  ;;  %v5356_v23 = vand.u32 4294901760, %v282_v34  ;;  %v5365_v18 = vand.u32 4294901760, %v705_v39 }
  0x6d   : > { %7771 = vst [vmem:[#allocation79_spill] sm:$0xff] %v5260_v61  ;;  %432 = vmatpush.msra.mxu1 %v5312_v6 }
  0x6e   : > { %7772 = vst [vmem:[#allocation80_spill] sm:$0xff] %v5263_v53  ;;  %v717_v60 = vsub.f32 %v5302_v30, %v5336_v7  ;;  %668 = vmatpush.msrb.mxu2 %v5356_v23 }
  0x6f   : > { %7773 = vst [vmem:[#allocation81_spill] sm:$0xff] %v5265_v48 }
  0x70   : > { %7774 = vst [vmem:[#allocation82_spill] sm:$0xff] %v5270_v56 }
  0x71   : > { %7775 = vst [vmem:[#allocation83_spill] sm:$0xff] %v5273_v55  ;;  %v5324_v55 = vand.u32 4294901760, %v693_v43  ;;  %v5345_v43 = vsub.f32 %v286_v16, %v5308_v14  ;;  %v5361_v16 = vand.u32 4294901760, %v5327_v26 }
  0x72   : > { %7776 = vst [vmem:[#allocation84_spill] sm:$0xff] %v5277_v19  ;;  %v5330_v19 = vand.u32 4294901760, %v436_v63  ;;  %v280_v63 = vld [vmem:[#allocation2 + $0x150] sm:$0xff] }
  0x73   : > { %7777 = vst [vmem:[#allocation85_spill] sm:$0xff] %v5282_v49  ;;  %695 = vmatpush.msrb.mxu3 %v5324_v55 }
  0x74   : > { %7778 = vst [vmem:[#allocation86_spill] sm:$0xff] %v5284_v2  ;;  %438 = vmatpush.msra.mxu1 %v5330_v19 }
  0x75   : > { %7779 = vst [vmem:[#allocation87_spill] sm:$0xff] %v5290_v15  ;;  %701 = vmatpush.msrb.mxu3 %v5342_v20 }
  0x76   : > { %7780 = vst [vmem:[#allocation88_spill] sm:$0xff] %v5294_v62  ;;  %v711_v62 = vsub.f32 %v5282_v49, %v5317_v37  ;;  %444 = vmatpush.msra.mxu1 %v5349_v46 }
  0x77   : > { %7781 = vst [vmem:[#allocation89_spill] sm:$0xff] %v5299_v13  ;;  %v5354_v13 = vand.u32 4294901760, %v5320_v47  ;;  %707 = vmatpush.msrb.mxu3 %v5365_v18 }
  0x78   : > { %7782 = vst [vmem:[#allocation90_spill] sm:$0xff] %v5302_v30  ;;  %v5381_v39 = vand.u32 4294901760, %v711_v62  ;;  %613 = vmatpush.msrb.mxu1 %v5023_v3  ;;  %v5396_v62 = vand.u32 4294901760, %v717_v60  ;;  %v274_v3 = vld [vmem:[#allocation2 + $0x120] sm:$0xff] }
  0x79   : > { %7783 = vst [vmem:[#allocation91_spill] sm:$0xff] %v5308_v14 }
  0x7a   : > { %7784 = vst [vmem:[#allocation92_spill] sm:$0xff] %v5312_v6  ;;  %v5370_v6 = vsub.f32 %v284_v42, %v5338_v22  ;;  %v723_v42 = vsub.f32 %v5320_v47, %v5354_v13  ;;  %615 = vmatpush.msrb.mxu1 %v5025_v4  ;;  %713 = vmatpush.msrb.mxu3 %v5381_v39  ;;  %v272_v4 = vld [vmem:[#allocation2 + $0x110] sm:$0xff] }
  0x7b   : > { %7785 = vst [vmem:[#allocation93_spill] sm:$0xff] %v5317_v37  ;;  %v5372_v37 = vand.u32 4294901760, %v280_v63 }
  0x7c   : > { %7786 = vst [vmem:[#allocation94_spill] sm:$0xff] %v5320_v47  ;;  %v5412_v60 = vand.u32 4294901760, %v723_v42  ;;  %617 = vmatpush.msrb.mxu1 %v5027_v5  ;;  %719 = vmatpush.msrb.mxu3 %v5396_v62 }
  0x7d   : > { %7787 = vst [vmem:[#allocation95_spill] sm:$0xff] %v5324_v55  ;;  %v5377_v55 = vand.u32 4294901760, %v5345_v43  ;;  %670 = vmatpush.msrb.mxu2 %v5372_v37 }
  0x7e   : > { %7788 = vst [vmem:[#allocation96_spill] sm:$0xff] %v5327_v26  ;;  %619 = vmatpush.msrb.mxu1 %v5029_v9  ;;  %725 = vmatpush.msrb.mxu3 %v5412_v60 }
  0x7f   : > { %7789 = vst [vmem:[#allocation97_spill] sm:$0xff] %v5330_v19  ;;  %v5386_v19 = vsub.f32 %v282_v34, %v5356_v23  ;;  %v5402_v34 = vsub.f32 %v280_v63, %v5372_v37  ;;  %v735_v33 = vsub.f32 %v5345_v43, %v5377_v55 }
  0x80   : > { %7790 = vst [vmem:[#allocation98_spill] sm:$0xff] %v5336_v7  ;;  %v5388_v7 = vand.u32 4294901760, %v278_v38  ;;  %621 = vmatpush.msrb.mxu1 %v5031_v10 }
  0x81   : > { %7791 = vst [vmem:[#allocation99_spill] sm:$0xff] %v5338_v22 }
  0x82   : > { %7792 = vst [vmem:[#allocation100_spill] sm:$0xff] %v5342_v20  ;;  %v729_v20 = vsub.f32 %v5327_v26, %v5361_v16  ;;  %v5418_v63 = vsub.f32 %v278_v38, %v5388_v7  ;;  %v5433_v38 = vand.u32 4294901760, %v274_v3  ;;  %623 = vmatpush.msrb.mxu1 %v5033_v11  ;;  %672 = vmatpush.msrb.mxu2 %v5388_v7 }
  0x83   : > { %7793 = vst [vmem:[#allocation101_spill] sm:$0xff] %v5345_v43 }
  0x84   : > { %7794 = vst [vmem:[#allocation102_spill] sm:$0xff] %v5349_v46  ;;  %v5399_v46 = vand.u32 4294901760, %v5370_v6  ;;  %v5424_v36 = vand.u32 4294901760, %v729_v20  ;;  %v5440_v20 = vand.u32 4294901760, %v735_v33  ;;  %v5447_v45 = vand.u32 4294901760, %v5418_v63  ;;  %625 = vmatpush.msrb.mxu1 %v5046_v17 }
  0x85   : > { %7795 = vst [vmem:[#allocation103_spill] sm:$0xff] %v5354_v13  ;;  %v5404_v13 = vand.u32 4294901760, %v276_v24  ;;  %v5509_v17 = vand.u32 4294901760, %v305_v1 }
  0x86   : > { %7796 = vst [vmem:[#allocation104_spill] sm:$0xff] %v5356_v23  ;;  %v741_v42 = vsub.f32 %v5370_v6, %v5399_v46  ;;  %731 = vmatpush.msrb.mxu3 %v5424_v36  ;;  %627 = vmatpush.msrb.mxu1 %v5068_v25 }
  0x87   : > { %7797 = vst [vmem:[#allocation105_spill] sm:$0xff] %v5361_v16  ;;  %v5420_v16 = vand.u32 4294901760, %v304_v27  ;;  %674 = vmatpush.msrb.mxu2 %v5404_v13 }
  0x88   : > { %7798 = vst [vmem:[#allocation106_spill] sm:$0xff] %v5365_v18  ;;  %v5415_v18 = vand.u32 4294901760, %v5386_v19  ;;  %v5458_v33 = vand.u32 4294901760, %v741_v42  ;;  %737 = vmatpush.msrb.mxu3 %v5440_v20  ;;  %629 = vmatpush.msrb.mxu1 %v5074_v28 }
  0x89   : > { %7799 = vst [vmem:[#allocation107_spill] sm:$0xff] %v5370_v6  ;;  %v5450_v5 = vsub.f32 %v304_v27, %v5420_v16  ;;  %v5466_v27 = vsub.f32 %v274_v3, %v5433_v38  ;;  %676 = vmatpush.msrb.mxu2 %v5433_v38  ;;  %446 = vmatmul.f32.vlgmr.msra.gmra.mxu1 %v5420_v16 }
  0x8a   : > { %7800 = vst [vmem:[#allocation108_spill] sm:$0xff] %v5372_v37  ;;  %743 = vmatpush.msrb.mxu3 %v5458_v33  ;;  %631 = vmatpush.msrb.mxu1 %v5091_v35 }
  0x8b   : > { %7801 = vst [vmem:[#allocation109_spill] sm:$0xff] %v5377_v55  ;;  %v5436_v55 = vsub.f32 %v276_v24, %v5404_v13  ;;  %v5452_v24 = vand.u32 4294901760, %v272_v4  ;;  %v5479_v10 = vand.u32 4294901760, %v5450_v5  ;;  %v5493_v11 = vand.u32 4294901760, %v5466_v27  ;;  %500 = vmatmul.f32.vlgmr.msra.gmra.mxu2 %v5450_v5 }
  0x8c   : > { %7802 = vst [vmem:[#allocation110_spill] sm:$0xff] %v5381_v39  ;;  %v5431_v39 = vand.u32 4294901760, %v5402_v34  ;;  %633 = vmatpush.msrb.mxu1 %v5108_v41 }
  0x8d   : > { %7803 = vst [vmem:[#allocation111_spill] sm:$0xff] %v5386_v19  ;;  %v5463_v9 = vand.u32 4294901760, %v5436_v55  ;;  %v5482_v3 = vsub.f32 %v272_v4, %v5452_v24  ;;  %v5498_v4 = vsub.f32 %v270_v51, %v5470_v59  ;;  %678 = vmatpush.msrb.mxu2 %v5452_v24  ;;  %539 = vmatmul.f32.vlgmr.msra.gmra.mxu3 %v5479_v10 }
  0x8e   : > { %7804 = vst [vmem:[#allocation112_spill] sm:$0xff] %v5388_v7  ;;  %635 = vmatpush.msrb.mxu1 %v5130_v50 }
  0x8f   : > { %7805 = vst [vmem:[#allocation113_spill] sm:$0xff] %v5396_v62  ;;  %v747_v62 = vsub.f32 %v5386_v19, %v5415_v18  ;;  %v5507_v8 = vand.u32 4294901760, %v5482_v3  ;;  %680 = vmatpush.msrb.mxu2 %v5470_v59 }
  0x90   : > { %7806 = vst [vmem:[#allocation114_spill] sm:$0xff] %v5399_v46  ;;  %637 = vmatpush.msrb.mxu1 %v5152_v58 }
  0x91   : > { %7807 = vst [vmem:[#allocation115_spill] sm:$0xff] %v5402_v34  ;;  %v5474_v42 = vand.u32 4294901760, %v747_v62 }
  0x92   : > { %7808 = vst [vmem:[#allocation116_spill] sm:$0xff] %v5404_v13  ;;  %639 = vmatpush.msrb.mxu1 %v5166_v0  ;;  %v295_v0 = vld [vmem:[#allocation2 + $0x1c8] sm:$0xff] }
  0x93   : > { %7809 = vst [vmem:[#allocation117_spill] sm:$0xff] %v5412_v60  ;;  %v753_v60 = vsub.f32 %v5402_v34, %v5431_v39  ;;  %749 = vmatpush.msrb.mxu3 %v5474_v42 }
  0x94   : > { %7810 = vst [vmem:[#allocation118_spill] sm:$0xff] %v5415_v18 }
  0x95   : > { %7811 = vst [vmem:[#allocation119_spill] sm:$0xff] %v5418_v63  ;;  %v5488_v62 = vand.u32 4294901760, %v753_v60  ;;  %v343_v60 = vsub.f32 %v5450_v5, %v5479_v10 }
  0x96   : > { %7812 = vst [vmem:[#allocation120_spill] sm:$0xff] %v5420_v16 }
  0x97   : > { %7813 = vst [vmem:[#allocation121_spill] sm:$0xff] %v5424_v36  ;;  %v759_v36 = vsub.f32 %v5418_v63, %v5447_v45  ;;  %755 = vmatpush.msrb.mxu3 %v5488_v62  ;;  %v5526_v54 = vand.u32 4294901760, %v343_v60 }
  0x98   : > { %7814 = vst [vmem:[#allocation122_spill] sm:$0xff] %v5431_v39 }
  0x99   : > { %7815 = vst [vmem:[#allocation123_spill] sm:$0xff] %v5433_v38  ;;  %345 = vmatmul.f32.vlgmr.msra.gmra.mxu0 %v5526_v54 }
  0x9a   : > { %7816 = vst [vmem:[#allocation124_spill] sm:$0xff] %v5436_v55  ;;  %793 = vmatpush.msra.mxu0 %v5215_v57 }
  0x9b   : > { %7817 = vst [vmem:[#allocation125_spill] sm:$0xff] %v5440_v20  ;;  %v765_v20 = vsub.f32 %v5436_v55, %v5463_v9 }
  0x9c   : > { %7818 = vst [vmem:[#allocation126_spill] sm:$0xff] %v5447_v45  ;;  %796 = vmatpush.msra.mxu0 %v5235_v29 }
  0x9d   : > { %7819 = vst [vmem:[#allocation127_spill] sm:$0xff] %v5452_v24  ;;  %v5515_v51 = vand.u32 4294901760, %v765_v20  ;;  %v777_v20 = vsub.f32 %v5482_v3, %v5507_v8 }
  0x9e   : > { %7820 = vst [vmem:[#allocation128_spill] sm:$0xff] %v5458_v33  ;;  %v5502_v33 = vand.u32 4294901760, %v759_v36  ;;  %v771_v36 = vsub.f32 %v5466_v27, %v5493_v11  ;;  %799 = vmatpush.msra.mxu0 %v5263_v53 }
  0x9f   : > { %7821 = vst [vmem:[#allocation129_spill] sm:$0xff] %v5463_v9 }
  0xa0   : > { %7822 = vst [vmem:[#allocation130_spill] sm:$0xff] %v5466_v27  ;;  %761 = vmatpush.msrb.mxu3 %v5502_v33  ;;  %v5537_v52 = vand.u32 4294901760, %v771_v36  ;;  %802 = vmatpush.msra.mxu0 %v5282_v49 }
  0xa1   : > { %7823 = vst [vmem:[#allocation131_spill] sm:$0xff] %v5470_v59  ;;  %608 = vmatmul.f32.vlgmr.msrb.gmra.mxu0 %v5420_v16 }
  0xa2   : > { %7824 = vst [vmem:[#allocation132_spill] sm:$0xff] %v5474_v42  ;;  %v5522_v42 = vand.u32 4294901760, %v5498_v4  ;;  %767 = vmatpush.msrb.mxu3 %v5515_v51  ;;  %805 = vmatpush.msra.mxu0 %v5302_v30 }
  0xa3   : > { %7825 = vst [vmem:[#allocation133_spill] sm:$0xff] %v5479_v10 }
  0xa4   : > { %7826 = vst [vmem:[#allocation134_spill] sm:$0xff] %v5482_v3  ;;  %v783_v60 = vsub.f32 %v5498_v4, %v5522_v42  ;;  %773 = vmatpush.msrb.mxu3 %v5537_v52  ;;  %808 = vmatpush.msra.mxu0 %v5320_v47 }
  0xa5   : > { %7827 = vst [vmem:[#allocation135_spill] sm:$0xff] %v5488_v62  ;;  %v5531_v62 = vsub.f32 %v305_v1, %v5509_v17  ;;  %v5545_v1 = vand.u32 4294901760, %v777_v20 }
  0xa6   : > { %7828 = vst [vmem:[#allocation136_spill] sm:$0xff] %v5493_v11  ;;  %v5556_v36 = vand.u32 4294901760, %v783_v60  ;;  %v7842_v60 = vld [vmem:[#allocation83_spill] sm:$0xff]  ;;  %811 = vmatpush.msra.mxu0 %v5327_v26 }
  0xa7   : > { %7829 = vst [vmem:[#allocation137_spill] sm:$0xff] %v5498_v4  ;;  %779 = vmatpush.msrb.mxu3 %v5545_v1 }
  0xa8   : > { %7830 = vst [vmem:[#allocation138_spill] sm:$0xff] %v5502_v33  ;;  %v5548_v33 = vand.u32 4294901760, %v5531_v62  ;;  %814 = vmatpush.msra.mxu0 %v5345_v43 }
  0xa9   : > { %7831 = vst [vmem:[#allocation139_spill] sm:$0xff] %v5507_v8  ;;  %785 = vmatpush.msrb.mxu3 %v5556_v36 }
  0xaa   : > { %7832 = vst [vmem:[#allocation140_spill] sm:$0xff] %v5509_v17  ;;  %v684_v20 = vsub.f32 %v5531_v62, %v5548_v33  ;;  %787 = vmatmul.f32.vlgmr.msrb.gmra.mxu3 %v5509_v17  ;;  %817 = vmatpush.msra.mxu0 %v5370_v6 }
  0xab   : > { %7833 = vst [vmem:[#allocation141_spill] sm:$0xff] %v5515_v51  ;;  %v7841_v51 = vld [vmem:[#allocation60_spill] sm:$0xff]  ;;  %954 = vmatpush.msra.mxu3 %v5179_v12 }
  0xac   : > { %7834 = vst [vmem:[#allocation142_spill] sm:$0xff] %v5522_v42  ;;  %641 = vmatpush.msrb.mxu1 %v7841_v51  ;;  %820 = vmatpush.msra.mxu0 %v5386_v19 }
  0xad   : > { %7835 = vst [vmem:[#allocation143_spill] sm:$0xff] %v5531_v62  ;;  %956 = vmatpush.msra.mxu3 %v5196_v32 }
  0xae   : > { %7836 = vst [vmem:[#allocation144_spill] sm:$0xff] %v5537_v52  ;;  %v7840_v52 = vld [vmem:[#allocation78_spill] sm:$0xff]  ;;  %643 = vmatpush.msrb.mxu1 %v5194_v31  ;;  %823 = vmatpush.msra.mxu0 %v5402_v34  ;;  %v265_v34 = vld [vmem:[#allocation2 + $0xd8] sm:$0xff] }
  0xaf   : > { %7837 = vst [vmem:[#allocation145_spill] sm:$0xff] %v5545_v1  ;;  %887 = vmatpush.msra.mxu2 %v7840_v52  ;;  %v5570_v1 = vand.u32 4294901760, %v684_v20  ;;  %v7844_v52 = vld [vmem:[#allocation89_spill] sm:$0xff]  ;;  %958 = vmatpush.msra.mxu3 %v5227_v40  ;;  %v297_v31 = vld [vmem:[#allocation2 + $0x1d8] sm:$0xff] }
  0xb0   : > { %7838 = vst [vmem:[#allocation146_spill] sm:$0xff] %v5548_v33  ;;  %846 = vmatpush.msra.mxu1 %v5179_v12  ;;  %v7845_v20 = vld [vmem:[#allocation93_spill] sm:$0xff]  ;;  %826 = vmatpush.msra.mxu0 %v5418_v63  ;;  %v5622_v63 = vand.u32 4294901760, %v265_v34  ;;  %v5851_v50 = vand.u32 4294901760, %v297_v31 }
  0xb1   : > { %7839 = vst [vmem:[#allocation147_spill] sm:$0xff] %v5556_v36  ;;  %891 = vmatpush.msra.mxu2 %v7842_v60  ;;  %960 = vmatpush.msra.mxu3 %v5246_v21  ;;  %v7848_v60 = vld [vmem:[#allocation105_spill] sm:$0xff] }
  0xb2   : > { %7843 = vst [vmem:[#allocation148_spill] sm:$0xff] %v5570_v1  ;;  %686 = vmatmul.f32.vlgmr.msrb.gmra.mxu2 %v5570_v1  ;;  %848 = vmatpush.msra.mxu1 %v5196_v32  ;;  %v5646_v19 = vsub.f32 %v265_v34, %v5622_v63  ;;  %v255_v34 = vld [vmem:[#allocation2 + $0x88] sm:$0xff] }
  0xb3   : > { %895 = vmatpush.msra.mxu2 %v7844_v52  ;;  %v7846_v52 = vld [vmem:[#allocation98_spill] sm:$0xff]  ;;  %645 = vmatmul.f32.vlgmr.msrb.gmra.mxu1 %v5420_v16  ;;  %7852 = vst [vmem:[#allocation151_spill] sm:$0xff] %v5622_v63  ;;  %v251_v36 = vld [vmem:[#allocation2 + $0x68] sm:$0xff] }
  0xb4   : > { %850 = vmatpush.msra.mxu1 %v5227_v40  ;;  %962 = vmatpush.msra.mxu3 %v5265_v48  ;;  %7858 = vst [vmem:[#allocation157_spill] sm:$0xff] %v5646_v19  ;;  %v5669_v26 = vand.u32 4294901760, %v5646_v19  ;;  %v299_v40 = vld [vmem:[#allocation2 + $0x1e8] sm:$0xff] }
  0xb5   : > { %899 = vmatpush.msra.mxu2 %v7845_v20  ;;  %v7847_v20 = vld [vmem:[#allocation103_spill] sm:$0xff]  ;;  %829 = vmatpush.msra.mxu0 %v5436_v55  ;;  %v5832_v51 = vand.u32 4294901760, %v299_v40 }
  0xb6   : > { %852 = vmatpush.msra.mxu1 %v5246_v21  ;;  %964 = vmatpush.msra.mxu3 %v5284_v2  ;;  %7861 = vst [vmem:[#allocation160_spill] sm:$0xff] %v5669_v26 }
  0xb7   : > { %903 = vmatpush.msra.mxu2 %v7846_v52  ;;  %v7849_v52 = vld [vmem:[#allocation109_spill] sm:$0xff]  ;;  %832 = vmatpush.msra.mxu0 %v5466_v27  ;;  %v5867_v41 = vsub.f32 %v299_v40, %v5832_v51 }
  0xb8   : > { %854 = vmatpush.msra.mxu1 %v5265_v48  ;;  %966 = vmatpush.msra.mxu3 %v5290_v15  ;;  %v301_v48 = vld [vmem:[#allocation2 + $0x1f8] sm:$0xff] }
  0xb9   : > { %907 = vmatpush.msra.mxu2 %v7847_v20  ;;  %v269_v20 = vld [vmem:[#allocation2 + $0xf8] sm:$0xff]  ;;  %835 = vmatpush.msra.mxu0 %v5482_v3 }
  0xba   : > { %856 = vmatpush.msra.mxu1 %v5284_v2  ;;  %968 = vmatpush.msra.mxu3 %v5308_v14 }
  0xbb   : > { %911 = vmatpush.msra.mxu2 %v7848_v60  ;;  %v267_v60 = vld [vmem:[#allocation2 + $0xe8] sm:$0xff]  ;;  %838 = vmatpush.msra.mxu0 %v5498_v4 }
  0xbc   : > { %858 = vmatpush.msra.mxu1 %v5290_v15  ;;  %970 = vmatpush.msra.mxu3 %v5338_v22 }
  0xbd   : > { %915 = vmatpush.msra.mxu2 %v7849_v52  ;;  %v5610_v52 = vand.u32 4294901760, %v269_v20  ;;  %841 = vmatmul.f32.vlgmr.msra.gmra.mxu0 %v5531_v62 }
  0xbe   : > { %860 = vmatpush.msra.mxu1 %v5308_v14  ;;  %972 = vmatpush.msra.mxu3 %v5356_v23 }
  0xbf   : > { %919 = vmatpush.msra.mxu2 %v5399_v46  ;;  %7850 = vst [vmem:[#allocation149_spill] sm:$0xff] %v5610_v52  ;;  %v5616_v46 = vand.u32 4294901760, %v267_v60  ;;  %v5625_v55 = vsub.f32 %v269_v20, %v5610_v52  ;;  %v259_v20 = vld [vmem:[#allocation2 + $0xa8] sm:$0xff]  ;;  %991 = vmatpush.msrb.mxu0 %v5610_v52 }
  0xc0   : > { %862 = vmatpush.msra.mxu1 %v5338_v22  ;;  %974 = vmatpush.msra.mxu3 %v5372_v37 }
  0xc1   : > { %923 = vmatpush.msra.mxu2 %v5415_v18  ;;  %7851 = vst [vmem:[#allocation150_spill] sm:$0xff] %v5616_v46  ;;  %v263_v18 = vld [vmem:[#allocation2 + $0xc8] sm:$0xff]  ;;  %993 = vmatpush.msrb.mxu0 %v5616_v46 }
  0xc2   : > { %864 = vmatpush.msra.mxu1 %v5356_v23  ;;  %7853 = vst [vmem:[#allocation152_spill] sm:$0xff] %v5625_v55  ;;  %976 = vmatpush.msra.mxu3 %v5388_v7  ;;  %v5631_v27 = vand.u32 4294901760, %v263_v18 }
  0xc3   : > { %927 = vmatpush.msra.mxu2 %v5431_v39  ;;  %v261_v39 = vld [vmem:[#allocation2 + $0xb8] sm:$0xff]  ;;  %995 = vmatpush.msrb.mxu0 %v5622_v63 }
  0xc4   : > { %866 = vmatpush.msra.mxu1 %v5372_v37  ;;  %7854 = vst [vmem:[#allocation153_spill] sm:$0xff] %v5631_v27  ;;  %978 = vmatpush.msra.mxu3 %v5404_v13  ;;  %v5640_v3 = vand.u32 4294901760, %v261_v39  ;;  %v5658_v6 = vsub.f32 %v263_v18, %v5631_v27  ;;  %v249_v37 = vld [vmem:[#allocation2 + $0x58] sm:$0xff] }
  0xc5   : > { %931 = vmatpush.msra.mxu2 %v5447_v45  ;;  %v5634_v45 = vsub.f32 %v267_v60, %v5616_v46  ;;  %v257_v60 = vld [vmem:[#allocation2 + $0x98] sm:$0xff]  ;;  %997 = vmatpush.msrb.mxu0 %v5631_v27  ;;  %v5731_v22 = vand.u32 4294901760, %v249_v37 }
  0xc6   : > { %868 = vmatpush.msra.mxu1 %v5388_v7  ;;  %7856 = vst [vmem:[#allocation155_spill] sm:$0xff] %v5640_v3  ;;  %980 = vmatpush.msra.mxu3 %v5433_v38  ;;  %v5666_v43 = vand.u32 4294901760, %v257_v60  ;;  %v5672_v18 = vsub.f32 %v261_v39, %v5640_v3  ;;  %v5683_v47 = vand.u32 4294901760, %v5658_v6  ;;  %v1046_v7 = vsub.f32 %v5646_v19, %v5669_v26 }
  0xc7   : > { %935 = vmatpush.msra.mxu2 %v5463_v9  ;;  %7855 = vst [vmem:[#allocation154_spill] sm:$0xff] %v5634_v45  ;;  %v5643_v9 = vand.u32 4294901760, %v5625_v55  ;;  %v5655_v4 = vand.u32 4294901760, %v5634_v45  ;;  %999 = vmatpush.msrb.mxu0 %v5640_v3  ;;  %v5766_v61 = vsub.f32 %v249_v37, %v5731_v22 }
  0xc8   : > { %870 = vmatpush.msra.mxu1 %v5404_v13  ;;  %7860 = vst [vmem:[#allocation159_spill] sm:$0xff] %v5658_v6  ;;  %v253_v13 = vld [vmem:[#allocation2 + $0x78] sm:$0xff]  ;;  %982 = vmatpush.msra.mxu3 %v5452_v24  ;;  %v5699_v49 = vand.u32 4294901760, %v5672_v18  ;;  %v1052_v53 = vsub.f32 %v5658_v6, %v5683_v47 }
  0xc9   : > { %939 = vmatpush.msra.mxu2 %v5493_v11  ;;  %7857 = vst [vmem:[#allocation156_spill] sm:$0xff] %v5643_v9  ;;  %v5652_v11 = vand.u32 4294901760, %v259_v20  ;;  %v5690_v30 = vand.u32 4294901760, %v253_v13 }
  0xca   : > { %7859 = vst [vmem:[#allocation158_spill] sm:$0xff] %v5655_v4  ;;  %872 = vmatpush.msra.mxu1 %v5433_v38  ;;  %v5680_v38 = vand.u32 4294901760, %v255_v34  ;;  %984 = vmatpush.msra.mxu3 %v5470_v59  ;;  %v1058_v29 = vsub.f32 %v5672_v18, %v5699_v49 }
  0xcb   : > { %943 = vmatpush.msra.mxu2 %v5507_v8  ;;  %v1034_v8 = vsub.f32 %v5625_v55, %v5643_v9  ;;  %7862 = vst [vmem:[#allocation161_spill] sm:$0xff] %v5672_v18  ;;  %v5686_v39 = vsub.f32 %v259_v20, %v5652_v11  ;;  %986 = vmatmul.f32.vlgmr.msra.gmra.mxu3 %v5509_v17 }
  0xcc   : > { %7863 = vst [vmem:[#allocation162_spill] sm:$0xff] %v5683_v47  ;;  %874 = vmatpush.msra.mxu1 %v5452_v24  ;;  %v5702_v20 = vsub.f32 %v257_v60, %v5666_v43  ;;  %1187 = vmatpush.msrb.mxu3 %v5610_v52  ;;  %v5706_v24 = vand.u32 4294901760, %v251_v36  ;;  %v5718_v60 = vsub.f32 %v255_v34, %v5680_v38 }
  0xcd   : > { %947 = vmatpush.msra.mxu2 %v5522_v42  ;;  %v1040_v42 = vsub.f32 %v5634_v45, %v5655_v4  ;;  %7864 = vst [vmem:[#allocation163_spill] sm:$0xff] %v5686_v39  ;;  %v5715_v23 = vand.u32 4294901760, %v5686_v39  ;;  %1001 = vmatpush.msrb.mxu0 %v5652_v11 }
  0xce   : > { %949 = vmatmul.f32.vlgmr.msra.gmra.mxu2 %v5509_v17  ;;  %7866 = vst [vmem:[#allocation165_spill] sm:$0xff] %v5699_v49  ;;  %876 = vmatpush.msra.mxu1 %v5470_v59  ;;  %v247_v59 = vld [vmem:[#allocation2 + $0x48] sm:$0xff]  ;;  %v5734_v34 = vand.u32 4294901760, %v5702_v20  ;;  %v5750_v56 = vand.u32 4294901760, %v5718_v60 }
  0xcf   : > { %1134 = vmatpush.msrb.mxu2 %v5625_v55  ;;  %v5694_v55 = vand.u32 4294901760, %v1034_v8  ;;  %7867 = vst [vmem:[#allocation166_spill] sm:$0xff] %v5702_v20  ;;  %v5710_v8 = vand.u32 4294901760, %v1040_v42  ;;  %880 = vmatmul.f32.vlgmr.msra.gmra.mxu1 %v5548_v33  ;;  %v5727_v42 = vand.u32 4294901760, %v1046_v7  ;;  %v5743_v7 = vand.u32 4294901760, %v1052_v53 }
  0xd0   : > { %7869 = vst [vmem:[#allocation168_spill] sm:$0xff] %v5715_v23  ;;  %1189 = vmatpush.msrb.mxu3 %v5616_v46  ;;  %v5747_v57 = vand.u32 4294901760, %v247_v59  ;;  %1003 = vmatpush.msrb.mxu0 %v5666_v43  ;;  %v5759_v53 = vand.u32 4294901760, %v1058_v29  ;;  %v1076_v15 = vsub.f32 %v5718_v60, %v5750_v56 }
  0xd1   : > { %7865 = vst [vmem:[#allocation164_spill] sm:$0xff] %v5694_v55  ;;  %1137 = vmatpush.msrb.mxu2 %v5634_v45  ;;  %v5723_v45 = vsub.f32 %v253_v13, %v5690_v30  ;;  %1036 = vmatpush.msrb.mxu1 %v5694_v55  ;;  %v5739_v13 = vsub.f32 %v251_v36, %v5706_v24 }
  0xd2   : > { %7868 = vst [vmem:[#allocation167_spill] sm:$0xff] %v5710_v8  ;;  %1191 = vmatpush.msrb.mxu3 %v5622_v63  ;;  %v1064_v55 = vsub.f32 %v5686_v39, %v5715_v23  ;;  %1005 = vmatpush.msrb.mxu0 %v5680_v38  ;;  %v5782_v37 = vsub.f32 %v247_v59, %v5747_v57  ;;  %v5795_v59 = vand.u32 4294901760, %v5766_v61 }
  0xd3   : > { %7870 = vst [vmem:[#allocation169_spill] sm:$0xff] %v5718_v60  ;;  %1140 = vmatpush.msrb.mxu2 %v5646_v19  ;;  %v245_v19 = vld [vmem:[#allocation2 + $0x38] sm:$0xff]  ;;  %1042 = vmatpush.msrb.mxu1 %v5710_v8  ;;  %v5755_v36 = vand.u32 4294901760, %v5723_v45  ;;  %v1070_v8 = vsub.f32 %v5702_v20, %v5734_v34 }
  0xd4   : > { %7871 = vst [vmem:[#allocation170_spill] sm:$0xff] %v5723_v45  ;;  %1193 = vmatpush.msrb.mxu3 %v5631_v27  ;;  %v5763_v14 = vand.u32 4294901760, %v245_v19  ;;  %v5775_v29 = vand.u32 4294901760, %v1064_v55  ;;  %1007 = vmatpush.msrb.mxu0 %v5690_v30 }
  0xd5   : > { %7872 = vst [vmem:[#allocation171_spill] sm:$0xff] %v5727_v42  ;;  %1143 = vmatpush.msrb.mxu2 %v5658_v6  ;;  %v243_v6 = vld [vmem:[#allocation2 + $0x28] sm:$0xff]  ;;  %1048 = vmatpush.msrb.mxu1 %v5727_v42  ;;  %v241_v42 = vld [vmem:[#allocation2 + $0x18] sm:$0xff]  ;;  %v5790_v55 = vand.u32 4294901760, %v1070_v8  ;;  %v5808_v8 = vand.u32 4294901760, %v1076_v15  ;;  %v1094_v15 = vsub.f32 %v5766_v61, %v5795_v59 }
  0xd6   : > { %7873 = vst [vmem:[#allocation172_spill] sm:$0xff] %v5734_v34  ;;  %1195 = vmatpush.msrb.mxu3 %v5640_v3  ;;  %v5779_v2 = vand.u32 4294901760, %v243_v6  ;;  %v5792_v44 = vand.u32 4294901760, %v241_v42  ;;  %v5798_v21 = vsub.f32 %v245_v19, %v5763_v14  ;;  %1009 = vmatpush.msrb.mxu0 %v5706_v24  ;;  %v5813_v19 = vand.u32 4294901760, %v5782_v37 }
  0xd7   : > { %7874 = vst [vmem:[#allocation173_spill] sm:$0xff] %v5739_v13  ;;  %1146 = vmatpush.msrb.mxu2 %v5672_v18  ;;  %v5771_v18 = vand.u32 4294901760, %v5739_v13  ;;  %1054 = vmatpush.msrb.mxu1 %v5743_v7 }
  0xd8   : > { %7875 = vst [vmem:[#allocation174_spill] sm:$0xff] %v5743_v7  ;;  %v239_v7 = vld [vmem:[#allocation2 + $0x8] sm:$0xff]  ;;  %1197 = vmatpush.msrb.mxu3 %v5652_v11  ;;  %v5816_v12 = vsub.f32 %v243_v6, %v5779_v2  ;;  %1011 = vmatpush.msrb.mxu0 %v5731_v22  ;;  %v5830_v6 = vsub.f32 %v241_v42, %v5792_v44 }
  0xd9   : > { %7876 = vst [vmem:[#allocation175_spill] sm:$0xff] %v5750_v56  ;;  %1149 = vmatpush.msrb.mxu2 %v5686_v39  ;;  %v1082_v39 = vsub.f32 %v5723_v45, %v5755_v36  ;;  %1060 = vmatpush.msrb.mxu1 %v5759_v53  ;;  %v5810_v32 = vand.u32 4294901760, %v239_v7  ;;  %v1100_v42 = vsub.f32 %v5782_v37, %v5813_v19 }
  0xda   : > { %7877 = vst [vmem:[#allocation176_spill] sm:$0xff] %v5755_v36  ;;  %1199 = vmatpush.msrb.mxu3 %v5666_v43  ;;  %1013 = vmatpush.msrb.mxu0 %v5747_v57 }
  0xdb   : > { %7878 = vst [vmem:[#allocation177_spill] sm:$0xff] %v5759_v53  ;;  %1152 = vmatpush.msrb.mxu2 %v5702_v20  ;;  %v1088_v20 = vsub.f32 %v5739_v13, %v5771_v18  ;;  %v5804_v53 = vand.u32 4294901760, %v301_v48  ;;  %1066 = vmatpush.msrb.mxu1 %v5775_v29  ;;  %v5849_v58 = vsub.f32 %v239_v7, %v5810_v32  ;;  %v5864_v7 = vand.u32 4294901760, %v5830_v6 }
  0xdc   : > { %7879 = vst [vmem:[#allocation178_spill] sm:$0xff] %v5766_v61  ;;  %1201 = vmatpush.msrb.mxu3 %v5680_v38  ;;  %1015 = vmatpush.msrb.mxu0 %v5763_v14  ;;  %v5878_v35 = vand.u32 4294901760, %v1100_v42 }
  0xdd   : > { %7880 = vst [vmem:[#allocation179_spill] sm:$0xff] %v5771_v18  ;;  %1155 = vmatpush.msrb.mxu2 %v5718_v60  ;;  %v5820_v60 = vand.u32 4294901760, %v1082_v39  ;;  %1072 = vmatpush.msrb.mxu1 %v5790_v55  ;;  %v5836_v39 = vand.u32 4294901760, %v1088_v20  ;;  %v293_v20 = vld [vmem:[#allocation2 + $0x1b8] sm:$0xff]  ;;  %v5883_v28 = vand.u32 4294901760, %v5849_v58  ;;  %v1118_v33 = vsub.f32 %v5830_v6, %v5864_v7 }
  0xde   : > { %7881 = vst [vmem:[#allocation180_spill] sm:$0xff] %v5775_v29  ;;  %v5827_v29 = vand.u32 4294901760, %v5798_v21  ;;  %1203 = vmatpush.msrb.mxu3 %v5690_v30  ;;  %1017 = vmatpush.msrb.mxu0 %v5779_v2 }
  0xdf   : > { %7882 = vst [vmem:[#allocation181_spill] sm:$0xff] %v5782_v37  ;;  %1158 = vmatpush.msrb.mxu2 %v5723_v45  ;;  %v5839_v45 = vsub.f32 %v301_v48, %v5804_v53  ;;  %1078 = vmatpush.msrb.mxu1 %v5808_v8  ;;  %v5855_v48 = vand.u32 4294901760, %v295_v0  ;;  %v1124_v17 = vsub.f32 %v5849_v58, %v5883_v28 }
  0xe0   : > { %7883 = vst [vmem:[#allocation182_spill] sm:$0xff] %v5790_v55  ;;  %v5846_v55 = vand.u32 4294901760, %v5816_v12  ;;  %1205 = vmatpush.msrb.mxu3 %v5706_v24  ;;  %1019 = vmatpush.msrb.mxu0 %v5792_v44 }
  0xe1   : > { %7884 = vst [vmem:[#allocation183_spill] sm:$0xff] %v5795_v59  ;;  %1161 = vmatpush.msrb.mxu2 %v5739_v13  ;;  %1084 = vmatpush.msrb.mxu1 %v5820_v60  ;;  %v5859_v13 = vand.u32 4294901760, %v1094_v15  ;;  %v291_v15 = vld [vmem:[#allocation2 + $0x1a8] sm:$0xff]  ;;  %v5891_v25 = vsub.f32 %v295_v0, %v5855_v48 }
  0xe2   : > { %7885 = vst [vmem:[#allocation184_spill] sm:$0xff] %v5798_v21  ;;  %1207 = vmatpush.msrb.mxu3 %v5731_v22  ;;  %v1112_v40 = vsub.f32 %v5816_v12, %v5846_v55  ;;  %v5902_v62 = vand.u32 4294901760, %v291_v15  ;;  %1021 = vmatpush.msrb.mxu0 %v5810_v32 }
  0xe3   : > { %7886 = vst [vmem:[#allocation185_spill] sm:$0xff] %v5808_v8  ;;  %1164 = vmatpush.msrb.mxu2 %v5766_v61  ;;  %v1106_v8 = vsub.f32 %v5798_v21, %v5827_v29  ;;  %v5872_v61 = vand.u32 4294901760, %v5839_v45  ;;  %1090 = vmatpush.msrb.mxu1 %v5836_v39 }
  0xe4   : > { %7887 = vst [vmem:[#allocation186_spill] sm:$0xff] %v5810_v32  ;;  %1209 = vmatpush.msrb.mxu3 %v5747_v57  ;;  %1228 = vmatpush.msra.mxu0 %v5643_v9 }
  0xe5   : > { %7888 = vst [vmem:[#allocation187_spill] sm:$0xff] %v5813_v19  ;;  %1167 = vmatpush.msrb.mxu2 %v5782_v37  ;;  %v5886_v37 = vsub.f32 %v297_v31, %v5851_v50  ;;  %1096 = vmatpush.msrb.mxu1 %v5859_v13  ;;  %v5895_v42 = vand.u32 4294901760, %v1106_v8  ;;  %v5900_v31 = vand.u32 4294901760, %v5867_v41  ;;  %v1375_v0 = vsub.f32 %v5839_v45, %v5872_v61  ;;  %v287_v8 = vld [vmem:[#allocation2 + $0x188] sm:$0xff] }
  0xe6   : > { %7889 = vst [vmem:[#allocation188_spill] sm:$0xff] %v5816_v12  ;;  %1211 = vmatpush.msrb.mxu3 %v5763_v14  ;;  %v5936_v10 = vand.u32 4294901760, %v287_v8  ;;  %1232 = vmatpush.msra.mxu0 %v5655_v4 }
  0xe7   : > { %7890 = vst [vmem:[#allocation189_spill] sm:$0xff] %v5820_v60  ;;  %v5874_v60 = vand.u32 4294901760, %v293_v20  ;;  %1170 = vmatpush.msrb.mxu2 %v5798_v21  ;;  %1102 = vmatpush.msrb.mxu1 %v5878_v35  ;;  %v5918_v1 = vand.u32 4294901760, %v5886_v37  ;;  %v1381_v16 = vsub.f32 %v5867_v41, %v5900_v31 }
  0xe8   : > { %7891 = vst [vmem:[#allocation190_spill] sm:$0xff] %v5827_v29  ;;  %1213 = vmatpush.msrb.mxu3 %v5779_v2  ;;  %1236 = vmatpush.msra.mxu0 %v5669_v26 }
  0xe9   : > { %7892 = vst [vmem:[#allocation191_spill] sm:$0xff] %v5830_v6  ;;  %1173 = vmatpush.msrb.mxu2 %v5816_v12  ;;  %v5909_v21 = vsub.f32 %v293_v20, %v5874_v60  ;;  %v5925_v20 = vand.u32 4294901760, %v5891_v25  ;;  %1108 = vmatpush.msrb.mxu1 %v5895_v42 }
  0xea   : > { %7893 = vst [vmem:[#allocation192_spill] sm:$0xff] %v5836_v39  ;;  %v289_v39 = vld [vmem:[#allocation2 + $0x198] sm:$0xff]  ;;  %1215 = vmatpush.msrb.mxu3 %v5792_v44  ;;  %1240 = vmatpush.msra.mxu0 %v5683_v47 }
  0xeb   : > { %7894 = vst [vmem:[#allocation193_spill] sm:$0xff] %v5839_v45  ;;  %v5920_v12 = vand.u32 4294901760, %v289_v39  ;;  %1176 = vmatpush.msrb.mxu2 %v5830_v6  ;;  %v5940_v6 = vand.u32 4294901760, %v1375_v0  ;;  %v5943_v9 = vand.u32 4294901760, %v5909_v21  ;;  %v1393_v0 = vsub.f32 %v5891_v25, %v5925_v20  ;;  %1027 = vmatmul.f32.vlgmr.msrb.gmra.mxu0 %v5526_v54  ;;  %v7962_v54 = vld [vmem:[#allocation133_spill] sm:$0xff] }
  0xec   : > { %7895 = vst [vmem:[#allocation194_spill] sm:$0xff] %v5846_v55  ;;  %1217 = vmatpush.msrb.mxu3 %v5810_v32  ;;  %1244 = vmatpush.msra.mxu0 %v5699_v49 }
  0xed   : > { %7896 = vst [vmem:[#allocation195_spill] sm:$0xff] %v5849_v58  ;;  %1179 = vmatpush.msrb.mxu2 %v5849_v58  ;;  %v281_v58 = vld [vmem:[#allocation2 + $0x158] sm:$0xff]  ;;  %v1399_v26 = vsub.f32 %v5909_v21, %v5943_v9  ;;  %v5990_v47 = vand.u32 4294901760, %v1393_v0  ;;  %1221 = vmatmul.f32.vlgmr.msrb.gmra.mxu3 %v7962_v54 }
  0xee   : > { %7897 = vst [vmem:[#allocation196_spill] sm:$0xff] %v5855_v48  ;;  %1377 = vmatpush.msra.mxu3 %v5940_v6  ;;  %v5986_v32 = vand.u32 4294901760, %v281_v58  ;;  %1248 = vmatpush.msra.mxu0 %v5715_v23  ;;  %v275_v23 = vld [vmem:[#allocation2 + $0x128] sm:$0xff] }
  0xef   : > { %7898 = vst [vmem:[#allocation197_spill] sm:$0xff] %v5859_v13  ;;  %v5913_v13 = vand.u32 4294901760, %v1112_v40  ;;  %v5929_v40 = vand.u32 4294901760, %v1118_v33  ;;  %v5947_v33 = vand.u32 4294901760, %v1124_v17  ;;  %1332 = vmatpush.msra.mxu2 %v5804_v53  ;;  %v5962_v17 = vand.u32 4294901760, %v1381_v16 }
  0xf0   : > { %7899 = vst [vmem:[#allocation198_spill] sm:$0xff] %v5872_v61  ;;  %v5934_v61 = vsub.f32 %v291_v15, %v5902_v62  ;;  %v1387_v15 = vsub.f32 %v5886_v37, %v5918_v1  ;;  %v6006_v0 = vand.u32 4294901760, %v1399_v26  ;;  %1252 = vmatpush.msra.mxu0 %v5734_v34  ;;  %v6036_v34 = vand.u32 4294901760, %v275_v23  ;;  %1182 = vmatmul.f32.vlgmr.msrb.gmra.mxu2 %v5450_v5  ;;  %v7964_v5 = vld [vmem:[#allocation120_spill] sm:$0xff] }
  0xf1   : > { %7900 = vst [vmem:[#allocation199_spill] sm:$0xff] %v5874_v60  ;;  %1114 = vmatpush.msrb.mxu1 %v5913_v13  ;;  %1334 = vmatpush.msra.mxu2 %v5832_v51 }
  0xf2   : > { %7901 = vst [vmem:[#allocation200_spill] sm:$0xff] %v5878_v35  ;;  %v285_v35 = vld [vmem:[#allocation2 + $0x178] sm:$0xff]  ;;  %v5978_v16 = vand.u32 4294901760, %v1387_v15  ;;  %1383 = vmatpush.msra.mxu3 %v5962_v17  ;;  %1256 = vmatpush.msra.mxu0 %v5750_v56 }
  0xf3   : > { %7902 = vst [vmem:[#allocation201_spill] sm:$0xff] %v5883_v28  ;;  %v5954_v4 = vand.u32 4294901760, %v285_v35  ;;  %1120 = vmatpush.msrb.mxu1 %v5929_v40  ;;  %1336 = vmatpush.msra.mxu2 %v5851_v50 }
  0xf4   : > { %7903 = vst [vmem:[#allocation202_spill] sm:$0xff] %v5886_v37  ;;  %1389 = vmatpush.msra.mxu3 %v5978_v16  ;;  %1260 = vmatpush.msra.mxu0 %v5755_v36 }
  0xf5   : > { %7904 = vst [vmem:[#allocation203_spill] sm:$0xff] %v5895_v42  ;;  %v283_v42 = vld [vmem:[#allocation2 + $0x168] sm:$0xff]  ;;  %1126 = vmatpush.msrb.mxu1 %v5947_v33  ;;  %1338 = vmatpush.msra.mxu2 %v5855_v48 }
  0xf6   : > { %7905 = vst [vmem:[#allocation204_spill] sm:$0xff] %v5900_v31  ;;  %v5952_v31 = vsub.f32 %v289_v39, %v5920_v12  ;;  %v5968_v39 = vsub.f32 %v287_v8, %v5936_v10  ;;  %v5984_v8 = vsub.f32 %v285_v35, %v5954_v4  ;;  %1395 = vmatpush.msra.mxu3 %v5990_v47 }
  0xf7   : > { %7906 = vst [vmem:[#allocation205_spill] sm:$0xff] %v5902_v62  ;;  %1295 = vmatpush.msra.mxu1 %v5610_v52  ;;  %1340 = vmatpush.msra.mxu2 %v5874_v60 }
  0xf8   : > { %7907 = vst [vmem:[#allocation206_spill] sm:$0xff] %v5909_v21  ;;  %v6013_v49 = vand.u32 4294901760, %v5984_v8  ;;  %1401 = vmatpush.msra.mxu3 %v6006_v0  ;;  %1264 = vmatpush.msra.mxu0 %v5771_v18 }
  0xf9   : > { %7908 = vst [vmem:[#allocation207_spill] sm:$0xff] %v5913_v13  ;;  %v5965_v13 = vand.u32 4294901760, %v5934_v61  ;;  %1297 = vmatpush.msra.mxu1 %v5616_v46  ;;  %1342 = vmatpush.msra.mxu2 %v5902_v62 }
  0xfa   : > { %7909 = vst [vmem:[#allocation208_spill] sm:$0xff] %v5918_v1  ;;  %v5970_v1 = vand.u32 4294901760, %v283_v42  ;;  %1268 = vmatpush.msra.mxu0 %v5795_v59  ;;  %1128 = vmatmul.f32.vlgmr.msrb.gmra.mxu1 %v7964_v5 }
  0xfb   : > { %7910 = vst [vmem:[#allocation209_spill] sm:$0xff] %v5920_v12  ;;  %v1405_v15 = vsub.f32 %v5934_v61, %v5965_v13  ;;  %1299 = vmatpush.msra.mxu1 %v5622_v63  ;;  %1344 = vmatpush.msra.mxu2 %v5920_v12 }
  0xfc   : > { %7911 = vst [vmem:[#allocation210_spill] sm:$0xff] %v5925_v20  ;;  %v5981_v20 = vand.u32 4294901760, %v5952_v31  ;;  %v6000_v35 = vsub.f32 %v283_v42, %v5970_v1  ;;  %v6016_v42 = vsub.f32 %v281_v58, %v5986_v32  ;;  %1272 = vmatpush.msra.mxu0 %v5813_v19 }
  0xfd   : > { %7912 = vst [vmem:[#allocation211_spill] sm:$0xff] %v5929_v40  ;;  %v279_v40 = vld [vmem:[#allocation2 + $0x148] sm:$0xff]  ;;  %v6024_v26 = vand.u32 4294901760, %v1405_v15  ;;  %1301 = vmatpush.msra.mxu1 %v5631_v27  ;;  %1346 = vmatpush.msra.mxu2 %v5936_v10 }
  0xfe   : > { %7913 = vst [vmem:[#allocation212_spill] sm:$0xff] %v5934_v61  ;;  %v6029_v46 = vand.u32 4294901760, %v6000_v35  ;;  %v6045_v63 = vand.u32 4294901760, %v6016_v42  ;;  %v271_v27 = vld [vmem:[#allocation2 + $0x108] sm:$0xff]  ;;  %1276 = vmatpush.msra.mxu0 %v5827_v29 }
  0xff   : > { %7914 = vst [vmem:[#allocation213_spill] sm:$0xff] %v5936_v10  ;;  %1303 = vmatpush.msra.mxu1 %v5640_v3  ;;  %1407 = vmatpush.msra.mxu3 %v6024_v26  ;;  %v6077_v3 = vand.u32 4294901760, %v271_v27 }
 0x100   : > { %7915 = vst [vmem:[#allocation214_spill] sm:$0xff] %v5940_v6  ;;  %v5997_v6 = vand.u32 4294901760, %v5968_v39  ;;  %1348 = vmatpush.msra.mxu2 %v5954_v4  ;;  %1280 = vmatpush.msra.mxu0 %v5846_v55 }
 0x101   : > { %7916 = vst [vmem:[#allocation215_spill] sm:$0xff] %v5943_v9  ;;  %v277_v9 = vld [vmem:[#allocation2 + $0x138] sm:$0xff]  ;;  %1305 = vmatpush.msra.mxu1 %v5652_v11  ;;  %v7967_v54 = vld [vmem:[#allocation208_spill] sm:$0xff] }
 0x102   : > { %7917 = vst [vmem:[#allocation216_spill] sm:$0xff] %v5947_v33  ;;  %v6002_v33 = vand.u32 4294901760, %v279_v40  ;;  %v6018_v52 = vand.u32 4294901760, %v277_v9  ;;  %1350 = vmatpush.msra.mxu2 %v5970_v1  ;;  %1284 = vmatpush.msra.mxu0 %v5864_v7 }
 0x103   : > { %7918 = vst [vmem:[#allocation217_spill] sm:$0xff] %v5952_v31  ;;  %1307 = vmatpush.msra.mxu1 %v5666_v43 }
 0x104   : > { %7919 = vst [vmem:[#allocation218_spill] sm:$0xff] %v5954_v4  ;;  %v6032_v58 = vsub.f32 %v279_v40, %v6002_v33  ;;  %v6048_v40 = vsub.f32 %v277_v9, %v6018_v52  ;;  %v6066_v9 = vsub.f32 %v275_v23, %v6036_v34  ;;  %1352 = vmatpush.msra.mxu2 %v5986_v32 }
 0x105   : > { %7920 = vst [vmem:[#allocation219_spill] sm:$0xff] %v5962_v17  ;;  %v1411_v17 = vsub.f32 %v5952_v31, %v5981_v20  ;;  %1309 = vmatpush.msra.mxu1 %v5680_v38  ;;  %1288 = vmatpush.msra.mxu0 %v5883_v28 }
 0x106   : > { %7921 = vst [vmem:[#allocation220_spill] sm:$0xff] %v5965_v13  ;;  %v6075_v36 = vand.u32 4294901760, %v6048_v40  ;;  %v6093_v59 = vand.u32 4294901760, %v6066_v9  ;;  %1354 = vmatpush.msra.mxu2 %v6002_v33  ;;  %1290 = vmatmul.f32.vlgmr.msra.gmra.mxu0 %v7964_v5 }
 0x107   : > { %7922 = vst [vmem:[#allocation221_spill] sm:$0xff] %v5968_v39  ;;  %v6040_v15 = vand.u32 4294901760, %v1411_v17  ;;  %1311 = vmatpush.msra.mxu1 %v5690_v30  ;;  %1475 = vmatpush.msrb.mxu0 %v5839_v45 }
 0x108   : > { %7923 = vst [vmem:[#allocation222_spill] sm:$0xff] %v5970_v1  ;;  %1356 = vmatpush.msra.mxu2 %v6018_v52 }
 0x109   : > { %7924 = vst [vmem:[#allocation223_spill] sm:$0xff] %v5978_v16  ;;  %v1417_v16 = vsub.f32 %v5968_v39, %v5997_v6  ;;  %1413 = vmatpush.msra.mxu3 %v6040_v15  ;;  %1313 = vmatpush.msra.mxu1 %v5706_v24 }
 0x10a   : > { %7925 = vst [vmem:[#allocation224_spill] sm:$0xff] %v5981_v20  ;;  %v273_v20 = vld [vmem:[#allocation2 + $0x118] sm:$0xff]  ;;  %1358 = vmatpush.msra.mxu2 %v6036_v34  ;;  %1478 = vmatpush.msrb.mxu0 %v5867_v41 }
 0x10b   : > { %7926 = vst [vmem:[#allocation225_spill] sm:$0xff] %v5984_v8  ;;  %v6052_v56 = vand.u32 4294901760, %v273_v20  ;;  %v6056_v17 = vand.u32 4294901760, %v1417_v16  ;;  %v1435_v16 = vsub.f32 %v6016_v42, %v6045_v63  ;;  %1315 = vmatpush.msra.mxu1 %v5731_v22 }
 0x10c   : > { %7927 = vst [vmem:[#allocation226_spill] sm:$0xff] %v5986_v32  ;;  %1481 = vmatpush.msrb.mxu0 %v5886_v37 }
 0x10d   : > { %7928 = vst [vmem:[#allocation227_spill] sm:$0xff] %v5990_v47  ;;  %v1423_v47 = vsub.f32 %v5984_v8, %v6013_v49  ;;  %v6082_v23 = vsub.f32 %v273_v20, %v6052_v56  ;;  %1419 = vmatpush.msra.mxu3 %v6056_v17  ;;  %v6097_v20 = vand.u32 4294901760, %v1435_v16  ;;  %1317 = vmatpush.msra.mxu1 %v5747_v57 }
 0x10e   : > { %7929 = vst [vmem:[#allocation228_spill] sm:$0xff] %v5997_v6  ;;  %1360 = vmatpush.msra.mxu2 %v6052_v56  ;;  %1484 = vmatpush.msrb.mxu0 %v5891_v25 }
 0x10f   : > { %7930 = vst [vmem:[#allocation229_spill] sm:$0xff] %v6000_v35  ;;  %v6107_v19 = vand.u32 4294901760, %v6082_v23  ;;  %1319 = vmatpush.msra.mxu1 %v5763_v14 }
 0x110   : > { %7931 = vst [vmem:[#allocation230_spill] sm:$0xff] %v6002_v33  ;;  %1362 = vmatpush.msra.mxu2 %v6077_v3  ;;  %1487 = vmatpush.msrb.mxu0 %v5909_v21 }
 0x111   : > { %7932 = vst [vmem:[#allocation231_spill] sm:$0xff] %v6006_v0  ;;  %v1429_v0 = vsub.f32 %v6000_v35, %v6029_v46  ;;  %1321 = vmatpush.msra.mxu1 %v5779_v2 }
 0x112   : > { %7933 = vst [vmem:[#allocation232_spill] sm:$0xff] %v6013_v49  ;;  %v6061_v49 = vand.u32 4294901760, %v6032_v58  ;;  %1490 = vmatpush.msrb.mxu0 %v5934_v61 }
 0x113   : > { %7934 = vst [vmem:[#allocation233_spill] sm:$0xff] %v6016_v42  ;;  %1323 = vmatpush.msra.mxu1 %v5792_v44 }
 0x114   : > { %7935 = vst [vmem:[#allocation234_spill] sm:$0xff] %v6018_v52  ;;  %1493 = vmatpush.msrb.mxu0 %v5952_v31 }
 0x115   : > { %7936 = vst [vmem:[#allocation235_spill] sm:$0xff] %v6024_v26  ;;  %v6070_v26 = vand.u32 4294901760, %v1423_v47  ;;  %v6086_v47 = vand.u32 4294901760, %v1429_v0  ;;  %v1447_v0 = vsub.f32 %v6048_v40, %v6075_v36 }
 0x116   : > { %7937 = vst [vmem:[#allocation236_spill] sm:$0xff] %v6029_v46  ;;  %1496 = vmatpush.msrb.mxu0 %v5968_v39 }
 0x117   : > { %7938 = vst [vmem:[#allocation237_spill] sm:$0xff] %v6032_v58  ;;  %1425 = vmatpush.msra.mxu3 %v6070_v26  ;;  %v6119_v16 = vand.u32 4294901760, %v1447_v0 }
 0x118   : > { %7939 = vst [vmem:[#allocation238_spill] sm:$0xff] %v6036_v34  ;;  %1499 = vmatpush.msrb.mxu0 %v5984_v8 }
 0x119   : > { %7940 = vst [vmem:[#allocation239_spill] sm:$0xff] %v6040_v15  ;;  %v1441_v15 = vsub.f32 %v6032_v58, %v6061_v49  ;;  %1431 = vmatpush.msra.mxu3 %v6086_v47 }
 0x11a   : > { %7941 = vst [vmem:[#allocation240_spill] sm:$0xff] %v6045_v63  ;;  %1502 = vmatpush.msrb.mxu0 %v6000_v35 }
 0x11b   : > { %7942 = vst [vmem:[#allocation241_spill] sm:$0xff] %v6048_v40  ;;  %1437 = vmatpush.msra.mxu3 %v6097_v20 }
 0x11c   : > { %7943 = vst [vmem:[#allocation242_spill] sm:$0xff] %v6052_v56  ;;  %1505 = vmatpush.msrb.mxu0 %v6016_v42  ;;  %v8024_v42 = vld [vmem:[#allocation102_spill] sm:$0xff] }
 0x11d   : > { %7944 = vst [vmem:[#allocation243_spill] sm:$0xff] %v6056_v17  ;;  %v6102_v17 = vsub.f32 %v271_v27, %v6077_v3  ;;  %v1453_v27 = vsub.f32 %v6066_v9, %v6093_v59 }
 0x11e   : > { %7945 = vst [vmem:[#allocation244_spill] sm:$0xff] %v6061_v49  ;;  %1508 = vmatpush.msrb.mxu0 %v6032_v58 }
 0x11f   : > { %7946 = vst [vmem:[#allocation245_spill] sm:$0xff] %v6066_v9  ;;  %v6122_v29 = vand.u32 4294901760, %v6102_v17  ;;  %v6132_v0 = vand.u32 4294901760, %v1453_v27 }
 0x120   : > { %7947 = vst [vmem:[#allocation246_spill] sm:$0xff] %v6070_v26  ;;  %v6111_v26 = vand.u32 4294901760, %v1441_v15  ;;  %v1459_v15 = vsub.f32 %v6082_v23, %v6107_v19  ;;  %1511 = vmatpush.msrb.mxu0 %v6048_v40 }
 0x121   : > { %7948 = vst [vmem:[#allocation247_spill] sm:$0xff] %v6075_v36 }
 0x122   : > { %7949 = vst [vmem:[#allocation248_spill] sm:$0xff] %v6077_v3  ;;  %1443 = vmatpush.msra.mxu3 %v6111_v26  ;;  %1514 = vmatpush.msrb.mxu0 %v6066_v9  ;;  %v8004_v9 = vld [vmem:[#allocation43_spill] sm:$0xff] }
 0x123   : > { %7950 = vst [vmem:[#allocation249_spill] sm:$0xff] %v6082_v23 }
 0x124   : > { %7951 = vst [vmem:[#allocation250_spill] sm:$0xff] %v6086_v47  ;;  %1449 = vmatpush.msra.mxu3 %v6119_v16  ;;  %v6140_v47 = vand.u32 4294901760, %v1459_v15  ;;  %v7963_v15 = vld [vmem:[#allocation198_spill] sm:$0xff]  ;;  %1517 = vmatpush.msrb.mxu0 %v6082_v23  ;;  %v7998_v23 = vld [vmem:[#allocation33_spill] sm:$0xff] }
 0x125   : > { %7952 = vst [vmem:[#allocation251_spill] sm:$0xff] %v6093_v59  ;;  %1569 = vmatpush.msrb.mxu2 %v7963_v15  ;;  %v7968_v15 = vld [vmem:[#allocation148_spill] sm:$0xff] }
 0x126   : > { %7953 = vst [vmem:[#allocation252_spill] sm:$0xff] %v6097_v20  ;;  %v1465_v20 = vsub.f32 %v6102_v17, %v6122_v29  ;;  %1455 = vmatpush.msra.mxu3 %v6132_v0  ;;  %1368 = vmatmul.f32.vlgmr.msra.gmra.mxu2 %v7968_v15  ;;  %v7972_v15 = vld [vmem:[#allocation224_spill] sm:$0xff] }
 0x127   : > { %7954 = vst [vmem:[#allocation253_spill] sm:$0xff] %v6102_v17  ;;  %1520 = vmatpush.msrb.mxu0 %v6102_v17  ;;  %v7992_v17 = vld [vmem:[#allocation25_spill] sm:$0xff] }
 0x128   : > { %7955 = vst [vmem:[#allocation254_spill] sm:$0xff] %v6107_v19  ;;  %v6148_v27 = vand.u32 4294901760, %v1465_v20  ;;  %1461 = vmatpush.msra.mxu3 %v6140_v47  ;;  %v7965_v20 = vld [vmem:[#allocation204_spill] sm:$0xff] }
 0x129   : > { %7956 = vst [vmem:[#allocation255_spill] sm:$0xff] %v6111_v26  ;;  %1573 = vmatpush.msrb.mxu2 %v7965_v20  ;;  %v7970_v20 = vld [vmem:[#allocation140_spill] sm:$0xff] }
 0x12a   : > { %7957 = vst [vmem:[#allocation256_spill] sm:$0xff] %v6119_v16  ;;  %1467 = vmatpush.msra.mxu3 %v6148_v27 }
 0x12b   : > { %7958 = vst [vmem:[#allocation257_spill] sm:$0xff] %v6122_v29  ;;  %1577 = vmatpush.msrb.mxu2 %v7967_v54  ;;  %1469 = vmatmul.f32.vlgmr.msra.gmra.mxu3 %v7970_v20  ;;  %v7971_v54 = vld [vmem:[#allocation215_spill] sm:$0xff] }
 0x12c   : > { %7959 = vst [vmem:[#allocation258_spill] sm:$0xff] %v6132_v0  ;;  %1636 = vmatpush.msrb.mxu3 %v5804_v53  ;;  %v7966_v0 = vld [vmem:[#allocation186_spill] sm:$0xff] }
 0x12d   : > { %7960 = vst [vmem:[#allocation259_spill] sm:$0xff] %v6140_v47  ;;  %1325 = vmatpush.msra.mxu1 %v7966_v0  ;;  %v8006_v47 = vld [vmem:[#allocation74_spill] sm:$0xff] }
 0x12e   : > { %7961 = vst [vmem:[#allocation260_spill] sm:$0xff] %v6148_v27  ;;  %1638 = vmatpush.msrb.mxu3 %v5832_v51  ;;  %v7969_v27 = vld [vmem:[#allocation210_spill] sm:$0xff]  ;;  %1327 = vmatmul.f32.vlgmr.msra.gmra.mxu1 %v7964_v5  ;;  %v7973_v5 = vld [vmem:[#allocation232_spill] sm:$0xff] }
 0x12f   : > { %1528 = vmatpush.msrb.mxu1 %v5804_v53  ;;  %1581 = vmatpush.msrb.mxu2 %v7969_v27  ;;  %v7982_v27 = vld [vmem:[#allocation38_spill] sm:$0xff] }
 0x130   : > { %1640 = vmatpush.msrb.mxu3 %v5851_v50 }
 0x131   : > { %1530 = vmatpush.msrb.mxu1 %v5832_v51  ;;  %1585 = vmatpush.msrb.mxu2 %v7971_v54 }
 0x132   : > { %1642 = vmatpush.msrb.mxu3 %v5855_v48 }
 0x133   : > { %1532 = vmatpush.msrb.mxu1 %v5851_v50  ;;  %1589 = vmatpush.msrb.mxu2 %v5965_v13  ;;  %v7981_v13 = vld [vmem:[#allocation17_spill] sm:$0xff] }
 0x134   : > { %1644 = vmatpush.msrb.mxu3 %v5874_v60 }
 0x135   : > { %1534 = vmatpush.msrb.mxu1 %v5855_v48  ;;  %1593 = vmatpush.msrb.mxu2 %v7972_v15  ;;  %v7980_v15 = vld [vmem:[#allocation20_spill] sm:$0xff] }
 0x136   : > { %1646 = vmatpush.msrb.mxu3 %v5902_v62 }
 0x137   : > { %1536 = vmatpush.msrb.mxu1 %v5874_v60  ;;  %1597 = vmatpush.msrb.mxu2 %v5997_v6  ;;  %v7979_v6 = vld [vmem:[#allocation37_spill] sm:$0xff] }
 0x138   : > { %1648 = vmatpush.msrb.mxu3 %v5920_v12 }
 0x139   : > { %1538 = vmatpush.msrb.mxu1 %v5902_v62  ;;  %1601 = vmatpush.msrb.mxu2 %v7973_v5  ;;  %v501_v5 = vpop.f32.mrf.mxu2 }
 0x13a   : > { %1650 = vmatpush.msrb.mxu3 %v5936_v10 }
 0x13b   : > { %1540 = vmatpush.msrb.mxu1 %v5920_v12  ;;  %1605 = vmatpush.msrb.mxu2 %v6029_v46  ;;  %v7977_v46 = vld [vmem:[#allocation16_spill] sm:$0xff] }
 0x13c   : > { %1652 = vmatpush.msrb.mxu3 %v5954_v4 }
 0x13d   : > { %1542 = vmatpush.msrb.mxu1 %v5936_v10  ;;  %1609 = vmatpush.msrb.mxu2 %v6045_v63  ;;  %v7974_v63 = vld [vmem:[#allocation143_spill] sm:$0xff] }
 0x13e   : > { %1654 = vmatpush.msrb.mxu3 %v5970_v1  ;;  %1523 = vmatmul.f32.vlgmr.msrb.gmra.mxu0 %v7974_v63  ;;  %v346_v63 = vpop.f32.mrf.mxu0 }
 0x13f   : > { %1544 = vmatpush.msrb.mxu1 %v5954_v4  ;;  %1613 = vmatpush.msrb.mxu2 %v6061_v49  ;;  %v447_v49 = vpop.f32.mrf.mxu1 }
 0x140   : > { %1656 = vmatpush.msrb.mxu3 %v5986_v32 }
 0x141   : > { %1546 = vmatpush.msrb.mxu1 %v5970_v1  ;;  %1617 = vmatpush.msrb.mxu2 %v6075_v36  ;;  %v7975_v36 = vld [vmem:[#allocation14_spill] sm:$0xff] }
 0x142   : > { %1658 = vmatpush.msrb.mxu3 %v6002_v33  ;;  %1682 = vmatpush.msra.mxu0 %v7975_v36  ;;  %v8023_v1 = vld [vmem:[#allocation70_spill] sm:$0xff] }
 0x143   : > { %1548 = vmatpush.msrb.mxu1 %v5986_v32  ;;  %1621 = vmatpush.msrb.mxu2 %v6093_v59  ;;  %v7976_v59 = vld [vmem:[#allocation15_spill] sm:$0xff]  ;;  %v8015_v32 = vld [vmem:[#allocation88_spill] sm:$0xff] }
 0x144   : > { %1660 = vmatpush.msrb.mxu3 %v6018_v52  ;;  %1684 = vmatpush.msra.mxu0 %v7976_v59 }
 0x145   : > { %1550 = vmatpush.msrb.mxu1 %v6002_v33  ;;  %1625 = vmatpush.msrb.mxu2 %v6107_v19  ;;  %v448_v19 = vadd.f32 %v447_v49, %v346_v63  ;;  %v540_v49 = vpop.f32.mrf.mxu3  ;;  %v7984_v63 = vld [vmem:[#allocation18_spill] sm:$0xff]  ;;  %v8010_v33 = vld [vmem:[#allocation48_spill] sm:$0xff] }
 0x146   : > { %1662 = vmatpush.msrb.mxu3 %v6036_v34  ;;  %1686 = vmatpush.msra.mxu0 %v7977_v46 }
 0x147   : > { %1552 = vmatpush.msrb.mxu1 %v6018_v52  ;;  %1629 = vmatpush.msrb.mxu2 %v6122_v29  ;;  %v7978_v29 = vld [vmem:[#allocation146_spill] sm:$0xff]  ;;  %v502_v54 = vadd.f32 %v501_v5, %v448_v19  ;;  %v7989_v19 = vld [vmem:[#allocation24_spill] sm:$0xff]  ;;  %v609_v5 = vpop.f32.mrf.mxu0 }
 0x148   : > { %1664 = vmatpush.msrb.mxu3 %v6052_v56  ;;  %1631 = vmatmul.f32.vlgmr.msrb.gmra.mxu2 %v7970_v20  ;;  %v8000_v52 = vld [vmem:[#allocation64_spill] sm:$0xff] }
 0x149   : > { %1554 = vmatpush.msrb.mxu1 %v6036_v34  ;;  %1825 = vmatpush.msra.mxu2 %v7980_v15  ;;  %v541_v15 = vadd.f32 %v540_v49, %v502_v54  ;;  %v7994_v34 = vld [vmem:[#allocation53_spill] sm:$0xff]  ;;  %v7995_v54 = vld [vmem:[#allocation26_spill] sm:$0xff]  ;;  %v646_v49 = vpop.f32.mrf.mxu1 }
 0x14a   : > { %1666 = vmatpush.msrb.mxu3 %v6077_v3  ;;  %1688 = vmatpush.msra.mxu0 %v7981_v13 }
 0x14b   : > { %1556 = vmatpush.msrb.mxu1 %v6052_v56  ;;  %1668 = vmatmul.f32.vlgmr.msrb.gmra.mxu3 %v7970_v20  ;;  %v7983_v20 = vld [vmem:[#allocation21_spill] sm:$0xff]  ;;  %v7988_v56 = vld [vmem:[#allocation44_spill] sm:$0xff] }
 0x14c   : > { %1878 = vmatpush.msra.mxu3 %v7975_v36  ;;  %1828 = vmatpush.msra.mxu2 %v7983_v20  ;;  %v7990_v20 = vld [vmem:[#allocation23_spill] sm:$0xff] }
 0x14d   : > { %1558 = vmatpush.msrb.mxu1 %v6077_v3  ;;  %1690 = vmatpush.msra.mxu0 %v7984_v63  ;;  %v7986_v3 = vld [vmem:[#allocation22_spill] sm:$0xff] }
 0x14e   : > { %1562 = vmatmul.f32.vlgmr.msrb.gmra.mxu1 %v7978_v29  ;;  %1880 = vmatpush.msra.mxu3 %v7976_v59  ;;  %v7985_v29 = vld [vmem:[#allocation41_spill] sm:$0xff] }
 0x14f   : > { %1727 = vmatpush.msra.mxu1 %v7979_v6  ;;  %1831 = vmatpush.msra.mxu2 %v7986_v3  ;;  %v7987_v6 = vld [vmem:[#allocation19_spill] sm:$0xff]  ;;  %v610_v3 = vadd.f32 %v609_v5, %v541_v15  ;;  %v687_v5 = vpop.f32.mrf.mxu2 }
 0x150   : > { %1692 = vmatpush.msra.mxu0 %v7987_v6  ;;  %1882 = vmatpush.msra.mxu3 %v7977_v46  ;;  %v8001_v15 = vld [vmem:[#allocation39_spill] sm:$0xff] }
 0x151   : > { %1733 = vmatpush.msra.mxu1 %v7982_v27  ;;  %1834 = vmatpush.msra.mxu2 %v7989_v19  ;;  %v7991_v27 = vld [vmem:[#allocation50_spill] sm:$0xff]  ;;  %v7996_v19 = vld [vmem:[#allocation32_spill] sm:$0xff]  ;;  %v881_v58 = vpop.f32.mrf.mxu1 }
 0x152   : > { %1694 = vmatpush.msra.mxu0 %v7990_v20  ;;  %1884 = vmatpush.msra.mxu3 %v7981_v13 }
 0x153   : > { %1739 = vmatpush.msra.mxu1 %v7985_v29  ;;  %1837 = vmatpush.msra.mxu2 %v7992_v17  ;;  %v7993_v29 = vld [vmem:[#allocation30_spill] sm:$0xff]  ;;  %v647_v17 = vadd.f32 %v646_v49, %v610_v3  ;;  %v8007_v3 = vld [vmem:[#allocation47_spill] sm:$0xff]  ;;  %v788_v49 = vpop.f32.mrf.mxu3 }
 0x154   : > { %1696 = vmatpush.msra.mxu0 %v7993_v29  ;;  %1886 = vmatpush.msra.mxu3 %v7984_v63 }
 0x155   : > { %1745 = vmatpush.msra.mxu1 %v7988_v56  ;;  %1840 = vmatpush.msra.mxu2 %v7995_v54  ;;  %v7997_v56 = vld [vmem:[#allocation59_spill] sm:$0xff]  ;;  %v8002_v54 = vld [vmem:[#allocation40_spill] sm:$0xff] }
 0x156   : > { %1698 = vmatpush.msra.mxu0 %v7996_v19  ;;  %1888 = vmatpush.msra.mxu3 %v7987_v6 }
 0x157   : > { %1751 = vmatpush.msra.mxu1 %v7991_v27  ;;  %1843 = vmatpush.msra.mxu2 %v7998_v23  ;;  %v7999_v27 = vld [vmem:[#allocation35_spill] sm:$0xff]  ;;  %v688_v23 = vadd.f32 %v687_v5, %v647_v17  ;;  %v8012_v17 = vld [vmem:[#allocation84_spill] sm:$0xff]  ;;  %v950_v16 = vpop.f32.mrf.mxu2 }
 0x158   : > { %1700 = vmatpush.msra.mxu0 %v7999_v27  ;;  %1890 = vmatpush.msra.mxu3 %v7990_v20  ;;  %v8013_v5 = vld [vmem:[#allocation56_spill] sm:$0xff] }
 0x159   : > { %1757 = vmatpush.msra.mxu1 %v7994_v34  ;;  %1846 = vmatpush.msra.mxu2 %v8001_v15  ;;  %v8003_v34 = vld [vmem:[#allocation68_spill] sm:$0xff]  ;;  %v8008_v15 = vld [vmem:[#allocation51_spill] sm:$0xff]  ;;  %v789_v40 = vadd.f32 %v788_v49, %v688_v23 }
 0x15a   : > { %1702 = vmatpush.msra.mxu0 %v8002_v54  ;;  %1892 = vmatpush.msra.mxu3 %v7993_v29  ;;  %v8018_v23 = vld [vmem:[#allocation92_spill] sm:$0xff]  ;;  %v8019_v49 = vld [vmem:[#allocation27_spill] sm:$0xff] }
 0x15b   : > { %1763 = vmatpush.msra.mxu1 %v7997_v56  ;;  %1849 = vmatpush.msra.mxu2 %v8004_v9  ;;  %v8005_v56 = vld [vmem:[#allocation45_spill] sm:$0xff]  ;;  %v842_v9 = vpop.f32.mrf.mxu0 }
 0x15c   : > { %1704 = vmatpush.msra.mxu0 %v8005_v56  ;;  %1894 = vmatpush.msra.mxu3 %v7996_v19 }
 0x15d   : > { %1769 = vmatpush.msra.mxu1 %v8000_v52  ;;  %1852 = vmatpush.msra.mxu2 %v8007_v3  ;;  %v8009_v52 = vld [vmem:[#allocation77_spill] sm:$0xff]  ;;  %v8014_v3 = vld [vmem:[#allocation60_spill] sm:$0xff] }
 0x15e   : > { %1706 = vmatpush.msra.mxu0 %v8008_v15  ;;  %1896 = vmatpush.msra.mxu3 %v7999_v27 }
 0x15f   : > { %1775 = vmatpush.msra.mxu1 %v8003_v34  ;;  %1855 = vmatpush.msra.mxu2 %v8010_v33  ;;  %v8011_v34 = vld [vmem:[#allocation54_spill] sm:$0xff] }
 0x160   : > { %1708 = vmatpush.msra.mxu0 %v8011_v34  ;;  %1898 = vmatpush.msra.mxu3 %v8002_v54  ;;  %v8017_v33 = vld [vmem:[#allocation62_spill] sm:$0xff] }
 0x161   : > { %1781 = vmatpush.msra.mxu1 %v8006_v47  ;;  %1858 = vmatpush.msra.mxu2 %v8013_v5  ;;  %v843_v47 = vadd.f32 %v842_v9, %v789_v40  ;;  %v8021_v40 = vld [vmem:[#allocation97_spill] sm:$0xff]  ;;  %v8022_v9 = vld [vmem:[#allocation28_spill] sm:$0xff] }
 0x162   : > { %1710 = vmatpush.msra.mxu0 %v8014_v3  ;;  %1900 = vmatpush.msra.mxu3 %v8005_v56 }
 0x163   : > { %1787 = vmatpush.msra.mxu1 %v8009_v52  ;;  %v8016_v52 = vld [vmem:[#allocation61_spill] sm:$0xff]  ;;  %v882_v5 = vadd.f32 %v881_v58, %v843_v47  ;;  %v8026_v58 = vld [vmem:[#allocation72_spill] sm:$0xff]  ;;  %v8027_v47 = vld [vmem:[#allocation31_spill] sm:$0xff] }
 0x164   : > { %1861 = vmatpush.msra.mxu2 %v8016_v52  ;;  %1712 = vmatpush.msra.mxu0 %v8017_v33 }
 0x165   : > { %1793 = vmatpush.msra.mxu1 %v8012_v17  ;;  %1902 = vmatpush.msra.mxu3 %v8008_v15  ;;  %v8020_v17 = vld [vmem:[#allocation66_spill] sm:$0xff]  ;;  %v951_v52 = vadd.f32 %v950_v16, %v882_v5  ;;  %v8028_v16 = vld [vmem:[#allocation95_spill] sm:$0xff] }
 0x166   : > { %1919 = vmatpush.msrb.mxu0 %v8019_v49  ;;  %1864 = vmatpush.msra.mxu2 %v8020_v17  ;;  %v8029_v5 = vld [vmem:[#allocation34_spill] sm:$0xff] }
 0x167   : > { %1799 = vmatpush.msra.mxu1 %v8015_v32  ;;  %1904 = vmatpush.msra.mxu3 %v8011_v34  ;;  %v987_v32 = vpop.f32.mrf.mxu3 }
 0x168   : > { %1923 = vmatpush.msrb.mxu0 %v8022_v9  ;;  %1867 = vmatpush.msra.mxu2 %v8023_v1  ;;  %v6292_v49 = vadd.f32 %v987_v32, %v951_v52  ;;  %v8030_v32 = vld [vmem:[#allocation100_spill] sm:$0xff]  ;;  %v8036_v9 = vld [vmem:[#allocation58_spill] sm:$0xff] }
 0x169   : > { %1805 = vmatpush.msra.mxu1 %v8018_v23  ;;  %1906 = vmatpush.msra.mxu3 %v8014_v3  ;;  %v8025_v23 = vld [vmem:[#allocation29_spill] sm:$0xff] }
 0x16a   : > { %1927 = vmatpush.msrb.mxu0 %v8025_v23  ;;  %1870 = vmatpush.msra.mxu2 %v8026_v58  ;;  %v6298_v17 = vand.u32 4294901760, %v6292_v49  ;;  %v8031_v58 = vld [vmem:[#allocation36_spill] sm:$0xff] }
 0x16b   : > { %1811 = vmatpush.msra.mxu1 %v8021_v40  ;;  %1908 = vmatpush.msra.mxu3 %v8017_v33  ;;  %v8040_v40 = vld [vmem:[#allocation55_spill] sm:$0xff] }
 0x16c   : > { %1931 = vmatpush.msrb.mxu0 %v8027_v47  ;;  %v6306_v52 = vsub.f32 %v6292_v49, %v6298_v17  ;;  %2023 = vmatpush.msrb.mxu2 %v8036_v9 }
 0x16d   : > { %1817 = vmatpush.msra.mxu1 %v8024_v42  ;;  %2068 = vmatpush.msrb.mxu3 %v8028_v16  ;;  %v8032_v16 = vld [vmem:[#allocation106_spill] sm:$0xff]  ;;  %v8039_v42 = vld [vmem:[#allocation63_spill] sm:$0xff] }
 0x16e   : > { %1935 = vmatpush.msrb.mxu0 %v8029_v5  ;;  %1819 = vmatmul.f32.vlgmr.msra.gmra.mxu1 %v6298_v17  ;;  %v6314_v1 = vand.u32 4294901760, %v6306_v52  ;;  %v8033_v5 = vld [vmem:[#allocation42_spill] sm:$0xff] }
 0x16f   : > { %1986 = vmatpush.msrb.mxu1 %v7975_v36  ;;  %2074 = vmatpush.msrb.mxu3 %v8030_v32  ;;  %v8034_v32 = vld [vmem:[#allocation110_spill] sm:$0xff] }
 0x170   : > { %1939 = vmatpush.msrb.mxu0 %v8031_v58  ;;  %1873 = vmatmul.f32.vlgmr.msra.gmra.mxu2 %v6306_v52  ;;  %v1716_v47 = vsub.f32 %v6306_v52, %v6314_v1  ;;  %v8035_v58 = vld [vmem:[#allocation46_spill] sm:$0xff] }
 0x171   : > { %1988 = vmatpush.msrb.mxu1 %v7976_v59  ;;  %2080 = vmatpush.msrb.mxu3 %v8032_v16  ;;  %v8037_v16 = vld [vmem:[#allocation113_spill] sm:$0xff] }
 0x172   : > { %1943 = vmatpush.msrb.mxu0 %v8033_v5  ;;  %1912 = vmatmul.f32.vlgmr.msra.gmra.mxu3 %v6314_v1  ;;  %v6325_v23 = vand.u32 4294901760, %v1716_v47  ;;  %v8038_v5 = vld [vmem:[#allocation52_spill] sm:$0xff]  ;;  %v8042_v47 = vld [vmem:[#allocation71_spill] sm:$0xff] }
 0x173   : > { %1990 = vmatpush.msrb.mxu1 %v7977_v46  ;;  %2086 = vmatpush.msrb.mxu3 %v8034_v32  ;;  %v8041_v32 = vld [vmem:[#allocation117_spill] sm:$0xff] }
 0x174   : > { %1947 = vmatpush.msrb.mxu0 %v8035_v58  ;;  %2025 = vmatpush.msrb.mxu2 %v8039_v42  ;;  %v8043_v58 = vld [vmem:[#allocation57_spill] sm:$0xff] }
 0x175   : > { %1992 = vmatpush.msrb.mxu1 %v7981_v13  ;;  %2092 = vmatpush.msrb.mxu3 %v8037_v16  ;;  %v8045_v16 = vld [vmem:[#allocation76_spill] sm:$0xff] }
 0x176   : > { %1951 = vmatpush.msrb.mxu0 %v8038_v5  ;;  %2027 = vmatpush.msrb.mxu2 %v8042_v47  ;;  %v8046_v5 = vld [vmem:[#allocation65_spill] sm:$0xff] }
 0x177   : > { %1994 = vmatpush.msrb.mxu1 %v7984_v63  ;;  %1718 = vmatmul.f32.vlgmr.msra.gmra.mxu0 %v6325_v23 }
 0x178   : > { %1955 = vmatpush.msrb.mxu0 %v8040_v40  ;;  %2098 = vmatpush.msrb.mxu3 %v8041_v32  ;;  %v8048_v40 = vld [vmem:[#allocation81_spill] sm:$0xff] }
 0x179   : > { %1996 = vmatpush.msrb.mxu1 %v7987_v6  ;;  %v8044_v6 = vld [vmem:[#allocation121_spill] sm:$0xff]  ;;  %2029 = vmatpush.msrb.mxu2 %v8045_v16 }
 0x17a   : > { %1959 = vmatpush.msrb.mxu0 %v8043_v58  ;;  %2104 = vmatpush.msrb.mxu3 %v8044_v6  ;;  %v8049_v32 = vld [vmem:[#allocation69_spill] sm:$0xff]  ;;  %v8051_v58 = vld [vmem:[#allocation86_spill] sm:$0xff]  ;;  %v8052_v6 = vld [vmem:[#allocation75_spill] sm:$0xff] }
 0x17b   : > { %1998 = vmatpush.msrb.mxu1 %v7990_v20  ;;  %v8047_v20 = vld [vmem:[#allocation125_spill] sm:$0xff]  ;;  %2031 = vmatpush.msrb.mxu2 %v8048_v40 }
 0x17c   : > { %1963 = vmatpush.msrb.mxu0 %v8046_v5  ;;  %2110 = vmatpush.msrb.mxu3 %v8047_v20  ;;  %v8054_v5 = vld [vmem:[#allocation87_spill] sm:$0xff] }
 0x17d   : > { %2000 = vmatpush.msrb.mxu1 %v7993_v29  ;;  %v8050_v29 = vld [vmem:[#allocation128_spill] sm:$0xff]  ;;  %2033 = vmatpush.msrb.mxu2 %v8051_v58  ;;  %v8055_v20 = vld [vmem:[#allocation79_spill] sm:$0xff] }
 0x17e   : > { %1967 = vmatpush.msrb.mxu0 %v8049_v32  ;;  %2116 = vmatpush.msrb.mxu3 %v8050_v29  ;;  %v8057_v32 = vld [vmem:[#allocation91_spill] sm:$0xff]  ;;  %v8058_v29 = vld [vmem:[#allocation82_spill] sm:$0xff] }
 0x17f   : > { %2002 = vmatpush.msrb.mxu1 %v7996_v19  ;;  %v8053_v19 = vld [vmem:[#allocation132_spill] sm:$0xff]  ;;  %2035 = vmatpush.msrb.mxu2 %v8054_v5 }
 0x180   : > { %1971 = vmatpush.msrb.mxu0 %v8052_v6  ;;  %2122 = vmatpush.msrb.mxu3 %v8053_v19  ;;  %v8060_v19 = vld [vmem:[#allocation67_spill] sm:$0xff] }
 0x181   : > { %2004 = vmatpush.msrb.mxu1 %v7999_v27  ;;  %v8056_v27 = vld [vmem:[#allocation135_spill] sm:$0xff]  ;;  %2037 = vmatpush.msrb.mxu2 %v8057_v32 }
 0x182   : > { %1975 = vmatpush.msrb.mxu0 %v8055_v20  ;;  %2128 = vmatpush.msrb.mxu3 %v8056_v27  ;;  %v8061_v6 = vld [vmem:[#allocation99_spill] sm:$0xff]  ;;  %v8062_v20 = vld [vmem:[#allocation141_spill] sm:$0xff] }
 0x183   : > { %2006 = vmatpush.msrb.mxu1 %v8002_v54  ;;  %v8059_v54 = vld [vmem:[#allocation138_spill] sm:$0xff]  ;;  %2039 = vmatpush.msrb.mxu2 %v8061_v6  ;;  %v8063_v27 = vld [vmem:[#allocation73_spill] sm:$0xff] }
 0x184   : > { %1979 = vmatpush.msrb.mxu0 %v8058_v29  ;;  %2134 = vmatpush.msrb.mxu3 %v8059_v54  ;;  %v8065_v29 = vld [vmem:[#allocation144_spill] sm:$0xff] }
 0x185   : > { %2008 = vmatpush.msrb.mxu1 %v8005_v56  ;;  %1981 = vmatmul.f32.vlgmr.msrb.gmra.mxu0 %v6298_v17  ;;  %v8066_v54 = vld [vmem:[#allocation80_spill] sm:$0xff] }
 0x186   : > { %2166 = vmatpush.msra.mxu0 %v8060_v19  ;;  %2140 = vmatpush.msrb.mxu3 %v8062_v20  ;;  %v8067_v19 = vld [vmem:[#allocation108_spill] sm:$0xff]  ;;  %v8071_v20 = vld [vmem:[#allocation90_spill] sm:$0xff] }
 0x187   : > { %2010 = vmatpush.msrb.mxu1 %v8008_v15  ;;  %v8064_v15 = vld [vmem:[#allocation104_spill] sm:$0xff] }
 0x188   : > { %2169 = vmatpush.msra.mxu0 %v8063_v27  ;;  %2041 = vmatpush.msrb.mxu2 %v8064_v15  ;;  %v8070_v27 = vld [vmem:[#allocation112_spill] sm:$0xff] }
 0x189   : > { %2012 = vmatpush.msrb.mxu1 %v8011_v34  ;;  %2146 = vmatpush.msrb.mxu3 %v8065_v29  ;;  %v8068_v34 = vld [vmem:[#allocation85_spill] sm:$0xff]  ;;  %v8074_v29 = vld [vmem:[#allocation116_spill] sm:$0xff] }
 0x18a   : > { %2172 = vmatpush.msra.mxu0 %v8066_v54  ;;  %2043 = vmatpush.msrb.mxu2 %v8067_v19  ;;  %v8073_v54 = vld [vmem:[#allocation94_spill] sm:$0xff] }
 0x18b   : > { %2014 = vmatpush.msrb.mxu1 %v8014_v3  ;;  %v8069_v3 = vld [vmem:[#allocation145_spill] sm:$0xff] }
 0x18c   : > { %2175 = vmatpush.msra.mxu0 %v8068_v34  ;;  %2152 = vmatpush.msrb.mxu3 %v8069_v3  ;;  %v8075_v34 = vld [vmem:[#allocation96_spill] sm:$0xff]  ;;  %v8076_v3 = vld [vmem:[#allocation123_spill] sm:$0xff] }
 0x18d   : > { %2016 = vmatpush.msrb.mxu1 %v8017_v33  ;;  %2045 = vmatpush.msrb.mxu2 %v8070_v27  ;;  %v8072_v33 = vld [vmem:[#allocation147_spill] sm:$0xff] }
 0x18e   : > { %2018 = vmatmul.f32.vlgmr.msrb.gmra.mxu1 %v6298_v17  ;;  %2178 = vmatpush.msra.mxu0 %v8071_v20  ;;  %v8077_v20 = vld [vmem:[#allocation101_spill] sm:$0xff] }
 0x18f   : > { %2219 = vmatpush.msra.mxu1 %v8036_v9  ;;  %2158 = vmatpush.msrb.mxu3 %v8072_v33  ;;  %v8078_v33 = vld [vmem:[#allocation127_spill] sm:$0xff] }
 0x190   : > { %2181 = vmatpush.msra.mxu0 %v8073_v54  ;;  %2047 = vmatpush.msrb.mxu2 %v8074_v29  ;;  %v8079_v54 = vld [vmem:[#allocation107_spill] sm:$0xff] }
 0x191   : > { %2221 = vmatpush.msra.mxu1 %v8039_v42  ;;  %2327 = vmatpush.msra.mxu3 %v8036_v9  ;;  %v8080_v9 = vld [vmem:[#allocation131_spill] sm:$0xff] }
 0x192   : > { %2184 = vmatpush.msra.mxu0 %v8075_v34  ;;  %2049 = vmatpush.msrb.mxu2 %v8076_v3  ;;  %v8081_v34 = vld [vmem:[#allocation78_spill] sm:$0xff] }
 0x193   : > { %2223 = vmatpush.msra.mxu1 %v8042_v47  ;;  %2329 = vmatpush.msra.mxu3 %v8039_v42  ;;  %v8082_v42 = vld [vmem:[#allocation111_spill] sm:$0xff] }
 0x194   : > { %2187 = vmatpush.msra.mxu0 %v8077_v20  ;;  %2051 = vmatpush.msrb.mxu2 %v8078_v33  ;;  %v8083_v20 = vld [vmem:[#allocation83_spill] sm:$0xff] }
 0x195   : > { %2225 = vmatpush.msra.mxu1 %v8045_v16  ;;  %2331 = vmatpush.msra.mxu3 %v8042_v47  ;;  %v8084_v47 = vld [vmem:[#allocation115_spill] sm:$0xff] }
 0x196   : > { %2190 = vmatpush.msra.mxu0 %v8079_v54  ;;  %2053 = vmatpush.msrb.mxu2 %v8080_v9  ;;  %v8085_v54 = vld [vmem:[#allocation89_spill] sm:$0xff] }
 0x197   : > { %2227 = vmatpush.msra.mxu1 %v8048_v40  ;;  %2333 = vmatpush.msra.mxu3 %v8045_v16  ;;  %v8086_v16 = vld [vmem:[#allocation119_spill] sm:$0xff] }
 0x198   : > { %2260 = vmatpush.msra.mxu2 %v8081_v34  ;;  %2193 = vmatpush.msra.mxu0 %v8082_v42  ;;  %v8087_v42 = vld [vmem:[#allocation93_spill] sm:$0xff]  ;;  %v8088_v34 = vld [vmem:[#allocation124_spill] sm:$0xff] }
 0x199   : > { %2229 = vmatpush.msra.mxu1 %v8051_v58  ;;  %2335 = vmatpush.msra.mxu3 %v8048_v40  ;;  %v8124_v40 = vld [vmem:[#allocation216_spill] sm:$0xff] }
 0x19a   : > { %2264 = vmatpush.msra.mxu2 %v8083_v20  ;;  %2196 = vmatpush.msra.mxu0 %v8084_v47  ;;  %v8089_v47 = vld [vmem:[#allocation98_spill] sm:$0xff] }
 0x19b   : > { %2231 = vmatpush.msra.mxu1 %v8054_v5  ;;  %2337 = vmatpush.msra.mxu3 %v8051_v58  ;;  %v8090_v20 = vld [vmem:[#allocation130_spill] sm:$0xff]  ;;  %v8106_v58 = vld [vmem:[#allocation171_spill] sm:$0xff] }
 0x19c   : > { %2268 = vmatpush.msra.mxu2 %v8085_v54  ;;  %2199 = vmatpush.msra.mxu0 %v8086_v16  ;;  %v8091_v16 = vld [vmem:[#allocation103_spill] sm:$0xff]  ;;  %v8092_v54 = vld [vmem:[#allocation134_spill] sm:$0xff] }
 0x19d   : > { %2233 = vmatpush.msra.mxu1 %v8057_v32  ;;  %2339 = vmatpush.msra.mxu3 %v8054_v5  ;;  %v1183_v5 = vpop.f32.mrf.mxu2 }
 0x19e   : > { %2272 = vmatpush.msra.mxu2 %v8087_v42  ;;  %2202 = vmatpush.msra.mxu0 %v8088_v34  ;;  %v8093_v34 = vld [vmem:[#allocation105_spill] sm:$0xff] }
 0x19f   : > { %2235 = vmatpush.msra.mxu1 %v8061_v6  ;;  %2341 = vmatpush.msra.mxu3 %v8057_v32  ;;  %v8094_v42 = vld [vmem:[#allocation137_spill] sm:$0xff]  ;;  %v8104_v32 = vld [vmem:[#allocation122_spill] sm:$0xff] }
 0x1a0   : > { %2276 = vmatpush.msra.mxu2 %v8089_v47  ;;  %2205 = vmatpush.msra.mxu0 %v8090_v20  ;;  %v8095_v20 = vld [vmem:[#allocation149_spill] sm:$0xff] }
 0x1a1   : > { %2237 = vmatpush.msra.mxu1 %v8064_v15  ;;  %2343 = vmatpush.msra.mxu3 %v8061_v6  ;;  %v8096_v47 = vld [vmem:[#allocation109_spill] sm:$0xff]  ;;  %v8103_v6 = vld [vmem:[#allocation167_spill] sm:$0xff] }
 0x1a2   : > { %2280 = vmatpush.msra.mxu2 %v8091_v16  ;;  %2208 = vmatpush.msra.mxu0 %v8092_v54  ;;  %v8097_v54 = vld [vmem:[#allocation150_spill] sm:$0xff] }
 0x1a3   : > { %2239 = vmatpush.msra.mxu1 %v8067_v19  ;;  %2345 = vmatpush.msra.mxu3 %v8064_v15  ;;  %v8098_v16 = vld [vmem:[#allocation114_spill] sm:$0xff] }
 0x1a4   : > { %2284 = vmatpush.msra.mxu2 %v8093_v34  ;;  %2211 = vmatpush.msra.mxu0 %v8094_v42  ;;  %v8099_v42 = vld [vmem:[#allocation151_spill] sm:$0xff]  ;;  %v1129_v34 = vpop.f32.mrf.mxu1  ;;  %v8101_v15 = vld [vmem:[#allocation118_spill] sm:$0xff] }
 0x1a5   : > { %2241 = vmatpush.msra.mxu1 %v8070_v27  ;;  %2347 = vmatpush.msra.mxu3 %v8067_v19  ;;  %v8100_v19 = vld [vmem:[#allocation164_spill] sm:$0xff] }
 0x1a6   : > { %2364 = vmatpush.msrb.mxu0 %v8095_v20  ;;  %2288 = vmatpush.msra.mxu2 %v8096_v47  ;;  %v8102_v47 = vld [vmem:[#allocation153_spill] sm:$0xff] }
 0x1a7   : > { %2243 = vmatpush.msra.mxu1 %v8074_v29  ;;  %2349 = vmatpush.msra.mxu3 %v8070_v27  ;;  %v1028_v27 = vpop.f32.mrf.mxu0 }
 0x1a8   : > { %2366 = vmatpush.msrb.mxu0 %v8097_v54  ;;  %2292 = vmatpush.msra.mxu2 %v8098_v16  ;;  %v1130_v16 = vadd.f32 %v1129_v34, %v1028_v27  ;;  %v1222_v34 = vpop.f32.mrf.mxu3  ;;  %v8110_v27 = vld [vmem:[#allocation177_spill] sm:$0xff] }
 0x1a9   : > { %2245 = vmatpush.msra.mxu1 %v8076_v3  ;;  %2351 = vmatpush.msra.mxu3 %v8074_v29  ;;  %v8105_v29 = vld [vmem:[#allocation155_spill] sm:$0xff] }
 0x1aa   : > { %2368 = vmatpush.msrb.mxu0 %v8099_v42  ;;  %2296 = vmatpush.msra.mxu2 %v8101_v15  ;;  %v8108_v15 = vld [vmem:[#allocation174_spill] sm:$0xff] }
 0x1ab   : > { %2247 = vmatpush.msra.mxu1 %v8078_v33  ;;  %2353 = vmatpush.msra.mxu3 %v8076_v3  ;;  %v8109_v3 = vld [vmem:[#allocation129_spill] sm:$0xff] }
 0x1ac   : > { %2370 = vmatpush.msrb.mxu0 %v8102_v47  ;;  %2300 = vmatpush.msra.mxu2 %v8104_v32  ;;  %v8111_v32 = vld [vmem:[#allocation136_spill] sm:$0xff] }
 0x1ad   : > { %2249 = vmatpush.msra.mxu1 %v8080_v9  ;;  %2355 = vmatpush.msra.mxu3 %v8078_v33 }
 0x1ae   : > { %2372 = vmatpush.msrb.mxu0 %v8105_v29 }
 0x1af   : > { %2409 = vmatpush.msrb.mxu1 %v8100_v19  ;;  %v8107_v19 = vld [vmem:[#allocation126_spill] sm:$0xff]  ;;  %2357 = vmatpush.msra.mxu3 %v8080_v9 }
 0x1b0   : > { %2304 = vmatpush.msra.mxu2 %v8107_v19  ;;  %2374 = vmatpush.msrb.mxu0 %v5652_v11  ;;  %v8113_v19 = vld [vmem:[#allocation139_spill] sm:$0xff]  ;;  %v8114_v9 = vld [vmem:[#allocation182_spill] sm:$0xff] }
 0x1b1   : > { %2415 = vmatpush.msrb.mxu1 %v8103_v6  ;;  %v1184_v6 = vadd.f32 %v1183_v5, %v1130_v16  ;;  %v8115_v16 = vld [vmem:[#allocation142_spill] sm:$0xff]  ;;  %v8116_v5 = vld [vmem:[#allocation185_spill] sm:$0xff] }
 0x1b2   : > { %2308 = vmatpush.msra.mxu2 %v8109_v3  ;;  %2376 = vmatpush.msrb.mxu0 %v5666_v43 }
 0x1b3   : > { %2421 = vmatpush.msrb.mxu1 %v8106_v58  ;;  %v8112_v58 = vld [vmem:[#allocation180_spill] sm:$0xff]  ;;  %v1223_v33 = vadd.f32 %v1222_v34, %v1184_v6 }
 0x1b4   : > { %2312 = vmatpush.msra.mxu2 %v8111_v32  ;;  %2378 = vmatpush.msrb.mxu0 %v5680_v38  ;;  %v1328_v32 = vpop.f32.mrf.mxu1  ;;  %v8118_v6 = vld [vmem:[#allocation192_spill] sm:$0xff] }
 0x1b5   : > { %2427 = vmatpush.msrb.mxu1 %v8108_v15  ;;  %v1291_v15 = vpop.f32.mrf.mxu0 }
 0x1b6   : > { %2316 = vmatpush.msra.mxu2 %v8113_v19  ;;  %2380 = vmatpush.msrb.mxu0 %v5690_v30  ;;  %v1292_v3 = vadd.f32 %v1291_v15, %v1223_v33  ;;  %v1369_v19 = vpop.f32.mrf.mxu2  ;;  %v1470_v15 = vpop.f32.mrf.mxu3 }
 0x1b7   : > { %2433 = vmatpush.msrb.mxu1 %v8110_v27  ;;  %v8117_v27 = vld [vmem:[#allocation189_spill] sm:$0xff] }
 0x1b8   : > { %2320 = vmatpush.msra.mxu2 %v8115_v16  ;;  %2382 = vmatpush.msrb.mxu0 %v5706_v24  ;;  %v1329_v34 = vadd.f32 %v1328_v32, %v1292_v3  ;;  %v8120_v16 = vld [vmem:[#allocation200_spill] sm:$0xff]  ;;  %v8122_v3 = vld [vmem:[#allocation207_spill] sm:$0xff] }
 0x1b9   : > { %2439 = vmatpush.msrb.mxu1 %v8112_v58 }
 0x1ba   : > { %2384 = vmatpush.msrb.mxu0 %v5731_v22  ;;  %v1370_v33 = vadd.f32 %v1369_v19, %v1329_v34 }
 0x1bb   : > { %2445 = vmatpush.msrb.mxu1 %v8114_v9  ;;  %v8119_v9 = vld [vmem:[#allocation197_spill] sm:$0xff] }
 0x1bc   : > { %2386 = vmatpush.msrb.mxu0 %v5747_v57  ;;  %v1471_v32 = vadd.f32 %v1470_v15, %v1370_v33  ;;  %v8129_v15 = vld [vmem:[#allocation152_spill] sm:$0xff] }
 0x1bd   : > { %2451 = vmatpush.msrb.mxu1 %v8116_v5  ;;  %v8123_v5 = vld [vmem:[#allocation211_spill] sm:$0xff] }
 0x1be   : > { %2388 = vmatpush.msrb.mxu0 %v5763_v14 }
 0x1bf   : > { %2457 = vmatpush.msrb.mxu1 %v8117_v27  ;;  %v8121_v27 = vld [vmem:[#allocation203_spill] sm:$0xff] }
 0x1c0   : > { %2390 = vmatpush.msrb.mxu0 %v5779_v2 }
 0x1c1   : > { %2463 = vmatpush.msrb.mxu1 %v8118_v6  ;;  %v1524_v6 = vpop.f32.mrf.mxu0 }
 0x1c2   : > { %2392 = vmatpush.msrb.mxu0 %v5792_v44 }
 0x1c3   : > { %2469 = vmatpush.msrb.mxu1 %v8119_v9  ;;  %v1525_v9 = vadd.f32 %v1524_v6, %v1471_v32  ;;  %v8128_v6 = vld [vmem:[#allocation160_spill] sm:$0xff]  ;;  %v8131_v32 = vld [vmem:[#allocation154_spill] sm:$0xff] }
 0x1c4   : > { %2394 = vmatpush.msrb.mxu0 %v7966_v0 }
 0x1c5   : > { %2475 = vmatpush.msrb.mxu1 %v8120_v16 }
 0x1c7   : > { %2481 = vmatpush.msrb.mxu1 %v8121_v27 }
 0x1c9   : > { %2487 = vmatpush.msrb.mxu1 %v8122_v3 }
 0x1cb   : > { %2493 = vmatpush.msrb.mxu1 %v8123_v5  ;;  %v1563_v58 = vpop.f32.mrf.mxu1  ;;  %v1632_v56 = vpop.f32.mrf.mxu2 }
 0x1cc   : > { %v1564_v16 = vadd.f32 %v1563_v58, %v1525_v9 }
 0x1cd   : > { %2499 = vmatpush.msrb.mxu1 %v8124_v40 }
 0x1ce   : > { %v1633_v19 = vadd.f32 %v1632_v56, %v1564_v16  ;;  %v1669_v34 = vpop.f32.mrf.mxu3  ;;  %v8125_v56 = vld [vmem:[#allocation49_spill] sm:$0xff] }
 0x1d0   : > { %v1670_v63 = vadd.f32 %v1669_v34, %v1633_v19  ;;  %v8132_v19 = vld [vmem:[#allocation165_spill] sm:$0xff] }
 0x1d1   : > { %v8133_v34 = vld [vmem:[#allocation157_spill] sm:$0xff] }
 0x1d2   : > { %v1674_v27 = vrot.slane %v1670_v63, 4  ;;  %v6474_v13 = vand.u32 4294901760, %v1670_v63 }
 0x1d4   : > { %v1676_v3 = vsel %vm1675_vm0, %v6292_v49, %v1674_v27  ;;  %v6479_v33 = vsub.f32 %v1670_v63, %v6474_v13  ;;  %2160 = vmatmul.f32.vlgmr.msrb.gmra.mxu3 %v6474_v13  ;;  %v8126_v63 = vld [vmem:[#allocation156_spill] sm:$0xff]  ;;  %v8127_v27 = vld [vmem:[#allocation158_spill] sm:$0xff] }
 0x1d5   : > { %1678 = vst [vmem:[%s6482_s23] sm:$0xff] %v1676_v3  ;;  %v1679_v9 = vsub.f32 %v8125_v56, %v1676_v3  ;;  %2560 = vmatpush.msrb.mxu3 %v8095_v20  ;;  %v8130_v3 = vld [vmem:[#allocation162_spill] sm:$0xff] }
 0x1d6   : > { %2214 = vmatmul.f32.vlgmr.msra.gmra.mxu0 %v6479_v33  ;;  %v6489_v58 = vand.u32 4294901760, %v6479_v33 }
 0x1d7   : > { %1680 = vst [vmem:[%s6491_s5] sm:$0xff] %v1679_v9  ;;  %2562 = vmatpush.msrb.mxu3 %v8097_v54  ;;  %2601 = vmatpush.msra.mxu0 %v8126_v63  ;;  %v8134_v9 = vld [vmem:[#allocation168_spill] sm:$0xff] }
 0x1d8   : > { %2253 = vmatmul.f32.vlgmr.msra.gmra.mxu1 %v6489_v58  ;;  %v2057_v49 = vsub.f32 %v6479_v33, %v6489_v58 }
 0x1d9   : > { %2564 = vmatpush.msrb.mxu3 %v8099_v42  ;;  %2605 = vmatpush.msra.mxu0 %v8127_v27 }
 0x1da   : > { %2668 = vmatpush.msra.mxu1 %v8095_v20  ;;  %v6502_v16 = vand.u32 4294901760, %v2057_v49  ;;  %v8135_v49 = vld [vmem:[#allocation159_spill] sm:$0xff] }
 0x1db   : > { %2566 = vmatpush.msrb.mxu3 %v8102_v47  ;;  %2609 = vmatpush.msra.mxu0 %v8128_v6 }
 0x1dc   : > { %2670 = vmatpush.msra.mxu1 %v8097_v54  ;;  %2059 = vmatmul.f32.vlgmr.msrb.gmra.mxu2 %v6502_v16 }
 0x1dd   : > { %2359 = vmatmul.f32.vlgmr.msra.gmra.mxu3 %v6474_v13  ;;  %2507 = vmatpush.msrb.mxu2 %v8129_v15 }
 0x1de   : > { %2568 = vmatpush.msrb.mxu3 %v8105_v29  ;;  %2613 = vmatpush.msra.mxu0 %v8130_v3 }
 0x1df   : > { %2672 = vmatpush.msra.mxu1 %v8099_v42  ;;  %2400 = vmatmul.f32.vlgmr.msrb.gmra.mxu0 %v6325_v23  ;;  %v8136_v23 = vld [vmem:[#allocation172_spill] sm:$0xff] }
 0x1e0   : > { %2510 = vmatpush.msrb.mxu2 %v8131_v32  ;;  %2570 = vmatpush.msrb.mxu3 %v5652_v11 }
 0x1e1   : > { %2617 = vmatpush.msra.mxu0 %v8132_v19  ;;  %2674 = vmatpush.msra.mxu1 %v8102_v47  ;;  %v8137_v19 = vld [vmem:[#allocation161_spill] sm:$0xff] }
 0x1e2   : > { %2501 = vmatmul.f32.vlgmr.msrb.gmra.mxu1 %v6298_v17  ;;  %2513 = vmatpush.msrb.mxu2 %v8133_v34  ;;  %v8138_v34 = vld [vmem:[#allocation175_spill] sm:$0xff] }
 0x1e3   : > { %2572 = vmatpush.msrb.mxu3 %v5666_v43  ;;  %2621 = vmatpush.msra.mxu0 %v8134_v9  ;;  %v8139_v9 = vld [vmem:[#allocation163_spill] sm:$0xff] }
 0x1e4   : > { %2676 = vmatpush.msra.mxu1 %v8105_v29  ;;  %2516 = vmatpush.msrb.mxu2 %v8135_v49  ;;  %v8140_v49 = vld [vmem:[#allocation176_spill] sm:$0xff] }
 0x1e5   : > { %2574 = vmatpush.msrb.mxu3 %v5680_v38  ;;  %2625 = vmatpush.msra.mxu0 %v8136_v23  ;;  %v8141_v23 = vld [vmem:[#allocation166_spill] sm:$0xff] }
 0x1e6   : > { %2678 = vmatpush.msra.mxu1 %v5652_v11  ;;  %2322 = vmatmul.f32.vlgmr.msra.gmra.mxu2 %v6474_v13 }
 0x1e7   : > { %2519 = vmatpush.msrb.mxu2 %v8137_v19  ;;  %2576 = vmatpush.msrb.mxu3 %v5690_v30  ;;  %v8142_v19 = vld [vmem:[#allocation169_spill] sm:$0xff] }
 0x1e8   : > { %2629 = vmatpush.msra.mxu0 %v8138_v34  ;;  %2680 = vmatpush.msra.mxu1 %v5666_v43  ;;  %v8143_v34 = vld [vmem:[#allocation183_spill] sm:$0xff] }
 0x1e9   : > { %2522 = vmatpush.msrb.mxu2 %v8139_v9  ;;  %2578 = vmatpush.msrb.mxu3 %v5706_v24  ;;  %v8144_v9 = vld [vmem:[#allocation170_spill] sm:$0xff] }
 0x1ea   : > { %2633 = vmatpush.msra.mxu0 %v8140_v49  ;;  %2682 = vmatpush.msra.mxu1 %v5680_v38  ;;  %v8145_v49 = vld [vmem:[#allocation187_spill] sm:$0xff] }
 0x1eb   : > { %2525 = vmatpush.msrb.mxu2 %v8141_v23  ;;  %2580 = vmatpush.msrb.mxu3 %v5731_v22  ;;  %v8146_v23 = vld [vmem:[#allocation173_spill] sm:$0xff] }
 0x1ec   : > { %2637 = vmatpush.msra.mxu0 %v5771_v18  ;;  %2684 = vmatpush.msra.mxu1 %v5690_v30  ;;  %v8147_v18 = vld [vmem:[#allocation190_spill] sm:$0xff] }
 0x1ed   : > { %2528 = vmatpush.msrb.mxu2 %v8142_v19  ;;  %2582 = vmatpush.msrb.mxu3 %v5747_v57  ;;  %v8148_v19 = vld [vmem:[#allocation178_spill] sm:$0xff] }
 0x1ee   : > { %2641 = vmatpush.msra.mxu0 %v8143_v34  ;;  %2686 = vmatpush.msra.mxu1 %v5706_v24 }
 0x1ef   : > { %2531 = vmatpush.msrb.mxu2 %v8144_v9  ;;  %2584 = vmatpush.msrb.mxu3 %v5763_v14  ;;  %v8149_v9 = vld [vmem:[#allocation181_spill] sm:$0xff] }
 0x1f0   : > { %2645 = vmatpush.msra.mxu0 %v8145_v49  ;;  %2688 = vmatpush.msra.mxu1 %v5731_v22 }
 0x1f1   : > { %2534 = vmatpush.msrb.mxu2 %v8146_v23  ;;  %2586 = vmatpush.msrb.mxu3 %v5779_v2  ;;  %v8151_v23 = vld [vmem:[#allocation214_spill] sm:$0xff] }
 0x1f2   : > { %2649 = vmatpush.msra.mxu0 %v8147_v18  ;;  %2690 = vmatpush.msra.mxu1 %v5747_v57  ;;  %v8150_v18 = vld [vmem:[#allocation184_spill] sm:$0xff] }
 0x1f3   : > { %2537 = vmatpush.msrb.mxu2 %v8148_v19  ;;  %2588 = vmatpush.msrb.mxu3 %v5792_v44 }
 0x1f4   : > { %2653 = vmatpush.msra.mxu0 %v5846_v55  ;;  %2692 = vmatpush.msra.mxu1 %v5763_v14  ;;  %v8152_v55 = vld [vmem:[#allocation219_spill] sm:$0xff] }
 0x1f5   : > { %2540 = vmatpush.msrb.mxu2 %v8149_v9  ;;  %2590 = vmatpush.msrb.mxu3 %v7966_v0  ;;  %v8153_v9 = vld [vmem:[#allocation188_spill] sm:$0xff] }
 0x1f6   : > { %2657 = vmatpush.msra.mxu0 %v5864_v7  ;;  %2694 = vmatpush.msra.mxu1 %v5779_v2 }
 0x1f7   : > { %2594 = vmatmul.f32.vlgmr.msrb.gmra.mxu3 %v6314_v1  ;;  %2543 = vmatpush.msrb.mxu2 %v8150_v18  ;;  %v8154_v1 = vld [vmem:[#allocation223_spill] sm:$0xff] }
 0x1f8   : > { %2750 = vmatpush.msra.mxu3 %v8151_v23  ;;  %2661 = vmatpush.msra.mxu0 %v5883_v28  ;;  %v8155_v28 = vld [vmem:[#allocation191_spill] sm:$0xff] }
 0x1f9   : > { %2696 = vmatpush.msra.mxu1 %v5792_v44  ;;  %2663 = vmatmul.f32.vlgmr.msra.gmra.mxu0 %v6298_v17  ;;  %v8156_v23 = vld [vmem:[#allocation227_spill] sm:$0xff] }
 0x1fa   : > { %2756 = vmatpush.msra.mxu3 %v8152_v55  ;;  %2848 = vmatpush.msrb.mxu0 %v5839_v45  ;;  %v8157_v45 = vld [vmem:[#allocation195_spill] sm:$0xff] }
 0x1fb   : > { %2546 = vmatpush.msrb.mxu2 %v8153_v9  ;;  %2698 = vmatpush.msra.mxu1 %v7966_v0  ;;  %v8158_v9 = vld [vmem:[#allocation231_spill] sm:$0xff] }
 0x1fc   : > { %2700 = vmatmul.f32.vlgmr.msra.gmra.mxu1 %v6298_v17  ;;  %2762 = vmatpush.msra.mxu3 %v8154_v1  ;;  %v8159_v17 = vld [vmem:[#allocation235_spill] sm:$0xff] }
 0x1fd   : > { %2851 = vmatpush.msrb.mxu0 %v5867_v41  ;;  %2901 = vmatpush.msrb.mxu1 %v5804_v53 }
 0x1fe   : > { %2549 = vmatpush.msrb.mxu2 %v8155_v28  ;;  %2768 = vmatpush.msra.mxu3 %v8156_v23 }
 0x1ff   : > { %2854 = vmatpush.msrb.mxu0 %v5886_v37  ;;  %2903 = vmatpush.msrb.mxu1 %v5832_v51  ;;  %v8160_v37 = vld [vmem:[#allocation239_spill] sm:$0xff] }
 0x200   : > { %2552 = vmatpush.msrb.mxu2 %v8157_v45  ;;  %2774 = vmatpush.msra.mxu3 %v8158_v9 }
 0x201   : > { %2555 = vmatmul.f32.vlgmr.msrb.gmra.mxu2 %v6306_v52  ;;  %2857 = vmatpush.msrb.mxu0 %v5891_v25  ;;  %v8161_v52 = vld [vmem:[#allocation243_spill] sm:$0xff] }
 0x202   : > { %2705 = vmatpush.msra.mxu2 %v5804_v53  ;;  %2905 = vmatpush.msrb.mxu1 %v5851_v50 }
 0x203   : > { %2780 = vmatpush.msra.mxu3 %v8159_v17  ;;  %2860 = vmatpush.msrb.mxu0 %v5909_v21  ;;  %v8162_v21 = vld [vmem:[#allocation246_spill] sm:$0xff]  ;;  %v8177_v17 = vld [vmem:[#allocation249_spill] sm:$0xff] }
 0x204   : > { %2707 = vmatpush.msra.mxu2 %v5832_v51  ;;  %2907 = vmatpush.msrb.mxu1 %v5855_v48 }
 0x205   : > { %2786 = vmatpush.msra.mxu3 %v8160_v37  ;;  %2863 = vmatpush.msrb.mxu0 %v5934_v61  ;;  %v8163_v61 = vld [vmem:[#allocation250_spill] sm:$0xff]  ;;  %v8174_v37 = vld [vmem:[#allocation245_spill] sm:$0xff] }
 0x206   : > { %2709 = vmatpush.msra.mxu2 %v5851_v50  ;;  %2909 = vmatpush.msrb.mxu1 %v5874_v60 }
 0x207   : > { %2792 = vmatpush.msra.mxu3 %v8161_v52  ;;  %2866 = vmatpush.msrb.mxu0 %v5952_v31  ;;  %v8164_v31 = vld [vmem:[#allocation252_spill] sm:$0xff]  ;;  %v8171_v52 = vld [vmem:[#allocation241_spill] sm:$0xff] }
 0x208   : > { %2711 = vmatpush.msra.mxu2 %v5855_v48  ;;  %2911 = vmatpush.msrb.mxu1 %v5902_v62 }
 0x209   : > { %2798 = vmatpush.msra.mxu3 %v8162_v21  ;;  %2869 = vmatpush.msrb.mxu0 %v5968_v39  ;;  %v8165_v39 = vld [vmem:[#allocation233_spill] sm:$0xff] }
 0x20a   : > { %2713 = vmatpush.msra.mxu2 %v5874_v60  ;;  %2913 = vmatpush.msrb.mxu1 %v5920_v12  ;;  %v8168_v21 = vld [vmem:[#allocation237_spill] sm:$0xff] }
 0x20b   : > { %2804 = vmatpush.msra.mxu3 %v8163_v61  ;;  %2872 = vmatpush.msrb.mxu0 %v5984_v8  ;;  %v8166_v61 = vld [vmem:[#allocation222_spill] sm:$0xff]  ;;  %v8167_v8 = vld [vmem:[#allocation256_spill] sm:$0xff] }
 0x20c   : > { %2715 = vmatpush.msra.mxu2 %v5902_v62  ;;  %2915 = vmatpush.msrb.mxu1 %v5936_v10 }
 0x20d   : > { %2810 = vmatpush.msra.mxu3 %v8164_v31  ;;  %2875 = vmatpush.msrb.mxu0 %v6000_v35  ;;  %v8169_v31 = vld [vmem:[#allocation226_spill] sm:$0xff] }
 0x20e   : > { %2717 = vmatpush.msra.mxu2 %v5920_v12  ;;  %2917 = vmatpush.msrb.mxu1 %v5954_v4  ;;  %v8170_v35 = vld [vmem:[#allocation258_spill] sm:$0xff] }
 0x20f   : > { %2816 = vmatpush.msra.mxu3 %v6111_v26  ;;  %2878 = vmatpush.msrb.mxu0 %v8165_v39  ;;  %v8172_v26 = vld [vmem:[#allocation230_spill] sm:$0xff]  ;;  %v8173_v39 = vld [vmem:[#allocation259_spill] sm:$0xff] }
 0x210   : > { %2719 = vmatpush.msra.mxu2 %v5936_v10  ;;  %2919 = vmatpush.msrb.mxu1 %v8166_v61 }
 0x211   : > { %2822 = vmatpush.msra.mxu3 %v8167_v8  ;;  %2881 = vmatpush.msrb.mxu0 %v8168_v21  ;;  %v8175_v8 = vld [vmem:[#allocation234_spill] sm:$0xff]  ;;  %v8176_v21 = vld [vmem:[#allocation260_spill] sm:$0xff] }
 0x212   : > { %2721 = vmatpush.msra.mxu2 %v5954_v4  ;;  %2921 = vmatpush.msrb.mxu1 %v8169_v31 }
 0x213   : > { %2828 = vmatpush.msra.mxu3 %v8170_v35  ;;  %2884 = vmatpush.msrb.mxu0 %v8171_v52  ;;  %v8178_v35 = vld [vmem:[#allocation238_spill] sm:$0xff]  ;;  %v8179_v52 = vld [vmem:[#allocation253_spill] sm:$0xff] }
 0x214   : > { %2723 = vmatpush.msra.mxu2 %v8166_v61  ;;  %2923 = vmatpush.msrb.mxu1 %v8172_v26 }
 0x215   : > { %2834 = vmatpush.msra.mxu3 %v8173_v39  ;;  %2887 = vmatpush.msrb.mxu0 %v8174_v37  ;;  %v8180_v37 = vld [vmem:[#allocation242_spill] sm:$0xff]  ;;  %v8187_v39 = vld [vmem:[#allocation44_spill] sm:$0xff] }
 0x216   : > { %2725 = vmatpush.msra.mxu2 %v8169_v31  ;;  %2925 = vmatpush.msrb.mxu1 %v8175_v8 }
 0x217   : > { %2840 = vmatpush.msra.mxu3 %v8176_v21  ;;  %2890 = vmatpush.msrb.mxu0 %v8177_v17  ;;  %v8181_v17 = vld [vmem:[#allocation248_spill] sm:$0xff]  ;;  %v8184_v21 = vld [vmem:[#allocation198_spill] sm:$0xff] }
 0x218   : > { %2727 = vmatpush.msra.mxu2 %v8172_v26  ;;  %2927 = vmatpush.msrb.mxu1 %v8178_v35 }
 0x219   : > { %2842 = vmatmul.f32.vlgmr.msra.gmra.mxu3 %v6474_v13  ;;  %2893 = vmatpush.msrb.mxu0 %v8179_v52  ;;  %v8182_v52 = vld [vmem:[#allocation37_spill] sm:$0xff] }
 0x21a   : > { %3009 = vmatpush.msrb.mxu3 %v5804_v53  ;;  %2729 = vmatpush.msra.mxu2 %v8175_v8 }
 0x21b   : > { %2929 = vmatpush.msrb.mxu1 %v8180_v37  ;;  %2896 = vmatmul.f32.vlgmr.msrb.gmra.mxu0 %v6479_v33  ;;  %v8183_v33 = vld [vmem:[#allocation38_spill] sm:$0xff] }
 0x21c   : > { %3011 = vmatpush.msrb.mxu3 %v5832_v51  ;;  %2731 = vmatpush.msra.mxu2 %v8178_v35 }
 0x21d   : > { %2931 = vmatpush.msrb.mxu1 %v8181_v17  ;;  %3056 = vmatpush.msra.mxu0 %v7975_v36 }
 0x21e   : > { %2935 = vmatmul.f32.vlgmr.msrb.gmra.mxu1 %v6489_v58  ;;  %3013 = vmatpush.msrb.mxu3 %v5851_v50  ;;  %v8185_v58 = vld [vmem:[#allocation41_spill] sm:$0xff] }
 0x21f   : > { %2733 = vmatpush.msra.mxu2 %v8180_v37  ;;  %3101 = vmatpush.msra.mxu1 %v8182_v52  ;;  %v8186_v52 = vld [vmem:[#allocation204_spill] sm:$0xff] }
 0x220   : > { %3015 = vmatpush.msrb.mxu3 %v5855_v48  ;;  %3058 = vmatpush.msra.mxu0 %v7976_v59  ;;  %v8188_v48 = vld [vmem:[#allocation17_spill] sm:$0xff] }
 0x221   : > { %2735 = vmatpush.msra.mxu2 %v8181_v17  ;;  %3107 = vmatpush.msra.mxu1 %v8183_v33  ;;  %v8189_v33 = vld [vmem:[#allocation208_spill] sm:$0xff] }
 0x222   : > { %2741 = vmatmul.f32.vlgmr.msra.gmra.mxu2 %v6502_v16  ;;  %3017 = vmatpush.msrb.mxu3 %v5874_v60  ;;  %v8190_v16 = vld [vmem:[#allocation50_spill] sm:$0xff]  ;;  %v8291_v60 = vld [vmem:[#allocation85_spill] sm:$0xff] }
 0x223   : > { %2942 = vmatpush.msrb.mxu2 %v8184_v21  ;;  %3113 = vmatpush.msra.mxu1 %v8185_v58  ;;  %v8191_v21 = vld [vmem:[#allocation18_spill] sm:$0xff] }
 0x224   : > { %3019 = vmatpush.msrb.mxu3 %v5902_v62  ;;  %3060 = vmatpush.msra.mxu0 %v7977_v46  ;;  %v8192_v58 = vld [vmem:[#allocation210_spill] sm:$0xff]  ;;  %v8193_v62 = vld [vmem:[#allocation53_spill] sm:$0xff] }
 0x225   : > { %2946 = vmatpush.msrb.mxu2 %v8186_v52  ;;  %3119 = vmatpush.msra.mxu1 %v8187_v39  ;;  %v8194_v52 = vld [vmem:[#allocation19_spill] sm:$0xff] }
 0x226   : > { %3021 = vmatpush.msrb.mxu3 %v5920_v12  ;;  %3062 = vmatpush.msra.mxu0 %v8188_v48  ;;  %v8195_v39 = vld [vmem:[#allocation215_spill] sm:$0xff] }
 0x227   : > { %2950 = vmatpush.msrb.mxu2 %v8189_v33  ;;  %3125 = vmatpush.msra.mxu1 %v8190_v16  ;;  %v8196_v12 = vld [vmem:[#allocation59_spill] sm:$0xff]  ;;  %v8198_v16 = vld [vmem:[#allocation220_spill] sm:$0xff] }
 0x228   : > { %3023 = vmatpush.msrb.mxu3 %v5936_v10  ;;  %3064 = vmatpush.msra.mxu0 %v8191_v21  ;;  %v8197_v33 = vld [vmem:[#allocation23_spill] sm:$0xff]  ;;  %v8199_v10 = vld [vmem:[#allocation64_spill] sm:$0xff] }
 0x229   : > { %2954 = vmatpush.msrb.mxu2 %v8192_v58  ;;  %3131 = vmatpush.msra.mxu1 %v8193_v62  ;;  %v8200_v58 = vld [vmem:[#allocation30_spill] sm:$0xff]  ;;  %v8201_v62 = vld [vmem:[#allocation224_spill] sm:$0xff] }
 0x22a   : > { %3025 = vmatpush.msrb.mxu3 %v5954_v4  ;;  %3066 = vmatpush.msra.mxu0 %v8194_v52  ;;  %v8202_v4 = vld [vmem:[#allocation68_spill] sm:$0xff] }
 0x22b   : > { %2958 = vmatpush.msrb.mxu2 %v8195_v39  ;;  %3137 = vmatpush.msra.mxu1 %v8196_v12  ;;  %v8203_v39 = vld [vmem:[#allocation32_spill] sm:$0xff] }
 0x22c   : > { %3027 = vmatpush.msrb.mxu3 %v8166_v61  ;;  %3068 = vmatpush.msra.mxu0 %v8197_v33  ;;  %v8204_v12 = vld [vmem:[#allocation228_spill] sm:$0xff]  ;;  %v8205_v61 = vld [vmem:[#allocation74_spill] sm:$0xff] }
 0x22d   : > { %2962 = vmatpush.msrb.mxu2 %v8198_v16  ;;  %3143 = vmatpush.msra.mxu1 %v8199_v10  ;;  %v8206_v16 = vld [vmem:[#allocation35_spill] sm:$0xff]  ;;  %v8207_v10 = vld [vmem:[#allocation232_spill] sm:$0xff] }
 0x22e   : > { %3029 = vmatpush.msrb.mxu3 %v8169_v31  ;;  %3070 = vmatpush.msra.mxu0 %v8200_v58  ;;  %v8208_v31 = vld [vmem:[#allocation77_spill] sm:$0xff] }
 0x22f   : > { %2966 = vmatpush.msrb.mxu2 %v8201_v62  ;;  %3149 = vmatpush.msra.mxu1 %v8202_v4  ;;  %v8209_v62 = vld [vmem:[#allocation40_spill] sm:$0xff] }
 0x230   : > { %3031 = vmatpush.msrb.mxu3 %v8172_v26  ;;  %3072 = vmatpush.msra.mxu0 %v8203_v39  ;;  %v8210_v4 = vld [vmem:[#allocation236_spill] sm:$0xff] }
 0x231   : > { %2970 = vmatpush.msrb.mxu2 %v8204_v12  ;;  %3155 = vmatpush.msra.mxu1 %v8205_v61  ;;  %v8211_v26 = vld [vmem:[#allocation84_spill] sm:$0xff]  ;;  %v8212_v12 = vld [vmem:[#allocation45_spill] sm:$0xff] }
 0x232   : > { %3033 = vmatpush.msrb.mxu3 %v8175_v8  ;;  %3074 = vmatpush.msra.mxu0 %v8206_v16  ;;  %v8213_v61 = vld [vmem:[#allocation240_spill] sm:$0xff] }
 0x233   : > { %2974 = vmatpush.msrb.mxu2 %v8207_v10  ;;  %3161 = vmatpush.msra.mxu1 %v8208_v31  ;;  %v8214_v8 = vld [vmem:[#allocation88_spill] sm:$0xff]  ;;  %v8215_v10 = vld [vmem:[#allocation51_spill] sm:$0xff] }
 0x234   : > { %3035 = vmatpush.msrb.mxu3 %v8178_v35  ;;  %3076 = vmatpush.msra.mxu0 %v8209_v62  ;;  %v8216_v31 = vld [vmem:[#allocation244_spill] sm:$0xff] }
 0x235   : > { %2978 = vmatpush.msrb.mxu2 %v8210_v4  ;;  %3167 = vmatpush.msra.mxu1 %v8211_v26  ;;  %v8217_v35 = vld [vmem:[#allocation92_spill] sm:$0xff]  ;;  %v8218_v26 = vld [vmem:[#allocation247_spill] sm:$0xff]  ;;  %v8219_v4 = vld [vmem:[#allocation54_spill] sm:$0xff] }
 0x236   : > { %3037 = vmatpush.msrb.mxu3 %v8180_v37  ;;  %3078 = vmatpush.msra.mxu0 %v8212_v12  ;;  %v8220_v37 = vld [vmem:[#allocation97_spill] sm:$0xff] }
 0x237   : > { %2982 = vmatpush.msrb.mxu2 %v8213_v61  ;;  %3173 = vmatpush.msra.mxu1 %v8214_v8  ;;  %v8221_v8 = vld [vmem:[#allocation251_spill] sm:$0xff]  ;;  %v8222_v61 = vld [vmem:[#allocation60_spill] sm:$0xff] }
 0x238   : > { %3039 = vmatpush.msrb.mxu3 %v8181_v17  ;;  %3080 = vmatpush.msra.mxu0 %v8215_v10  ;;  %v8223_v17 = vld [vmem:[#allocation102_spill] sm:$0xff] }
 0x239   : > { %2986 = vmatpush.msrb.mxu2 %v8216_v31  ;;  %3041 = vmatmul.f32.vlgmr.msrb.gmra.mxu3 %v6474_v13  ;;  %v8224_v31 = vld [vmem:[#allocation254_spill] sm:$0xff] }
 0x23a   : > { %3179 = vmatpush.msra.mxu1 %v8217_v35  ;;  %3252 = vmatpush.msra.mxu3 %v7975_v36  ;;  %v8225_v35 = vld [vmem:[#allocation62_spill] sm:$0xff] }
 0x23b   : > { %2990 = vmatpush.msrb.mxu2 %v8218_v26  ;;  %3082 = vmatpush.msra.mxu0 %v8219_v4  ;;  %v8226_v26 = vld [vmem:[#allocation257_spill] sm:$0xff] }
 0x23c   : > { %3185 = vmatpush.msra.mxu1 %v8220_v37  ;;  %3254 = vmatpush.msra.mxu3 %v7976_v59  ;;  %v8227_v37 = vld [vmem:[#allocation20_spill] sm:$0xff] }
 0x23d   : > { %2994 = vmatpush.msrb.mxu2 %v8221_v8  ;;  %3084 = vmatpush.msra.mxu0 %v8222_v61  ;;  %v8288_v8 = vld [vmem:[#allocation147_spill] sm:$0xff] }
 0x23e   : > { %3191 = vmatpush.msra.mxu1 %v8223_v17  ;;  %3256 = vmatpush.msra.mxu3 %v7977_v46  ;;  %v8228_v17 = vld [vmem:[#allocation27_spill] sm:$0xff] }
 0x23f   : > { %2998 = vmatpush.msrb.mxu2 %v8224_v31  ;;  %3086 = vmatpush.msra.mxu0 %v8225_v35  ;;  %v8285_v31 = vld [vmem:[#allocation145_spill] sm:$0xff] }
 0x240   : > { %3360 = vmatpush.msrb.mxu1 %v7975_v36  ;;  %3258 = vmatpush.msra.mxu3 %v8188_v48  ;;  %v8229_v36 = vld [vmem:[#allocation21_spill] sm:$0xff] }
 0x241   : > { %3002 = vmatpush.msrb.mxu2 %v8226_v26  ;;  %3293 = vmatpush.msrb.mxu0 %v8228_v17  ;;  %v8230_v26 = vld [vmem:[#allocation28_spill] sm:$0xff] }
 0x242   : > { %3362 = vmatpush.msrb.mxu1 %v7976_v59  ;;  %3004 = vmatmul.f32.vlgmr.msrb.gmra.mxu2 %v6474_v13  ;;  %v8231_v59 = vld [vmem:[#allocation22_spill] sm:$0xff]  ;;  %v8232_v13 = vld [vmem:[#allocation29_spill] sm:$0xff]  ;;  %v8238_v17 = vld [vmem:[#allocation36_spill] sm:$0xff] }
 0x243   : > { %3260 = vmatpush.msra.mxu3 %v8191_v21  ;;  %3199 = vmatpush.msra.mxu2 %v8227_v37  ;;  %v8234_v37 = vld [vmem:[#allocation31_spill] sm:$0xff] }
 0x244   : > { %3364 = vmatpush.msrb.mxu1 %v7977_v46  ;;  %3297 = vmatpush.msrb.mxu0 %v8230_v26  ;;  %v8233_v46 = vld [vmem:[#allocation24_spill] sm:$0xff]  ;;  %v8236_v26 = vld [vmem:[#allocation34_spill] sm:$0xff] }
 0x245   : > { %3262 = vmatpush.msra.mxu3 %v8194_v52  ;;  %3202 = vmatpush.msra.mxu2 %v8229_v36  ;;  %v8239_v36 = vld [vmem:[#allocation33_spill] sm:$0xff] }
 0x246   : > { %3366 = vmatpush.msrb.mxu1 %v8188_v48  ;;  %3301 = vmatpush.msrb.mxu0 %v8232_v13  ;;  %v8235_v48 = vld [vmem:[#allocation25_spill] sm:$0xff]  ;;  %v8241_v13 = vld [vmem:[#allocation39_spill] sm:$0xff] }
 0x247   : > { %3264 = vmatpush.msra.mxu3 %v8197_v33  ;;  %3205 = vmatpush.msra.mxu2 %v8231_v59  ;;  %v1820_v59 = vpop.f32.mrf.mxu1 }
 0x248   : > { %3368 = vmatpush.msrb.mxu1 %v8191_v21  ;;  %3305 = vmatpush.msrb.mxu0 %v8234_v37  ;;  %v8237_v21 = vld [vmem:[#allocation26_spill] sm:$0xff]  ;;  %v8243_v37 = vld [vmem:[#allocation43_spill] sm:$0xff] }
 0x249   : > { %3266 = vmatpush.msra.mxu3 %v8200_v58  ;;  %3208 = vmatpush.msra.mxu2 %v8233_v46 }
 0x24a   : > { %3370 = vmatpush.msrb.mxu1 %v8194_v52  ;;  %3309 = vmatpush.msrb.mxu0 %v8236_v26  ;;  %v1719_v52 = vpop.f32.mrf.mxu0  ;;  %v8245_v26 = vld [vmem:[#allocation47_spill] sm:$0xff] }
 0x24b   : > { %3268 = vmatpush.msra.mxu3 %v8203_v39  ;;  %3211 = vmatpush.msra.mxu2 %v8235_v48  ;;  %v1821_v46 = vadd.f32 %v1820_v59, %v1719_v52  ;;  %v1874_v48 = vpop.f32.mrf.mxu2  ;;  %v1913_v52 = vpop.f32.mrf.mxu3  ;;  %v8250_v59 = vld [vmem:[#allocation65_spill] sm:$0xff] }
 0x24c   : > { %3372 = vmatpush.msrb.mxu1 %v8197_v33  ;;  %3313 = vmatpush.msrb.mxu0 %v8238_v17  ;;  %v8240_v33 = vld [vmem:[#allocation42_spill] sm:$0xff]  ;;  %v8247_v17 = vld [vmem:[#allocation48_spill] sm:$0xff] }
 0x24d   : > { %3270 = vmatpush.msra.mxu3 %v8206_v16  ;;  %3214 = vmatpush.msra.mxu2 %v8237_v21  ;;  %v1875_v21 = vadd.f32 %v1874_v48, %v1821_v46  ;;  %v8255_v48 = vld [vmem:[#allocation66_spill] sm:$0xff] }
 0x24e   : > { %3374 = vmatpush.msrb.mxu1 %v8200_v58  ;;  %3317 = vmatpush.msrb.mxu0 %v8240_v33  ;;  %v8242_v58 = vld [vmem:[#allocation46_spill] sm:$0xff]  ;;  %v8249_v33 = vld [vmem:[#allocation56_spill] sm:$0xff] }
 0x24f   : > { %3272 = vmatpush.msra.mxu3 %v8209_v62  ;;  %3217 = vmatpush.msra.mxu2 %v8239_v36  ;;  %v2019_v46 = vpop.f32.mrf.mxu1 }
 0x250   : > { %3376 = vmatpush.msrb.mxu1 %v8203_v39  ;;  %3321 = vmatpush.msrb.mxu0 %v8242_v58  ;;  %v8244_v39 = vld [vmem:[#allocation52_spill] sm:$0xff]  ;;  %v8252_v58 = vld [vmem:[#allocation61_spill] sm:$0xff] }
 0x251   : > { %3274 = vmatpush.msra.mxu3 %v8212_v12  ;;  %3220 = vmatpush.msra.mxu2 %v8241_v13  ;;  %v8251_v13 = vld [vmem:[#allocation95_spill] sm:$0xff] }
 0x252   : > { %3378 = vmatpush.msrb.mxu1 %v8206_v16  ;;  %3325 = vmatpush.msrb.mxu0 %v8244_v39  ;;  %v8246_v16 = vld [vmem:[#allocation55_spill] sm:$0xff]  ;;  %v1982_v36 = vpop.f32.mrf.mxu0  ;;  %v8254_v39 = vld [vmem:[#allocation100_spill] sm:$0xff] }
 0x253   : > { %3276 = vmatpush.msra.mxu3 %v8215_v10  ;;  %3223 = vmatpush.msra.mxu2 %v8243_v37  ;;  %v8253_v37 = vld [vmem:[#allocation69_spill] sm:$0xff] }
 0x254   : > { %3380 = vmatpush.msrb.mxu1 %v8209_v62  ;;  %3329 = vmatpush.msrb.mxu0 %v8246_v16  ;;  %v8248_v62 = vld [vmem:[#allocation57_spill] sm:$0xff] }
 0x255   : > { %3278 = vmatpush.msra.mxu3 %v8219_v4  ;;  %3226 = vmatpush.msra.mxu2 %v8245_v26  ;;  %v8256_v26 = vld [vmem:[#allocation75_spill] sm:$0xff] }
 0x256   : > { %3382 = vmatpush.msrb.mxu1 %v8212_v12  ;;  %3333 = vmatpush.msrb.mxu0 %v8248_v62  ;;  %v1914_v12 = vadd.f32 %v1913_v52, %v1875_v21  ;;  %v8257_v21 = vld [vmem:[#allocation106_spill] sm:$0xff]  ;;  %v8259_v52 = vld [vmem:[#allocation79_spill] sm:$0xff] }
 0x257   : > { %3280 = vmatpush.msra.mxu3 %v8222_v61  ;;  %3229 = vmatpush.msra.mxu2 %v8247_v17  ;;  %v8258_v17 = vld [vmem:[#allocation70_spill] sm:$0xff] }
 0x258   : > { %3384 = vmatpush.msrb.mxu1 %v8215_v10  ;;  %3337 = vmatpush.msrb.mxu0 %v8250_v59  ;;  %v1983_v10 = vadd.f32 %v1982_v36, %v1914_v12  ;;  %v2161_v36 = vpop.f32.mrf.mxu3  ;;  %v8262_v59 = vld [vmem:[#allocation82_spill] sm:$0xff] }
 0x259   : > { %3282 = vmatpush.msra.mxu3 %v8225_v35  ;;  %3232 = vmatpush.msra.mxu2 %v8249_v33  ;;  %v8261_v33 = vld [vmem:[#allocation72_spill] sm:$0xff] }
 0x25a   : > { %3386 = vmatpush.msrb.mxu1 %v8219_v4  ;;  %3341 = vmatpush.msrb.mxu0 %v8253_v37  ;;  %v2020_v4 = vadd.f32 %v2019_v46, %v1983_v10  ;;  %v8264_v46 = vld [vmem:[#allocation113_spill] sm:$0xff]  ;;  %v8265_v10 = vld [vmem:[#allocation63_spill] sm:$0xff]  ;;  %v2254_v37 = vpop.f32.mrf.mxu1 }
 0x25b   : > { %3442 = vmatpush.msrb.mxu3 %v8251_v13  ;;  %3235 = vmatpush.msra.mxu2 %v8252_v58  ;;  %v2215_v13 = vpop.f32.mrf.mxu0 }
 0x25c   : > { %3388 = vmatpush.msrb.mxu1 %v8222_v61  ;;  %3345 = vmatpush.msrb.mxu0 %v8256_v26  ;;  %v8260_v61 = vld [vmem:[#allocation110_spill] sm:$0xff]  ;;  %v8268_v26 = vld [vmem:[#allocation121_spill] sm:$0xff] }
 0x25d   : > { %3448 = vmatpush.msrb.mxu3 %v8254_v39  ;;  %3238 = vmatpush.msra.mxu2 %v8255_v48  ;;  %v8266_v39 = vld [vmem:[#allocation117_spill] sm:$0xff] }
 0x25e   : > { %3390 = vmatpush.msrb.mxu1 %v8225_v35  ;;  %3349 = vmatpush.msrb.mxu0 %v8259_v52  ;;  %v8263_v35 = vld [vmem:[#allocation58_spill] sm:$0xff]  ;;  %v8271_v52 = vld [vmem:[#allocation81_spill] sm:$0xff] }
 0x25f   : > { %3454 = vmatpush.msrb.mxu3 %v8257_v21  ;;  %v2060_v16 = vpop.f32.mrf.mxu2  ;;  %3241 = vmatpush.msra.mxu2 %v8258_v17  ;;  %v8269_v21 = vld [vmem:[#allocation76_spill] sm:$0xff]  ;;  %v8270_v17 = vld [vmem:[#allocation125_spill] sm:$0xff] }
 0x260   : > { %v2061_v62 = vadd.f32 %v2060_v16, %v2020_v4  ;;  %3353 = vmatpush.msrb.mxu0 %v8262_v59  ;;  %v8267_v4 = vld [vmem:[#allocation71_spill] sm:$0xff]  ;;  %v8274_v59 = vld [vmem:[#allocation132_spill] sm:$0xff] }
 0x261   : > { %3460 = vmatpush.msrb.mxu3 %v8260_v61  ;;  %3244 = vmatpush.msra.mxu2 %v8261_v33  ;;  %v2360_v61 = vpop.f32.mrf.mxu3 }
 0x262   : > { %v2162_v12 = vadd.f32 %v2161_v36, %v2061_v62  ;;  %v8272_v36 = vld [vmem:[#allocation128_spill] sm:$0xff] }
 0x263   : > { %3397 = vmatpush.msrb.mxu2 %v8263_v35  ;;  %3466 = vmatpush.msrb.mxu3 %v8264_v46  ;;  %v8275_v46 = vld [vmem:[#allocation87_spill] sm:$0xff] }
 0x264   : > { %v2216_v58 = vadd.f32 %v2215_v13, %v2162_v12  ;;  %v8273_v12 = vld [vmem:[#allocation86_spill] sm:$0xff] }
 0x265   : > { %3399 = vmatpush.msrb.mxu2 %v8265_v10  ;;  %3472 = vmatpush.msrb.mxu3 %v8266_v39  ;;  %v8277_v39 = vld [vmem:[#allocation91_spill] sm:$0xff] }
 0x266   : > { %v2255_v48 = vadd.f32 %v2254_v37, %v2216_v58  ;;  %v8276_v58 = vld [vmem:[#allocation135_spill] sm:$0xff] }
 0x267   : > { %3401 = vmatpush.msrb.mxu2 %v8267_v4  ;;  %3478 = vmatpush.msrb.mxu3 %v8268_v26 }
 0x269   : > { %3403 = vmatpush.msrb.mxu2 %v8269_v21  ;;  %v2323_v16 = vpop.f32.mrf.mxu2  ;;  %3484 = vmatpush.msrb.mxu3 %v8270_v17 }
 0x26a   : > { %v2324_v62 = vadd.f32 %v2323_v16, %v2255_v48  ;;  %v8278_v48 = vld [vmem:[#allocation138_spill] sm:$0xff]  ;;  %v8279_v16 = vld [vmem:[#allocation99_spill] sm:$0xff] }
 0x26b   : > { %3405 = vmatpush.msrb.mxu2 %v8271_v52  ;;  %3490 = vmatpush.msrb.mxu3 %v8272_v36  ;;  %v8281_v36 = vld [vmem:[#allocation104_spill] sm:$0xff] }
 0x26c   : > { %v6783_v33 = vadd.f32 %v2360_v61, %v2324_v62  ;;  %v8280_v62 = vld [vmem:[#allocation141_spill] sm:$0xff] }
 0x26d   : > { %3407 = vmatpush.msrb.mxu2 %v8273_v12  ;;  %3496 = vmatpush.msrb.mxu3 %v8274_v59  ;;  %v8282_v59 = vld [vmem:[#allocation144_spill] sm:$0xff] }
 0x26e   : > { %v6788_v13 = vand.u32 4294901760, %v6783_v33 }
 0x26f   : > { %3409 = vmatpush.msrb.mxu2 %v8275_v46  ;;  %3502 = vmatpush.msrb.mxu3 %v8276_v58  ;;  %v8283_v58 = vld [vmem:[#allocation67_spill] sm:$0xff] }
 0x270   : > { %v6794_v37 = vsub.f32 %v6783_v33, %v6788_v13  ;;  %3193 = vmatmul.f32.vlgmr.msra.gmra.mxu1 %v6788_v13 }
 0x271   : > { %3411 = vmatpush.msrb.mxu2 %v8277_v39  ;;  %3593 = vmatpush.msra.mxu1 %v8263_v35 }
 0x272   : > { %3508 = vmatpush.msrb.mxu3 %v8278_v48  ;;  %3247 = vmatmul.f32.vlgmr.msra.gmra.mxu2 %v6794_v37  ;;  %v6802_v26 = vand.u32 4294901760, %v6794_v37  ;;  %v8284_v48 = vld [vmem:[#allocation108_spill] sm:$0xff] }
 0x273   : > { %3595 = vmatpush.msra.mxu1 %v8265_v10  ;;  %3413 = vmatpush.msrb.mxu2 %v8279_v16 }
 0x274   : > { %3286 = vmatmul.f32.vlgmr.msra.gmra.mxu3 %v6802_v26  ;;  %v3090_v17 = vsub.f32 %v6794_v37, %v6802_v26 }
 0x275   : > { %3597 = vmatpush.msra.mxu1 %v8267_v4  ;;  %3514 = vmatpush.msrb.mxu3 %v8280_v62  ;;  %v8287_v62 = vld [vmem:[#allocation112_spill] sm:$0xff] }
 0x276   : > { %v6811_v61 = vand.u32 4294901760, %v3090_v17  ;;  %3415 = vmatpush.msrb.mxu2 %v8281_v36  ;;  %v8286_v17 = vld [vmem:[#allocation73_spill] sm:$0xff] }
 0x277   : > { %3599 = vmatpush.msra.mxu1 %v8269_v21  ;;  %3520 = vmatpush.msrb.mxu3 %v8282_v59  ;;  %v8289_v59 = vld [vmem:[#allocation80_spill] sm:$0xff] }
 0x278   : > { %3092 = vmatmul.f32.vlgmr.msra.gmra.mxu0 %v6811_v61  ;;  %3392 = vmatmul.f32.vlgmr.msrb.gmra.mxu1 %v6788_v13 }
 0x279   : > { %3540 = vmatpush.msra.mxu0 %v8283_v58  ;;  %3601 = vmatpush.msra.mxu1 %v8271_v52  ;;  %v8290_v58 = vld [vmem:[#allocation116_spill] sm:$0xff] }
 0x27a   : > { %3417 = vmatpush.msrb.mxu2 %v8284_v48  ;;  %3526 = vmatpush.msrb.mxu3 %v8285_v31  ;;  %v8292_v31 = vld [vmem:[#allocation90_spill] sm:$0xff] }
 0x27b   : > { %3543 = vmatpush.msra.mxu0 %v8286_v17  ;;  %3603 = vmatpush.msra.mxu1 %v8273_v12  ;;  %v8294_v17 = vld [vmem:[#allocation94_spill] sm:$0xff] }
 0x27c   : > { %3419 = vmatpush.msrb.mxu2 %v8287_v62  ;;  %3532 = vmatpush.msrb.mxu3 %v8288_v8  ;;  %v8293_v8 = vld [vmem:[#allocation123_spill] sm:$0xff] }
 0x27d   : > { %3546 = vmatpush.msra.mxu0 %v8289_v59  ;;  %3605 = vmatpush.msra.mxu1 %v8275_v46  ;;  %v8298_v59 = vld [vmem:[#allocation101_spill] sm:$0xff] }
 0x27e   : > { %3701 = vmatpush.msra.mxu3 %v8263_v35  ;;  %3421 = vmatpush.msrb.mxu2 %v8290_v58  ;;  %v8295_v35 = vld [vmem:[#allocation127_spill] sm:$0xff] }
 0x27f   : > { %3549 = vmatpush.msra.mxu0 %v8291_v60  ;;  %3607 = vmatpush.msra.mxu1 %v8277_v39  ;;  %v8296_v60 = vld [vmem:[#allocation96_spill] sm:$0xff] }
 0x280   : > { %3355 = vmatmul.f32.vlgmr.msrb.gmra.mxu0 %v6788_v13  ;;  %3703 = vmatpush.msra.mxu3 %v8265_v10  ;;  %v8297_v10 = vld [vmem:[#allocation131_spill] sm:$0xff] }
 0x281   : > { %3552 = vmatpush.msra.mxu0 %v8292_v31  ;;  %3609 = vmatpush.msra.mxu1 %v8279_v16  ;;  %v8300_v31 = vld [vmem:[#allocation107_spill] sm:$0xff] }
 0x282   : > { %3423 = vmatpush.msrb.mxu2 %v8293_v8  ;;  %3705 = vmatpush.msra.mxu3 %v8267_v4  ;;  %v8299_v4 = vld [vmem:[#allocation78_spill] sm:$0xff] }
 0x283   : > { %3555 = vmatpush.msra.mxu0 %v8294_v17  ;;  %3611 = vmatpush.msra.mxu1 %v8281_v36  ;;  %v8302_v17 = vld [vmem:[#allocation111_spill] sm:$0xff] }
 0x284   : > { %3425 = vmatpush.msrb.mxu2 %v8295_v35  ;;  %3707 = vmatpush.msra.mxu3 %v8269_v21  ;;  %v8301_v21 = vld [vmem:[#allocation83_spill] sm:$0xff] }
 0x285   : > { %3558 = vmatpush.msra.mxu0 %v8296_v60  ;;  %3613 = vmatpush.msra.mxu1 %v8284_v48  ;;  %v8304_v60 = vld [vmem:[#allocation115_spill] sm:$0xff] }
 0x286   : > { %3427 = vmatpush.msrb.mxu2 %v8297_v10  ;;  %3709 = vmatpush.msra.mxu3 %v8271_v52  ;;  %v8303_v52 = vld [vmem:[#allocation89_spill] sm:$0xff] }
 0x287   : > { %3561 = vmatpush.msra.mxu0 %v8298_v59  ;;  %3615 = vmatpush.msra.mxu1 %v8287_v62  ;;  %v8306_v59 = vld [vmem:[#allocation119_spill] sm:$0xff] }
 0x288   : > { %3634 = vmatpush.msra.mxu2 %v8299_v4  ;;  %3711 = vmatpush.msra.mxu3 %v8273_v12  ;;  %v8305_v12 = vld [vmem:[#allocation93_spill] sm:$0xff]  ;;  %v8308_v4 = vld [vmem:[#allocation98_spill] sm:$0xff] }
 0x289   : > { %3564 = vmatpush.msra.mxu0 %v8300_v31  ;;  %3617 = vmatpush.msra.mxu1 %v8290_v58  ;;  %v8309_v31 = vld [vmem:[#allocation124_spill] sm:$0xff] }
 0x28a   : > { %3638 = vmatpush.msra.mxu2 %v8301_v21  ;;  %3713 = vmatpush.msra.mxu3 %v8275_v46  ;;  %v8307_v46 = vld [vmem:[#allocation164_spill] sm:$0xff]  ;;  %v8311_v21 = vld [vmem:[#allocation103_spill] sm:$0xff] }
 0x28b   : > { %3567 = vmatpush.msra.mxu0 %v8302_v17  ;;  %3619 = vmatpush.msra.mxu1 %v8293_v8  ;;  %v8312_v17 = vld [vmem:[#allocation130_spill] sm:$0xff] }
 0x28c   : > { %3642 = vmatpush.msra.mxu2 %v8303_v52  ;;  %3715 = vmatpush.msra.mxu3 %v8277_v39  ;;  %v8310_v39 = vld [vmem:[#allocation167_spill] sm:$0xff]  ;;  %v8314_v52 = vld [vmem:[#allocation105_spill] sm:$0xff] }
 0x28d   : > { %3570 = vmatpush.msra.mxu0 %v8304_v60  ;;  %3621 = vmatpush.msra.mxu1 %v8295_v35  ;;  %v8315_v60 = vld [vmem:[#allocation134_spill] sm:$0xff] }
 0x28e   : > { %3646 = vmatpush.msra.mxu2 %v8305_v12  ;;  %3717 = vmatpush.msra.mxu3 %v8279_v16  ;;  %v8313_v16 = vld [vmem:[#allocation171_spill] sm:$0xff]  ;;  %v8316_v12 = vld [vmem:[#allocation174_spill] sm:$0xff] }
 0x28f   : > { %3573 = vmatpush.msra.mxu0 %v8306_v59  ;;  %3623 = vmatpush.msra.mxu1 %v8297_v10  ;;  %v8317_v59 = vld [vmem:[#allocation109_spill] sm:$0xff] }
 0x290   : > { %3650 = vmatpush.msra.mxu2 %v8308_v4  ;;  %3719 = vmatpush.msra.mxu3 %v8281_v36  ;;  %v8318_v36 = vld [vmem:[#allocation137_spill] sm:$0xff]  ;;  %v8321_v4 = vld [vmem:[#allocation180_spill] sm:$0xff] }
 0x291   : > { %3783 = vmatpush.msrb.mxu1 %v8307_v46  ;;  %3576 = vmatpush.msra.mxu0 %v8309_v31  ;;  %v8319_v46 = vld [vmem:[#allocation177_spill] sm:$0xff]  ;;  %v8323_v31 = vld [vmem:[#allocation182_spill] sm:$0xff] }
 0x292   : > { %3654 = vmatpush.msra.mxu2 %v8311_v21  ;;  %3721 = vmatpush.msra.mxu3 %v8284_v48  ;;  %v8320_v48 = vld [vmem:[#allocation114_spill] sm:$0xff]  ;;  %v8327_v21 = vld [vmem:[#allocation189_spill] sm:$0xff] }
 0x293   : > { %3789 = vmatpush.msrb.mxu1 %v8310_v39  ;;  %3579 = vmatpush.msra.mxu0 %v8312_v17  ;;  %v8325_v39 = vld [vmem:[#allocation185_spill] sm:$0xff] }
 0x294   : > { %3658 = vmatpush.msra.mxu2 %v8314_v52  ;;  %3723 = vmatpush.msra.mxu3 %v8287_v62  ;;  %v8322_v62 = vld [vmem:[#allocation118_spill] sm:$0xff]  ;;  %v8328_v17 = vld [vmem:[#allocation129_spill] sm:$0xff]  ;;  %v2502_v52 = vpop.f32.mrf.mxu1 }
 0x295   : > { %3795 = vmatpush.msrb.mxu1 %v8313_v16  ;;  %3582 = vmatpush.msra.mxu0 %v8315_v60  ;;  %v8330_v16 = vld [vmem:[#allocation136_spill] sm:$0xff]  ;;  %v8332_v60 = vld [vmem:[#allocation139_spill] sm:$0xff] }
 0x296   : > { %3662 = vmatpush.msra.mxu2 %v8317_v59  ;;  %3725 = vmatpush.msra.mxu3 %v8290_v58  ;;  %v8324_v58 = vld [vmem:[#allocation122_spill] sm:$0xff]  ;;  %v2401_v59 = vpop.f32.mrf.mxu0 }
 0x297   : > { %3801 = vmatpush.msrb.mxu1 %v8316_v12  ;;  %3585 = vmatpush.msra.mxu0 %v8318_v36  ;;  %v8333_v12 = vld [vmem:[#allocation200_spill] sm:$0xff]  ;;  %v2556_v36 = vpop.f32.mrf.mxu2 }
 0x298   : > { %3666 = vmatpush.msra.mxu2 %v8320_v48  ;;  %3727 = vmatpush.msra.mxu3 %v8293_v8  ;;  %v8326_v8 = vld [vmem:[#allocation126_spill] sm:$0xff]  ;;  %v2503_v48 = vadd.f32 %v2502_v52, %v2401_v59 }
 0x299   : > { %3738 = vmatpush.msrb.mxu0 %v8095_v20  ;;  %3807 = vmatpush.msrb.mxu1 %v8319_v46  ;;  %v8334_v46 = vld [vmem:[#allocation142_spill] sm:$0xff] }
 0x29a   : > { %3670 = vmatpush.msra.mxu2 %v8322_v62  ;;  %3729 = vmatpush.msra.mxu3 %v8295_v35  ;;  %v8329_v35 = vld [vmem:[#allocation192_spill] sm:$0xff]  ;;  %v2557_v62 = vadd.f32 %v2556_v36, %v2503_v48 }
 0x29b   : > { %3740 = vmatpush.msrb.mxu0 %v8097_v54  ;;  %3813 = vmatpush.msrb.mxu1 %v8321_v4  ;;  %v8335_v4 = vld [vmem:[#allocation203_spill] sm:$0xff] }
 0x29c   : > { %3674 = vmatpush.msra.mxu2 %v8324_v58  ;;  %3731 = vmatpush.msra.mxu3 %v8297_v10  ;;  %v8331_v10 = vld [vmem:[#allocation197_spill] sm:$0xff]  ;;  %v2595_v58 = vpop.f32.mrf.mxu3 }
 0x29d   : > { %3742 = vmatpush.msrb.mxu0 %v8099_v42  ;;  %3819 = vmatpush.msrb.mxu1 %v8323_v31  ;;  %v8336_v31 = vld [vmem:[#allocation207_spill] sm:$0xff] }
 0x29e   : > { %3678 = vmatpush.msra.mxu2 %v8326_v8  ;;  %v2664_v8 = vpop.f32.mrf.mxu0 }
 0x29f   : > { %3744 = vmatpush.msrb.mxu0 %v8102_v47  ;;  %3825 = vmatpush.msrb.mxu1 %v8325_v39  ;;  %v2596_v39 = vadd.f32 %v2595_v58, %v2557_v62 }
 0x2a0   : > { %3682 = vmatpush.msra.mxu2 %v8328_v17  ;;  %v2701_v17 = vpop.f32.mrf.mxu1 }
 0x2a1   : > { %3746 = vmatpush.msrb.mxu0 %v8105_v29  ;;  %3831 = vmatpush.msrb.mxu1 %v8327_v21  ;;  %v2665_v21 = vadd.f32 %v2664_v8, %v2596_v39 }
 0x2a2   : > { %3686 = vmatpush.msra.mxu2 %v8330_v16 }
 0x2a3   : > { %3748 = vmatpush.msrb.mxu0 %v5652_v11  ;;  %3837 = vmatpush.msrb.mxu1 %v8329_v35  ;;  %v2702_v16 = vadd.f32 %v2701_v17, %v2665_v21 }
 0x2a4   : > { %3690 = vmatpush.msra.mxu2 %v8332_v60 }
 0x2a5   : > { %3750 = vmatpush.msrb.mxu0 %v5666_v43  ;;  %3843 = vmatpush.msrb.mxu1 %v8331_v10  ;;  %v2742_v35 = vpop.f32.mrf.mxu2  ;;  %v2843_v10 = vpop.f32.mrf.mxu3 }
 0x2a6   : > { %3694 = vmatpush.msra.mxu2 %v8334_v46  ;;  %v2897_v60 = vpop.f32.mrf.mxu0 }
 0x2a7   : > { %3752 = vmatpush.msrb.mxu0 %v5680_v38  ;;  %3849 = vmatpush.msrb.mxu1 %v8333_v12 }
 0x2a9   : > { %3754 = vmatpush.msrb.mxu0 %v5690_v30  ;;  %3855 = vmatpush.msrb.mxu1 %v8335_v4 }
 0x2ab   : > { %3756 = vmatpush.msrb.mxu0 %v5706_v24  ;;  %3861 = vmatpush.msrb.mxu1 %v8336_v31 }
 0x2ad   : > { %3758 = vmatpush.msrb.mxu0 %v5731_v22  ;;  %3867 = vmatpush.msrb.mxu1 %v8123_v5  ;;  %v2743_v5 = vadd.f32 %v2742_v35, %v2702_v16  ;;  %v8376_v35 = vld [vmem:[#allocation218_spill] sm:$0xff]  ;;  %v8377_v16 = vld [vmem:[#allocation255_spill] sm:$0xff] }
 0x2af   : > { %3760 = vmatpush.msrb.mxu0 %v5747_v57  ;;  %3873 = vmatpush.msrb.mxu1 %v8124_v40  ;;  %v2844_v52 = vadd.f32 %v2843_v10, %v2743_v5  ;;  %v2936_v40 = vpop.f32.mrf.mxu1  ;;  %v8378_v5 = vld [vmem:[#allocation233_spill] sm:$0xff]  ;;  %v8379_v10 = vld [vmem:[#allocation222_spill] sm:$0xff] }
 0x2b1   : > { %3762 = vmatpush.msrb.mxu0 %v5763_v14  ;;  %v2898_v12 = vadd.f32 %v2897_v60, %v2844_v52  ;;  %v8380_v52 = vld [vmem:[#allocation256_spill] sm:$0xff]  ;;  %v8381_v60 = vld [vmem:[#allocation237_spill] sm:$0xff] }
 0x2b3   : > { %3764 = vmatpush.msrb.mxu0 %v5779_v2  ;;  %v2937_v59 = vadd.f32 %v2936_v40, %v2898_v12  ;;  %v8382_v12 = vld [vmem:[#allocation226_spill] sm:$0xff] }
 0x2b4   : > { %v8383_v40 = vld [vmem:[#allocation258_spill] sm:$0xff] }
 0x2b5   : > { %3766 = vmatpush.msrb.mxu0 %v5792_v44 }
 0x2b7   : > { %3768 = vmatpush.msrb.mxu0 %v7966_v0 }
 0x2bc   : > { %v3042_v48 = vpop.f32.mrf.mxu3 }
 0x2c5   : > { %v3005_v36 = vpop.f32.mrf.mxu2 }
 0x2c6   : > { %v3006_v46 = vadd.f32 %v3005_v36, %v2937_v59  ;;  %v8384_v59 = vld [vmem:[#allocation241_spill] sm:$0xff]  ;;  %v8385_v36 = vld [vmem:[#allocation230_spill] sm:$0xff] }
 0x2c8   : > { %v3043_v4 = vadd.f32 %v3042_v48, %v3006_v46  ;;  %v8386_v46 = vld [vmem:[#allocation259_spill] sm:$0xff]  ;;  %v8387_v48 = vld [vmem:[#allocation245_spill] sm:$0xff] }
 0x2ca   : > { %v3047_v62 = vrot.slane %v3043_v4, 4  ;;  %v6919_v31 = vand.u32 4294901760, %v3043_v4 }
 0x2cc   : > { %v3048_v58 = vsel %vm1675_vm0, %v6783_v33, %v3047_v62  ;;  %v6924_v39 = vsub.f32 %v3043_v4, %v6919_v31  ;;  %3534 = vmatmul.f32.vlgmr.msrb.gmra.mxu3 %v6919_v31  ;;  %v8388_v4 = vld [vmem:[#allocation234_spill] sm:$0xff]  ;;  %v8389_v62 = vld [vmem:[#allocation260_spill] sm:$0xff] }
 0x2cd   : > { %4617 = vst [vmem:[%s6482_s23 + $0x8] sm:$0xff] %v3048_v58  ;;  %v3052_v8 = vsub.f32 %v8125_v56, %v3048_v58  ;;  %3934 = vmatpush.msrb.mxu3 %v8095_v20  ;;  %v8390_v58 = vld [vmem:[#allocation249_spill] sm:$0xff] }
 0x2ce   : > { %3588 = vmatmul.f32.vlgmr.msra.gmra.mxu0 %v6924_v39  ;;  %v6932_v21 = vand.u32 4294901760, %v6924_v39 }
 0x2cf   : > { %4618 = vst [vmem:[%s6491_s5 + $0x8] sm:$0xff] %v3052_v8  ;;  %3936 = vmatpush.msrb.mxu3 %v8097_v54  ;;  %3975 = vmatpush.msra.mxu0 %v8126_v63  ;;  %v8339_v63 = vld [vmem:[#allocation168_spill] sm:$0xff]  ;;  %v8391_v8 = vld [vmem:[#allocation238_spill] sm:$0xff] }
 0x2d0   : > { %3627 = vmatmul.f32.vlgmr.msra.gmra.mxu1 %v6932_v21  ;;  %v3431_v33 = vsub.f32 %v6924_v39, %v6932_v21 }
 0x2d1   : > { %3938 = vmatpush.msrb.mxu3 %v8099_v42  ;;  %3979 = vmatpush.msra.mxu0 %v8127_v27  ;;  %v8341_v27 = vld [vmem:[#allocation172_spill] sm:$0xff] }
 0x2d2   : > { %4042 = vmatpush.msra.mxu1 %v8095_v20  ;;  %v6943_v17 = vand.u32 4294901760, %v3431_v33  ;;  %v8337_v20 = vld [vmem:[#allocation165_spill] sm:$0xff] }
 0x2d3   : > { %3940 = vmatpush.msrb.mxu3 %v8102_v47  ;;  %3983 = vmatpush.msra.mxu0 %v8128_v6  ;;  %v8343_v6 = vld [vmem:[#allocation175_spill] sm:$0xff]  ;;  %v8392_v33 = vld [vmem:[#allocation253_spill] sm:$0xff] }
 0x2d4   : > { %4044 = vmatpush.msra.mxu1 %v8097_v54  ;;  %3433 = vmatmul.f32.vlgmr.msrb.gmra.mxu2 %v6943_v17  ;;  %v8338_v54 = vld [vmem:[#allocation157_spill] sm:$0xff] }
 0x2d5   : > { %3733 = vmatmul.f32.vlgmr.msra.gmra.mxu3 %v6919_v31  ;;  %3881 = vmatpush.msrb.mxu2 %v8129_v15  ;;  %v8344_v15 = vld [vmem:[#allocation163_spill] sm:$0xff] }
 0x2d6   : > { %3942 = vmatpush.msrb.mxu3 %v8105_v29  ;;  %3987 = vmatpush.msra.mxu0 %v8130_v3  ;;  %v8346_v3 = vld [vmem:[#allocation166_spill] sm:$0xff] }
 0x2d7   : > { %4046 = vmatpush.msra.mxu1 %v8099_v42  ;;  %3774 = vmatmul.f32.vlgmr.msrb.gmra.mxu0 %v6811_v61  ;;  %v8340_v42 = vld [vmem:[#allocation159_spill] sm:$0xff]  ;;  %v8375_v61 = vld [vmem:[#allocation229_spill] sm:$0xff] }
 0x2d8   : > { %3884 = vmatpush.msrb.mxu2 %v8131_v32  ;;  %3944 = vmatpush.msrb.mxu3 %v5652_v11  ;;  %v8348_v32 = vld [vmem:[#allocation169_spill] sm:$0xff] }
 0x2d9   : > { %3991 = vmatpush.msra.mxu0 %v8337_v20  ;;  %4048 = vmatpush.msra.mxu1 %v8102_v47  ;;  %v8342_v47 = vld [vmem:[#allocation161_spill] sm:$0xff]  ;;  %v8393_v20 = vld [vmem:[#allocation242_spill] sm:$0xff] }
 0x2da   : > { %3875 = vmatmul.f32.vlgmr.msrb.gmra.mxu1 %v6788_v13  ;;  %3887 = vmatpush.msrb.mxu2 %v8338_v54  ;;  %v8394_v54 = vld [vmem:[#allocation248_spill] sm:$0xff] }
 0x2db   : > { %3946 = vmatpush.msrb.mxu3 %v5666_v43  ;;  %3995 = vmatpush.msra.mxu0 %v8339_v63  ;;  %v8401_v63 = vld [vmem:[#allocation224_spill] sm:$0xff] }
 0x2dc   : > { %4050 = vmatpush.msra.mxu1 %v8105_v29  ;;  %3890 = vmatpush.msrb.mxu2 %v8340_v42  ;;  %v8345_v29 = vld [vmem:[#allocation176_spill] sm:$0xff] }
 0x2dd   : > { %3948 = vmatpush.msrb.mxu3 %v5680_v38  ;;  %3999 = vmatpush.msra.mxu0 %v8341_v27  ;;  %v8402_v42 = vld [vmem:[#allocation228_spill] sm:$0xff] }
 0x2de   : > { %4052 = vmatpush.msra.mxu1 %v5652_v11  ;;  %3696 = vmatmul.f32.vlgmr.msra.gmra.mxu2 %v6919_v31  ;;  %v8347_v11 = vld [vmem:[#allocation179_spill] sm:$0xff]  ;;  %v8403_v27 = vld [vmem:[#allocation232_spill] sm:$0xff] }
 0x2df   : > { %3893 = vmatpush.msrb.mxu2 %v8342_v47  ;;  %3950 = vmatpush.msrb.mxu3 %v5690_v30  ;;  %v8404_v47 = vld [vmem:[#allocation236_spill] sm:$0xff] }
 0x2e0   : > { %4003 = vmatpush.msra.mxu0 %v8343_v6  ;;  %4054 = vmatpush.msra.mxu1 %v5666_v43  ;;  %v8349_v43 = vld [vmem:[#allocation170_spill] sm:$0xff]  ;;  %v8405_v6 = vld [vmem:[#allocation240_spill] sm:$0xff] }
 0x2e1   : > { %3896 = vmatpush.msrb.mxu2 %v8344_v15  ;;  %3952 = vmatpush.msrb.mxu3 %v5706_v24  ;;  %v8406_v15 = vld [vmem:[#allocation244_spill] sm:$0xff] }
 0x2e2   : > { %4007 = vmatpush.msra.mxu0 %v8345_v29  ;;  %4056 = vmatpush.msra.mxu1 %v5680_v38  ;;  %v8350_v38 = vld [vmem:[#allocation173_spill] sm:$0xff]  ;;  %v8407_v29 = vld [vmem:[#allocation247_spill] sm:$0xff] }
 0x2e3   : > { %3899 = vmatpush.msrb.mxu2 %v8346_v3  ;;  %3954 = vmatpush.msrb.mxu3 %v5731_v22  ;;  %v8408_v3 = vld [vmem:[#allocation251_spill] sm:$0xff] }
 0x2e4   : > { %4011 = vmatpush.msra.mxu0 %v8347_v11  ;;  %4058 = vmatpush.msra.mxu1 %v5690_v30  ;;  %v8351_v30 = vld [vmem:[#allocation190_spill] sm:$0xff] }
 0x2e5   : > { %3902 = vmatpush.msrb.mxu2 %v8348_v32  ;;  %3956 = vmatpush.msrb.mxu3 %v5747_v57  ;;  %v8409_v11 = vld [vmem:[#allocation254_spill] sm:$0xff]  ;;  %v8410_v32 = vld [vmem:[#allocation257_spill] sm:$0xff] }
 0x2e6   : > { %4015 = vmatpush.msra.mxu0 %v8143_v34  ;;  %4060 = vmatpush.msra.mxu1 %v5706_v24  ;;  %v8352_v24 = vld [vmem:[#allocation194_spill] sm:$0xff]  ;;  %v8353_v34 = vld [vmem:[#allocation181_spill] sm:$0xff] }
 0x2e7   : > { %3905 = vmatpush.msrb.mxu2 %v8349_v43  ;;  %3958 = vmatpush.msrb.mxu3 %v5763_v14 }
 0x2e8   : > { %4019 = vmatpush.msra.mxu0 %v8145_v49  ;;  %4062 = vmatpush.msra.mxu1 %v5731_v22  ;;  %v8354_v22 = vld [vmem:[#allocation214_spill] sm:$0xff]  ;;  %v8369_v49 = vld [vmem:[#allocation221_spill] sm:$0xff] }
 0x2e9   : > { %3908 = vmatpush.msrb.mxu2 %v8350_v38  ;;  %3960 = vmatpush.msrb.mxu3 %v5779_v2 }
 0x2ea   : > { %4023 = vmatpush.msra.mxu0 %v8351_v30  ;;  %4064 = vmatpush.msra.mxu1 %v5747_v57  ;;  %v8355_v57 = vld [vmem:[#allocation201_spill] sm:$0xff] }
 0x2eb   : > { %3911 = vmatpush.msrb.mxu2 %v8148_v19  ;;  %3962 = vmatpush.msrb.mxu3 %v5792_v44  ;;  %v8357_v19 = vld [vmem:[#allocation188_spill] sm:$0xff] }
 0x2ec   : > { %4027 = vmatpush.msra.mxu0 %v8352_v24  ;;  %4066 = vmatpush.msra.mxu1 %v5763_v14  ;;  %v8356_v14 = vld [vmem:[#allocation193_spill] sm:$0xff] }
 0x2ed   : > { %3914 = vmatpush.msrb.mxu2 %v8353_v34  ;;  %3964 = vmatpush.msrb.mxu3 %v7966_v0  ;;  %v3194_v43 = vpop.f32.mrf.mxu1 }
 0x2ee   : > { %4031 = vmatpush.msra.mxu0 %v5864_v7  ;;  %4068 = vmatpush.msra.mxu1 %v5779_v2  ;;  %v8358_v2 = vld [vmem:[#allocation202_spill] sm:$0xff]  ;;  %v8366_v7 = vld [vmem:[#allocation217_spill] sm:$0xff] }
 0x2ef   : > { %3968 = vmatmul.f32.vlgmr.msrb.gmra.mxu3 %v6802_v26  ;;  %3917 = vmatpush.msrb.mxu2 %v8150_v18  ;;  %v8362_v18 = vld [vmem:[#allocation239_spill] sm:$0xff]  ;;  %v8374_v26 = vld [vmem:[#allocation252_spill] sm:$0xff] }
 0x2f0   : > { %4124 = vmatpush.msra.mxu3 %v8354_v22  ;;  %4035 = vmatpush.msra.mxu0 %v8355_v57 }
 0x2f1   : > { %4070 = vmatpush.msra.mxu1 %v5792_v44  ;;  %4037 = vmatmul.f32.vlgmr.msra.gmra.mxu0 %v6788_v13  ;;  %v8361_v44 = vld [vmem:[#allocation196_spill] sm:$0xff] }
 0x2f2   : > { %4130 = vmatpush.msra.mxu3 %v8152_v55  ;;  %4222 = vmatpush.msrb.mxu0 %v8356_v14  ;;  %v8364_v55 = vld [vmem:[#allocation199_spill] sm:$0xff] }
 0x2f3   : > { %3920 = vmatpush.msrb.mxu2 %v8357_v19  ;;  %4072 = vmatpush.msra.mxu1 %v7966_v0  ;;  %v8367_v0 = vld [vmem:[#allocation205_spill] sm:$0xff] }
 0x2f4   : > { %4074 = vmatmul.f32.vlgmr.msra.gmra.mxu1 %v6788_v13  ;;  %4136 = vmatpush.msra.mxu3 %v8154_v1  ;;  %v8371_v1 = vld [vmem:[#allocation250_spill] sm:$0xff]  ;;  %v8372_v13 = vld [vmem:[#allocation225_spill] sm:$0xff] }
 0x2f5   : > { %4225 = vmatpush.msrb.mxu0 %v5867_v41  ;;  %4275 = vmatpush.msrb.mxu1 %v5804_v53  ;;  %v8359_v41 = vld [vmem:[#allocation235_spill] sm:$0xff]  ;;  %v3093_v38 = vpop.f32.mrf.mxu0  ;;  %v3248_v30 = vpop.f32.mrf.mxu2 }
 0x2f6   : > { %3923 = vmatpush.msrb.mxu2 %v8155_v28  ;;  %4142 = vmatpush.msra.mxu3 %v8156_v23  ;;  %v8360_v28 = vld [vmem:[#allocation206_spill] sm:$0xff]  ;;  %v8370_v23 = vld [vmem:[#allocation209_spill] sm:$0xff]  ;;  %v3393_v24 = vpop.f32.mrf.mxu1 }
 0x2f7   : > { %4228 = vmatpush.msrb.mxu0 %v8358_v2  ;;  %4277 = vmatpush.msrb.mxu1 %v5832_v51  ;;  %v3287_v34 = vpop.f32.mrf.mxu3 }
 0x2f8   : > { %3926 = vmatpush.msrb.mxu2 %v8157_v45  ;;  %4148 = vmatpush.msra.mxu3 %v8158_v9  ;;  %v8363_v45 = vld [vmem:[#allocation212_spill] sm:$0xff]  ;;  %v8368_v9 = vld [vmem:[#allocation246_spill] sm:$0xff] }
 0x2f9   : > { %3929 = vmatmul.f32.vlgmr.msrb.gmra.mxu2 %v6794_v37  ;;  %4231 = vmatpush.msrb.mxu0 %v5891_v25  ;;  %v8365_v25 = vld [vmem:[#allocation243_spill] sm:$0xff]  ;;  %v8373_v37 = vld [vmem:[#allocation213_spill] sm:$0xff] }
 0x2fa   : > { %4079 = vmatpush.msra.mxu2 %v5804_v53  ;;  %4279 = vmatpush.msrb.mxu1 %v5851_v50 }
 0x2fb   : > { %4154 = vmatpush.msra.mxu3 %v8359_v41  ;;  %4234 = vmatpush.msrb.mxu0 %v8360_v28 }
 0x2fc   : > { %4081 = vmatpush.msra.mxu2 %v5832_v51  ;;  %4281 = vmatpush.msrb.mxu1 %v8361_v44 }
 0x2fd   : > { %4160 = vmatpush.msra.mxu3 %v8362_v18  ;;  %4237 = vmatpush.msrb.mxu0 %v8363_v45  ;;  %v3356_v22 = vpop.f32.mrf.mxu0  ;;  %v3195_v18 = vadd.f32 %v3194_v43, %v3093_v38 }
 0x2fe   : > { %4083 = vmatpush.msra.mxu2 %v5851_v50  ;;  %4283 = vmatpush.msrb.mxu1 %v8364_v55 }
 0x2ff   : > { %4166 = vmatpush.msra.mxu3 %v8365_v25  ;;  %4240 = vmatpush.msrb.mxu0 %v8366_v7  ;;  %v3249_v7 = vadd.f32 %v3248_v30, %v3195_v18 }
 0x300   : > { %4085 = vmatpush.msra.mxu2 %v8361_v44  ;;  %4285 = vmatpush.msrb.mxu1 %v8367_v0 }
 0x301   : > { %4172 = vmatpush.msra.mxu3 %v8368_v9  ;;  %4243 = vmatpush.msrb.mxu0 %v8369_v49  ;;  %v3288_v9 = vadd.f32 %v3287_v34, %v3249_v7 }
 0x302   : > { %4087 = vmatpush.msra.mxu2 %v8364_v55  ;;  %4287 = vmatpush.msrb.mxu1 %v8370_v23 }
 0x303   : > { %4178 = vmatpush.msra.mxu3 %v8371_v1  ;;  %4246 = vmatpush.msrb.mxu0 %v8372_v13 }
 0x304   : > { %4089 = vmatpush.msra.mxu2 %v8367_v0  ;;  %4289 = vmatpush.msrb.mxu1 %v8373_v37 }
 0x305   : > { %4184 = vmatpush.msra.mxu3 %v8374_v26  ;;  %4249 = vmatpush.msrb.mxu0 %v8375_v61 }
 0x306   : > { %4091 = vmatpush.msra.mxu2 %v8370_v23  ;;  %4291 = vmatpush.msrb.mxu1 %v8376_v35 }
 0x307   : > { %4190 = vmatpush.msra.mxu3 %v8377_v16  ;;  %4252 = vmatpush.msrb.mxu0 %v8378_v5 }
 0x308   : > { %4093 = vmatpush.msra.mxu2 %v8373_v37  ;;  %4293 = vmatpush.msrb.mxu1 %v8379_v10 }
 0x309   : > { %4196 = vmatpush.msra.mxu3 %v8380_v52  ;;  %4255 = vmatpush.msrb.mxu0 %v8381_v60 }
 0x30a   : > { %4095 = vmatpush.msra.mxu2 %v8376_v35  ;;  %4295 = vmatpush.msrb.mxu1 %v8382_v12 }
 0x30b   : > { %4202 = vmatpush.msra.mxu3 %v8383_v40  ;;  %4258 = vmatpush.msrb.mxu0 %v8384_v59 }
 0x30c   : > { %4097 = vmatpush.msra.mxu2 %v8379_v10  ;;  %4297 = vmatpush.msrb.mxu1 %v8385_v36 }
 0x30d   : > { %4208 = vmatpush.msra.mxu3 %v8386_v46  ;;  %4261 = vmatpush.msrb.mxu0 %v8387_v48 }
 0x30e   : > { %4099 = vmatpush.msra.mxu2 %v8382_v12  ;;  %4299 = vmatpush.msrb.mxu1 %v8388_v4 }
 0x30f   : > { %4214 = vmatpush.msra.mxu3 %v8389_v62  ;;  %4264 = vmatpush.msrb.mxu0 %v8390_v58 }
 0x310   : > { %4101 = vmatpush.msra.mxu2 %v8385_v36  ;;  %4301 = vmatpush.msrb.mxu1 %v8391_v8 }
 0x311   : > { %4216 = vmatmul.f32.vlgmr.msra.gmra.mxu3 %v6919_v31  ;;  %4267 = vmatpush.msrb.mxu0 %v8392_v33 }
 0x312   : > { %4383 = vmatpush.msrb.mxu3 %v5804_v53  ;;  %4103 = vmatpush.msra.mxu2 %v8388_v4  ;;  %v8395_v53 = vld [vmem:[#allocation198_spill] sm:$0xff] }
 0x313   : > { %4303 = vmatpush.msrb.mxu1 %v8393_v20  ;;  %4270 = vmatmul.f32.vlgmr.msrb.gmra.mxu0 %v6924_v39  ;;  %v8397_v39 = vld [vmem:[#allocation208_spill] sm:$0xff] }
 0x314   : > { %4385 = vmatpush.msrb.mxu3 %v5832_v51  ;;  %4105 = vmatpush.msra.mxu2 %v8391_v8  ;;  %v8396_v51 = vld [vmem:[#allocation204_spill] sm:$0xff] }
 0x315   : > { %4305 = vmatpush.msrb.mxu1 %v8394_v54 }
 0x316   : > { %4309 = vmatmul.f32.vlgmr.msrb.gmra.mxu1 %v6932_v21  ;;  %4387 = vmatpush.msrb.mxu3 %v5851_v50  ;;  %v8398_v50 = vld [vmem:[#allocation210_spill] sm:$0xff]  ;;  %v8399_v21 = vld [vmem:[#allocation215_spill] sm:$0xff] }
 0x317   : > { %4107 = vmatpush.msra.mxu2 %v8393_v20 }
 0x318   : > { %4389 = vmatpush.msrb.mxu3 %v8361_v44 }
 0x319   : > { %4109 = vmatpush.msra.mxu2 %v8394_v54 }
 0x31a   : > { %4115 = vmatmul.f32.vlgmr.msra.gmra.mxu2 %v6943_v17  ;;  %4391 = vmatpush.msrb.mxu3 %v8364_v55  ;;  %v8400_v17 = vld [vmem:[#allocation220_spill] sm:$0xff] }
 0x31b   : > { %4316 = vmatpush.msrb.mxu2 %v8395_v53 }
 0x31c   : > { %4393 = vmatpush.msrb.mxu3 %v8367_v0 }
 0x31d   : > { %4320 = vmatpush.msrb.mxu2 %v8396_v51 }
 0x31e   : > { %4395 = vmatpush.msrb.mxu3 %v8370_v23  ;;  %v3357_v23 = vadd.f32 %v3356_v22, %v3288_v9 }
 0x31f   : > { %4324 = vmatpush.msrb.mxu2 %v8397_v39 }
 0x320   : > { %4397 = vmatpush.msrb.mxu3 %v8373_v37  ;;  %v3394_v37 = vadd.f32 %v3393_v24, %v3357_v23 }
 0x321   : > { %4328 = vmatpush.msrb.mxu2 %v8398_v50 }
 0x322   : > { %4399 = vmatpush.msrb.mxu3 %v8376_v35 }
 0x323   : > { %4332 = vmatpush.msrb.mxu2 %v8399_v21 }
 0x324   : > { %4401 = vmatpush.msrb.mxu3 %v8379_v10 }
 0x325   : > { %4336 = vmatpush.msrb.mxu2 %v8400_v17 }
 0x326   : > { %4403 = vmatpush.msrb.mxu3 %v8382_v12 }
 0x327   : > { %4340 = vmatpush.msrb.mxu2 %v8401_v63 }
 0x328   : > { %4405 = vmatpush.msrb.mxu3 %v8385_v36 }
 0x329   : > { %4344 = vmatpush.msrb.mxu2 %v8402_v42 }
 0x32a   : > { %4407 = vmatpush.msrb.mxu3 %v8388_v4 }
 0x32b   : > { %4348 = vmatpush.msrb.mxu2 %v8403_v27 }
 0x32c   : > { %4409 = vmatpush.msrb.mxu3 %v8391_v8 }
 0x32d   : > { %4352 = vmatpush.msrb.mxu2 %v8404_v47 }
 0x32e   : > { %4411 = vmatpush.msrb.mxu3 %v8393_v20 }
 0x32f   : > { %4356 = vmatpush.msrb.mxu2 %v8405_v6 }
 0x330   : > { %4413 = vmatpush.msrb.mxu3 %v8394_v54 }
 0x331   : > { %4360 = vmatpush.msrb.mxu2 %v8406_v15  ;;  %4415 = vmatmul.f32.vlgmr.msrb.gmra.mxu3 %v6919_v31 }
 0x333   : > { %4364 = vmatpush.msrb.mxu2 %v8407_v29 }
 0x335   : > { %4368 = vmatpush.msrb.mxu2 %v8408_v3 }
 0x337   : > { %4372 = vmatpush.msrb.mxu2 %v8409_v11 }
 0x339   : > { %4376 = vmatpush.msrb.mxu2 %v8410_v32 }
 0x33a   : > { %4378 = vmatmul.f32.vlgmr.msrb.gmra.mxu2 %v6919_v31 }
 0x34b   : > { %v3589_v2 = vpop.f32.mrf.mxu0 }
 0x34d   : > { %v3628_v14 = vpop.f32.mrf.mxu1 }
 0x34f   : > { %v3535_v19 = vpop.f32.mrf.mxu3 }
 0x354   : > { %v3775_v45 = vpop.f32.mrf.mxu0 }
 0x357   : > { %v3434_v57 = vpop.f32.mrf.mxu2  ;;  %v3876_v28 = vpop.f32.mrf.mxu1 }
 0x358   : > { %v3734_v44 = vpop.f32.mrf.mxu3  ;;  %v3877_v25 = vadd.f32 %v3876_v28, %v3775_v45  ;;  %v3435_v35 = vadd.f32 %v3434_v57, %v3394_v37 }
 0x35a   : > { %v3536_v10 = vadd.f32 %v3535_v19, %v3435_v35 }
 0x35c   : > { %v3590_v12 = vadd.f32 %v3589_v2, %v3536_v10 }
 0x35e   : > { %v3629_v36 = vadd.f32 %v3628_v14, %v3590_v12 }
 0x361   : > { %v3697_v41 = vpop.f32.mrf.mxu2 }
 0x362   : > { %v3698_v62 = vadd.f32 %v3697_v41, %v3629_v36 }
 0x364   : > { %v3735_v20 = vadd.f32 %v3734_v44, %v3698_v62 }
 0x36e   : > { %v4038_v1 = vpop.f32.mrf.mxu0 }
 0x371   : > { %v4075_v26 = vpop.f32.mrf.mxu1 }
 0x372   : > { %v3969_v31 = vpop.f32.mrf.mxu3 }
 0x37c   : > { %v3930_v55 = vpop.f32.mrf.mxu2 }
 0x37d   : > { %v3931_v0 = vadd.f32 %v3930_v55, %v3877_v25 }
 0x37f   : > { %v3970_v49 = vadd.f32 %v3969_v31, %v3931_v0 }
 0x381   : > { %v4039_v13 = vadd.f32 %v4038_v1, %v3970_v49 }
 0x383   : > { %v4076_v16 = vadd.f32 %v4075_v26, %v4039_v13 }
 0x390   : > { %v4271_v40 = vpop.f32.mrf.mxu0 }
 0x393   : > { %v4310_v46 = vpop.f32.mrf.mxu1 }
 0x394   : > { %v4217_v52 = vpop.f32.mrf.mxu3 }
 0x39d   : > { %v4116_v61 = vpop.f32.mrf.mxu2 }
 0x39e   : > { %v4117_v5 = vadd.f32 %v4116_v61, %v4076_v16 }
 0x3a0   : > { %v4218_v60 = vadd.f32 %v4217_v52, %v4117_v5 }
 0x3a2   : > { %v4272_v59 = vadd.f32 %v4271_v40, %v4218_v60 }
 0x3a4   : > { %v4311_v48 = vadd.f32 %v4310_v46, %v4272_v59 }
 0x3b4   : > { %v4416_v8 = vpop.f32.mrf.mxu3 }
 0x3bd   : > { %v4379_v4 = vpop.f32.mrf.mxu2 }
 0x3be   : > { %v4380_v58 = vadd.f32 %v4379_v4, %v4311_v48 }
 0x3c0   : > { %v4417_v33 = vadd.f32 %v4416_v8, %v4380_v58 }
 0x3c2   : > { %v4421_v54 = vrot.slane %v4417_v33, 4 }
 0x3c4   : > { %v4422_v53 = vsel %vm1675_vm0, %v3735_v20, %v4421_v54 }
 0x3c5   : > { %4619 = vst [vmem:[%s6482_s23 + $0x10] sm:$0xff] %v4422_v53  ;;  %v4426_v51 = vsub.f32 %v8125_v56, %v4422_v53 }
 0x3c6   : > { %4798 = shalt.err (!%p4795_p13)
}
 0x3c7   : > { %s4894_s21 = smov 128   ;;  %s4895_s24 = smov 8   ;;  %4620 = vst [vmem:[%s6491_s5 + $0x10] sm:$0xff] %v4426_v51 }
 0x3c8   : > { %4635 = dma.vmem_to_hbm [thread:$0]  (%p4987_p4), %s7123_s22, 384, %s4452_s18, %s4430_s30, %s4894_s21, %s4894_s21, %s4895_s24  }
 0x3c9   : > { %s4435_s25 = scalar_lea.sflag [#allocation9], %s5013_s28  ;;  %s4813_s26 = sshra.s32 %s7130_s27, 4  ;;  %s4814_s26 = int_to_ptr.hbm [resolvable:$true] %s4813_s26 }
 0x3ca   : > { %s4815_s19 = scalar_lea.hbm %s4814_s26, 24  ;;  %s4819_s10 = scalar_lea.hbm %s7185_s3, 48 }
 0x3cb   : > { %p4816_p0 = scmp.ne.s32.totalorder %s4814_s26, %s4815_s19  ;;  %p4820_p8 = scmp.lt.s32.totalorder %s4814_s26, %s7185_s3 }
 0x3cc   : > { %p4821_p1 = scmp.lt.s32.totalorder %s4819_s10, %s4815_s19 }
 0x3cd   : > { %p4817_p2 = pnand %p4816_p0, %p4987_p4 }
 0x3ce   : > { %p4822_p3 = por %p4821_p1, %p4820_p8 }
 0x3cf   : > { %p4818_p5 = pneg %p4817_p2 }
 0x3d1   : > { %p4823_p9 = pnand %p4822_p3, %p4818_p5 }
 0x3d3   : > { %4826 = shalt.err (!%p4823_p9)
}
 0x3d4   : > { %4636 = dma.vmem_to_hbm [thread:$0]  (%p4987_p4), %s7128_s15, 384, %s7130_s27, %s4435_s25, %s4894_s21, %s4894_s21, %s4895_s24  }
 0x3d5 PF: > { %s4485_s28 = sand.u32 1, %s4869_s12   ;;  %p4648_p10 = pnand %p4610_p6, %p4995_p7 }
 0x3d6   : > { %s4486_s5 = scalar_lea.sflag [#allocation4], %s4485_s28 }
 0x3d7   : > { %p4649_p11 = pneg %p4648_p10 }
 0x3d9   : > { %4860 = dma.done.wait (%p4649_p11), %s4486_s5, 384  }
 0x3da   : > { %4862 = vsyncadd (%p4649_p11), %s4486_s5, 4294966912  ;;  %s4496_s22 = scalar_lea.sflag [#allocation9], %s4485_s28 }
 0x3db   : > { %4864 = dma.done.wait (%p4649_p11), %s4496_s22, 384  }
 0x3dc   : > { %4866 = vsyncadd (%p4649_p11), %s4496_s22, 4294966912  ;;  %s24_s17 = sadd.s32 1, %s4889_s17   ;;  %s8411_s12 = smov %s4873_s13 }
 0x3dd   : > { %p21_p12 = scmp.ge.s32.totalorder %s24_s17, 4   ;;  %s8412_s13 = smov %s4877_s14 }
 0x3de   : > { %s8413_s14 = smov %s4993_s8  ;;  %s8414_s15 = smov %s4885_s16 }
 0x3df   : > { %s8415_s16 = smov %s8417_s29  ;;  %23 = sbr.rel (!%p21_p12) target bundleno = 9 (0x9), region = 99 }
 0x3e4   :  { %4502 = vsyncpa [#allocation3], 1 }
 0x3e5   :  { %4504 = vsyncpa [#allocation3 + $0x1], 1 }
 0x3e6   :  { %4505 = vsyncpa [#allocation6], 1 }
 0x3e7   :  { %4507 = vsyncpa [#allocation6 + $0x1], 1 }
 0x3e8   :  { %4508 = vsyncpa [#allocation4], 1 }
 0x3e9   :  { %4510 = vsyncpa [#allocation4 + $0x1], 1 }
 0x3ea   :  { %4511 = vsyncpa [#allocation9], 1 }
 0x3eb   :  { %4513 = vsyncpa [#allocation9 + $0x1], 1 }

</bundles_post_ra>
